<compile_context>
chip_gen: v7x
topology: tpu7x:2x2x1
jax: 0.10.0
libtpu: 0.0.40
codegen_flags: <defaults>
</compile_context>

<pallas_src>
import functools

import jax
import jax.numpy as jnp
from jax import lax
from jax.experimental import pallas as pl
from jax.experimental.pallas import tpu as pltpu

C_OUT = 256                  # per-branch conv output channels (fixed by module)
DILATIONS = (6, 12, 18)
PAD = max(DILATIONS)         # shared spatial halo for all dilated branches

# (ki, kj) -> index of the tap inside the (3, 8, C, 256) non-centre weight slab
_NC_TAP = {(0, 0): 0, (0, 1): 1, (0, 2): 2, (1, 0): 3,
           (1, 2): 4, (2, 0): 5, (2, 1): 6, (2, 2): 7}


def _aspp_conv_kernel(xpad_ref, wc_ref, wd_ref, bc_ref, out_ref, *, th, W, C):
    """One (batch, row-tile) grid step of the fused ASPP conv branches.

    xpad_ref: (Hp, Wp_al, C)   bf16  padded image of the current batch element
    wc_ref:   (C, 1024)        bf16  [w1 | centre taps of w6, w12, w18]
    wd_ref:   (3, 8, C, 256)   bf16  non-centre taps [dilation, tap, in, out]
    bc_ref:   (1, 1024)        f32   [b1 | b6 | b12 | b18]
    out_ref:  (th*W, 1024)     f32   lanes = [y1 | y6 | y12 | y18]
    """
    r = pl.program_id(1)
    TM = th * W
    HS = th + 2 * PAD            # halo'd strip height
    row0 = r * th                # first padded row touched by this row tile

    def strip(dc):
        # Column-shifted halo strip: every row this tile touches, W columns at
        # offset dc.  One unaligned sublane extraction per distinct dc.
        c0 = PAD + dc
        return xpad_ref[pl.ds(row0, HS), c0:c0 + W, :]

    def window(s, dr):
        # (th, W, C) row window of a strip -> (TM, C) matmul LHS (bf16).
        r0 = PAD + dr
        return s[r0:r0 + th].reshape(TM, C)

    # --- fused centre matmul: 1x1 branch + centre tap of every dilated branch,
    # --- with all four biases folded into the accumulator init.
    s_center = strip(0)
    fused = jnp.dot(window(s_center, 0), wc_ref[...],
                    preferred_element_type=jnp.float32) + bc_ref[...]
    out_ref[:, 0:C_OUT] = fused[:, 0:C_OUT]
    accs = [fused[:, (di + 1) * C_OUT:(di + 2) * C_OUT] for di in range(3)]

    # --- static tap schedule grouped by column offset so that at most one
    # --- halo strip is live at a time (7 column extractions per grid step).
    sched = {}
    for di, d in enumerate(DILATIONS):
        for (ki, kj), t in _NC_TAP.items():
            sched.setdefault((kj - 1) * d, []).append((di, t, (ki - 1) * d))

    for dc in sorted(sched):
        s = s_center if dc == 0 else strip(dc)
        for di, t, dr in sched[dc]:
            accs[di] = accs[di] + jnp.dot(
                window(s, dr), wd_ref[di, t],
                preferred_element_type=jnp.float32)

    for di in range(3):
        off = (di + 1) * C_OUT
        out_ref[:, off:off + C_OUT] = accs[di]


def _pick_row_tile(H, W, max_rows=4096):
    """Largest divisor `t` of H with t*W <= max_rows and t*W % 8 == 0 (so the
    flattened (t*W, 1024) output block is (8,128)-legal); falls back to the
    whole image (a block equal to the full dim is always legal)."""
    best = None
    for t in range(1, H + 1):
        if H % t:
            continue
        rows = t * W
        if rows <= max_rows and rows % 8 == 0:
            best = t
    return best if best is not None else H


def aspp_forward(x_nchw, params, *, row_tile=None):
    N, C, H, W = x_nchw.shape
    assert H % 2 == 0 and W % 2 == 0, "AvgPool2d(2) needs even spatial dims"
    x_nchw = x_nchw.astype(jnp.float32)

    # ---- pool branch (AvgPool2d(2) + nearest Upsample(2)): pure bandwidth,
    # ---- computed in NCHW by XLA and fused into the final concat.
    pooled = x_nchw.reshape(N, C, H // 2, 2, W // 2, 2).mean(axis=(3, 5))
    pool_up = jnp.repeat(jnp.repeat(pooled, 2, axis=2), 2, axis=3)

    # ---- bf16 padded NHWC activations, shared halo for all dilated branches,
    # ---- padded width rounded up to a sublane multiple of 8.
    x_nhwc = jnp.transpose(x_nchw, (0, 2, 3, 1)).astype(jnp.bfloat16)
    Hp = H + 2 * PAD
    Wp_al = ((W + 2 * PAD + 7) // 8) * 8
    xpad = jnp.pad(x_nhwc,
                   ((0, 0), (PAD, PAD), (PAD, Wp_al - W - PAD), (0, 0)))

    # ---- weights -> matmul layout, bf16 operands (f32 accumulation in-kernel).
    def taps(w):  # (256, C, 3, 3) -> (9, C, 256), tap index = ki*3 + kj
        return jnp.transpose(w, (2, 3, 1, 0)).reshape(9, C, C_OUT)

    w1 = params["w1"][:, :, 0, 0].T                                   # (C, 256)
    wd_full = [taps(params[k]) for k in ("w6", "w12", "w18")]
    wc = jnp.concatenate([w1] + [w[4] for w in wd_full],
                         axis=1).astype(jnp.bfloat16)                 # (C, 1024)
    wd = jnp.stack([jnp.concatenate([w[:4], w[5:]], axis=0) for w in wd_full],
                   axis=0).astype(jnp.bfloat16)                       # (3,8,C,256)
    bc = jnp.concatenate([params[k] for k in ("b1", "b6", "b12", "b18")]
                         )[None, :].astype(jnp.float32)               # (1, 1024)

    th = _pick_row_tile(H, W) if row_tile is None else row_tile
    assert H % th == 0
    R = H // th
    TM = th * W

    kernel = functools.partial(_aspp_conv_kernel, th=th, W=W, C=C)

    # Advisory cost estimate: 1x1 + three 3x3 convs = 28 C-wide taps per pixel.
    flops = 2 * N * H * W * 28 * C * C_OUT
    bytes_accessed = int(xpad.size * 2 + wc.size * 2 + wd.size * 2
                         + bc.size * 4 + N * H * W * 4 * C_OUT * 4)

    # VMEM budget: double-buffered image + output blocks, single-buffered
    # weights, one live halo strip + fused/branch accumulators as temps.
    img_blk = Hp * Wp_al * C * 2
    out_blk = TM * 4 * C_OUT * 4
    wts = (wc.size + wd.size) * 2 + bc.size * 4
    temps = 2 * (th + 2 * PAD) * W * C * 2 + 2 * out_blk
    vmem_need = 2 * img_blk + 2 * out_blk + wts + temps
    vmem_limit = int(min(max(2 * vmem_need, 48 << 20), 96 << 20))

    conv_flat = pl.pallas_call(
        kernel,
        out_shape=jax.ShapeDtypeStruct((N, H * W, 4 * C_OUT), jnp.float32),
        grid_spec=pltpu.PrefetchScalarGridSpec(
            num_scalar_prefetch=0,
            grid=(N, R),
            in_specs=[
                # Padded image: block index constant along the row-tile axis
                # -> DMA'd once per batch element, then VMEM-resident.
                pl.BlockSpec((None, Hp, Wp_al, C), lambda n, r: (n, 0, 0, 0)),
                # Grid-constant operands: single-buffered (double-buffering a
                # block whose index never changes only wastes VMEM).
                pl.BlockSpec((C, 4 * C_OUT), lambda n, r: (0, 0),
                             pipeline_mode=pl.Buffered(1)),
                pl.BlockSpec((3, 8, C, C_OUT), lambda n, r: (0, 0, 0, 0),
                             pipeline_mode=pl.Buffered(1)),
                pl.BlockSpec((1, 4 * C_OUT), lambda n, r: (0, 0),
                             pipeline_mode=pl.Buffered(1)),
            ],
            out_specs=pl.BlockSpec((None, TM, 4 * C_OUT),
                                   lambda n, r: (n, r, 0)),
        ),
        compiler_params=pltpu.CompilerParams(
            # Megacore split over the batch axis only: the image block is
            # constant along the row axis, so sharding rows would duplicate it.
            dimension_semantics=("parallel", "arbitrary"),
            vmem_limit_bytes=vmem_limit),
        cost_estimate=pl.CostEstimate(flops=flops, transcendentals=0,
                                      bytes_accessed=bytes_accessed),
    )(xpad, wc, wd, bc)

    # Glue: back to NCHW and concat in the PyTorch channel order
    # (pool, 1x1, dil6, dil12, dil18).  The transpose disappears if the
    # consumer accepts NHWC; kept here to match the reference module exactly.
    conv_nchw = jnp.transpose(conv_flat.reshape(N, H, W, 4 * C_OUT),
                              (0, 3, 1, 2))
    return jnp.concatenate([pool_up, conv_nchw], axis=1)


def aspp_reference(x, params):
    """Pure-JAX f32 reference matching the PyTorch forward (NCHW)."""
    N, C, H, W = x.shape
    pooled = x.reshape(N, C, H // 2, 2, W // 2, 2).mean(axis=(3, 5))
    pool_up = jnp.repeat(jnp.repeat(pooled, 2, axis=2), 2, axis=3)

    def conv(w, b, dil, pad):
        y = lax.conv_general_dilated(
            x, w, window_strides=(1, 1),
            padding=((pad, pad), (pad, pad)),
            rhs_dilation=(dil, dil),
            dimension_numbers=("NCHW", "OIHW", "NCHW"))
        return y + b[None, :, None, None]

    y1 = conv(params["w1"], params["b1"], 1, 0)
    y6 = conv(params["w6"], params["b6"], 6, 6)
    y12 = conv(params["w12"], params["b12"], 12, 12)
    y18 = conv(params["w18"], params["b18"], 18, 18)
    return jnp.concatenate([pool_up, y1, y6, y12, y18], axis=1)


def init_params(key, inp_chs):
    """Deterministic PyTorch-Conv2d-style init (uniform(-1/sqrt(fan_in), ...))."""
    ks = jax.random.split(key, 8)

    def u(k, shape, fan_in):
        bound = 1.0 / (fan_in ** 0.5)
        return jax.random.uniform(k, shape, jnp.float32, -bound, bound)

    p = {}
    p["w1"] = u(ks[0], (C_OUT, inp_chs, 1, 1), inp_chs * 1 * 1)
    p["b1"] = u(ks[1], (C_OUT,), inp_chs * 1 * 1)
    p["w6"] = u(ks[2], (C_OUT, inp_chs, 3, 3), inp_chs * 9)
    p["b6"] = u(ks[3], (C_OUT,), inp_chs * 9)
    p["w12"] = u(ks[4], (C_OUT, inp_chs, 3, 3), inp_chs * 9)
    p["b12"] = u(ks[5], (C_OUT,), inp_chs * 9)
    p["w18"] = u(ks[6], (C_OUT, inp_chs, 3, 3), inp_chs * 9)
    p["b18"] = u(ks[7], (C_OUT,), inp_chs * 9)
    return p


if __name__ == "__main__":
    key = jax.random.PRNGKey(0)
    kx, kp = jax.random.split(key)
    N, C, H, W = 2, 4, 16, 16
    x = jax.random.normal(kx, (N, C, H, W), jnp.float32)
    params = init_params(kp, C)

    out = jax.block_until_ready(aspp_forward(x, params))
    assert out.shape == (N, C + 4 * C_OUT, H, W), out.shape

    ref = aspp_reference(x, params)
    max_err = float(jnp.max(jnp.abs(out - ref)))
    # bf16 matmul operands (with f32 accumulation) -> bf16-class error
    # against the f32 XLA reference.
    assert max_err < 6e-2, f"max abs err {max_err}"

    print("KERNEL_OK")
</pallas_src>

<mosaic_0001>
module attributes {stable_mosaic.version = 11 : i64} {
  func.func @_aspp_conv_kernel(%arg0: i32, %arg1: i32, %arg2: memref<1x52x56x4xbf16, #tpu.memory_space<vmem>>, %arg3: memref<4x1024xbf16, #tpu.memory_space<vmem>>, %arg4: memref<3x8x4x256xbf16, #tpu.memory_space<vmem>>, %arg5: memref<1x1024xf32, #tpu.memory_space<vmem>>, %arg6: memref<1x256x1024xf32, #tpu.memory_space<vmem>>) attributes {dimension_semantics = [#tpu.dimension_semantics<parallel>, #tpu.dimension_semantics<arbitrary>], iteration_bounds = array<i64: 2, 1>, scalar_prefetch = 0 : i64, scratch_operands = 0 : i64, tpu.core_type = #tpu.core_type<tc>, window_params = [{transform_indices = @transform_0, window_bounds = array<i64: 1, 52, 56, 4>}, {pipeline_mode = #tpu.pipeline_mode<synchronous>, transform_indices = @transform_1, window_bounds = array<i64: 4, 1024>}, {pipeline_mode = #tpu.pipeline_mode<synchronous>, transform_indices = @transform_2, window_bounds = array<i64: 3, 8, 4, 256>}, {pipeline_mode = #tpu.pipeline_mode<synchronous>, transform_indices = @transform_3, window_bounds = array<i64: 1, 1024>}, {transform_indices = @transform_4, window_bounds = array<i64: 1, 256, 1024>}]} {
    %c16_i32 = arith.constant 16 : i32
    %0 = arith.muli %arg1, %c16_i32 : i32
    %c0 = arith.constant 0 : index
    %1 = arith.index_cast %0 : i32 to index
    %c18 = arith.constant 18 : index
    %c0_0 = arith.constant 0 : index
    %2 = vector.load %arg2[%c0, %1, %c18, %c0_0] : memref<1x52x56x4xbf16, #tpu.memory_space<vmem>>, vector<1x52x16x4xbf16>
    %3 = vector.shape_cast %2 : vector<1x52x16x4xbf16> to vector<52x16x4xbf16>
    %4 = vector.extract_strided_slice %3 {offsets = [18, 0, 0], sizes = [16, 16, 4], strides = [1, 1, 1]} : vector<52x16x4xbf16> to vector<16x16x4xbf16>
    %5 = vector.shape_cast %4 : vector<16x16x4xbf16> to vector<256x4xbf16>
    %c0_1 = arith.constant 0 : index
    %c0_2 = arith.constant 0 : index
    %6 = vector.load %arg3[%c0_1, %c0_2] : memref<4x1024xbf16, #tpu.memory_space<vmem>>, vector<4x1024xbf16>
    %cst = arith.constant dense<0.000000e+00> : vector<256x1024xf32>
    %7 = tpu.matmul %5, %6, %cst {dimension_numbers = #tpu.dot_dimension_numbers<[1], [0], [0], [1], [0, 0, 1, 1], [], []>} : vector<256x4xbf16>, vector<4x1024xbf16>, vector<256x1024xf32> -> vector<256x1024xf32>
    %c0_3 = arith.constant 0 : index
    %c0_4 = arith.constant 0 : index
    %8 = vector.load %arg5[%c0_3, %c0_4] : memref<1x1024xf32, #tpu.memory_space<vmem>>, vector<1x1024xf32>
    %9 = vector.broadcast %8 : vector<1x1024xf32> to vector<256x1024xf32>
    %10 = arith.addf %7, %9 : vector<256x1024xf32>
    %11 = vector.extract_strided_slice %10 {offsets = [0, 0], sizes = [256, 256], strides = [1, 1]} : vector<256x1024xf32> to vector<256x256xf32>
    %c0_5 = arith.constant 0 : index
    %c0_6 = arith.constant 0 : index
    %c0_7 = arith.constant 0 : index
    %12 = vector.load %arg6[%c0_5, %c0_6, %c0_7] : memref<1x256x1024xf32, #tpu.memory_space<vmem>>, vector<1x256x256xf32>
    %13 = vector.shape_cast %12 : vector<1x256x256xf32> to vector<256x256xf32>
    %14 = vector.shape_cast %11 : vector<256x256xf32> to vector<1x256x256xf32>
    tpu.vector_store %arg6[%c0_5, %c0_6, %c0_7], %14 {strides = array<i32>} : memref<1x256x1024xf32, #tpu.memory_space<vmem>>, vector<1x256x256xf32>,
    %15 = vector.extract_strided_slice %10 {offsets = [0, 256], sizes = [256, 256], strides = [1, 1]} : vector<256x1024xf32> to vector<256x256xf32>
    %16 = vector.extract_strided_slice %10 {offsets = [0, 512], sizes = [256, 256], strides = [1, 1]} : vector<256x1024xf32> to vector<256x256xf32>
    %17 = vector.extract_strided_slice %10 {offsets = [0, 768], sizes = [256, 256], strides = [1, 1]} : vector<256x1024xf32> to vector<256x256xf32>
    %c0_8 = arith.constant 0 : index
    %18 = arith.index_cast %0 : i32 to index
    %c0_9 = arith.constant 0 : index
    %c0_10 = arith.constant 0 : index
    %19 = vector.load %arg2[%c0_8, %18, %c0_9, %c0_10] : memref<1x52x56x4xbf16, #tpu.memory_space<vmem>>, vector<1x52x16x4xbf16>
    %20 = vector.shape_cast %19 : vector<1x52x16x4xbf16> to vector<52x16x4xbf16>
    %21 = vector.extract_strided_slice %20 {offsets = [0, 0, 0], sizes = [16, 16, 4], strides = [1, 1, 1]} : vector<52x16x4xbf16> to vector<16x16x4xbf16>
    %22 = vector.shape_cast %21 : vector<16x16x4xbf16> to vector<256x4xbf16>
    %c2 = arith.constant 2 : index
    %c0_11 = arith.constant 0 : index
    %c0_12 = arith.constant 0 : index
    %c0_13 = arith.constant 0 : index
    %23 = vector.load %arg4[%c2, %c0_11, %c0_12, %c0_13] : memref<3x8x4x256xbf16, #tpu.memory_space<vmem>>, vector<1x1x4x256xbf16>
    %24 = vector.shape_cast %23 : vector<1x1x4x256xbf16> to vector<4x256xbf16>
    %cst_14 = arith.constant dense<0.000000e+00> : vector<256x256xf32>
    %25 = tpu.matmul %22, %24, %cst_14 {dimension_numbers = #tpu.dot_dimension_numbers<[1], [0], [0], [1], [0, 0, 1, 1], [], []>} : vector<256x4xbf16>, vector<4x256xbf16>, vector<256x256xf32> -> vector<256x256xf32>
    %26 = arith.addf %17, %25 : vector<256x256xf32>
    %27 = vector.extract_strided_slice %20 {offsets = [18, 0, 0], sizes = [16, 16, 4], strides = [1, 1, 1]} : vector<52x16x4xbf16> to vector<16x16x4xbf16>
    %28 = vector.shape_cast %27 : vector<16x16x4xbf16> to vector<256x4xbf16>
    %c2_15 = arith.constant 2 : index
    %c3 = arith.constant 3 : index
    %c0_16 = arith.constant 0 : index
    %c0_17 = arith.constant 0 : index
    %29 = vector.load %arg4[%c2_15, %c3, %c0_16, %c0_17] : memref<3x8x4x256xbf16, #tpu.memory_space<vmem>>, vector<1x1x4x256xbf16>
    %30 = vector.shape_cast %29 : vector<1x1x4x256xbf16> to vector<4x256xbf16>
    %cst_18 = arith.constant dense<0.000000e+00> : vector<256x256xf32>
    %31 = tpu.matmul %28, %30, %cst_18 {dimension_numbers = #tpu.dot_dimension_numbers<[1], [0], [0], [1], [0, 0, 1, 1], [], []>} : vector<256x4xbf16>, vector<4x256xbf16>, vector<256x256xf32> -> vector<256x256xf32>
    %32 = arith.addf %26, %31 : vector<256x256xf32>
    %33 = vector.extract_strided_slice %20 {offsets = [36, 0, 0], sizes = [16, 16, 4], strides = [1, 1, 1]} : vector<52x16x4xbf16> to vector<16x16x4xbf16>
    %34 = vector.shape_cast %33 : vector<16x16x4xbf16> to vector<256x4xbf16>
    %c2_19 = arith.constant 2 : index
    %c5 = arith.constant 5 : index
    %c0_20 = arith.constant 0 : index
    %c0_21 = arith.constant 0 : index
    %35 = vector.load %arg4[%c2_19, %c5, %c0_20, %c0_21] : memref<3x8x4x256xbf16, #tpu.memory_space<vmem>>, vector<1x1x4x256xbf16>
    %36 = vector.shape_cast %35 : vector<1x1x4x256xbf16> to vector<4x256xbf16>
    %cst_22 = arith.constant dense<0.000000e+00> : vector<256x256xf32>
    %37 = tpu.matmul %34, %36, %cst_22 {dimension_numbers = #tpu.dot_dimension_numbers<[1], [0], [0], [1], [0, 0, 1, 1], [], []>} : vector<256x4xbf16>, vector<4x256xbf16>, vector<256x256xf32> -> vector<256x256xf32>
    %38 = arith.addf %32, %37 : vector<256x256xf32>
    %c0_23 = arith.constant 0 : index
    %39 = arith.index_cast %0 : i32 to index
    %c6 = arith.constant 6 : index
    %c0_24 = arith.constant 0 : index
    %40 = vector.load %arg2[%c0_23, %39, %c6, %c0_24] : memref<1x52x56x4xbf16, #tpu.memory_space<vmem>>, vector<1x52x16x4xbf16>
    %41 = vector.shape_cast %40 : vector<1x52x16x4xbf16> to vector<52x16x4xbf16>
    %42 = vector.extract_strided_slice %41 {offsets = [6, 0, 0], sizes = [16, 16, 4], strides = [1, 1, 1]} : vector<52x16x4xbf16> to vector<16x16x4xbf16>
    %43 = vector.shape_cast %42 : vector<16x16x4xbf16> to vector<256x4xbf16>
    %c1 = arith.constant 1 : index
    %c0_25 = arith.constant 0 : index
    %c0_26 = arith.constant 0 : index
    %c0_27 = arith.constant 0 : index
    %44 = vector.load %arg4[%c1, %c0_25, %c0_26, %c0_27] : memref<3x8x4x256xbf16, #tpu.memory_space<vmem>>, vector<1x1x4x256xbf16>
    %45 = vector.shape_cast %44 : vector<1x1x4x256xbf16> to vector<4x256xbf16>
    %cst_28 = arith.constant dense<0.000000e+00> : vector<256x256xf32>
    %46 = tpu.matmul %43, %45, %cst_28 {dimension_numbers = #tpu.dot_dimension_numbers<[1], [0], [0], [1], [0, 0, 1, 1], [], []>} : vector<256x4xbf16>, vector<4x256xbf16>, vector<256x256xf32> -> vector<256x256xf32>
    %47 = arith.addf %16, %46 : vector<256x256xf32>
    %48 = vector.extract_strided_slice %41 {offsets = [18, 0, 0], sizes = [16, 16, 4], strides = [1, 1, 1]} : vector<52x16x4xbf16> to vector<16x16x4xbf16>
    %49 = vector.shape_cast %48 : vector<16x16x4xbf16> to vector<256x4xbf16>
    %c1_29 = arith.constant 1 : index
    %c3_30 = arith.constant 3 : index
    %c0_31 = arith.constant 0 : index
    %c0_32 = arith.constant 0 : index
    %50 = vector.load %arg4[%c1_29, %c3_30, %c0_31, %c0_32] : memref<3x8x4x256xbf16, #tpu.memory_space<vmem>>, vector<1x1x4x256xbf16>
    %51 = vector.shape_cast %50 : vector<1x1x4x256xbf16> to vector<4x256xbf16>
    %cst_33 = arith.constant dense<0.000000e+00> : vector<256x256xf32>
    %52 = tpu.matmul %49, %51, %cst_33 {dimension_numbers = #tpu.dot_dimension_numbers<[1], [0], [0], [1], [0, 0, 1, 1], [], []>} : vector<256x4xbf16>, vector<4x256xbf16>, vector<256x256xf32> -> vector<256x256xf32>
    %53 = arith.addf %47, %52 : vector<256x256xf32>
    %54 = vector.extract_strided_slice %41 {offsets = [30, 0, 0], sizes = [16, 16, 4], strides = [1, 1, 1]} : vector<52x16x4xbf16> to vector<16x16x4xbf16>
    %55 = vector.shape_cast %54 : vector<16x16x4xbf16> to vector<256x4xbf16>
    %c1_34 = arith.constant 1 : index
    %c5_35 = arith.constant 5 : index
    %c0_36 = arith.constant 0 : index
    %c0_37 = arith.constant 0 : index
    %56 = vector.load %arg4[%c1_34, %c5_35, %c0_36, %c0_37] : memref<3x8x4x256xbf16, #tpu.memory_space<vmem>>, vector<1x1x4x256xbf16>
    %57 = vector.shape_cast %56 : vector<1x1x4x256xbf16> to vector<4x256xbf16>
    %cst_38 = arith.constant dense<0.000000e+00> : vector<256x256xf32>
    %58 = tpu.matmul %55, %57, %cst_38 {dimension_numbers = #tpu.dot_dimension_numbers<[1], [0], [0], [1], [0, 0, 1, 1], [], []>} : vector<256x4xbf16>, vector<4x256xbf16>, vector<256x256xf32> -> vector<256x256xf32>
    %59 = arith.addf %53, %58 : vector<256x256xf32>
    %c0_39 = arith.constant 0 : index
    %60 = arith.index_cast %0 : i32 to index
    %c12 = arith.constant 12 : index
    %c0_40 = arith.constant 0 : index
    %61 = vector.load %arg2[%c0_39, %60, %c12, %c0_40] : memref<1x52x56x4xbf16, #tpu.memory_space<vmem>>, vector<1x52x16x4xbf16>
    %62 = vector.shape_cast %61 : vector<1x52x16x4xbf16> to vector<52x16x4xbf16>
    %63 = vector.extract_strided_slice %62 {offsets = [12, 0, 0], sizes = [16, 16, 4], strides = [1, 1, 1]} : vector<52x16x4xbf16> to vector<16x16x4xbf16>
    %64 = vector.shape_cast %63 : vector<16x16x4xbf16> to vector<256x4xbf16>
    %c0_41 = arith.constant 0 : index
    %c0_42 = arith.constant 0 : index
    %c0_43 = arith.constant 0 : index
    %c0_44 = arith.constant 0 : index
    %65 = vector.load %arg4[%c0_41, %c0_42, %c0_43, %c0_44] : memref<3x8x4x256xbf16, #tpu.memory_space<vmem>>, vector<1x1x4x256xbf16>
    %66 = vector.shape_cast %65 : vector<1x1x4x256xbf16> to vector<4x256xbf16>
    %cst_45 = arith.constant dense<0.000000e+00> : vector<256x256xf32>
    %67 = tpu.matmul %64, %66, %cst_45 {dimension_numbers = #tpu.dot_dimension_numbers<[1], [0], [0], [1], [0, 0, 1, 1], [], []>} : vector<256x4xbf16>, vector<4x256xbf16>, vector<256x256xf32> -> vector<256x256xf32>
    %68 = arith.addf %15, %67 : vector<256x256xf32>
    %69 = vector.extract_strided_slice %62 {offsets = [18, 0, 0], sizes = [16, 16, 4], strides = [1, 1, 1]} : vector<52x16x4xbf16> to vector<16x16x4xbf16>
    %70 = vector.shape_cast %69 : vector<16x16x4xbf16> to vector<256x4xbf16>
    %c0_46 = arith.constant 0 : index
    %c3_47 = arith.constant 3 : index
    %c0_48 = arith.constant 0 : index
    %c0_49 = arith.constant 0 : index
    %71 = vector.load %arg4[%c0_46, %c3_47, %c0_48, %c0_49] : memref<3x8x4x256xbf16, #tpu.memory_space<vmem>>, vector<1x1x4x256xbf16>
    %72 = vector.shape_cast %71 : vector<1x1x4x256xbf16> to vector<4x256xbf16>
    %cst_50 = arith.constant dense<0.000000e+00> : vector<256x256xf32>
    %73 = tpu.matmul %70, %72, %cst_50 {dimension_numbers = #tpu.dot_dimension_numbers<[1], [0], [0], [1], [0, 0, 1, 1], [], []>} : vector<256x4xbf16>, vector<4x256xbf16>, vector<256x256xf32> -> vector<256x256xf32>
    %74 = arith.addf %68, %73 : vector<256x256xf32>
    %75 = vector.extract_strided_slice %62 {offsets = [24, 0, 0], sizes = [16, 16, 4], strides = [1, 1, 1]} : vector<52x16x4xbf16> to vector<16x16x4xbf16>
    %76 = vector.shape_cast %75 : vector<16x16x4xbf16> to vector<256x4xbf16>
    %c0_51 = arith.constant 0 : index
    %c5_52 = arith.constant 5 : index
    %c0_53 = arith.constant 0 : index
    %c0_54 = arith.constant 0 : index
    %77 = vector.load %arg4[%c0_51, %c5_52, %c0_53, %c0_54] : memref<3x8x4x256xbf16, #tpu.memory_space<vmem>>, vector<1x1x4x256xbf16>
    %78 = vector.shape_cast %77 : vector<1x1x4x256xbf16> to vector<4x256xbf16>
    %cst_55 = arith.constant dense<0.000000e+00> : vector<256x256xf32>
    %79 = tpu.matmul %76, %78, %cst_55 {dimension_numbers = #tpu.dot_dimension_numbers<[1], [0], [0], [1], [0, 0, 1, 1], [], []>} : vector<256x4xbf16>, vector<4x256xbf16>, vector<256x256xf32> -> vector<256x256xf32>
    %80 = arith.addf %74, %79 : vector<256x256xf32>
    %81 = vector.extract_strided_slice %3 {offsets = [12, 0, 0], sizes = [16, 16, 4], strides = [1, 1, 1]} : vector<52x16x4xbf16> to vector<16x16x4xbf16>
    %82 = vector.shape_cast %81 : vector<16x16x4xbf16> to vector<256x4xbf16>
    %c0_56 = arith.constant 0 : index
    %c1_57 = arith.constant 1 : index
    %c0_58 = arith.constant 0 : index
    %c0_59 = arith.constant 0 : index
    %83 = vector.load %arg4[%c0_56, %c1_57, %c0_58, %c0_59] : memref<3x8x4x256xbf16, #tpu.memory_space<vmem>>, vector<1x1x4x256xbf16>
    %84 = vector.shape_cast %83 : vector<1x1x4x256xbf16> to vector<4x256xbf16>
    %cst_60 = arith.constant dense<0.000000e+00> : vector<256x256xf32>
    %85 = tpu.matmul %82, %84, %cst_60 {dimension_numbers = #tpu.dot_dimension_numbers<[1], [0], [0], [1], [0, 0, 1, 1], [], []>} : vector<256x4xbf16>, vector<4x256xbf16>, vector<256x256xf32> -> vector<256x256xf32>
    %86 = arith.addf %80, %85 : vector<256x256xf32>
    %87 = vector.extract_strided_slice %3 {offsets = [24, 0, 0], sizes = [16, 16, 4], strides = [1, 1, 1]} : vector<52x16x4xbf16> to vector<16x16x4xbf16>
    %88 = vector.shape_cast %87 : vector<16x16x4xbf16> to vector<256x4xbf16>
    %c0_61 = arith.constant 0 : index
    %c6_62 = arith.constant 6 : index
    %c0_63 = arith.constant 0 : index
    %c0_64 = arith.constant 0 : index
    %89 = vector.load %arg4[%c0_61, %c6_62, %c0_63, %c0_64] : memref<3x8x4x256xbf16, #tpu.memory_space<vmem>>, vector<1x1x4x256xbf16>
    %90 = vector.shape_cast %89 : vector<1x1x4x256xbf16> to vector<4x256xbf16>
    %cst_65 = arith.constant dense<0.000000e+00> : vector<256x256xf32>
    %91 = tpu.matmul %88, %90, %cst_65 {dimension_numbers = #tpu.dot_dimension_numbers<[1], [0], [0], [1], [0, 0, 1, 1], [], []>} : vector<256x4xbf16>, vector<4x256xbf16>, vector<256x256xf32> -> vector<256x256xf32>
    %92 = arith.addf %86, %91 : vector<256x256xf32>
    %93 = vector.extract_strided_slice %3 {offsets = [6, 0, 0], sizes = [16, 16, 4], strides = [1, 1, 1]} : vector<52x16x4xbf16> to vector<16x16x4xbf16>
    %94 = vector.shape_cast %93 : vector<16x16x4xbf16> to vector<256x4xbf16>
    %c1_66 = arith.constant 1 : index
    %c1_67 = arith.constant 1 : index
    %c0_68 = arith.constant 0 : index
    %c0_69 = arith.constant 0 : index
    %95 = vector.load %arg4[%c1_66, %c1_67, %c0_68, %c0_69] : memref<3x8x4x256xbf16, #tpu.memory_space<vmem>>, vector<1x1x4x256xbf16>
    %96 = vector.shape_cast %95 : vector<1x1x4x256xbf16> to vector<4x256xbf16>
    %cst_70 = arith.constant dense<0.000000e+00> : vector<256x256xf32>
    %97 = tpu.matmul %94, %96, %cst_70 {dimension_numbers = #tpu.dot_dimension_numbers<[1], [0], [0], [1], [0, 0, 1, 1], [], []>} : vector<256x4xbf16>, vector<4x256xbf16>, vector<256x256xf32> -> vector<256x256xf32>
    %98 = arith.addf %59, %97 : vector<256x256xf32>
    %99 = vector.extract_strided_slice %3 {offsets = [30, 0, 0], sizes = [16, 16, 4], strides = [1, 1, 1]} : vector<52x16x4xbf16> to vector<16x16x4xbf16>
    %100 = vector.shape_cast %99 : vector<16x16x4xbf16> to vector<256x4xbf16>
    %c1_71 = arith.constant 1 : index
    %c6_72 = arith.constant 6 : index
    %c0_73 = arith.constant 0 : index
    %c0_74 = arith.constant 0 : index
    %101 = vector.load %arg4[%c1_71, %c6_72, %c0_73, %c0_74] : memref<3x8x4x256xbf16, #tpu.memory_space<vmem>>, vector<1x1x4x256xbf16>
    %102 = vector.shape_cast %101 : vector<1x1x4x256xbf16> to vector<4x256xbf16>
    %cst_75 = arith.constant dense<0.000000e+00> : vector<256x256xf32>
    %103 = tpu.matmul %100, %102, %cst_75 {dimension_numbers = #tpu.dot_dimension_numbers<[1], [0], [0], [1], [0, 0, 1, 1], [], []>} : vector<256x4xbf16>, vector<4x256xbf16>, vector<256x256xf32> -> vector<256x256xf32>
    %104 = arith.addf %98, %103 : vector<256x256xf32>
    %105 = vector.extract_strided_slice %3 {offsets = [0, 0, 0], sizes = [16, 16, 4], strides = [1, 1, 1]} : vector<52x16x4xbf16> to vector<16x16x4xbf16>
    %106 = vector.shape_cast %105 : vector<16x16x4xbf16> to vector<256x4xbf16>
    %c2_76 = arith.constant 2 : index
    %c1_77 = arith.constant 1 : index
    %c0_78 = arith.constant 0 : index
    %c0_79 = arith.constant 0 : index
    %107 = vector.load %arg4[%c2_76, %c1_77, %c0_78, %c0_79] : memref<3x8x4x256xbf16, #tpu.memory_space<vmem>>, vector<1x1x4x256xbf16>
    %108 = vector.shape_cast %107 : vector<1x1x4x256xbf16> to vector<4x256xbf16>
    %cst_80 = arith.constant dense<0.000000e+00> : vector<256x256xf32>
    %109 = tpu.matmul %106, %108, %cst_80 {dimension_numbers = #tpu.dot_dimension_numbers<[1], [0], [0], [1], [0, 0, 1, 1], [], []>} : vector<256x4xbf16>, vector<4x256xbf16>, vector<256x256xf32> -> vector<256x256xf32>
    %110 = arith.addf %38, %109 : vector<256x256xf32>
    %111 = vector.extract_strided_slice %3 {offsets = [36, 0, 0], sizes = [16, 16, 4], strides = [1, 1, 1]} : vector<52x16x4xbf16> to vector<16x16x4xbf16>
    %112 = vector.shape_cast %111 : vector<16x16x4xbf16> to vector<256x4xbf16>
    %c2_81 = arith.constant 2 : index
    %c6_82 = arith.constant 6 : index
    %c0_83 = arith.constant 0 : index
    %c0_84 = arith.constant 0 : index
    %113 = vector.load %arg4[%c2_81, %c6_82, %c0_83, %c0_84] : memref<3x8x4x256xbf16, #tpu.memory_space<vmem>>, vector<1x1x4x256xbf16>
    %114 = vector.shape_cast %113 : vector<1x1x4x256xbf16> to vector<4x256xbf16>
    %cst_85 = arith.constant dense<0.000000e+00> : vector<256x256xf32>
    %115 = tpu.matmul %112, %114, %cst_85 {dimension_numbers = #tpu.dot_dimension_numbers<[1], [0], [0], [1], [0, 0, 1, 1], [], []>} : vector<256x4xbf16>, vector<4x256xbf16>, vector<256x256xf32> -> vector<256x256xf32>
    %116 = arith.addf %110, %115 : vector<256x256xf32>
    %c0_86 = arith.constant 0 : index
    %117 = arith.index_cast %0 : i32 to index
    %c24 = arith.constant 24 : index
    %c0_87 = arith.constant 0 : index
    %118 = vector.load %arg2[%c0_86, %117, %c24, %c0_87] : memref<1x52x56x4xbf16, #tpu.memory_space<vmem>>, vector<1x52x16x4xbf16>
    %119 = vector.shape_cast %118 : vector<1x52x16x4xbf16> to vector<52x16x4xbf16>
    %120 = vector.extract_strided_slice %119 {offsets = [12, 0, 0], sizes = [16, 16, 4], strides = [1, 1, 1]} : vector<52x16x4xbf16> to vector<16x16x4xbf16>
    %121 = vector.shape_cast %120 : vector<16x16x4xbf16> to vector<256x4xbf16>
    %c0_88 = arith.constant 0 : index
    %c2_89 = arith.constant 2 : index
    %c0_90 = arith.constant 0 : index
    %c0_91 = arith.constant 0 : index
    %122 = vector.load %arg4[%c0_88, %c2_89, %c0_90, %c0_91] : memref<3x8x4x256xbf16, #tpu.memory_space<vmem>>, vector<1x1x4x256xbf16>
    %123 = vector.shape_cast %122 : vector<1x1x4x256xbf16> to vector<4x256xbf16>
    %cst_92 = arith.constant dense<0.000000e+00> : vector<256x256xf32>
    %124 = tpu.matmul %121, %123, %cst_92 {dimension_numbers = #tpu.dot_dimension_numbers<[1], [0], [0], [1], [0, 0, 1, 1], [], []>} : vector<256x4xbf16>, vector<4x256xbf16>, vector<256x256xf32> -> vector<256x256xf32>
    %125 = arith.addf %92, %124 : vector<256x256xf32>
    %126 = vector.extract_strided_slice %119 {offsets = [18, 0, 0], sizes = [16, 16, 4], strides = [1, 1, 1]} : vector<52x16x4xbf16> to vector<16x16x4xbf16>
    %127 = vector.shape_cast %126 : vector<16x16x4xbf16> to vector<256x4xbf16>
    %c0_93 = arith.constant 0 : index
    %c4 = arith.constant 4 : index
    %c0_94 = arith.constant 0 : index
    %c0_95 = arith.constant 0 : index
    %128 = vector.load %arg4[%c0_93, %c4, %c0_94, %c0_95] : memref<3x8x4x256xbf16, #tpu.memory_space<vmem>>, vector<1x1x4x256xbf16>
    %129 = vector.shape_cast %128 : vector<1x1x4x256xbf16> to vector<4x256xbf16>
    %cst_96 = arith.constant dense<0.000000e+00> : vector<256x256xf32>
    %130 = tpu.matmul %127, %129, %cst_96 {dimension_numbers = #tpu.dot_dimension_numbers<[1], [0], [0], [1], [0, 0, 1, 1], [], []>} : vector<256x4xbf16>, vector<4x256xbf16>, vector<256x256xf32> -> vector<256x256xf32>
    %131 = arith.addf %125, %130 : vector<256x256xf32>
    %132 = vector.extract_strided_slice %119 {offsets = [24, 0, 0], sizes = [16, 16, 4], strides = [1, 1, 1]} : vector<52x16x4xbf16> to vector<16x16x4xbf16>
    %133 = vector.shape_cast %132 : vector<16x16x4xbf16> to vector<256x4xbf16>
    %c0_97 = arith.constant 0 : index
    %c7 = arith.constant 7 : index
    %c0_98 = arith.constant 0 : index
    %c0_99 = arith.constant 0 : index
    %134 = vector.load %arg4[%c0_97, %c7, %c0_98, %c0_99] : memref<3x8x4x256xbf16, #tpu.memory_space<vmem>>, vector<1x1x4x256xbf16>
    %135 = vector.shape_cast %134 : vector<1x1x4x256xbf16> to vector<4x256xbf16>
    %cst_100 = arith.constant dense<0.000000e+00> : vector<256x256xf32>
    %136 = tpu.matmul %133, %135, %cst_100 {dimension_numbers = #tpu.dot_dimension_numbers<[1], [0], [0], [1], [0, 0, 1, 1], [], []>} : vector<256x4xbf16>, vector<4x256xbf16>, vector<256x256xf32> -> vector<256x256xf32>
    %137 = arith.addf %131, %136 : vector<256x256xf32>
    %c0_101 = arith.constant 0 : index
    %138 = arith.index_cast %0 : i32 to index
    %c30 = arith.constant 30 : index
    %c0_102 = arith.constant 0 : index
    %139 = vector.load %arg2[%c0_101, %138, %c30, %c0_102] : memref<1x52x56x4xbf16, #tpu.memory_space<vmem>>, vector<1x52x16x4xbf16>
    %140 = vector.shape_cast %139 : vector<1x52x16x4xbf16> to vector<52x16x4xbf16>
    %141 = vector.extract_strided_slice %140 {offsets = [6, 0, 0], sizes = [16, 16, 4], strides = [1, 1, 1]} : vector<52x16x4xbf16> to vector<16x16x4xbf16>
    %142 = vector.shape_cast %141 : vector<16x16x4xbf16> to vector<256x4xbf16>
    %c1_103 = arith.constant 1 : index
    %c2_104 = arith.constant 2 : index
    %c0_105 = arith.constant 0 : index
    %c0_106 = arith.constant 0 : index
    %143 = vector.load %arg4[%c1_103, %c2_104, %c0_105, %c0_106] : memref<3x8x4x256xbf16, #tpu.memory_space<vmem>>, vector<1x1x4x256xbf16>
    %144 = vector.shape_cast %143 : vector<1x1x4x256xbf16> to vector<4x256xbf16>
    %cst_107 = arith.constant dense<0.000000e+00> : vector<256x256xf32>
    %145 = tpu.matmul %142, %144, %cst_107 {dimension_numbers = #tpu.dot_dimension_numbers<[1], [0], [0], [1], [0, 0, 1, 1], [], []>} : vector<256x4xbf16>, vector<4x256xbf16>, vector<256x256xf32> -> vector<256x256xf32>
    %146 = arith.addf %104, %145 : vector<256x256xf32>
    %147 = vector.extract_strided_slice %140 {offsets = [18, 0, 0], sizes = [16, 16, 4], strides = [1, 1, 1]} : vector<52x16x4xbf16> to vector<16x16x4xbf16>
    %148 = vector.shape_cast %147 : vector<16x16x4xbf16> to vector<256x4xbf16>
    %c1_108 = arith.constant 1 : index
    %c4_109 = arith.constant 4 : index
    %c0_110 = arith.constant 0 : index
    %c0_111 = arith.constant 0 : index
    %149 = vector.load %arg4[%c1_108, %c4_109, %c0_110, %c0_111] : memref<3x8x4x256xbf16, #tpu.memory_space<vmem>>, vector<1x1x4x256xbf16>
    %150 = vector.shape_cast %149 : vector<1x1x4x256xbf16> to vector<4x256xbf16>
    %cst_112 = arith.constant dense<0.000000e+00> : vector<256x256xf32>
    %151 = tpu.matmul %148, %150, %cst_112 {dimension_numbers = #tpu.dot_dimension_numbers<[1], [0], [0], [1], [0, 0, 1, 1], [], []>} : vector<256x4xbf16>, vector<4x256xbf16>, vector<256x256xf32> -> vector<256x256xf32>
    %152 = arith.addf %146, %151 : vector<256x256xf32>
    %153 = vector.extract_strided_slice %140 {offsets = [30, 0, 0], sizes = [16, 16, 4], strides = [1, 1, 1]} : vector<52x16x4xbf16> to vector<16x16x4xbf16>
    %154 = vector.shape_cast %153 : vector<16x16x4xbf16> to vector<256x4xbf16>
    %c1_113 = arith.constant 1 : index
    %c7_114 = arith.constant 7 : index
    %c0_115 = arith.constant 0 : index
    %c0_116 = arith.constant 0 : index
    %155 = vector.load %arg4[%c1_113, %c7_114, %c0_115, %c0_116] : memref<3x8x4x256xbf16, #tpu.memory_space<vmem>>, vector<1x1x4x256xbf16>
    %156 = vector.shape_cast %155 : vector<1x1x4x256xbf16> to vector<4x256xbf16>
    %cst_117 = arith.constant dense<0.000000e+00> : vector<256x256xf32>
    %157 = tpu.matmul %154, %156, %cst_117 {dimension_numbers = #tpu.dot_dimension_numbers<[1], [0], [0], [1], [0, 0, 1, 1], [], []>} : vector<256x4xbf16>, vector<4x256xbf16>, vector<256x256xf32> -> vector<256x256xf32>
    %158 = arith.addf %152, %157 : vector<256x256xf32>
    %c0_118 = arith.constant 0 : index
    %159 = arith.index_cast %0 : i32 to index
    %c36 = arith.constant 36 : index
    %c0_119 = arith.constant 0 : index
    %160 = vector.load %arg2[%c0_118, %159, %c36, %c0_119] : memref<1x52x56x4xbf16, #tpu.memory_space<vmem>>, vector<1x52x16x4xbf16>
    %161 = vector.shape_cast %160 : vector<1x52x16x4xbf16> to vector<52x16x4xbf16>
    %162 = vector.extract_strided_slice %161 {offsets = [0, 0, 0], sizes = [16, 16, 4], strides = [1, 1, 1]} : vector<52x16x4xbf16> to vector<16x16x4xbf16>
    %163 = vector.shape_cast %162 : vector<16x16x4xbf16> to vector<256x4xbf16>
    %c2_120 = arith.constant 2 : index
    %c2_121 = arith.constant 2 : index
    %c0_122 = arith.constant 0 : index
    %c0_123 = arith.constant 0 : index
    %164 = vector.load %arg4[%c2_120, %c2_121, %c0_122, %c0_123] : memref<3x8x4x256xbf16, #tpu.memory_space<vmem>>, vector<1x1x4x256xbf16>
    %165 = vector.shape_cast %164 : vector<1x1x4x256xbf16> to vector<4x256xbf16>
    %cst_124 = arith.constant dense<0.000000e+00> : vector<256x256xf32>
    %166 = tpu.matmul %163, %165, %cst_124 {dimension_numbers = #tpu.dot_dimension_numbers<[1], [0], [0], [1], [0, 0, 1, 1], [], []>} : vector<256x4xbf16>, vector<4x256xbf16>, vector<256x256xf32> -> vector<256x256xf32>
    %167 = arith.addf %116, %166 : vector<256x256xf32>
    %168 = vector.extract_strided_slice %161 {offsets = [18, 0, 0], sizes = [16, 16, 4], strides = [1, 1, 1]} : vector<52x16x4xbf16> to vector<16x16x4xbf16>
    %169 = vector.shape_cast %168 : vector<16x16x4xbf16> to vector<256x4xbf16>
    %c2_125 = arith.constant 2 : index
    %c4_126 = arith.constant 4 : index
    %c0_127 = arith.constant 0 : index
    %c0_128 = arith.constant 0 : index
    %170 = vector.load %arg4[%c2_125, %c4_126, %c0_127, %c0_128] : memref<3x8x4x256xbf16, #tpu.memory_space<vmem>>, vector<1x1x4x256xbf16>
    %171 = vector.shape_cast %170 : vector<1x1x4x256xbf16> to vector<4x256xbf16>
    %cst_129 = arith.constant dense<0.000000e+00> : vector<256x256xf32>
    %172 = tpu.matmul %169, %171, %cst_129 {dimension_numbers = #tpu.dot_dimension_numbers<[1], [0], [0], [1], [0, 0, 1, 1], [], []>} : vector<256x4xbf16>, vector<4x256xbf16>, vector<256x256xf32> -> vector<256x256xf32>
    %173 = arith.addf %167, %172 : vector<256x256xf32>
    %174 = vector.extract_strided_slice %161 {offsets = [36, 0, 0], sizes = [16, 16, 4], strides = [1, 1, 1]} : vector<52x16x4xbf16> to vector<16x16x4xbf16>
    %175 = vector.shape_cast %174 : vector<16x16x4xbf16> to vector<256x4xbf16>
    %c2_130 = arith.constant 2 : index
    %c7_131 = arith.constant 7 : index
    %c0_132 = arith.constant 0 : index
    %c0_133 = arith.constant 0 : index
    %176 = vector.load %arg4[%c2_130, %c7_131, %c0_132, %c0_133] : memref<3x8x4x256xbf16, #tpu.memory_space<vmem>>, vector<1x1x4x256xbf16>
    %177 = vector.shape_cast %176 : vector<1x1x4x256xbf16> to vector<4x256xbf16>
    %cst_134 = arith.constant dense<0.000000e+00> : vector<256x256xf32>
    %178 = tpu.matmul %175, %177, %cst_134 {dimension_numbers = #tpu.dot_dimension_numbers<[1], [0], [0], [1], [0, 0, 1, 1], [], []>} : vector<256x4xbf16>, vector<4x256xbf16>, vector<256x256xf32> -> vector<256x256xf32>
    %179 = arith.addf %173, %178 : vector<256x256xf32>
    %c0_135 = arith.constant 0 : index
    %c0_136 = arith.constant 0 : index
    %c256 = arith.constant 256 : index
    %180 = vector.load %arg6[%c0_135, %c0_136, %c256] : memref<1x256x1024xf32, #tpu.memory_space<vmem>>, vector<1x256x256xf32>
    %181 = vector.shape_cast %180 : vector<1x256x256xf32> to vector<256x256xf32>
    %182 = vector.shape_cast %137 : vector<256x256xf32> to vector<1x256x256xf32>
    tpu.vector_store %arg6[%c0_135, %c0_136, %c256], %182 {strides = array<i32>} : memref<1x256x1024xf32, #tpu.memory_space<vmem>>, vector<1x256x256xf32>,
    %c0_137 = arith.constant 0 : index
    %c0_138 = arith.constant 0 : index
    %c512 = arith.constant 512 : index
    %183 = vector.load %arg6[%c0_137, %c0_138, %c512] : memref<1x256x1024xf32, #tpu.memory_space<vmem>>, vector<1x256x256xf32>
    %184 = vector.shape_cast %183 : vector<1x256x256xf32> to vector<256x256xf32>
    %185 = vector.shape_cast %158 : vector<256x256xf32> to vector<1x256x256xf32>
    tpu.vector_store %arg6[%c0_137, %c0_138, %c512], %185 {strides = array<i32>} : memref<1x256x1024xf32, #tpu.memory_space<vmem>>, vector<1x256x256xf32>,
    %c0_139 = arith.constant 0 : index
    %c0_140 = arith.constant 0 : index
    %c768 = arith.constant 768 : index
    %186 = vector.load %arg6[%c0_139, %c0_140, %c768] : memref<1x256x1024xf32, #tpu.memory_space<vmem>>, vector<1x256x256xf32>
    %187 = vector.shape_cast %186 : vector<1x256x256xf32> to vector<256x256xf32>
    %188 = vector.shape_cast %179 : vector<256x256xf32> to vector<1x256x256xf32>
    tpu.vector_store %arg6[%c0_139, %c0_140, %c768], %188 {strides = array<i32>} : memref<1x256x1024xf32, #tpu.memory_space<vmem>>, vector<1x256x256xf32>,
    return
  }
  func.func @transform_0(%arg0: i32, %arg1: i32) -> (i32, i32, i32, i32) {
    %c0_i32 = arith.constant 0 : i32
    %c0_i32_0 = arith.constant 0 : i32
    %c0_i32_1 = arith.constant 0 : i32
    %c0_i32_2 = arith.constant 0 : i32
    return %arg0, %c0_i32, %c0_i32_0, %c0_i32_1 : i32, i32, i32, i32
  }
  func.func @transform_1(%arg0: i32, %arg1: i32) -> (i32, i32) {
    %c0_i32 = arith.constant 0 : i32
    %c0_i32_0 = arith.constant 0 : i32
    %c0_i32_1 = arith.constant 0 : i32
    return %c0_i32, %c0_i32_0 : i32, i32
  }
  func.func @transform_2(%arg0: i32, %arg1: i32) -> (i32, i32, i32, i32) {
    %c0_i32 = arith.constant 0 : i32
    %c0_i32_0 = arith.constant 0 : i32
    %c0_i32_1 = arith.constant 0 : i32
    %c0_i32_2 = arith.constant 0 : i32
    %c0_i32_3 = arith.constant 0 : i32
    return %c0_i32, %c0_i32_0, %c0_i32_1, %c0_i32_2 : i32, i32, i32, i32
  }
  func.func @transform_3(%arg0: i32, %arg1: i32) -> (i32, i32) {
    %c0_i32 = arith.constant 0 : i32
    %c0_i32_0 = arith.constant 0 : i32
    %c0_i32_1 = arith.constant 0 : i32
    return %c0_i32, %c0_i32_0 : i32, i32
  }
  func.func @transform_4(%arg0: i32, %arg1: i32) -> (i32, i32, i32) {
    %c0_i32 = arith.constant 0 : i32
    %c0_i32_0 = arith.constant 0 : i32
    return %arg0, %arg1, %c0_i32 : i32, i32, i32
  }
}

</mosaic_0001>

<bundles_post_ra>
// kernel: tpu_custom_call.1
= control target key start
LH: loop header
LB: loop body
LE: loop exit
PB: predicated region body
PF: predicated region fallthrough
CT: control target
= control target key end

     0   :  { %9 = vsyncpa [#allocation3], 0  ;;  %s20074_s0 = inlined_call_operand.vmem [shape: bf16[2,52,56,4], index: 0, kind: input, shape index: {}]   ;;  %s20075_s1 = inlined_call_operand.hbm [shape: bf16[4,1024], index: 1, kind: input, shape index: {}]   ;;  %s20076_s2 = inlined_call_operand.hbm [shape: bf16[3,8,4,256], index: 2, kind: input, shape index: {}]   ;;  %s20077_s3 = inlined_call_operand.hbm [shape: f32[1,1024], index: 3, kind: input, shape index: {}]   ;;  %s20078_s4 = inlined_call_operand.hbm [shape: f32[2,256,1024], index: 4, kind: output, shape index: {}]  }
   0x1   :  { %10 = vsyncpa [#allocation6], 0 }
   0x2   :  { %11 = vsyncpa [#allocation4], 0 }
   0x3   :  { %13 = vsyncpa [#allocation4 + $0x1], 0  ;;  %s15927_s15 = smov 0   ;;  %s15929_s16 = smov 0  }
   0x4   :  { %s15931_s17 = smov 0   ;;  %s15933_s18 = smov 0  }
   0x5   :  { %s15935_s19 = smov 0   ;;  %s15937_s20 = smov 0  }
   0x6 LB: > { %s12809_s21 = sadd.s32 4294967295, %s15890_s20   ;;  %s12810_s22 = sadd.s32 4294967294, %s15890_s20   ;;  %s15890_s20 = sphi %s15937_s20, %s19_s20   ;;  %s15886_s19 = sphi %s15935_s19, %s20375_s19   ;;  %s15882_s18 = sphi %s15933_s18, %s20374_s18   ;;  %s15878_s17 = sphi %s15931_s17, %s20373_s17   ;;  %s15874_s16 = sphi %s15929_s16, %s20372_s16   ;;  %s15870_s15 = sphi %s15927_s15, %s20371_s15  }
   0x7   : > { %s31_s23 = sadd.s32 1, %s15886_s19  ;;  %s129_s24 = sadd.s32 1, %s15878_s17 }
   0x8   : > { %p33_p0 = scmp.ge.s32.totalorder %s31_s23, 2  ;;  %p139_p1 = scmp.ne.s32.totalorder %s15878_s17, %s15874_s16 }
   0x9   : > { %p140_p2 = scmp.eq.s32.totalorder %s12809_s21, 1  ;;  %p145_p3 = scmp.ne.s32.totalorder %s15874_s16, %s15870_s15 }
   0xa   : > { %s20377_s23 = smov (%p33_p0, %s31_s23), 0  ;;  %p146_p5 = scmp.eq.s32.totalorder %s12810_s22, 1 }
   0xb   : > { %20090 = sst [smem:[#allocation12_spill]] %s20377_s23  ;;  %p15967_p4 = por %p140_p2, %p139_p1 }
   0xc   : > { %s124_s26 = ssub.s32 %s15886_s19, %s20377_s23  ;;  %p12811_p6 = scmp.ge.s32.totalorder %s15890_s20, 1 }
   0xd   : > { %s20091_s25 = scalar_select %p15967_p4, 1, 0 }
   0xe   : > { %p127_p7 = scmp.eq.s32.totalorder %s124_s26, 0  ;;  %p15974_p8 = por %p146_p5, %p145_p3 }
   0xf   : > { %p153_p9 = scmp.lt.s32.totalorder %s15890_s20, 3  ;;  %p15986_p11 = scmp.eq.s32.totalorder %s12809_s21, 0 }
  0x10   : > { %s20092_s27 = scalar_select %p15974_p8, 1, 0 }
  0x11   : > { %s15980_s28 = scalar_select %p127_p7, %s15878_s17, %s129_s24  }
  0x12   : > { %p15982_p10 = pnand %p12811_p6, %p153_p9  ;;  %s15892_s5 = smov [#allocation5]  }
  0x13   : > { %s20094_s30 = scalar_select %p15986_p11, 1, 0 }
  0x14   : > { %s20093_s29 = scalar_select %p15982_p10, 1, 0 }
  0x15   : > { %p15563_p12 = pneg %p15982_p10  ;;  %s176_s6 = sshll.u32 %s15892_s5, 4  ;;  %s177_s6 = int_to_ptr.vmem [resolvable:$true] %s176_s6 }
  0x16   : > { %s15893_s8 = smov [#allocation2]   ;;  %s15720_s12 = scalar_lea.hbm %s20076_s2, 1536 }
  0x17   : > { %p15994_p13 = pnand %p15986_p11, %p15563_p12  ;;  %s166_s9 = sshll.u32 %s15893_s8, 4  ;;  %s167_s9 = int_to_ptr.vmem [resolvable:$true] %s166_s9 }
  0x18   : > { %p15721_p0 = scmp.ne.s32.totalorder %s20076_s2, %s15720_s12  ;;  %p15727_p5 = scmp.lt.u32.totalorder %s15720_s12, %s20076_s2 }
  0x19   : > { %p16006_p1 = pneg %p15994_p13 }
  0x1b   : > { %p15723_p2 = pnand %p16006_p1, %p15721_p0 }
  0x1d   : > { %p15724_p3 = pneg %p15723_p2 }
  0x1f   : > { %p15729_p6 = pnand %p15727_p5, %p15724_p3 }
  0x21   : > { %15732 = shalt.err (!%p15729_p6)
}
  0x22   : > { %s15733_s26 = scalar_lea.vmem %s177_s6, 1536  ;;  %p15741_p8 = scmp.lt.s32.totalorder %s177_s6, %s177_s6 }
  0x23   : > { %p15734_p7 = scmp.ne.s32.totalorder %s177_s6, %s15733_s26  ;;  %p15742_p4 = scmp.lt.s32.totalorder %s15733_s26, %s15733_s26 }
  0x25   : > { %p15736_p9 = pnand %p15734_p7, %p16006_p1  ;;  %p15743_p11 = por %p15742_p4, %p15741_p8 }
  0x27   : > { %p15737_p12 = pneg %p15736_p9 }
  0x29   : > { %p15744_p10 = pnand %p15743_p11, %p15737_p12 }
  0x2b   : > { %15747 = shalt.err (!%p15744_p10)
}
  0x2c   : > { %s15894_s5 = smov 64   ;;  %s15895_s8 = smov 4  }
  0x2d   : > { %15569 = dma.hbm_to_vmem [thread:$0]  (!%p15994_p13), %s20076_s2, 1536, %s177_s6, [#allocation6], %s15894_s5, %s15894_s5, %s15895_s8  }
  0x2e   : > { %s15748_s14 = scalar_lea.hbm %s20075_s1, 256 }
  0x2f   : > { %p15749_p4 = scmp.ne.s32.totalorder %s20075_s1, %s15748_s14  ;;  %p15755_p11 = scmp.lt.u32.totalorder %s15748_s14, %s20075_s1 }
  0x31   : > { %p15751_p8 = pnand %p15749_p4, %p16006_p1 }
  0x33   : > { %p15752_p10 = pneg %p15751_p8 }
  0x35   : > { %p15757_p0 = pnand %p15755_p11, %p15752_p10 }
  0x37   : > { %15760 = shalt.err (!%p15757_p0)
}
  0x38   : > { %s15761_s10 = scalar_lea.vmem %s167_s9, 256  ;;  %p15769_p6 = scmp.lt.s32.totalorder %s167_s9, %s167_s9 }
  0x39   : > { %p15762_p2 = scmp.ne.s32.totalorder %s167_s9, %s15761_s10  ;;  %p15770_p7 = scmp.lt.s32.totalorder %s15761_s10, %s15761_s10 }
  0x3b   : > { %p15764_p3 = pnand %p15762_p2, %p16006_p1  ;;  %p15771_p9 = por %p15770_p7, %p15769_p6 }
  0x3d   : > { %p15765_p5 = pneg %p15764_p3 }
  0x3f   : > { %p15772_p12 = pnand %p15771_p9, %p15765_p5 }
  0x41   : > { %15775 = shalt.err (!%p15772_p12)
}
  0x42   : > { %15566 = dma.hbm_to_vmem [thread:$0]  (!%p15994_p13), %s20075_s1, 256, %s167_s9, [#allocation3]  }
  0x43   : > { %s15896_s23 = smov [#allocation7]   ;;  %s15776_s13 = scalar_lea.hbm %s20077_s3, 128 }
  0x44   : > { %s190_s8 = sshll.u32 %s15896_s23, 4  ;;  %p15777_p4 = scmp.ne.s32.totalorder %s20077_s3, %s15776_s13  ;;  %s191_s8 = int_to_ptr.vmem [resolvable:$true] %s190_s8 }
  0x45   : > { %p15783_p11 = scmp.lt.u32.totalorder %s15776_s13, %s20077_s3 }
  0x46   : > { %p15779_p8 = pnand %p15777_p4, %p16006_p1 }
  0x48   : > { %p15780_p10 = pneg %p15779_p8 }
  0x4a   : > { %p15785_p0 = pnand %p15783_p11, %p15780_p10 }
  0x4c   : > { %15788 = shalt.err (!%p15785_p0)
}
  0x4d   : > { %s15789_s9 = scalar_lea.vmem %s191_s8, 128  ;;  %p15797_p6 = scmp.lt.s32.totalorder %s191_s8, %s191_s8 }
  0x4e   : > { %p15790_p2 = scmp.ne.s32.totalorder %s191_s8, %s15789_s9  ;;  %p15798_p7 = scmp.lt.s32.totalorder %s15789_s9, %s15789_s9 }
  0x50   : > { %p15792_p3 = pnand %p15790_p2, %p16006_p1  ;;  %p15799_p9 = por %p15798_p7, %p15797_p6 }
  0x52   : > { %p15793_p5 = pneg %p15792_p3 }
  0x54   : > { %p15800_p12 = pnand %p15799_p9, %p15793_p5 }
  0x56   : > { %15803 = shalt.err (!%p15800_p12)
}
  0x57   : > { %15572 = dma.hbm_to_vmem [thread:$0]  (!%p15994_p13), %s20077_s3, 128, %s191_s8, [#allocation6]  }
  0x58   : > { %p20097_p4 = scmp.ne.s32.totalorder %s20093_s29, 0 }
  0x5a   : > { %211 = sbr.rel (%p20097_p4) target bundleno = 2133 (0x855), region = 36 }
  0x61   : > { %p20098_p8 = scmp.ne.s32.totalorder %s20094_s30, 0 }
  0x63   : > { %15857 = dma.done.wait (%p20098_p8), [#allocation3], 256  }
  0x64   : > { %15859 = vsyncadd (%p20098_p8), [#allocation3], 4294967040 }
  0x65   : > { %15861 = dma.done.wait (%p20098_p8), [#allocation6], 1664  }
  0x66   : > { %15863 = vsyncadd (%p20098_p8), [#allocation6], 4294965632  ;;  %v579_v0 = vlaneseq  ;;  %v15897_v1 = vmov 1983009808   ;;  %v20088_v3 = vmov 0   ;;  %p245_p13 = scmp.lt.s32.totalorder %s15882_s18, 1 }
  0x67   : > { %v671_v2 = vunpack.c.l.s4 %v15897_v1  ;;  %2690 = vmatprep.mubr.bf16.mxu1 %v20088_v3  ;;  %809 = vmatprep.mubr.bf16.mxu0 %v20088_v3  ;;  %vm752_vm0 = vcmask 1041408   ;;  %vm703_vm1 = vcmask 31744   ;;  %vm460_vm2 = vcmask 1042432   ;;  %v575_v14 = vld [vmem:[#allocation2] sm:$0xff]  ;;  %v577_v15 = vld [vmem:[#allocation7] sm:$0xff]  ;;  %s242_s23 = sand.u32 1, %s15874_s16  }
  0x68   : > { %v16071_v4 = vshrl.u32 %v579_v0, 7  ;;  %s246_s29 = scalar_select %p245_p13, %s15882_s18, 1  ;;  %vm461_vm3 = vcmask 1046532   ;;  %v669_v28 = vcombine.high %v575_v14, %v575_v14  ;;  %vm4633_vm5 = vcmask 1045508  }
  0x69   : > { %v672_v5 = vunpack.c.0.s8 %v671_v2  ;;  %v13006_v13 = vld.sshfl [vmem:[#allocation5 + $0x54] sm:$0x33 pattern:$0x76325410]  ;;  %vm16109_vm4 = vmor %vm460_vm2, %vm461_vm3  ;;  %s12820_s8 = sshll.u32 %s242_s23, 11  ;;  %vm3083_vm7 = vcmask 1040384  }
  0x6a   : > { %v589_v6 = vsub.s32 2, %v16071_v4  ;;  %v593_v7 = vsub.s32 3, %v16071_v4  ;;  %v597_v8 = vsub.s32 4, %v16071_v4  ;;  %v601_v9 = vsub.s32 5, %v16071_v4  ;;  %s15548_s30 = smul.u32 1456, %s246_s29  ;;  %vm16367_vm6 = vmor %vm752_vm0, %vm4633_vm5  ;;  %s16570_s11 = scalar_lea.vmem [#allocation8], %s12820_s8 }
  0x6b   : > { %v605_v10 = vsub.s32 6, %v16071_v4  ;;  %v609_v11 = vsub.s32 7, %v16071_v4  ;;  %v16081_v12 = vsub.s32 %v672_v5, %v16071_v4  ;;  %v2603_v16 = vcombine.high %v13006_v13, %v13006_v13  ;;  %v13190_v31 = vld.sshfl [vmem:[#allocation5] sm:$0x33 pattern:$0x76325410] }
  0x6c   : > { %s16086_s5 = scalar_lea.vmem %s20074_s0, %s15548_s30  ;;  %v2653_v17 = vsel %vm752_vm0, %v13006_v13, 0  ;;  %v16090_v19 = vrot.slane %v577_v15, %v589_v6  ;;  %v16092_v20 = vrot.slane %v577_v15, %v593_v7  ;;  %v16094_v21 = vrot.slane %v577_v15, %v597_v8  ;;  %s13819_s12 = sshll.u32 %s15882_s18, 15 }
  0x6d   : > { %v15642_v18 = vld [vmem:[%s16086_s5 + $0x3f0] sm:$0xff]   ;;  %v16096_v22 = vrot.slane %v577_v15, %v601_v9  ;;  %v310_v23 = vld [vmem:[%s16086_s5 + $0x200] sm:$0xe]  ;;  %v311_v24 = vld [vmem:[%s16086_s5 + $0x204] sm:$0xf]  ;;  %13007 = vmatprep.subr.msk.bf16.mxu1 %vm752_vm0, %v2603_v16  ;;  %v16102_v26 = vrot.slane %v577_v15, %v605_v10  ;;  %v16104_v27 = vrot.slane %v577_v15, %v609_v11  ;;  %v676_v29 = vrot.slane %v575_v14, %v16081_v12  ;;  %s12703_s13 = sshll.u32 %s16570_s11, 4  ;;  %s20018_s18 = scalar_lea.hbm %s20078_s4, %s13819_s12  ;;  %s20020_s13 = int_to_ptr.vmem [resolvable:$true] %s12703_s13 }
  0x6e   : > { %20099 = vst [vmem:[#allocation13_spill] sm:$0xff] %v16094_v21  ;;  %v312_v25 = vld [vmem:[%s16086_s5 + $0x208] sm:$0x1]  ;;  %2659 = vmatpush1.bf16.msra.mxu1 %v2653_v17  ;;  %v12822_v32 = vrot.slane %v310_v23, 9  ;;  %v465_v33 = vrot.slane %v311_v24, 5  ;;  %v4804_v35 = vcombine.high %v13190_v31, %v13190_v31  ;;  %v683_v36 = vrot.slane %v669_v28, %v16081_v12  ;;  %v15643_v54 = vld [vmem:[%s16086_s5 + $0x40c] sm:$0xff]  }
  0x6f   : > { %20100 = vst [vmem:[#allocation14_spill] sm:$0xff] %v16096_v22  ;;  %20101 = vst [vmem:[#allocation15_spill] sm:$0xff] %v16102_v26  ;;  %v468_v34 = vrot.slane %v312_v25, 5  ;;  %v684_v37 = vcombine.high %v676_v29, %v676_v29  ;;  %v754_v38 = vsel %vm752_vm0, %v676_v29, 0  ;;  %v4854_v39 = vsel %vm752_vm0, %v13190_v31, 0  ;;  %v15644_v1 = vld [vmem:[%s16086_s5 + $0x428] sm:$0xff]  }
  0x70   : > { %20102 = vst [vmem:[#allocation16_spill] sm:$0xff] %v16104_v27  ;;  %v313_v40 = vld [vmem:[%s16086_s5 + $0x21c] sm:$0xe]  ;;  %v314_v41 = vld [vmem:[%s16086_s5 + $0x220] sm:$0xf]  ;;  %v466_v42 = vsel %vm16109_vm4, %v12822_v32, %v465_v33  ;;  %v467_v43 = vrot.slane %v465_v33, 4  ;;  %13191 = vmatprep.subr.msk.bf16.mxu1 %vm752_vm0, %v4804_v35  ;;  %v685_v46 = vcombine.high %v683_v36, %v683_v36 }
  0x71   : > { %v315_v44 = vld [vmem:[%s16086_s5 + $0x224] sm:$0x1]  ;;  %v472_v45 = vrot.slane %v314_v41, 5  ;;  %12854 = vmatprep.subr.msk.bf16.mxu0 %vm752_vm0, %v684_v37  ;;  %13008 = vmatmul.mubr.msk.bf16.vlgmr.msra.gmra.mrb[0].mxu1 %vm703_vm1, %v15642_v18  ;;  %v12823_v48 = vrot.slane %v313_v40, 9  ;;  %v760_v52 = vsel %vm752_vm0, %v683_v36, 0  ;;  %vm3084_vm8 = vcmask 1044484  }
  0x72   : > { %778 = vmatpush1.bf16.msra.mxu0 %v754_v38  ;;  %v469_v47 = vsel %vm16109_vm4, %v467_v43, %v468_v34  ;;  %4860 = vmatpush1.bf16.msra.mxu1 %v4854_v39  ;;  %v475_v50 = vrot.slane %v315_v44, 5  ;;  %v317_v53 = vld [vmem:[%s16086_s5 + $0x23c] sm:$0xf]  ;;  %v316_v58 = vld [vmem:[%s16086_s5 + $0x238] sm:$0xe]  ;;  %v15645_v15 = vld [vmem:[%s16086_s5 + $0x444] sm:$0xff]  }
  0x73   : > { %v474_v49 = vrot.slane %v472_v45, 4  ;;  %v16126_v51 = vcombine.low %v466_v42, %v469_v47  ;;  %12871 = vmatprep.subr.msk.bf16.mxu0 %vm752_vm0, %v685_v46  ;;  %2700 = vmatprep.mubr.bf16.mxu1 %v20088_v3  ;;  %v473_v55 = vsel %vm16109_vm4, %v12823_v48, %v472_v45  ;;  %v479_v57 = vrot.slane %v317_v53, 5  ;;  %v318_v59 = vld [vmem:[%s16086_s5 + $0x240] sm:$0x1]  ;;  %v320_v0 = vld [vmem:[%s16086_s5 + $0x258] sm:$0xf]  ;;  %vm17528_vm9 = vmor %vm3083_vm7, %vm3084_vm8 }
  0x74   : > { %v12824_v61 = vrot.slane %v316_v58, 9  ;;  %v482_v63 = vrot.slane %v318_v59, 5  ;;  %v486_v6 = vrot.slane %v320_v0, 5  ;;  %v319_v7 = vld [vmem:[%s16086_s5 + $0x254] sm:$0xe]  ;;  %v15646_v33 = vld [vmem:[%s16086_s5 + $0x460] sm:$0xff]  }
  0x75   : > { %12855 = vmatmul.mubr.msk.bf16.vlgmr.msra.gmra.mrb[0].mxu0 %vm703_vm1, %v16126_v51  ;;  %v476_v56 = vsel %vm16109_vm4, %v474_v49, %v475_v50  ;;  %v481_v62 = vrot.slane %v479_v57, 4  ;;  %v321_v8 = vld [vmem:[%s16086_s5 + $0x25c] sm:$0x1]  ;;  %v12825_v10 = vrot.slane %v319_v7, 9  ;;  %v323_v14 = vld [vmem:[%s16086_s5 + $0x274] sm:$0xf] }
  0x76   : > { %971 = vmatpush1.bf16.msra.mxu0 %v760_v52  ;;  %819 = vmatprep.mubr.bf16.mxu0 %v20088_v3  ;;  %v16143_v60 = vcombine.low %v473_v55, %v476_v56  ;;  %v480_v2 = vsel %vm16109_vm4, %v12824_v61, %v479_v57  ;;  %v488_v11 = vrot.slane %v486_v6, 4  ;;  %v489_v13 = vrot.slane %v321_v8, 5  ;;  %v322_v18 = vld [vmem:[%s16086_s5 + $0x270] sm:$0xe]  ;;  %v324_v24 = vld [vmem:[%s16086_s5 + $0x278] sm:$0x1] }
  0x77   : > { %v483_v5 = vsel %vm16109_vm4, %v481_v62, %v482_v63  ;;  %v487_v16 = vsel %vm16109_vm4, %v12825_v10, %v486_v6  ;;  %v493_v23 = vrot.slane %v323_v14, 5  ;;  %v12826_v28 = vrot.slane %v322_v18, 9  ;;  %v326_v32 = vld [vmem:[%s16086_s5 + $0x290] sm:$0xf]  ;;  %v325_v36 = vld [vmem:[%s16086_s5 + $0x28c] sm:$0xe] }
  0x78   : > { %v16158_v9 = vcombine.low %v480_v2, %v483_v5  ;;  %v490_v17 = vsel %vm16109_vm4, %v488_v11, %v489_v13  ;;  %v496_v31 = vrot.slane %v324_v24, 5  ;;  %v500_v37 = vrot.slane %v326_v32, 5  ;;  %v327_v38 = vld [vmem:[%s16086_s5 + $0x294] sm:$0x1]  ;;  %v329_v43 = vld [vmem:[%s16086_s5 + $0x2ac] sm:$0xf] }
  0x79   : > { %13009 = vmatmul.mubr.msk.bf16.gmra.mrb[4].mxu1 %vm703_vm1, %v15643_v54  ;;  %v16173_v25 = vcombine.low %v487_v16, %v490_v17  ;;  %v495_v29 = vrot.slane %v493_v23, 4  ;;  %v494_v34 = vsel %vm16109_vm4, %v12826_v28, %v493_v23  ;;  %v12827_v40 = vrot.slane %v325_v36, 9  ;;  %v16192_v44 = vld [vmem:[#allocation2 + $0x8] sm:$0xff]  ;;  %v15647_v45 = vld [vmem:[%s16086_s5 + $0x47c] sm:$0xff]   ;;  %v330_v53 = vld [vmem:[%s16086_s5 + $0x2b0] sm:$0x1] }
  0x7a   : > { %2710 = vmatprep.mubr.bf16.mxu1 %v20088_v3  ;;  %v502_v41 = vrot.slane %v500_v37, 4  ;;  %v503_v42 = vrot.slane %v327_v38, 5  ;;  %v16199_v46 = vrot.slane %v16192_v44, %v16081_v12  ;;  %v507_v49 = vrot.slane %v329_v43, 5  ;;  %v328_v52 = vld [vmem:[%s16086_s5 + $0x2a8] sm:$0xe]  ;;  %v15648_v62 = vld [vmem:[%s16086_s5 + $0x498] sm:$0xff]  }
  0x7b   : > { %v497_v35 = vsel %vm16109_vm4, %v495_v29, %v496_v31  ;;  %v501_v47 = vsel %vm16109_vm4, %v12827_v40, %v500_v37  ;;  %v16206_v50 = vld.sshfl [vmem:[#allocation5 + $0xc] sm:$0x33 pattern:$0x76325410]  ;;  %v12828_v57 = vrot.slane %v328_v52, 9  ;;  %v510_v59 = vrot.slane %v330_v53, 5 }
  0x7c   : > { %v16188_v39 = vcombine.low %v494_v34, %v497_v35  ;;  %v504_v48 = vsel %vm16109_vm4, %v502_v41, %v503_v42  ;;  %v701_v54 = vcombine.high %v16199_v46, %v16199_v46  ;;  %v5204_v55 = vcombine.high %v16206_v50, %v16206_v50  ;;  %v332_v61 = vld [vmem:[%s16086_s5 + $0x2c8] sm:$0xf]  ;;  %v333_v5 = vld [vmem:[%s16086_s5 + $0x2cc] sm:$0x1]  ;;  %v335_v6 = vld [vmem:[%s16086_s5 + $0x2e4] sm:$0xf] }
  0x7d   : > { %12856 = vmatmul.mubr.msk.bf16.gmra.mrb[4].mxu0 %vm703_vm1, %v16143_v60  ;;  %v16215_v56 = vcombine.low %v501_v47, %v504_v48  ;;  %v509_v58 = vrot.slane %v507_v49, 4  ;;  %v508_v63 = vsel %vm16109_vm4, %v12828_v57, %v507_v49  ;;  %v514_v2 = vrot.slane %v332_v61, 5  ;;  %v334_v10 = vld [vmem:[%s16086_s5 + $0x2e0] sm:$0xe]  ;;  %v336_v14 = vld [vmem:[%s16086_s5 + $0x2e8] sm:$0x1] }
  0x7e   : > { %829 = vmatprep.mubr.bf16.mxu0 %v20088_v3  ;;  %12888 = vmatprep.subr.msk.bf16.mxu0 %vm752_vm0, %v701_v54  ;;  %v517_v13 = vrot.slane %v333_v5, 5  ;;  %v338_v16 = vld [vmem:[%s16086_s5 + $0x300] sm:$0xf]  ;;  %v15649_v17 = vld [vmem:[%s16086_s5 + $0x4b4] sm:$0xff]   ;;  %v12830_v24 = vrot.slane %v334_v10, 9  ;;  %v524_v28 = vrot.slane %v336_v14, 5 }
  0x7f   : > { %13221 = vmatprep.subr.msk.bf16.mxu1 %vm752_vm0, %v5204_v55  ;;  %v511_v0 = vsel %vm16109_vm4, %v509_v58, %v510_v59  ;;  %v516_v11 = vrot.slane %v514_v2, 4  ;;  %v528_v31 = vrot.slane %v338_v16, 5  ;;  %v337_v32 = vld [vmem:[%s16086_s5 + $0x2fc] sm:$0xe]  ;;  %v339_v34 = vld [vmem:[%s16086_s5 + $0x304] sm:$0x1] }
  0x80   : > { %v16233_v7 = vcombine.low %v508_v63, %v511_v0  ;;  %v341_v35 = vld [vmem:[%s16086_s5 + $0x31c] sm:$0xf]  ;;  %v15650_v36 = vld [vmem:[%s16086_s5 + $0x4d0] sm:$0xff]   ;;  %v12831_v38 = vrot.slane %v337_v32, 9  ;;  %v531_v42 = vrot.slane %v339_v34, 5  ;;  %v15652_v0 = vld [vmem:[%s16086_s5 + $0x508] sm:$0xff]  }
  0x81   : > { %13010 = vmatmul.mubr.msk.bf16.gmra.mrb[8].mxu1 %vm703_vm1, %v15644_v1  ;;  %v331_v1 = vld [vmem:[%s16086_s5 + $0x2c4] sm:$0xe]  ;;  %v518_v23 = vsel %vm16109_vm4, %v516_v11, %v517_v13  ;;  %v530_v41 = vrot.slane %v528_v31, 4  ;;  %v535_v43 = vrot.slane %v341_v35, 5  ;;  %v342_v48 = vld [vmem:[%s16086_s5 + $0x320] sm:$0x1] }
  0x82   : > { %2720 = vmatprep.mubr.bf16.mxu1 %v20088_v3  ;;  %v12829_v8 = vrot.slane %v331_v1, 9  ;;  %v344_v49 = vld [vmem:[%s16086_s5 + $0x338] sm:$0xf]  ;;  %v15651_v52 = vld [vmem:[%s16086_s5 + $0x4ec] sm:$0xff]   ;;  %v529_v53 = vsel %vm16109_vm4, %v12831_v38, %v528_v31  ;;  %v538_v58 = vrot.slane %v342_v48, 5  ;;  %v15655_v48 = vld [vmem:[%s16086_s5 + $0x55c] sm:$0xff]  }
  0x83   : > { %v532_v55 = vsel %vm16109_vm4, %v530_v41, %v531_v42  ;;  %v537_v57 = vrot.slane %v535_v43, 4  ;;  %v542_v59 = vrot.slane %v344_v49, 5  ;;  %v343_v61 = vld [vmem:[%s16086_s5 + $0x334] sm:$0xe]  ;;  %v345_v63 = vld [vmem:[%s16086_s5 + $0x33c] sm:$0x1] }
  0x84   : > { %v515_v18 = vsel %vm16109_vm4, %v12829_v8, %v514_v2  ;;  %v12833_v1 = vrot.slane %v343_v61, 9  ;;  %v545_v8 = vrot.slane %v345_v63, 5  ;;  %v347_v10 = vld [vmem:[%s16086_s5 + $0x354] sm:$0xf]  ;;  %v346_v13 = vld [vmem:[%s16086_s5 + $0x350] sm:$0xe] }
  0x85   : > { %12857 = vmatmul.mubr.msk.bf16.gmra.mrb[8].mxu0 %vm703_vm1, %v16158_v9  ;;  %v539_v5 = vsel %vm16109_vm4, %v537_v57, %v538_v58  ;;  %v348_v14 = vld [vmem:[%s16086_s5 + $0x358] sm:$0x1]  ;;  %v350_v16 = vld [vmem:[%s16086_s5 + $0x370] sm:$0xf]  ;;  %v349_v32 = vld [vmem:[%s16086_s5 + $0x36c] sm:$0xe] }
  0x86   : > { %839 = vmatprep.mubr.bf16.mxu0 %v20088_v3  ;;  %v556_v31 = vrot.slane %v350_v16, 5  ;;  %v351_v35 = vld [vmem:[%s16086_s5 + $0x374] sm:$0x1]  ;;  %v352_v49 = vld [vmem:[%s16086_s5 + $0x388] sm:$0xe]  ;;  %v15691_v30 = vld [vmem:[%s16086_s5 + $0x15c] sm:$0xff]  }
  0x87   : > { %v559_v42 = vrot.slane %v351_v35, 5  ;;  %v12836_v58 = vrot.slane %v352_v49, 9  ;;  %v356_v63 = vld [vmem:[%s16086_s5 + $0x3a8] sm:$0xf]  ;;  %s20028_s24 = scalar_lea.sflag [#allocation4], %s242_s23  ;;  %s15804_s26 = scalar_lea.vmem %s20020_s13, 32768 }
  0x88   : > { %v558_v41 = vrot.slane %v556_v31, 4  ;;  %p15805_p1 = scmp.ne.s32.totalorder %s20020_s13, %s15804_s26  ;;  %p20368_p10 = scmp.ne.s32.totalorder %s20091_s25, 0 }
  0x89   : > { %13011 = vmatmul.mubr.msk.bf16.gmra.mrb[12].mxu1 %vm703_vm1, %v15645_v15  ;;  %v521_v15 = vrot.slane %v335_v6, 5  ;;  %v544_v6 = vrot.slane %v542_v59, 4  ;;  %s15899_s9 = smov [#allocation8]  }
  0x8a   : > { %2730 = vmatprep.mubr.bf16.mxu1 %v20088_v3  ;;  %p15806_p11 = pnand %p15805_p1, %p20368_p10  ;;  %s15808_s10 = sshll.u32 %s15899_s9, 4  ;;  %s15809_s10 = int_to_ptr.vmem [resolvable:$false] %s15808_s10 }
  0x8b   : > { %v523_v29 = vrot.slane %v521_v15, 4  ;;  %v522_v37 = vsel %vm16109_vm4, %v12830_v24, %v521_v15  ;;  %v549_v15 = vrot.slane %v347_v10, 5  ;;  %v12834_v24 = vrot.slane %v346_v13, 9  ;;  %v4501_v10 = vld [vmem:[%s16086_s5 + $0x158] sm:$0xf]  ;;  %s15810_s6 = scalar_lea.vmem %s15809_s10, 65536  ;;  %p15811_p2 = scmp.lt.s32.totalorder %s20020_s13, %s15809_s10 }
  0x8c   : > { %p15807_p0 = pneg %p15806_p11  ;;  %p15812_p3 = scmp.lt.s32.totalorder %s15810_s6, %s15804_s26 }
  0x8d   : > { %12858 = vmatmul.mubr.msk.bf16.gmra.mrb[12].mxu0 %vm703_vm1, %v16173_v25  ;;  %v525_v40 = vsel %vm16109_vm4, %v523_v29, %v524_v28  ;;  %v552_v28 = vrot.slane %v348_v14, 5  ;;  %v551_v29 = vrot.slane %v549_v15, 4  ;;  %v550_v38 = vsel %vm16109_vm4, %v12834_v24, %v549_v15  ;;  %v15657_v24 = vld [vmem:[%s16086_s5 + $0x594] sm:$0xff]  }
  0x8e   : > { %849 = vmatprep.mubr.bf16.mxu0 %v20088_v3  ;;  %v16264_v47 = vcombine.low %v522_v37, %v525_v40  ;;  %v12835_v37 = vrot.slane %v349_v32, 9  ;;  %p15813_p5 = por %p15812_p3, %p15811_p2 }
  0x8f   : > { %v553_v40 = vsel %vm16109_vm4, %v551_v29, %v552_v28 }
  0x90   : > { %p15814_p6 = pnand %p15813_p5, %p15807_p0 }
  0x91   : > { %13012 = vmatmul.mubr.msk.bf16.gmra.mrb[16].mxu1 %vm703_vm1, %v15646_v33  ;;  %v16249_v33 = vcombine.low %v515_v18, %v518_v23  ;;  %v543_v18 = vsel %vm16109_vm4, %v12833_v1, %v542_v59  ;;  %v546_v23 = vsel %vm16109_vm4, %v544_v6, %v545_v8  ;;  %v355_v6 = vld [vmem:[%s16086_s5 + $0x3a4] sm:$0xe]  ;;  %v357_v8 = vld [vmem:[%s16086_s5 + $0x3ac] sm:$0x1] }
  0x92   : > { %2740 = vmatprep.mubr.bf16.mxu1 %v20088_v3  ;;  %v16309_v34 = vcombine.low %v543_v18, %v546_v23  ;;  %v12837_v14 = vrot.slane %v355_v6, 9  ;;  %v573_v16 = vrot.slane %v357_v8, 5  ;;  %v4637_v18 = vrot.slane %v4501_v10, 6  ;;  %v4502_v23 = vld [vmem:[%s16086_s5 + $0x15c] sm:$0x3] }
  0x93   : > { %v4640_v35 = vrot.slane %v4502_v23, 6  ;;  %v686_v10 = vcombine.high %v16192_v44, %v16192_v44 }
  0x94   : > { %v4639_v32 = vrot.slane %v4637_v18, 4 }
  0x95   : > { %12859 = vmatmul.mubr.msk.bf16.gmra.mrb[16].mxu0 %vm703_vm1, %v16188_v39 }
  0x96   : > { %859 = vmatprep.mubr.bf16.mxu0 %v20088_v3 }
  0x99   : > { %13013 = vmatmul.mubr.msk.bf16.gmra.mrb[20].mxu1 %vm703_vm1, %v15647_v45  ;;  %v340_v45 = vld [vmem:[%s16086_s5 + $0x318] sm:$0xe] }
  0x9a   : > { %2750 = vmatprep.mubr.bf16.mxu1 %v20088_v3  ;;  %v12832_v54 = vrot.slane %v340_v45, 9  ;;  %v353_v45 = vld [vmem:[%s16086_s5 + $0x38c] sm:$0xf] }
  0x9c   : > { %v536_v2 = vsel %vm16109_vm4, %v12832_v54, %v535_v43  ;;  %v16322_v43 = vcombine.low %v550_v38, %v553_v40  ;;  %v354_v54 = vld [vmem:[%s16086_s5 + $0x390] sm:$0x1] }
  0x9d   : > { %12860 = vmatmul.mubr.msk.bf16.gmra.mrb[20].mxu0 %vm703_vm1, %v16215_v56  ;;  %v16293_v11 = vcombine.low %v536_v2, %v539_v5  ;;  %v566_v61 = vrot.slane %v354_v54, 5  ;;  %v570_v5 = vrot.slane %v356_v63, 5  ;;  %v4506_v63 = vld [vmem:[%s16086_s5 + $0x18c] sm:$0xc] }
  0x9e   : > { %869 = vmatprep.mubr.bf16.mxu0 %v20088_v3 }
  0x9f   : > { %v572_v15 = vrot.slane %v570_v5, 4  ;;  %v571_v29 = vsel %vm16109_vm4, %v12837_v14, %v570_v5  ;;  %v13160_v5 = vrot.slane %v4506_v63, 10  ;;  %v16403_v14 = vld.sshfl [vmem:[#allocation5 + $0x14] sm:$0x33 pattern:$0x76325410] }
  0xa0   : > { %v4517_v63 = vld [vmem:[%s16086_s5 + $0x1e8] sm:$0x3] }
  0xa1   : > { %13014 = vmatmul.mubr.msk.bf16.gmra.mrb[24].mxu1 %vm703_vm1, %v15648_v62  ;;  %v16279_v62 = vcombine.low %v529_v53, %v532_v55  ;;  %v560_v53 = vsel %vm16109_vm4, %v558_v41, %v559_v42  ;;  %v563_v55 = vrot.slane %v353_v45, 5  ;;  %v4641_v41 = vsel %vm16367_vm6, %v4639_v32, %v4640_v35  ;;  %v4503_v45 = vld [vmem:[%s16086_s5 + $0x170] sm:$0xc]  ;;  %v4513_v35 = vld [vmem:[%s16086_s5 + $0x1c8] sm:$0xf] }
  0xa2   : > { %2760 = vmatprep.mubr.bf16.mxu1 %v20088_v3 }
  0xa3   : > { %v565_v59 = vrot.slane %v563_v55, 4  ;;  %v564_v1 = vsel %vm16109_vm4, %v12836_v58, %v563_v55  ;;  %v5224_v55 = vsel %vm752_vm0, %v16206_v50, 0  ;;  %v4507_v58 = vld [vmem:[%s16086_s5 + $0x190] sm:$0xf] }
  0xa5   : > { %12861 = vmatmul.mubr.msk.bf16.gmra.mrb[24].mxu0 %vm703_vm1, %v16233_v7  ;;  %v567_v2 = vsel %vm16109_vm4, %v565_v59, %v566_v61 }
  0xa6   : > { %879 = vmatprep.mubr.bf16.mxu0 %v20088_v3  ;;  %v16353_v13 = vcombine.low %v564_v1, %v567_v2  ;;  %v766_v1 = vsel %vm752_vm0, %v16199_v46, 0  ;;  %v4508_v2 = vld [vmem:[%s16086_s5 + $0x194] sm:$0x3]  ;;  %v5574_v46 = vcombine.high %v16403_v14, %v16403_v14 }
  0xa7   : > { %v4654_v8 = vrot.slane %v4508_v2, 6 }
  0xa9   : > { %13015 = vmatmul.mubr.msk.bf16.gmra.mrb[28].mxu1 %vm703_vm1, %v15649_v17  ;;  %v15653_v17 = vld [vmem:[%s16086_s5 + $0x524] sm:$0xff]  }
  0xaa   : > { %2770 = vmatprep.mubr.bf16.mxu1 %v20088_v3 }
  0xad   : > { %12862 = vmatmul.mubr.msk.bf16.gmra.mrb[28].mxu0 %vm703_vm1, %v16249_v33 }
  0xae   : > { %889 = vmatprep.mubr.bf16.mxu0 %v20088_v3 }
  0xb1   : > { %13016 = vmatmul.mubr.msk.bf16.gmra.mrb[32].mxu1 %vm703_vm1, %v15650_v36  ;;  %v15654_v36 = vld [vmem:[%s16086_s5 + $0x540] sm:$0xff]  }
  0xb2   : > { %2780 = vmatprep.mubr.bf16.mxu1 %v20088_v3 }
  0xb5   : > { %12863 = vmatmul.mubr.msk.bf16.gmra.mrb[32].mxu0 %vm703_vm1, %v16264_v47 }
  0xb6   : > { %899 = vmatprep.mubr.bf16.mxu0 %v20088_v3 }
  0xb9   : > { %13017 = vmatmul.mubr.msk.bf16.gmra.mrb[36].mxu1 %vm703_vm1, %v15651_v52  ;;  %v557_v52 = vsel %vm16109_vm4, %v12835_v37, %v556_v31  ;;  %v574_v31 = vsel %vm16109_vm4, %v572_v15, %v573_v16  ;;  %v4504_v37 = vld [vmem:[%s16086_s5 + $0x174] sm:$0xf]  ;;  %v4510_v15 = vld [vmem:[%s16086_s5 + $0x1ac] sm:$0xf]  ;;  %v16409_v16 = vrot.slane %v686_v10, %v16081_v12  ;;  %v4509_v12 = vld [vmem:[%s16086_s5 + $0x1a8] sm:$0xc] }
  0xba   : > { %2790 = vmatprep.mubr.bf16.mxu1 %v20088_v3  ;;  %v16337_v57 = vcombine.low %v557_v52, %v560_v53  ;;  %v16373_v38 = vcombine.low %v571_v29, %v574_v31  ;;  %v4644_v42 = vrot.slane %v4504_v37, 6  ;;  %v13159_v52 = vrot.slane %v4503_v45, 10  ;;  %v4514_v45 = vld [vmem:[%s16086_s5 + $0x1cc] sm:$0x3] }
  0xbb   : > { %v702_v23 = vcombine.high %v16409_v16, %v16409_v16  ;;  %v13161_v29 = vrot.slane %v4509_v12, 10  ;;  %v4522_v12 = vld [vmem:[%s16086_s5 + $0x21c] sm:$0xf] }
  0xbc   : > { %v4646_v53 = vrot.slane %v4644_v42, 4  ;;  %v4645_v59 = vsel %vm16367_vm6, %v13159_v52, %v4644_v42  ;;  %v4512_v42 = vld [vmem:[%s16086_s5 + $0x1c4] sm:$0xc] }
  0xbd   : > { %12864 = vmatmul.mubr.msk.bf16.gmra.mrb[36].mxu0 %vm703_vm1, %v16279_v62 }
  0xbe   : > { %909 = vmatprep.mubr.bf16.mxu0 %v20088_v3 }
  0xc1   : > { %13018 = vmatmul.mubr.msk.bf16.gmra.mrb[40].mxu1 %vm703_vm1, %v15652_v0  ;;  %v15656_v0 = vld [vmem:[%s16086_s5 + $0x578] sm:$0xff]  }
  0xc2   : > { %2800 = vmatprep.mubr.bf16.mxu1 %v20088_v3 }
  0xc5   : > { %12865 = vmatmul.mubr.msk.bf16.gmra.mrb[40].mxu0 %vm703_vm1, %v16293_v11 }
  0xc6   : > { %919 = vmatprep.mubr.bf16.mxu0 %v20088_v3 }
  0xc9   : > { %13019 = vmatmul.mubr.msk.bf16.gmra.mrb[44].mxu1 %vm703_vm1, %v15653_v17  ;;  %v4500_v17 = vld [vmem:[%s16086_s5 + $0x154] sm:$0xc] }
  0xca   : > { %2810 = vmatprep.mubr.bf16.mxu1 %v20088_v3  ;;  %v13158_v28 = vrot.slane %v4500_v17, 10 }
  0xcc   : > { %v4638_v40 = vsel %vm16367_vm6, %v13158_v28, %v4637_v18  ;;  %v4658_v18 = vrot.slane %v4510_v15, 6  ;;  %v4518_v15 = vld [vmem:[%s16086_s5 + $0x1fc] sm:$0xc] }
  0xcd   : > { %12866 = vmatmul.mubr.msk.bf16.gmra.mrb[44].mxu0 %vm703_vm1, %v16309_v34  ;;  %v13174_v49 = vcombine.low %v4638_v40, %v4641_v41  ;;  %v4665_v41 = vrot.slane %v4513_v35, 6 }
  0xce   : > { %929 = vmatprep.mubr.bf16.mxu0 %v20088_v3  ;;  %v4660_v31 = vrot.slane %v4658_v18, 4  ;;  %v4659_v37 = vsel %vm16367_vm6, %v13161_v29, %v4658_v18  ;;  %v4686_v29 = vrot.slane %v4522_v12, 6 }
  0xcf   : > { %v4667_v52 = vrot.slane %v4665_v41, 4 }
  0xd1   : > { %13020 = vmatmul.mubr.msk.bf16.gmra.mrb[48].mxu1 %vm703_vm1, %v15654_v36 }
  0xd2   : > { %2820 = vmatprep.mubr.bf16.mxu1 %v20088_v3 }
  0xd5   : > { %12867 = vmatmul.mubr.msk.bf16.gmra.mrb[48].mxu0 %vm703_vm1, %v16322_v43 }
  0xd6   : > { %939 = vmatprep.mubr.bf16.mxu0 %v20088_v3 }
  0xd9   : > { %13021 = vmatmul.mubr.msk.bf16.gmra.mrb[52].mxu1 %vm703_vm1, %v15655_v48  ;;  %v4505_v48 = vld [vmem:[%s16086_s5 + $0x178] sm:$0x3] }
  0xda   : > { %2830 = vmatprep.mubr.bf16.mxu1 %v20088_v3  ;;  %v4647_v54 = vrot.slane %v4505_v48, 6 }
  0xdc   : > { %v4648_v61 = vsel %vm16367_vm6, %v4646_v53, %v4647_v54  ;;  %v4668_v53 = vrot.slane %v4514_v45, 6  ;;  %v4516_v54 = vld [vmem:[%s16086_s5 + $0x1e4] sm:$0xf] }
  0xdd   : > { %12868 = vmatmul.mubr.msk.bf16.gmra.mrb[52].mxu0 %vm703_vm1, %v16337_v57  ;;  %v13175_v50 = vcombine.low %v4645_v59, %v4648_v61  ;;  %v4672_v59 = vrot.slane %v4516_v54, 6  ;;  %v4515_v61 = vld [vmem:[%s16086_s5 + $0x1e0] sm:$0xc] }
  0xde   : > { %949 = vmatprep.mubr.bf16.mxu0 %v20088_v3 }
  0xdf   : > { %v4674_v2 = vrot.slane %v4672_v59, 4 }
  0xe1   : > { %13022 = vmatmul.mubr.msk.bf16.gmra.mrb[56].mxu1 %vm703_vm1, %v15656_v0  ;;  %v4651_v0 = vrot.slane %v4507_v58, 6  ;;  %v4669_v58 = vsel %vm16367_vm6, %v4667_v52, %v4668_v53  ;;  %v4524_v52 = vld [vmem:[%s16086_s5 + $0x234] sm:$0xc]  ;;  %v4526_v53 = vld [vmem:[%s16086_s5 + $0x23c] sm:$0x3] }
  0xe2   : > { %2840 = vmatprep.mubr.bf16.mxu1 %v20088_v3 }
  0xe3   : > { %v4653_v6 = vrot.slane %v4651_v0, 4  ;;  %v4652_v17 = vsel %vm16367_vm6, %v13160_v5, %v4651_v0  ;;  %v4519_v5 = vld [vmem:[%s16086_s5 + $0x200] sm:$0xf] }
  0xe4   : > { %v4679_v10 = vrot.slane %v4519_v5, 6 }
  0xe5   : > { %12869 = vmatmul.mubr.msk.bf16.gmra.mrb[56].mxu0 %vm703_vm1, %v16353_v13  ;;  %v4655_v44 = vsel %vm16367_vm6, %v4653_v6, %v4654_v8 }
  0xe6   : > { %959 = vmatprep.mubr.bf16.mxu0 %v20088_v3  ;;  %v13176_v28 = vcombine.low %v4652_v17, %v4655_v44  ;;  %v13164_v44 = vrot.slane %v4518_v15, 10  ;;  %v4681_v18 = vrot.slane %v4679_v10, 4  ;;  %v4531_v15 = vld [vmem:[%s16086_s5 + $0x270] sm:$0xf] }
  0xe9   : > { %13023 = vmatmul.mubr.msk.bf16.gmra.mrb[60].mxu1 %vm703_vm1, %v15657_v24  ;;  %v4511_v24 = vld [vmem:[%s16086_s5 + $0x1b0] sm:$0x3] }
  0xea   : > { %4891 = vmatprep.mubr.bf16.mxu1 %v20088_v3  ;;  %v4661_v32 = vrot.slane %v4511_v24, 6  ;;  %v4680_v24 = vsel %vm16367_vm6, %v13164_v44, %v4679_v10  ;;  %v4707_v44 = vrot.slane %v4531_v15, 6 }
  0xec   : > { %v4662_v40 = vsel %vm16367_vm6, %v4660_v31, %v4661_v32  ;;  %v4521_v31 = vld [vmem:[%s16086_s5 + $0x218] sm:$0xc]  ;;  %v4523_v32 = vld [vmem:[%s16086_s5 + $0x220] sm:$0x3] }
  0xed   : > { %12870 = vmatmul.mubr.msk.bf16.gmra.mrb[60].mxu0 %vm703_vm1, %v16373_v38  ;;  %v13177_v48 = vcombine.low %v4659_v37, %v4662_v40  ;;  %v13165_v37 = vrot.slane %v4521_v31, 10  ;;  %v4688_v40 = vrot.slane %v4686_v29, 4  ;;  %v4534_v31 = vld [vmem:[%s16086_s5 + $0x28c] sm:$0xf] }
  0xee   : > { %1002 = vmatprep.mubr.bf16.mxu0 %v20088_v3 }
  0xef   : > { %v4687_v45 = vsel %vm16367_vm6, %v13165_v37, %v4686_v29 }
  0xf1   : > { %13192 = vmatmul.mubr.msk.bf16.vlgmr.msra.gmra.mrb[64].mxu1 %vm703_vm1, %v13174_v49  ;;  %v13162_v49 = vrot.slane %v4512_v42, 10  ;;  %v4525_v42 = vld [vmem:[%s16086_s5 + $0x238] sm:$0xf] }
  0xf2   : > { %5230 = vmatpush1.bf16.msra.mxu1 %v5224_v55  ;;  %4901 = vmatprep.mubr.bf16.mxu1 %v20088_v3 }
  0xf3   : > { %13251 = vmatprep.subr.msk.bf16.mxu1 %vm752_vm0, %v5574_v46  ;;  %v4666_v55 = vsel %vm16367_vm6, %v13162_v49, %v4665_v41  ;;  %v4520_v46 = vld [vmem:[%s16086_s5 + $0x204] sm:$0x3]  ;;  %v4689_v41 = vrot.slane %v4523_v32, 6  ;;  %v4693_v49 = vrot.slane %v4525_v42, 6  ;;  %v4535_v42 = vld [vmem:[%s16086_s5 + $0x290] sm:$0x3] }
  0xf4   : > { %v13178_v0 = vcombine.low %v4666_v55, %v4669_v58  ;;  %v13166_v55 = vrot.slane %v4524_v52, 10  ;;  %v4717_v52 = vrot.slane %v4535_v42, 6 }
  0xf5   : > { %12872 = vmatmul.mubr.msk.bf16.vlgmr.msra.gmra.mrb[64].mxu0 %vm703_vm1, %v16126_v51  ;;  %v4695_v58 = vrot.slane %v4693_v49, 4 }
  0xf6   : > { %1164 = vmatpush1.bf16.msra.mxu0 %v766_v1  ;;  %1012 = vmatprep.mubr.bf16.mxu0 %v20088_v3  ;;  %v13163_v1 = vrot.slane %v4515_v61, 10  ;;  %v4528_v61 = vld [vmem:[%s16086_s5 + $0x254] sm:$0xf] }
  0xf7   : > { %12905 = vmatprep.subr.msk.bf16.mxu0 %vm752_vm0, %v702_v23  ;;  %v4682_v23 = vrot.slane %v4520_v46, 6 }
  0xf8   : > { %v4673_v6 = vsel %vm16367_vm6, %v13163_v1, %v4672_v59  ;;  %v4696_v59 = vrot.slane %v4526_v53, 6  ;;  %v4700_v1 = vrot.slane %v4528_v61, 6  ;;  %v4537_v53 = vld [vmem:[%s16086_s5 + $0x2a8] sm:$0xf] }
  0xf9   : > { %13193 = vmatmul.mubr.msk.bf16.gmra.mrb[68].mxu1 %vm703_vm1, %v13175_v50  ;;  %v4675_v50 = vrot.slane %v4517_v63, 6  ;;  %v4694_v63 = vsel %vm16367_vm6, %v13166_v55, %v4693_v49  ;;  %v581_v55 = vsub.s32 0, %v16071_v4 }
  0xfa   : > { %4911 = vmatprep.mubr.bf16.mxu1 %v20088_v3 }
  0xfb   : > { %v4676_v8 = vsel %vm16367_vm6, %v4674_v2, %v4675_v50  ;;  %v4527_v2 = vld [vmem:[%s16086_s5 + $0x250] sm:$0xc]  ;;  %v4529_v50 = vld [vmem:[%s16086_s5 + $0x258] sm:$0x3] }
  0xfc   : > { %v13179_v17 = vcombine.low %v4673_v6, %v4676_v8  ;;  %v13167_v6 = vrot.slane %v4527_v2, 10  ;;  %v4702_v8 = vrot.slane %v4700_v1, 4  ;;  %v4703_v10 = vrot.slane %v4529_v50, 6  ;;  %v15719_v2 = vld [vmem:[#allocation7] sm:$0xff] }
  0xfd   : > { %12873 = vmatmul.mubr.msk.bf16.gmra.mrb[68].mxu0 %vm703_vm1, %v16143_v60  ;;  %v16549_v50 = vrot.slane %v15719_v2, %v581_v55  ;;  %v4543_v55 = vld [vmem:[%s16086_s5 + $0x2e0] sm:$0xf] }
  0xfe   : > { %1022 = vmatprep.mubr.bf16.mxu0 %v20088_v3  ;;  %v4701_v46 = vsel %vm16367_vm6, %v13167_v6, %v4700_v1  ;;  %v4538_v1 = vld [vmem:[%s16086_s5 + $0x2ac] sm:$0x3] }
  0xff   : > { %v4724_v15 = vrot.slane %v4538_v1, 6 }
 0x101   : > { %13194 = vmatmul.mubr.msk.bf16.gmra.mrb[72].mxu1 %vm703_vm1, %v13176_v28  ;;  %v4683_v28 = vsel %vm16367_vm6, %v4681_v18, %v4682_v23  ;;  %v4530_v18 = vld [vmem:[%s16086_s5 + $0x26c] sm:$0xc]  ;;  %v4532_v23 = vld [vmem:[%s16086_s5 + $0x274] sm:$0x3] }
 0x102   : > { %4921 = vmatprep.mubr.bf16.mxu1 %v20088_v3  ;;  %v16473_v35 = vcombine.low %v4680_v24, %v4683_v28  ;;  %v13168_v24 = vrot.slane %v4530_v18, 10  ;;  %v4709_v28 = vrot.slane %v4707_v44, 4  ;;  %v4710_v29 = vrot.slane %v4532_v23, 6 }
 0x104   : > { %v4708_v32 = vsel %vm16367_vm6, %v13168_v24, %v4707_v44  ;;  %v4711_v37 = vsel %vm16367_vm6, %v4709_v28, %v4710_v29 }
 0x105   : > { %12874 = vmatmul.mubr.msk.bf16.gmra.mrb[72].mxu0 %vm703_vm1, %v16158_v9 }
 0x106   : > { %1032 = vmatprep.mubr.bf16.mxu0 %v20088_v3 }
 0x109   : > { %13195 = vmatmul.mubr.msk.bf16.gmra.mrb[76].mxu1 %vm703_vm1, %v13177_v48  ;;  %v4690_v48 = vsel %vm16367_vm6, %v4688_v40, %v4689_v41  ;;  %v4714_v40 = vrot.slane %v4534_v31, 6  ;;  %v4533_v41 = vld [vmem:[%s16086_s5 + $0x288] sm:$0xc] }
 0x10a   : > { %4931 = vmatprep.mubr.bf16.mxu1 %v20088_v3  ;;  %v16488_v54 = vcombine.low %v4687_v45, %v4690_v48  ;;  %v16533_v45 = vcombine.low %v4708_v32, %v4711_v37  ;;  %v13169_v48 = vrot.slane %v4533_v41, 10  ;;  %v4541_v41 = vld [vmem:[%s16086_s5 + $0x2c8] sm:$0x3] }
 0x10b   : > { %v4716_v49 = vrot.slane %v4714_v40, 4 }
 0x10d   : > { %12875 = vmatmul.mubr.msk.bf16.gmra.mrb[76].mxu0 %vm703_vm1, %v16173_v25  ;;  %v4718_v61 = vsel %vm16367_vm6, %v4716_v49, %v4717_v52 }
 0x10e   : > { %1042 = vmatprep.mubr.bf16.mxu0 %v20088_v3 }
 0x111   : > { %13196 = vmatmul.mubr.msk.bf16.gmra.mrb[80].mxu1 %vm703_vm1, %v13178_v0  ;;  %v4697_v0 = vsel %vm16367_vm6, %v4695_v58, %v4696_v59  ;;  %v585_v58 = vsub.s32 1, %v16071_v4  ;;  %v4715_v59 = vsel %vm16367_vm6, %v13169_v48, %v4714_v40  ;;  %v4539_v40 = vld [vmem:[%s16086_s5 + $0x2c0] sm:$0xc] }
 0x112   : > { %4941 = vmatprep.mubr.bf16.mxu1 %v20088_v3  ;;  %v16503_v5 = vcombine.low %v4694_v63, %v4697_v0  ;;  %v4721_v63 = vrot.slane %v4537_v53, 6  ;;  %v4536_v0 = vld [vmem:[%s16086_s5 + $0x2a4] sm:$0xc]  ;;  %v16555_v4 = vcombine.low %v4715_v59, %v4718_v61  ;;  %v13171_v49 = vrot.slane %v4539_v40, 10 }
 0x113   : > { %v16557_v6 = vrot.slane %v15719_v2, %v585_v58  ;;  %v4731_v53 = vrot.slane %v4541_v41, 6 }
 0x115   : > { %12876 = vmatmul.mubr.msk.bf16.gmra.mrb[80].mxu0 %vm703_vm1, %v16188_v39 }
 0x116   : > { %1052 = vmatprep.mubr.bf16.mxu0 %v20088_v3 }
 0x119   : > { %13197 = vmatmul.mubr.msk.bf16.gmra.mrb[84].mxu1 %vm703_vm1, %v13179_v17  ;;  %v4704_v17 = vsel %vm16367_vm6, %v4702_v8, %v4703_v10  ;;  %v13170_v8 = vrot.slane %v4536_v0, 10  ;;  %v4723_v10 = vrot.slane %v4721_v63, 4 }
 0x11a   : > { %4951 = vmatprep.mubr.bf16.mxu1 %v20088_v3  ;;  %v16518_v12 = vcombine.low %v4701_v46, %v4704_v17  ;;  %v4540_v46 = vld [vmem:[%s16086_s5 + $0x2c4] sm:$0xf] }
 0x11b   : > { %v4722_v28 = vsel %vm16367_vm6, %v13170_v8, %v4721_v63  ;;  %v4725_v29 = vsel %vm16367_vm6, %v4723_v10, %v4724_v15  ;;  %v4728_v31 = vrot.slane %v4540_v46, 6  ;;  %v4735_v8 = vrot.slane %v4543_v55, 6  ;;  %v4542_v46 = vld [vmem:[%s16086_s5 + $0x2dc] sm:$0xc] }
 0x11c   : > { %v16581_v48 = vcombine.low %v4722_v28, %v4725_v29  ;;  %v4546_v29 = vld [vmem:[%s16086_s5 + $0x2fc] sm:$0xf] }
 0x11d   : > { %12877 = vmatmul.mubr.msk.bf16.gmra.mrb[84].mxu0 %vm703_vm1, %v16215_v56  ;;  %v4730_v52 = vrot.slane %v4728_v31, 4  ;;  %v4729_v1 = vsel %vm16367_vm6, %v13171_v49, %v4728_v31 }
 0x11e   : > { %1062 = vmatprep.mubr.bf16.mxu0 %v20088_v3 }
 0x11f   : > { %v4732_v2 = vsel %vm16367_vm6, %v4730_v52, %v4731_v53  ;;  %v4742_v52 = vrot.slane %v4546_v29, 6 }
 0x121   : > { %13198 = vmatmul.mubr.msk.bf16.gmra.mrb[88].mxu1 %vm703_vm1, %v16473_v35 }
 0x122   : > { %4961 = vmatprep.mubr.bf16.mxu1 %v20088_v3 }
 0x125   : > { %12878 = vmatmul.mubr.msk.bf16.gmra.mrb[88].mxu0 %vm703_vm1, %v16233_v7 }
 0x126   : > { %1072 = vmatprep.mubr.bf16.mxu0 %v20088_v3 }
 0x129   : > { %13199 = vmatmul.mubr.msk.bf16.gmra.mrb[92].mxu1 %vm703_vm1, %v16488_v54 }
 0x12a   : > { %4971 = vmatprep.mubr.bf16.mxu1 %v20088_v3 }
 0x12d   : > { %12879 = vmatmul.mubr.msk.bf16.gmra.mrb[92].mxu0 %vm703_vm1, %v16249_v33 }
 0x12e   : > { %1082 = vmatprep.mubr.bf16.mxu0 %v20088_v3 }
 0x131   : > { %13200 = vmatmul.mubr.msk.bf16.gmra.mrb[96].mxu1 %vm703_vm1, %v16503_v5 }
 0x132   : > { %4981 = vmatprep.mubr.bf16.mxu1 %v20088_v3 }
 0x135   : > { %12880 = vmatmul.mubr.msk.bf16.gmra.mrb[96].mxu0 %vm703_vm1, %v16264_v47 }
 0x136   : > { %1092 = vmatprep.mubr.bf16.mxu0 %v20088_v3 }
 0x139   : > { %13201 = vmatmul.mubr.msk.bf16.gmra.mrb[100].mxu1 %vm703_vm1, %v16518_v12 }
 0x13a   : > { %4991 = vmatprep.mubr.bf16.mxu1 %v20088_v3 }
 0x13d   : > { %12881 = vmatmul.mubr.msk.bf16.gmra.mrb[100].mxu0 %vm703_vm1, %v16279_v62 }
 0x13e   : > { %1102 = vmatprep.mubr.bf16.mxu0 %v20088_v3 }
 0x141   : > { %13202 = vmatmul.mubr.msk.bf16.gmra.mrb[104].mxu1 %vm703_vm1, %v16533_v45 }
 0x142   : > { %5001 = vmatprep.mubr.bf16.mxu1 %v20088_v3 }
 0x145   : > { %12882 = vmatmul.mubr.msk.bf16.gmra.mrb[104].mxu0 %vm703_vm1, %v16293_v11 }
 0x146   : > { %1112 = vmatprep.mubr.bf16.mxu0 %v20088_v3 }
 0x148   : > { %v811_v17 = vpop.f32.mrb[0].mxu0 }
 0x149   : > { %v812_v44 = vadd.f32 %v811_v17, %v16549_v50  ;;  %v813_v18 = vpop.f32.mrb[1].mxu0  ;;  %13203 = vmatmul.mubr.msk.bf16.gmra.mrb[108].mxu1 %vm703_vm1, %v16555_v4  ;;  %v4544_v17 = vld [vmem:[%s16086_s5 + $0x2e4] sm:$0x3] }
 0x14a   : > { %v814_v23 = vadd.f32 %v813_v18, %v16557_v6  ;;  %v815_v24 = vpop.f32.mrb[2].mxu0  ;;  %5011 = vmatprep.mubr.bf16.mxu1 %v20088_v3  ;;  %v16604_v18 = vcombine.low %v4729_v1, %v4732_v2  ;;  %v4738_v28 = vrot.slane %v4544_v17, 6  ;;  %v4744_v1 = vrot.slane %v4742_v52, 4 }
 0x14b   : > { %1549 = vst [vmem:[%s16570_s11] sm:$0xff] %v812_v44  ;;  %v816_v32 = vadd.f32 %v815_v24, %v16549_v50  ;;  %v817_v37 = vpop.f32.mrb[3].mxu0  ;;  %v4737_v24 = vrot.slane %v4735_v8, 4 }
 0x14c   : > { %1550 = vst [vmem:[%s16570_s11 + $0x8] sm:$0xff] %v814_v23  ;;  %v818_v42 = vadd.f32 %v817_v37, %v16557_v6  ;;  %v13172_v23 = vrot.slane %v4542_v46, 10 }
 0x14d   : > { %1551 = vst [vmem:[%s16570_s11 + $0x40] sm:$0xff] %v816_v32  ;;  %12883 = vmatmul.mubr.msk.bf16.gmra.mrb[108].mxu0 %vm703_vm1, %v16309_v34  ;;  %v4739_v49 = vsel %vm16367_vm6, %v4737_v24, %v4738_v28 }
 0x14e   : > { %1552 = vst [vmem:[%s16570_s11 + $0x48] sm:$0xff] %v818_v42  ;;  %1122 = vmatprep.mubr.bf16.mxu0 %v20088_v3  ;;  %v4736_v42 = vsel %vm16367_vm6, %v13172_v23, %v4735_v8 }
 0x150   : > { %v821_v58 = vpop.f32.mrb[4].mxu0 }
 0x151   : > { %v822_v59 = vadd.f32 %v821_v58, %v16549_v50  ;;  %v823_v61 = vpop.f32.mrb[5].mxu0  ;;  %13204 = vmatmul.mubr.msk.bf16.gmra.mrb[112].mxu1 %vm703_vm1, %v16581_v48  ;;  %v4545_v58 = vld [vmem:[%s16086_s5 + $0x2f8] sm:$0xc] }
 0x152   : > { %v824_v63 = vadd.f32 %v823_v61, %v16557_v6  ;;  %v825_v0 = vpop.f32.mrb[6].mxu0  ;;  %5021 = vmatprep.mubr.bf16.mxu1 %v20088_v3 }
 0x153   : > { %1553 = vst [vmem:[%s16570_s11 + $0x80] sm:$0xff] %v822_v59  ;;  %v826_v10 = vadd.f32 %v825_v0, %v16549_v50  ;;  %v827_v15 = vpop.f32.mrb[7].mxu0  ;;  %v4547_v59 = vld [vmem:[%s16086_s5 + $0x300] sm:$0x3]  ;;  %v13173_v0 = vrot.slane %v4545_v58, 10 }
 0x154   : > { %1554 = vst [vmem:[%s16570_s11 + $0x88] sm:$0xff] %v824_v63  ;;  %v828_v44 = vadd.f32 %v827_v15, %v16557_v6  ;;  %v16627_v63 = vcombine.low %v4736_v42, %v4739_v49  ;;  %v4745_v2 = vrot.slane %v4547_v59, 6 }
 0x155   : > { %1555 = vst [vmem:[%s16570_s11 + $0xc0] sm:$0xff] %v826_v10  ;;  %12884 = vmatmul.mubr.msk.bf16.gmra.mrb[112].mxu0 %vm703_vm1, %v16322_v43 }
 0x156   : > { %1556 = vst [vmem:[%s16570_s11 + $0xc8] sm:$0xff] %v828_v44  ;;  %1132 = vmatprep.mubr.bf16.mxu0 %v20088_v3  ;;  %v4743_v44 = vsel %vm16367_vm6, %v13173_v0, %v4742_v52  ;;  %v4746_v23 = vsel %vm16367_vm6, %v4744_v1, %v4745_v2 }
 0x158   : > { %v831_v31 = vpop.f32.mrb[8].mxu0 }
 0x159   : > { %v832_v32 = vadd.f32 %v831_v31, %v16549_v50  ;;  %v833_v37 = vpop.f32.mrb[9].mxu0  ;;  %13205 = vmatmul.mubr.msk.bf16.gmra.mrb[116].mxu1 %vm703_vm1, %v16604_v18  ;;  %v16647_v31 = vcombine.low %v4743_v44, %v4746_v23 }
 0x15a   : > { %v834_v40 = vadd.f32 %v833_v37, %v16557_v6  ;;  %v835_v41 = vpop.f32.mrb[10].mxu0  ;;  %5031 = vmatprep.mubr.bf16.mxu1 %v20088_v3 }
 0x15b   : > { %1557 = vst [vmem:[%s16570_s11 + $0x100] sm:$0xff] %v832_v32  ;;  %v836_v53 = vadd.f32 %v835_v41, %v16549_v50  ;;  %v837_v55 = vpop.f32.mrb[11].mxu0 }
 0x15c   : > { %1558 = vst [vmem:[%s16570_s11 + $0x108] sm:$0xff] %v834_v40  ;;  %v838_v61 = vadd.f32 %v837_v55, %v16557_v6  ;;  %v5594_v55 = vsel %vm752_vm0, %v16403_v14, 0  ;;  %v772_v14 = vsel %vm752_vm0, %v16409_v16, 0 }
 0x15d   : > { %1559 = vst [vmem:[%s16570_s11 + $0x140] sm:$0xff] %v836_v53  ;;  %12885 = vmatmul.mubr.msk.bf16.gmra.mrb[116].mxu0 %vm703_vm1, %v16337_v57 }
 0x15e   : > { %1560 = vst [vmem:[%s16570_s11 + $0x148] sm:$0xff] %v838_v61  ;;  %1142 = vmatprep.mubr.bf16.mxu0 %v20088_v3 }
 0x160   : > { %v841_v8 = vpop.f32.mrb[12].mxu0 }
 0x161   : > { %v842_v10 = vadd.f32 %v841_v8, %v16549_v50  ;;  %v843_v15 = vpop.f32.mrb[13].mxu0  ;;  %13206 = vmatmul.mubr.msk.bf16.gmra.mrb[120].mxu1 %vm703_vm1, %v16627_v63 }
 0x162   : > { %v844_v46 = vadd.f32 %v843_v15, %v16557_v6  ;;  %v845_v17 = vpop.f32.mrb[14].mxu0  ;;  %5041 = vmatprep.mubr.bf16.mxu1 %v20088_v3 }
 0x163   : > { %1561 = vst [vmem:[%s16570_s11 + $0x180] sm:$0xff] %v842_v10  ;;  %v846_v24 = vadd.f32 %v845_v17, %v16549_v50  ;;  %v847_v28 = vpop.f32.mrb[15].mxu0 }
 0x164   : > { %1562 = vst [vmem:[%s16570_s11 + $0x188] sm:$0xff] %v844_v46  ;;  %v848_v29 = vadd.f32 %v847_v28, %v16557_v6  ;;  %v16687_v46 = vld.sshfl [vmem:[#allocation5 + $0x4] sm:$0x33 pattern:$0x76325410] }
 0x165   : > { %1563 = vst [vmem:[%s16570_s11 + $0x1c0] sm:$0xff] %v846_v24  ;;  %12886 = vmatmul.mubr.msk.bf16.gmra.mrb[120].mxu0 %vm703_vm1, %v16353_v13  ;;  %v5944_v16 = vcombine.high %v16687_v46, %v16687_v46 }
 0x166   : > { %1564 = vst [vmem:[%s16570_s11 + $0x1c8] sm:$0xff] %v848_v29  ;;  %1152 = vmatprep.mubr.bf16.mxu0 %v20088_v3 }
 0x168   : > { %v851_v32 = vpop.f32.mrb[16].mxu0 }
 0x169   : > { %v852_v37 = vadd.f32 %v851_v32, %v16549_v50  ;;  %v853_v40 = vpop.f32.mrb[17].mxu0  ;;  %13207 = vmatmul.mubr.msk.bf16.gmra.mrb[124].mxu1 %vm703_vm1, %v16647_v31 }
 0x16a   : > { %v854_v41 = vadd.f32 %v853_v40, %v16557_v6  ;;  %v855_v42 = vpop.f32.mrb[18].mxu0  ;;  %5261 = vmatprep.mubr.bf16.mxu1 %v20088_v3 }
 0x16b   : > { %1565 = vst [vmem:[%s16570_s11 + $0x200] sm:$0xff] %v852_v37  ;;  %v856_v49 = vadd.f32 %v855_v42, %v16549_v50  ;;  %v857_v52 = vpop.f32.mrb[19].mxu0 }
 0x16c   : > { %1566 = vst [vmem:[%s16570_s11 + $0x208] sm:$0xff] %v854_v41  ;;  %v858_v53 = vadd.f32 %v857_v52, %v16557_v6 }
 0x16d   : > { %1567 = vst [vmem:[%s16570_s11 + $0x240] sm:$0xff] %v856_v49  ;;  %12887 = vmatmul.mubr.msk.bf16.gmra.mrb[124].mxu0 %vm703_vm1, %v16373_v38 }
 0x16e   : > { %1568 = vst [vmem:[%s16570_s11 + $0x248] sm:$0xff] %v858_v53  ;;  %1195 = vmatprep.mubr.bf16.mxu0 %v20088_v3 }
 0x170   : > { %v861_v58 = vpop.f32.mrb[20].mxu0 }
 0x171   : > { %v862_v59 = vadd.f32 %v861_v58, %v16549_v50  ;;  %v863_v61 = vpop.f32.mrb[21].mxu0  ;;  %13222 = vmatmul.mubr.msk.bf16.vlgmr.msra.gmra.mrb[64].mxu1 %vm703_vm1, %v16473_v35  ;;  %v16681_v35 = vld.sshfl [vmem:[#allocation5 + $0x40] sm:$0x33 pattern:$0x76325410] }
 0x172   : > { %v864_v0 = vadd.f32 %v863_v61, %v16557_v6  ;;  %v865_v1 = vpop.f32.mrb[22].mxu0  ;;  %5600 = vmatpush1.bf16.msra.mxu1 %v5594_v55  ;;  %5271 = vmatprep.mubr.bf16.mxu1 %v20088_v3  ;;  %v1799_v15 = vcombine.high %v16681_v35, %v16681_v35 }
 0x173   : > { %1569 = vst [vmem:[%s16570_s11 + $0x280] sm:$0xff] %v862_v59  ;;  %v866_v2 = vadd.f32 %v865_v1, %v16549_v50  ;;  %v867_v8 = vpop.f32.mrb[23].mxu0  ;;  %13281 = vmatprep.subr.msk.bf16.mxu1 %vm752_vm0, %v5944_v16 }
 0x174   : > { %1570 = vst [vmem:[%s16570_s11 + $0x288] sm:$0xff] %v864_v0  ;;  %v868_v10 = vadd.f32 %v867_v8, %v16557_v6 }
 0x175   : > { %1571 = vst [vmem:[%s16570_s11 + $0x2c0] sm:$0xff] %v866_v2  ;;  %12889 = vmatmul.mubr.msk.bf16.vlgmr.msra.gmra.mrb[128].mxu0 %vm703_vm1, %v16126_v51 }
 0x176   : > { %1572 = vst [vmem:[%s16570_s11 + $0x2c8] sm:$0xff] %v868_v10  ;;  %1357 = vmatpush1.bf16.msra.mxu0 %v772_v14  ;;  %1205 = vmatprep.mubr.bf16.mxu0 %v20088_v3 }
 0x177   : > { %12939 = vmatprep.subr.msk.bf16.mxu0 %vm752_vm0, %v1799_v15 }
 0x178   : > { %v871_v17 = vpop.f32.mrb[24].mxu0 }
 0x179   : > { %v872_v44 = vadd.f32 %v871_v17, %v16549_v50  ;;  %v873_v23 = vpop.f32.mrb[25].mxu0  ;;  %13223 = vmatmul.mubr.msk.bf16.gmra.mrb[68].mxu1 %vm703_vm1, %v16488_v54 }
 0x17a   : > { %v874_v24 = vadd.f32 %v873_v23, %v16557_v6  ;;  %v875_v28 = vpop.f32.mrb[26].mxu0  ;;  %5281 = vmatprep.mubr.bf16.mxu1 %v20088_v3 }
 0x17b   : > { %1573 = vst [vmem:[%s16570_s11 + $0x300] sm:$0xff] %v872_v44  ;;  %v876_v29 = vadd.f32 %v875_v28, %v16549_v50  ;;  %v877_v32 = vpop.f32.mrb[27].mxu0 }
 0x17c   : > { %1574 = vst [vmem:[%s16570_s11 + $0x308] sm:$0xff] %v874_v24  ;;  %v878_v37 = vadd.f32 %v877_v32, %v16557_v6 }
 0x17d   : > { %1575 = vst [vmem:[%s16570_s11 + $0x340] sm:$0xff] %v876_v29  ;;  %12890 = vmatmul.mubr.msk.bf16.gmra.mrb[132].mxu0 %vm703_vm1, %v16143_v60 }
 0x17e   : > { %1576 = vst [vmem:[%s16570_s11 + $0x348] sm:$0xff] %v878_v37  ;;  %1215 = vmatprep.mubr.bf16.mxu0 %v20088_v3 }
 0x180   : > { %v881_v54 = vpop.f32.mrb[28].mxu0 }
 0x181   : > { %v882_v40 = vadd.f32 %v881_v54, %v16549_v50  ;;  %v883_v41 = vpop.f32.mrb[29].mxu0  ;;  %13224 = vmatmul.mubr.msk.bf16.gmra.mrb[72].mxu1 %vm703_vm1, %v16503_v5 }
 0x182   : > { %v884_v42 = vadd.f32 %v883_v41, %v16557_v6  ;;  %v885_v49 = vpop.f32.mrb[30].mxu0  ;;  %5291 = vmatprep.mubr.bf16.mxu1 %v20088_v3 }
 0x183   : > { %1577 = vst [vmem:[%s16570_s11 + $0x380] sm:$0xff] %v882_v40  ;;  %v886_v52 = vadd.f32 %v885_v49, %v16549_v50  ;;  %v887_v53 = vpop.f32.mrb[31].mxu0 }
 0x184   : > { %1578 = vst [vmem:[%s16570_s11 + $0x388] sm:$0xff] %v884_v42  ;;  %v888_v55 = vadd.f32 %v887_v53, %v16557_v6 }
 0x185   : > { %1579 = vst [vmem:[%s16570_s11 + $0x3c0] sm:$0xff] %v886_v52  ;;  %12891 = vmatmul.mubr.msk.bf16.gmra.mrb[136].mxu0 %vm703_vm1, %v16158_v9 }
 0x186   : > { %1580 = vst [vmem:[%s16570_s11 + $0x3c8] sm:$0xff] %v888_v55  ;;  %1225 = vmatprep.mubr.bf16.mxu0 %v20088_v3 }
 0x188   : > { %v891_v5 = vpop.f32.mrb[32].mxu0 }
 0x189   : > { %v892_v58 = vadd.f32 %v891_v5, %v16549_v50  ;;  %v893_v59 = vpop.f32.mrb[33].mxu0  ;;  %13225 = vmatmul.mubr.msk.bf16.gmra.mrb[76].mxu1 %vm703_vm1, %v16518_v12 }
 0x18a   : > { %v894_v61 = vadd.f32 %v893_v59, %v16557_v6  ;;  %v895_v0 = vpop.f32.mrb[34].mxu0  ;;  %5301 = vmatprep.mubr.bf16.mxu1 %v20088_v3 }
 0x18b   : > { %1581 = vst [vmem:[%s16570_s11 + $0x400] sm:$0xff] %v892_v58  ;;  %v896_v1 = vadd.f32 %v895_v0, %v16549_v50  ;;  %v897_v2 = vpop.f32.mrb[35].mxu0 }
 0x18c   : > { %1582 = vst [vmem:[%s16570_s11 + $0x408] sm:$0xff] %v894_v61  ;;  %v898_v8 = vadd.f32 %v897_v2, %v16557_v6 }
 0x18d   : > { %1583 = vst [vmem:[%s16570_s11 + $0x440] sm:$0xff] %v896_v1  ;;  %12892 = vmatmul.mubr.msk.bf16.gmra.mrb[140].mxu0 %vm703_vm1, %v16173_v25 }
 0x18e   : > { %1584 = vst [vmem:[%s16570_s11 + $0x448] sm:$0xff] %v898_v8  ;;  %1235 = vmatprep.mubr.bf16.mxu0 %v20088_v3 }
 0x190   : > { %v901_v12 = vpop.f32.mrb[36].mxu0 }
 0x191   : > { %v902_v14 = vadd.f32 %v901_v12, %v16549_v50  ;;  %v903_v10 = vpop.f32.mrb[37].mxu0  ;;  %13226 = vmatmul.mubr.msk.bf16.gmra.mrb[80].mxu1 %vm703_vm1, %v16533_v45 }
 0x192   : > { %v904_v15 = vadd.f32 %v903_v10, %v16557_v6  ;;  %v905_v16 = vpop.f32.mrb[38].mxu0  ;;  %5311 = vmatprep.mubr.bf16.mxu1 %v20088_v3 }
 0x193   : > { %1585 = vst [vmem:[%s16570_s11 + $0x480] sm:$0xff] %v902_v14  ;;  %v906_v17 = vadd.f32 %v905_v16, %v16549_v50  ;;  %v907_v44 = vpop.f32.mrb[39].mxu0  ;;  %v4549_v14 = vld [vmem:[%s16086_s5 + $0x318] sm:$0xf] }
 0x194   : > { %1586 = vst [vmem:[%s16570_s11 + $0x488] sm:$0xff] %v904_v15  ;;  %v908_v23 = vadd.f32 %v907_v44, %v16557_v6 }
 0x195   : > { %1587 = vst [vmem:[%s16570_s11 + $0x4c0] sm:$0xff] %v906_v17  ;;  %12893 = vmatmul.mubr.msk.bf16.gmra.mrb[144].mxu0 %vm703_vm1, %v16188_v39 }
 0x196   : > { %1588 = vst [vmem:[%s16570_s11 + $0x4c8] sm:$0xff] %v908_v23  ;;  %1245 = vmatprep.mubr.bf16.mxu0 %v20088_v3  ;;  %v5136_v23 = vrot.slane %v4549_v14, 6 }
 0x198   : > { %v911_v45 = vpop.f32.mrb[40].mxu0 }
 0x199   : > { %v912_v24 = vadd.f32 %v911_v45, %v16549_v50  ;;  %v913_v28 = vpop.f32.mrb[41].mxu0  ;;  %13227 = vmatmul.mubr.msk.bf16.gmra.mrb[84].mxu1 %vm703_vm1, %v16555_v4 }
 0x19a   : > { %v914_v29 = vadd.f32 %v913_v28, %v16557_v6  ;;  %v915_v32 = vpop.f32.mrb[42].mxu0  ;;  %5321 = vmatprep.mubr.bf16.mxu1 %v20088_v3  ;;  %v4548_v28 = vld [vmem:[%s16086_s5 + $0x314] sm:$0xc] }
 0x19b   : > { %1589 = vst [vmem:[%s16570_s11 + $0x500] sm:$0xff] %v912_v24  ;;  %v916_v37 = vadd.f32 %v915_v32, %v16549_v50  ;;  %v917_v54 = vpop.f32.mrb[43].mxu0 }
 0x19c   : > { %1590 = vst [vmem:[%s16570_s11 + $0x508] sm:$0xff] %v914_v29  ;;  %v918_v40 = vadd.f32 %v917_v54, %v16557_v6  ;;  %v4550_v29 = vld [vmem:[%s16086_s5 + $0x31c] sm:$0x3]  ;;  %v5138_v54 = vrot.slane %v5136_v23, 4 }
 0x19d   : > { %1591 = vst [vmem:[%s16570_s11 + $0x540] sm:$0xff] %v916_v37  ;;  %12894 = vmatmul.mubr.msk.bf16.gmra.mrb[148].mxu0 %vm703_vm1, %v16215_v56  ;;  %v13208_v37 = vrot.slane %v4548_v28, 10 }
 0x19e   : > { %1592 = vst [vmem:[%s16570_s11 + $0x548] sm:$0xff] %v918_v40  ;;  %1255 = vmatprep.mubr.bf16.mxu0 %v20088_v3  ;;  %v5139_v40 = vrot.slane %v4550_v29, 6 }
 0x1a0   : > { %v921_v4 = vpop.f32.mrb[44].mxu0 }
 0x1a1   : > { %v922_v41 = vadd.f32 %v921_v4, %v16549_v50  ;;  %v923_v42 = vpop.f32.mrb[45].mxu0  ;;  %13228 = vmatmul.mubr.msk.bf16.gmra.mrb[88].mxu1 %vm703_vm1, %v16581_v48  ;;  %v4552_v4 = vld [vmem:[%s16086_s5 + $0x334] sm:$0xf] }
 0x1a2   : > { %v924_v49 = vadd.f32 %v923_v42, %v16557_v6  ;;  %v925_v52 = vpop.f32.mrb[46].mxu0  ;;  %5331 = vmatprep.mubr.bf16.mxu1 %v20088_v3 }
 0x1a3   : > { %1593 = vst [vmem:[%s16570_s11 + $0x580] sm:$0xff] %v922_v41  ;;  %v926_v53 = vadd.f32 %v925_v52, %v16549_v50  ;;  %v927_v55 = vpop.f32.mrb[47].mxu0 }
 0x1a4   : > { %1594 = vst [vmem:[%s16570_s11 + $0x588] sm:$0xff] %v924_v49  ;;  %v928_v5 = vadd.f32 %v927_v55, %v16557_v6  ;;  %v5137_v55 = vsel %vm16367_vm6, %v13208_v37, %v5136_v23 }
 0x1a5   : > { %1595 = vst [vmem:[%s16570_s11 + $0x5c0] sm:$0xff] %v926_v53  ;;  %12895 = vmatmul.mubr.msk.bf16.gmra.mrb[152].mxu0 %vm703_vm1, %v16233_v7 }
 0x1a6   : > { %1596 = vst [vmem:[%s16570_s11 + $0x5c8] sm:$0xff] %v928_v5  ;;  %1265 = vmatprep.mubr.bf16.mxu0 %v20088_v3  ;;  %v5140_v5 = vsel %vm16367_vm6, %v5138_v54, %v5139_v40  ;;  %v4554_v54 = vld [vmem:[%s16086_s5 + $0x34c] sm:$0xc]  ;;  %v4556_v40 = vld [vmem:[%s16086_s5 + $0x354] sm:$0x3] }
 0x1a8   : > { %v931_v58 = vpop.f32.mrb[48].mxu0 }
 0x1a9   : > { %v932_v59 = vadd.f32 %v931_v58, %v16549_v50  ;;  %v933_v61 = vpop.f32.mrb[49].mxu0  ;;  %13229 = vmatmul.mubr.msk.bf16.gmra.mrb[92].mxu1 %vm703_vm1, %v16604_v18  ;;  %v5143_v58 = vrot.slane %v4552_v4, 6 }
 0x1aa   : > { %v934_v0 = vadd.f32 %v933_v61, %v16557_v6  ;;  %v935_v1 = vpop.f32.mrb[50].mxu0  ;;  %5341 = vmatprep.mubr.bf16.mxu1 %v20088_v3 }
 0x1ab   : > { %1597 = vst [vmem:[%s16570_s11 + $0x600] sm:$0xff] %v932_v59  ;;  %v936_v2 = vadd.f32 %v935_v1, %v16549_v50  ;;  %v937_v8 = vpop.f32.mrb[51].mxu0  ;;  %v4553_v1 = vld [vmem:[%s16086_s5 + $0x338] sm:$0x3]  ;;  %v5145_v14 = vrot.slane %v5143_v58, 4 }
 0x1ac   : > { %1598 = vst [vmem:[%s16570_s11 + $0x608] sm:$0xff] %v934_v0  ;;  %v938_v12 = vadd.f32 %v937_v8, %v16557_v6  ;;  %v4551_v0 = vld [vmem:[%s16086_s5 + $0x330] sm:$0xc]  ;;  %v16827_v8 = vcombine.low %v5137_v55, %v5140_v5 }
 0x1ad   : > { %1599 = vst [vmem:[%s16570_s11 + $0x640] sm:$0xff] %v936_v2  ;;  %12896 = vmatmul.mubr.msk.bf16.gmra.mrb[156].mxu0 %vm703_vm1, %v16249_v33 }
 0x1ae   : > { %1600 = vst [vmem:[%s16570_s11 + $0x648] sm:$0xff] %v938_v12  ;;  %1275 = vmatprep.mubr.bf16.mxu0 %v20088_v3  ;;  %v13209_v12 = vrot.slane %v4551_v0, 10  ;;  %v4557_v0 = vld [vmem:[%s16086_s5 + $0x368] sm:$0xc] }
 0x1b0   : > { %v941_v10 = vpop.f32.mrb[52].mxu0 }
 0x1b1   : > { %v942_v15 = vadd.f32 %v941_v10, %v16549_v50  ;;  %v943_v16 = vpop.f32.mrb[53].mxu0  ;;  %13230 = vmatmul.mubr.msk.bf16.gmra.mrb[96].mxu1 %vm703_vm1, %v16627_v63  ;;  %v5146_v10 = vrot.slane %v4553_v1, 6  ;;  %v4559_v1 = vld [vmem:[%s16086_s5 + $0x370] sm:$0x3] }
 0x1b2   : > { %v944_v17 = vadd.f32 %v943_v16, %v16557_v6  ;;  %v945_v44 = vpop.f32.mrb[54].mxu0  ;;  %5351 = vmatprep.mubr.bf16.mxu1 %v20088_v3 }
 0x1b3   : > { %1601 = vst [vmem:[%s16570_s11 + $0x680] sm:$0xff] %v942_v15  ;;  %v946_v45 = vadd.f32 %v945_v44, %v16549_v50  ;;  %v947_v24 = vpop.f32.mrb[55].mxu0  ;;  %v4555_v15 = vld [vmem:[%s16086_s5 + $0x350] sm:$0xf]  ;;  %v5147_v28 = vsel %vm16367_vm6, %v5145_v14, %v5146_v10  ;;  %v5160_v10 = vrot.slane %v4559_v1, 6 }
 0x1b4   : > { %1602 = vst [vmem:[%s16570_s11 + $0x688] sm:$0xff] %v944_v17  ;;  %v948_v32 = vadd.f32 %v947_v24, %v16557_v6  ;;  %v5144_v24 = vsel %vm16367_vm6, %v13209_v12, %v5143_v58  ;;  %v5150_v29 = vrot.slane %v4555_v15, 6  ;;  %v13211_v12 = vrot.slane %v4557_v0, 10  ;;  %v4561_v15 = vld [vmem:[%s16086_s5 + $0x388] sm:$0xf] }
 0x1b5   : > { %1603 = vst [vmem:[%s16570_s11 + $0x6c0] sm:$0xff] %v946_v45  ;;  %12897 = vmatmul.mubr.msk.bf16.gmra.mrb[160].mxu0 %vm703_vm1, %v16264_v47  ;;  %v4563_v1 = vld [vmem:[%s16086_s5 + $0x3a0] sm:$0xc] }
 0x1b6   : > { %1604 = vst [vmem:[%s16570_s11 + $0x6c8] sm:$0xff] %v948_v32  ;;  %1285 = vmatprep.mubr.bf16.mxu0 %v20088_v3 }
 0x1b8   : > { %v951_v41 = vpop.f32.mrb[56].mxu0 }
 0x1b9   : > { %v952_v42 = vadd.f32 %v951_v41, %v16549_v50  ;;  %v953_v49 = vpop.f32.mrb[57].mxu0  ;;  %13231 = vmatmul.mubr.msk.bf16.gmra.mrb[100].mxu1 %vm703_vm1, %v16647_v31  ;;  %v16850_v41 = vcombine.low %v5144_v24, %v5147_v28  ;;  %v5164_v24 = vrot.slane %v4561_v15, 6 }
 0x1ba   : > { %v954_v52 = vadd.f32 %v953_v49, %v16557_v6  ;;  %v955_v53 = vpop.f32.mrb[58].mxu0  ;;  %5361 = vmatprep.mubr.bf16.mxu1 %v20088_v3  ;;  %v5152_v49 = vrot.slane %v5150_v29, 4 }
 0x1bb   : > { %1605 = vst [vmem:[%s16570_s11 + $0x700] sm:$0xff] %v952_v42  ;;  %v956_v59 = vadd.f32 %v955_v53, %v16549_v50  ;;  %v957_v61 = vpop.f32.mrb[59].mxu0  ;;  %v13210_v42 = vrot.slane %v4554_v54, 10 }
 0x1bc   : > { %1606 = vst [vmem:[%s16570_s11 + $0x708] sm:$0xff] %v954_v52  ;;  %v958_v2 = vadd.f32 %v957_v61, %v16557_v6  ;;  %v4558_v52 = vld [vmem:[%s16086_s5 + $0x36c] sm:$0xf] }
 0x1bd   : > { %1607 = vst [vmem:[%s16570_s11 + $0x740] sm:$0xff] %v956_v59  ;;  %12898 = vmatmul.mubr.msk.bf16.gmra.mrb[164].mxu0 %vm703_vm1, %v16279_v62  ;;  %v5151_v5 = vsel %vm16367_vm6, %v13210_v42, %v5150_v29  ;;  %v5157_v59 = vrot.slane %v4558_v52, 6  ;;  %v4560_v29 = vld [vmem:[%s16086_s5 + $0x384] sm:$0xc] }
 0x1be   : > { %1608 = vst [vmem:[%s16570_s11 + $0x748] sm:$0xff] %v958_v2  ;;  %1295 = vmatprep.mubr.bf16.mxu0 %v20088_v3  ;;  %v13212_v54 = vrot.slane %v4560_v29, 10  ;;  %v4564_v42 = vld [vmem:[%s16086_s5 + $0x3a4] sm:$0xf] }
 0x1bf   : > { %v5159_v14 = vrot.slane %v5157_v59, 4 }
 0x1c0   : > { %v961_v16 = vpop.f32.mrb[60].mxu0 }
 0x1c1   : > { %v962_v17 = vadd.f32 %v961_v16, %v16549_v50  ;;  %v963_v44 = vpop.f32.mrb[61].mxu0  ;;  %13232 = vmatmul.mubr.msk.bf16.gmra.mrb[104].mxu1 %vm703_vm1, %v16827_v8 }
 0x1c2   : > { %v964_v23 = vadd.f32 %v963_v44, %v16557_v6  ;;  %v965_v45 = vpop.f32.mrb[62].mxu0  ;;  %5371 = vmatprep.mubr.bf16.mxu1 %v20088_v3 }
 0x1c3   : > { %1609 = vst [vmem:[%s16570_s11 + $0x780] sm:$0xff] %v962_v17  ;;  %v966_v32 = vadd.f32 %v965_v45, %v16549_v50  ;;  %v967_v37 = vpop.f32.mrb[63].mxu0  ;;  %v5153_v50 = vrot.slane %v4556_v40, 6  ;;  %v5161_v45 = vsel %vm16367_vm6, %v5159_v14, %v5160_v10  ;;  %v5166_v40 = vrot.slane %v5164_v24, 4 }
 0x1c4   : > { %1610 = vst [vmem:[%s16570_s11 + $0x788] sm:$0xff] %v964_v23  ;;  %v968_v4 = vadd.f32 %v967_v37, %v16557_v6  ;;  %v5158_v23 = vsel %vm16367_vm6, %v13211_v12, %v5157_v59  ;;  %v5171_v59 = vrot.slane %v4564_v42, 6  ;;  %v4565_v12 = vld [vmem:[%s16086_s5 + $0x3a8] sm:$0x3]  ;;  %v13213_v10 = vrot.slane %v4563_v1, 10 }
 0x1c5   : > { %1611 = vst [vmem:[%s16570_s11 + $0x7c0] sm:$0xff] %v966_v32  ;;  %12899 = vmatmul.mubr.msk.bf16.gmra.mrb[168].mxu0 %vm703_vm1, %v16293_v11  ;;  %v5154_v58 = vsel %vm16367_vm6, %v5152_v49, %v5153_v50  ;;  %v4562_v32 = vld [vmem:[%s16086_s5 + $0x38c] sm:$0x3]  ;;  %v16897_v37 = vcombine.low %v5158_v23, %v5161_v45  ;;  %v5174_v23 = vrot.slane %v4565_v12, 6  ;;  %v5964_v1 = vsel %vm752_vm0, %v16687_v46, 0 }
 0x1c6   : > { %1612 = vst [vmem:[%s16570_s11 + $0x7c8] sm:$0xff] %v968_v4  ;;  %1305 = vmatprep.mubr.bf16.mxu0 %v20088_v3  ;;  %v16874_v2 = vcombine.low %v5151_v5, %v5154_v58  ;;  %v5167_v4 = vrot.slane %v4562_v32, 6  ;;  %v5165_v5 = vsel %vm16367_vm6, %v13212_v54, %v5164_v24  ;;  %v5173_v15 = vrot.slane %v5171_v59, 4 }
 0x1c7   : > { %v5172_v32 = vsel %vm16367_vm6, %v13213_v10, %v5171_v59  ;;  %v16974_v46 = vld.sshfl [vmem:[#allocation5 + $0x4c] sm:$0x33 pattern:$0x76325410] }
 0x1c8   : > { %v16855_v53 = vpop.f32.mrb[64].mxu0  ;;  %v5168_v58 = vsel %vm16367_vm6, %v5166_v40, %v5167_v4  ;;  %v5175_v54 = vsel %vm16367_vm6, %v5173_v15, %v5174_v23 }
 0x1c9   : > { %v16857_v55 = vpop.f32.mrb[65].mxu0  ;;  %13233 = vmatmul.mubr.msk.bf16.gmra.mrb[108].mxu1 %vm703_vm1, %v16850_v41  ;;  %v16920_v14 = vcombine.low %v5165_v5, %v5168_v58  ;;  %v16940_v4 = vcombine.low %v5172_v32, %v5175_v54  ;;  %v1849_v32 = vsel %vm752_vm0, %v16681_v35, 0  ;;  %v16979_v54 = vld.sshfl [vmem:[#allocation5 + $0x18] sm:$0x33 pattern:$0x76325410] }
 0x1ca   : > { %20107 = vst [vmem:[#allocation17_spill] sm:$0xff] %v16857_v55  ;;  %v16861_v6 = vpop.f32.mrb[66].mxu0  ;;  %5381 = vmatprep.mubr.bf16.mxu1 %v20088_v3  ;;  %v18423_v55 = vld [vmem:[%s16086_s5 + $0x300] sm:$0xff]  }
 0x1cb   : > { %20108 = vst [vmem:[#allocation18_spill] sm:$0xff] %v16861_v6  ;;  %v16868_v61 = vpop.f32.mrb[67].mxu0  ;;  %v2997_v6 = vld [vmem:[%s16086_s5 + $0x3a0] sm:$0xf] }
 0x1cc   : > { %20109 = vst [vmem:[#allocation19_spill] sm:$0xff] %v16868_v61  ;;  %v401_v61 = vld [vmem:[%s16086_s5 + $0x54c] sm:$0xf] }
 0x1cd   : > { %12900 = vmatmul.mubr.msk.bf16.gmra.mrb[172].mxu0 %vm703_vm1, %v16309_v34 }
 0x1ce   : > { %1315 = vmatprep.mubr.bf16.mxu0 %v20088_v3 }
 0x1d0   : > { %v16878_v16 = vpop.f32.mrb[68].mxu0 }
 0x1d1   : > { %20110 = vst [vmem:[#allocation20_spill] sm:$0xff] %v16878_v16  ;;  %v16880_v17 = vpop.f32.mrb[69].mxu0  ;;  %13234 = vmatmul.mubr.msk.bf16.gmra.mrb[112].mxu1 %vm703_vm1, %v16874_v2  ;;  %v398_v16 = vld [vmem:[%s16086_s5 + $0x530] sm:$0xf] }
 0x1d2   : > { %20111 = vst [vmem:[#allocation21_spill] sm:$0xff] %v16880_v17  ;;  %v16884_v44 = vpop.f32.mrb[70].mxu0  ;;  %5391 = vmatprep.mubr.bf16.mxu1 %v20088_v3  ;;  %v395_v17 = vld [vmem:[%s16086_s5 + $0x514] sm:$0xf] }
 0x1d3   : > { %20112 = vst [vmem:[#allocation22_spill] sm:$0xff] %v16884_v44  ;;  %v16891_v28 = vpop.f32.mrb[71].mxu0  ;;  %v392_v44 = vld [vmem:[%s16086_s5 + $0x4f8] sm:$0xf] }
 0x1d4   : > { %20113 = vst [vmem:[#allocation23_spill] sm:$0xff] %v16891_v28  ;;  %v389_v28 = vld [vmem:[%s16086_s5 + $0x4dc] sm:$0xf] }
 0x1d5   : > { %12901 = vmatmul.mubr.msk.bf16.gmra.mrb[176].mxu0 %vm703_vm1, %v16322_v43 }
 0x1d6   : > { %1325 = vmatprep.mubr.bf16.mxu0 %v20088_v3 }
 0x1d8   : > { %v16901_v49 = vpop.f32.mrb[72].mxu0 }
 0x1d9   : > { %20114 = vst [vmem:[#allocation24_spill] sm:$0xff] %v16901_v49  ;;  %v16903_v50 = vpop.f32.mrb[73].mxu0  ;;  %13235 = vmatmul.mubr.msk.bf16.gmra.mrb[116].mxu1 %vm703_vm1, %v16897_v37  ;;  %v386_v49 = vld [vmem:[%s16086_s5 + $0x4c0] sm:$0xf] }
 0x1da   : > { %20115 = vst [vmem:[#allocation25_spill] sm:$0xff] %v16903_v50  ;;  %v16907_v52 = vpop.f32.mrb[74].mxu0  ;;  %5401 = vmatprep.mubr.bf16.mxu1 %v20088_v3  ;;  %v383_v50 = vld [vmem:[%s16086_s5 + $0x4a4] sm:$0xf] }
 0x1db   : > { %20116 = vst [vmem:[#allocation26_spill] sm:$0xff] %v16907_v52  ;;  %v16914_v0 = vpop.f32.mrb[75].mxu0  ;;  %v2967_v52 = vld [vmem:[%s16086_s5 + $0x288] sm:$0xf] }
 0x1dc   : > { %20117 = vst [vmem:[#allocation27_spill] sm:$0xff] %v16914_v0  ;;  %v381_v0 = vld [vmem:[%s16086_s5 + $0x48c] sm:$0x1] }
 0x1dd   : > { %12902 = vmatmul.mubr.msk.bf16.gmra.mrb[180].mxu0 %vm703_vm1, %v16337_v57 }
 0x1de   : > { %1335 = vmatprep.mubr.bf16.mxu0 %v20088_v3 }
 0x1e0   : > { %v16923_v45 = vpop.f32.mrb[76].mxu0 }
 0x1e1   : > { %20118 = vst [vmem:[#allocation28_spill] sm:$0xff] %v16923_v45  ;;  %v16925_v24 = vpop.f32.mrb[77].mxu0  ;;  %13236 = vmatmul.mubr.msk.bf16.gmra.mrb[120].mxu1 %vm703_vm1, %v16920_v14  ;;  %v2949_v45 = vld [vmem:[%s16086_s5 + $0x1e0] sm:$0xf] }
 0x1e2   : > { %20119 = vst [vmem:[#allocation29_spill] sm:$0xff] %v16925_v24  ;;  %v16929_v29 = vpop.f32.mrb[78].mxu0  ;;  %5411 = vmatprep.mubr.bf16.mxu1 %v20088_v3  ;;  %v2946_v24 = vld [vmem:[%s16086_s5 + $0x1c4] sm:$0xf] }
 0x1e3   : > { %20120 = vst [vmem:[#allocation30_spill] sm:$0xff] %v16929_v29  ;;  %v16936_v40 = vpop.f32.mrb[79].mxu0  ;;  %v2943_v29 = vld [vmem:[%s16086_s5 + $0x1a8] sm:$0xf] }
 0x1e4   : > { %20121 = vst [vmem:[#allocation31_spill] sm:$0xff] %v16936_v40  ;;  %v269_v40 = vld [vmem:[%s16086_s5 + $0x7c] sm:$0xf] }
 0x1e5   : > { %12903 = vmatmul.mubr.msk.bf16.gmra.mrb[184].mxu0 %vm703_vm1, %v16353_v13 }
 0x1e6   : > { %1345 = vmatprep.mubr.bf16.mxu0 %v20088_v3 }
 0x1e8   : > { %v16943_v42 = vpop.f32.mrb[80].mxu0 }
 0x1e9   : > { %20122 = vst [vmem:[#allocation32_spill] sm:$0xff] %v16943_v42  ;;  %v16945_v5 = vpop.f32.mrb[81].mxu0  ;;  %13237 = vmatmul.mubr.msk.bf16.gmra.mrb[124].mxu1 %vm703_vm1, %v16940_v4 }
 0x1ea   : > { %20123 = vst [vmem:[#allocation33_spill] sm:$0xff] %v16945_v5  ;;  %v16949_v58 = vpop.f32.mrb[82].mxu0  ;;  %5631 = vmatprep.mubr.bf16.mxu1 %v20088_v3  ;;  %v2918_v5 = vld [vmem:[%s16086_s5 + $0xc4] sm:$0x8] }
 0x1eb   : > { %20124 = vst [vmem:[#allocation34_spill] sm:$0xff] %v16949_v58  ;;  %v16952_v59 = vpop.f32.mrb[83].mxu0 }
 0x1ec   : > { %20125 = vst [vmem:[#allocation35_spill] sm:$0xff] %v16952_v59  ;;  %v261_v59 = vld [vmem:[%s16086_s5 + $0x2c] sm:$0x1] }
 0x1ed   : > { %12904 = vmatmul.mubr.msk.bf16.gmra.mrb[188].mxu0 %vm703_vm1, %v16373_v38 }
 0x1ee   : > { %1388 = vmatprep.mubr.bf16.mxu0 %v20088_v3 }
 0x1f0   : > { %v16959_v12 = vpop.f32.mrb[84].mxu0 }
 0x1f1   : > { %20126 = vst [vmem:[#allocation36_spill] sm:$0xff] %v16959_v12  ;;  %v16961_v10 = vpop.f32.mrb[85].mxu0  ;;  %13252 = vmatmul.mubr.msk.bf16.vlgmr.msra.gmra.mrb[64].mxu1 %vm703_vm1, %v16581_v48  ;;  %v2201_v48 = vcombine.high %v16974_v46, %v16974_v46  ;;  %v259_v12 = vld [vmem:[%s16086_s5 + $0x24] sm:$0xe] }
 0x1f2   : > { %20127 = vst [vmem:[#allocation37_spill] sm:$0xff] %v16961_v10  ;;  %v16965_v15 = vpop.f32.mrb[86].mxu0  ;;  %5970 = vmatpush1.bf16.msra.mxu1 %v5964_v1  ;;  %5641 = vmatprep.mubr.bf16.mxu1 %v20088_v3  ;;  %v6314_v1 = vcombine.high %v16979_v54, %v16979_v54 }
 0x1f3   : > { %20128 = vst [vmem:[#allocation38_spill] sm:$0xff] %v16965_v15  ;;  %v16968_v23 = vpop.f32.mrb[87].mxu0  ;;  %v308_v15 = vld [vmem:[%s16086_s5 + $0x1e8] sm:$0xf] }
 0x1f4   : > { %20129 = vst [vmem:[#allocation39_spill] sm:$0xff] %v16968_v23  ;;  %13311 = vmatprep.subr.msk.bf16.mxu1 %vm752_vm0, %v6314_v1  ;;  %v305_v23 = vld [vmem:[%s16086_s5 + $0x1cc] sm:$0xf] }
 0x1f5   : > { %12906 = vmatmul.mubr.msk.bf16.vlgmr.msra.gmra.mrb[192].mxu0 %vm703_vm1, %v16126_v51 }
 0x1f6   : > { %1855 = vmatpush1.bf16.msra.mxu0 %v1849_v32  ;;  %1398 = vmatprep.mubr.bf16.mxu0 %v20088_v3 }
 0x1f7   : > { %12973 = vmatprep.subr.msk.bf16.mxu0 %vm752_vm0, %v2201_v48 }
 0x1f8   : > { %v16983_v22 = vpop.f32.mrb[88].mxu0 }
 0x1f9   : > { %20130 = vst [vmem:[#allocation40_spill] sm:$0xff] %v16983_v22  ;;  %v16986_v35 = vpop.f32.mrb[89].mxu0  ;;  %13253 = vmatmul.mubr.msk.bf16.gmra.mrb[68].mxu1 %vm703_vm1, %v16604_v18 }
 0x1fa   : > { %20131 = vst [vmem:[#allocation41_spill] sm:$0xff] %v16986_v35  ;;  %v16991_v32 = vpop.f32.mrb[90].mxu0  ;;  %5651 = vmatprep.mubr.bf16.mxu1 %v20088_v3 }
 0x1fb   : > { %20132 = vst [vmem:[#allocation42_spill] sm:$0xff] %v16991_v32  ;;  %v16994_v21 = vpop.f32.mrb[91].mxu0 }
 0x1fc   : > { %20133 = vst [vmem:[#allocation43_spill] sm:$0xff] %v16994_v21 }
 0x1fd   : > { %12907 = vmatmul.mubr.msk.bf16.gmra.mrb[196].mxu0 %vm703_vm1, %v16143_v60 }
 0x1fe   : > { %1408 = vmatprep.mubr.bf16.mxu0 %v20088_v3 }
 0x200   : > { %v16999_v27 = vpop.f32.mrb[92].mxu0 }
 0x201   : > { %20134 = vst [vmem:[#allocation44_spill] sm:$0xff] %v16999_v27  ;;  %v17001_v48 = vpop.f32.mrb[93].mxu0  ;;  %13254 = vmatmul.mubr.msk.bf16.gmra.mrb[72].mxu1 %vm703_vm1, %v16627_v63  ;;  %v4571_v27 = vld [vmem:[%s16086_s5 + $0x3e0] sm:$0x3] }
 0x202   : > { %20135 = vst [vmem:[#allocation45_spill] sm:$0xff] %v17001_v48  ;;  %v17005_v18 = vpop.f32.mrb[94].mxu0  ;;  %5661 = vmatprep.mubr.bf16.mxu1 %v20088_v3  ;;  %v5516_v32 = vrot.slane %v4571_v27, 6 }
 0x203   : > { %20136 = vst [vmem:[#allocation46_spill] sm:$0xff] %v17005_v18  ;;  %v17008_v1 = vpop.f32.mrb[95].mxu0 }
 0x204   : > { %20137 = vst [vmem:[#allocation47_spill] sm:$0xff] %v17008_v1 }
 0x205   : > { %12908 = vmatmul.mubr.msk.bf16.gmra.mrb[200].mxu0 %vm703_vm1, %v16158_v9 }
 0x206   : > { %1418 = vmatprep.mubr.bf16.mxu0 %v20088_v3 }
 0x208   : > { %v17013_v26 = vpop.f32.mrb[96].mxu0 }
 0x209   : > { %20138 = vst [vmem:[#allocation48_spill] sm:$0xff] %v17013_v26  ;;  %v17015_v21 = vpop.f32.mrb[97].mxu0  ;;  %13255 = vmatmul.mubr.msk.bf16.gmra.mrb[76].mxu1 %vm703_vm1, %v16647_v31 }
 0x20a   : > { %20139 = vst [vmem:[#allocation49_spill] sm:$0xff] %v17015_v21  ;;  %v17019_v48 = vpop.f32.mrb[98].mxu0  ;;  %5671 = vmatprep.mubr.bf16.mxu1 %v20088_v3 }
 0x20b   : > { %20140 = vst [vmem:[#allocation50_spill] sm:$0xff] %v17019_v48  ;;  %v17022_v63 = vpop.f32.mrb[99].mxu0 }
 0x20c   : > { %20141 = vst [vmem:[#allocation51_spill] sm:$0xff] %v17022_v63 }
 0x20d   : > { %12909 = vmatmul.mubr.msk.bf16.gmra.mrb[204].mxu0 %vm703_vm1, %v16173_v25 }
 0x20e   : > { %1428 = vmatprep.mubr.bf16.mxu0 %v20088_v3 }
 0x210   : > { %v17027_v1 = vpop.f32.mrb[100].mxu0 }
 0x211   : > { %20142 = vst [vmem:[#allocation52_spill] sm:$0xff] %v17027_v1  ;;  %v17029_v18 = vpop.f32.mrb[101].mxu0  ;;  %13256 = vmatmul.mubr.msk.bf16.gmra.mrb[80].mxu1 %vm703_vm1, %v16827_v8 }
 0x212   : > { %20143 = vst [vmem:[#allocation53_spill] sm:$0xff] %v17029_v18  ;;  %v17033_v21 = vpop.f32.mrb[102].mxu0  ;;  %5681 = vmatprep.mubr.bf16.mxu1 %v20088_v3 }
 0x213   : > { %20144 = vst [vmem:[#allocation54_spill] sm:$0xff] %v17033_v21  ;;  %v17036_v31 = vpop.f32.mrb[103].mxu0 }
 0x214   : > { %20145 = vst [vmem:[#allocation55_spill] sm:$0xff] %v17036_v31 }
 0x215   : > { %12910 = vmatmul.mubr.msk.bf16.gmra.mrb[208].mxu0 %vm703_vm1, %v16188_v39 }
 0x216   : > { %1438 = vmatprep.mubr.bf16.mxu0 %v20088_v3 }
 0x218   : > { %v17041_v63 = vpop.f32.mrb[104].mxu0 }
 0x219   : > { %20146 = vst [vmem:[#allocation56_spill] sm:$0xff] %v17041_v63  ;;  %v17043_v48 = vpop.f32.mrb[105].mxu0  ;;  %13257 = vmatmul.mubr.msk.bf16.gmra.mrb[84].mxu1 %vm703_vm1, %v16850_v41 }
 0x21a   : > { %20147 = vst [vmem:[#allocation57_spill] sm:$0xff] %v17043_v48  ;;  %v17047_v18 = vpop.f32.mrb[106].mxu0  ;;  %5691 = vmatprep.mubr.bf16.mxu1 %v20088_v3  ;;  %v4568_v48 = vld [vmem:[%s16086_s5 + $0x3c4] sm:$0x3] }
 0x21b   : > { %20148 = vst [vmem:[#allocation58_spill] sm:$0xff] %v17047_v18  ;;  %v17050_v8 = vpop.f32.mrb[107].mxu0  ;;  %v5509_v21 = vrot.slane %v4568_v48, 6 }
 0x21c   : > { %20149 = vst [vmem:[#allocation59_spill] sm:$0xff] %v17050_v8 }
 0x21d   : > { %12911 = vmatmul.mubr.msk.bf16.gmra.mrb[212].mxu0 %vm703_vm1, %v16215_v56 }
 0x21e   : > { %1448 = vmatprep.mubr.bf16.mxu0 %v20088_v3 }
 0x220   : > { %v17055_v31 = vpop.f32.mrb[108].mxu0 }
 0x221   : > { %20150 = vst [vmem:[#allocation60_spill] sm:$0xff] %v17055_v31  ;;  %v17057_v63 = vpop.f32.mrb[109].mxu0  ;;  %13258 = vmatmul.mubr.msk.bf16.gmra.mrb[88].mxu1 %vm703_vm1, %v16874_v2 }
 0x222   : > { %20151 = vst [vmem:[#allocation61_spill] sm:$0xff] %v17057_v63  ;;  %v17061_v41 = vpop.f32.mrb[110].mxu0  ;;  %5701 = vmatprep.mubr.bf16.mxu1 %v20088_v3  ;;  %v4566_v63 = vld [vmem:[%s16086_s5 + $0x3bc] sm:$0xc] }
 0x223   : > { %20152 = vst [vmem:[#allocation62_spill] sm:$0xff] %v17061_v41  ;;  %v17064_v18 = vpop.f32.mrb[111].mxu0 }
 0x224   : > { %20153 = vst [vmem:[#allocation63_spill] sm:$0xff] %v17064_v18 }
 0x225   : > { %12912 = vmatmul.mubr.msk.bf16.gmra.mrb[216].mxu0 %vm703_vm1, %v16233_v7 }
 0x226   : > { %1458 = vmatprep.mubr.bf16.mxu0 %v20088_v3 }
 0x228   : > { %v17069_v8 = vpop.f32.mrb[112].mxu0 }
 0x229   : > { %20154 = vst [vmem:[#allocation64_spill] sm:$0xff] %v17069_v8  ;;  %v17071_v31 = vpop.f32.mrb[113].mxu0  ;;  %13259 = vmatmul.mubr.msk.bf16.gmra.mrb[92].mxu1 %vm703_vm1, %v16897_v37  ;;  %v4567_v8 = vld [vmem:[%s16086_s5 + $0x3c0] sm:$0xf] }
 0x22a   : > { %20155 = vst [vmem:[#allocation65_spill] sm:$0xff] %v17071_v31  ;;  %v17075_v2 = vpop.f32.mrb[114].mxu0  ;;  %5711 = vmatprep.mubr.bf16.mxu1 %v20088_v3 }
 0x22b   : > { %20156 = vst [vmem:[#allocation66_spill] sm:$0xff] %v17075_v2  ;;  %v17078_v41 = vpop.f32.mrb[115].mxu0  ;;  %v5506_v2 = vrot.slane %v4567_v8, 6 }
 0x22c   : > { %20157 = vst [vmem:[#allocation67_spill] sm:$0xff] %v17078_v41 }
 0x22d   : > { %12913 = vmatmul.mubr.msk.bf16.gmra.mrb[220].mxu0 %vm703_vm1, %v16249_v33 }
 0x22e   : > { %1468 = vmatprep.mubr.bf16.mxu0 %v20088_v3 }
 0x230   : > { %v17084_v18 = vpop.f32.mrb[116].mxu0 }
 0x231   : > { %20158 = vst [vmem:[#allocation68_spill] sm:$0xff] %v17084_v18  ;;  %v17086_v31 = vpop.f32.mrb[117].mxu0  ;;  %13260 = vmatmul.mubr.msk.bf16.gmra.mrb[96].mxu1 %vm703_vm1, %v16920_v14  ;;  %v5508_v18 = vrot.slane %v5506_v2, 4  ;;  %v4570_v14 = vld [vmem:[%s16086_s5 + $0x3dc] sm:$0xf] }
 0x232   : > { %20159 = vst [vmem:[#allocation69_spill] sm:$0xff] %v17086_v31  ;;  %v17090_v37 = vpop.f32.mrb[118].mxu0  ;;  %5721 = vmatprep.mubr.bf16.mxu1 %v20088_v3  ;;  %v13238_v31 = vrot.slane %v4566_v63, 10  ;;  %v5513_v48 = vrot.slane %v4570_v14, 6 }
 0x233   : > { %20160 = vst [vmem:[#allocation70_spill] sm:$0xff] %v17090_v37  ;;  %v17093_v41 = vpop.f32.mrb[119].mxu0  ;;  %v5510_v63 = vsel %vm16367_vm6, %v5508_v18, %v5509_v21 }
 0x234   : > { %20161 = vst [vmem:[#allocation71_spill] sm:$0xff] %v17093_v41  ;;  %v5507_v41 = vsel %vm16367_vm6, %v13238_v31, %v5506_v2  ;;  %v4573_v31 = vld [vmem:[%s16086_s5 + $0x3f8] sm:$0xf] }
 0x235   : > { %12914 = vmatmul.mubr.msk.bf16.gmra.mrb[224].mxu0 %vm703_vm1, %v16264_v47  ;;  %v5520_v14 = vrot.slane %v4573_v31, 6 }
 0x236   : > { %1478 = vmatprep.mubr.bf16.mxu0 %v20088_v3 }
 0x238   : > { %v17101_v1 = vpop.f32.mrb[120].mxu0 }
 0x239   : > { %20162 = vst [vmem:[#allocation72_spill] sm:$0xff] %v17101_v1  ;;  %v17103_v37 = vpop.f32.mrb[121].mxu0  ;;  %13261 = vmatmul.mubr.msk.bf16.gmra.mrb[100].mxu1 %vm703_vm1, %v16940_v4  ;;  %v4569_v1 = vld [vmem:[%s16086_s5 + $0x3d8] sm:$0xc]  ;;  %v13244_v4 = vcombine.low %v5507_v41, %v5510_v63  ;;  %v4572_v63 = vld [vmem:[%s16086_s5 + $0x3f4] sm:$0xc] }
 0x23a   : > { %20163 = vst [vmem:[#allocation73_spill] sm:$0xff] %v17103_v37  ;;  %v17107_v8 = vpop.f32.mrb[122].mxu0  ;;  %5731 = vmatprep.mubr.bf16.mxu1 %v20088_v3  ;;  %v5515_v37 = vrot.slane %v5513_v48, 4 }
 0x23b   : > { %20164 = vst [vmem:[#allocation74_spill] sm:$0xff] %v17107_v8  ;;  %v17114_v26 = vpop.f32.mrb[123].mxu0  ;;  %v13239_v8 = vrot.slane %v4569_v1, 10 }
 0x23c   : > { %20165 = vst [vmem:[#allocation75_spill] sm:$0xff] %v17114_v26  ;;  %v5517_v1 = vsel %vm16367_vm6, %v5515_v37, %v5516_v32  ;;  %v4579_v26 = vld [vmem:[%s16086_s5 + $0x430] sm:$0xf] }
 0x23d   : > { %12915 = vmatmul.mubr.msk.bf16.gmra.mrb[228].mxu0 %vm703_vm1, %v16279_v62  ;;  %v5514_v41 = vsel %vm16367_vm6, %v13239_v8, %v5513_v48  ;;  %v4576_v48 = vld [vmem:[%s16086_s5 + $0x414] sm:$0xf] }
 0x23e   : > { %1488 = vmatprep.mubr.bf16.mxu0 %v20088_v3  ;;  %v5527_v31 = vrot.slane %v4576_v48, 6  ;;  %v4580_v48 = vld [vmem:[%s16086_s5 + $0x434] sm:$0x3] }
 0x240   : > { %v17122_v2 = vpop.f32.mrb[124].mxu0 }
 0x241   : > { %20166 = vst [vmem:[#allocation76_spill] sm:$0xff] %v17122_v2  ;;  %v17124_v21 = vpop.f32.mrb[125].mxu0  ;;  %13262 = vmatmul.mubr.msk.bf16.gmra.mrb[104].mxu1 %vm703_vm1, %v13244_v4  ;;  %v13245_v4 = vcombine.low %v5514_v41, %v5517_v1  ;;  %v5522_v2 = vrot.slane %v5520_v14, 4  ;;  %v4575_v41 = vld [vmem:[%s16086_s5 + $0x410] sm:$0xc] }
 0x242   : > { %20167 = vst [vmem:[#allocation77_spill] sm:$0xff] %v17124_v21  ;;  %v17127_v18 = vpop.f32.mrb[126].mxu0  ;;  %5741 = vmatprep.mubr.bf16.mxu1 %v20088_v3  ;;  %v4574_v21 = vld [vmem:[%s16086_s5 + $0x3fc] sm:$0x3]  ;;  %v4577_v1 = vld [vmem:[%s16086_s5 + $0x418] sm:$0x3] }
 0x243   : > { %20168 = vst [vmem:[#allocation78_spill] sm:$0xff] %v17127_v18  ;;  %v17134_v27 = vpop.f32.mrb[127].mxu0  ;;  %v13240_v18 = vrot.slane %v4572_v63, 10  ;;  %v5523_v8 = vrot.slane %v4574_v21, 6  ;;  %v13241_v63 = vrot.slane %v4575_v41, 10 }
 0x244   : > { %20169 = vst [vmem:[#allocation79_spill] sm:$0xff] %v17134_v27  ;;  %v5530_v27 = vrot.slane %v4577_v1, 6  ;;  %v5537_v1 = vrot.slane %v4580_v48, 6 }
 0x245   : > { %12916 = vmatmul.mubr.msk.bf16.gmra.mrb[232].mxu0 %vm703_vm1, %v16293_v11  ;;  %v5521_v32 = vsel %vm16367_vm6, %v13240_v18, %v5520_v14  ;;  %v5524_v37 = vsel %vm16367_vm6, %v5522_v2, %v5523_v8  ;;  %v5528_v2 = vsel %vm16367_vm6, %v13241_v63, %v5527_v31  ;;  %v5534_v14 = vrot.slane %v4579_v26, 6  ;;  %v4578_v8 = vld [vmem:[%s16086_s5 + $0x42c] sm:$0xc]  ;;  %v4581_v63 = vld [vmem:[%s16086_s5 + $0x448] sm:$0xc] }
 0x246   : > { %1498 = vmatprep.mubr.bf16.mxu0 %v20088_v3  ;;  %v13246_v21 = vcombine.low %v5521_v32, %v5524_v37  ;;  %v13242_v37 = vrot.slane %v4578_v8, 10 }
 0x247   : > { %v5536_v41 = vrot.slane %v5534_v14, 4 }
 0x248   : > { %v5535_v26 = vsel %vm16367_vm6, %v13242_v37, %v5534_v14 }
 0x249   : > { %13263 = vmatmul.mubr.msk.bf16.gmra.mrb[108].mxu1 %vm703_vm1, %v13245_v4  ;;  %v5529_v4 = vrot.slane %v5527_v31, 4 }
 0x24a   : > { %5751 = vmatprep.mubr.bf16.mxu1 %v20088_v3 }
 0x24b   : > { %v5531_v18 = vsel %vm16367_vm6, %v5529_v4, %v5530_v27  ;;  %v5538_v27 = vsel %vm16367_vm6, %v5536_v41, %v5537_v1  ;;  %v4583_v4 = vld [vmem:[%s16086_s5 + $0x450] sm:$0x3]  ;;  %v292_v1 = vld [vmem:[%s16086_s5 + $0x158] sm:$0xe] }
 0x24c   : > { %v13247_v32 = vcombine.low %v5528_v2, %v5531_v18  ;;  %v13248_v2 = vcombine.low %v5535_v26, %v5538_v27  ;;  %v13243_v18 = vrot.slane %v4581_v63, 10  ;;  %v5544_v48 = vrot.slane %v4583_v4, 6 }
 0x24d   : > { %12917 = vmatmul.mubr.msk.bf16.gmra.mrb[236].mxu0 %vm703_vm1, %v16309_v34  ;;  %v13268_v27 = vrot.slane %v292_v1, 9 }
 0x24e   : > { %1508 = vmatprep.mubr.bf16.mxu0 %v20088_v3 }
 0x251   : > { %13264 = vmatmul.mubr.msk.bf16.gmra.mrb[112].mxu1 %vm703_vm1, %v13246_v21  ;;  %v4582_v21 = vld [vmem:[%s16086_s5 + $0x44c] sm:$0xf] }
 0x252   : > { %5761 = vmatprep.mubr.bf16.mxu1 %v20088_v3  ;;  %v5541_v31 = vrot.slane %v4582_v21, 6  ;;  %v294_v21 = vld [vmem:[%s16086_s5 + $0x160] sm:$0x1] }
 0x253   : > { %v5879_v4 = vrot.slane %v294_v21, 5 }
 0x254   : > { %v5543_v8 = vrot.slane %v5541_v31, 4  ;;  %v5542_v14 = vsel %vm16367_vm6, %v13243_v18, %v5541_v31 }
 0x255   : > { %12918 = vmatmul.mubr.msk.bf16.gmra.mrb[240].mxu0 %vm703_vm1, %v16322_v43 }
 0x256   : > { %1518 = vmatprep.mubr.bf16.mxu0 %v20088_v3  ;;  %v5545_v37 = vsel %vm16367_vm6, %v5543_v8, %v5544_v48  ;;  %v295_v48 = vld [vmem:[%s16086_s5 + $0x174] sm:$0xe] }
 0x257   : > { %v13249_v26 = vcombine.low %v5542_v14, %v5545_v37  ;;  %v13269_v37 = vrot.slane %v295_v48, 9 }
 0x259   : > { %13265 = vmatmul.mubr.msk.bf16.gmra.mrb[116].mxu1 %vm703_vm1, %v13247_v32  ;;  %v293_v32 = vld [vmem:[%s16086_s5 + $0x15c] sm:$0xf] }
 0x25a   : > { %5771 = vmatprep.mubr.bf16.mxu1 %v20088_v3  ;;  %v5876_v41 = vrot.slane %v293_v32, 5  ;;  %v297_v32 = vld [vmem:[%s16086_s5 + $0x17c] sm:$0x1] }
 0x25b   : > { %v5886_v21 = vrot.slane %v297_v32, 5 }
 0x25c   : > { %v5878_v63 = vrot.slane %v5876_v41, 4  ;;  %v5877_v31 = vsel %vm16109_vm4, %v13268_v27, %v5876_v41  ;;  %v6334_v41 = vsel %vm752_vm0, %v16979_v54, 0  ;;  %v15659_v27 = vld [vmem:[%s16086_s5] sm:$0xff]   ;;  %v2251_v54 = vsel %vm752_vm0, %v16974_v46, 0 }
 0x25d   : > { %12919 = vmatmul.mubr.msk.bf16.gmra.mrb[244].mxu0 %vm703_vm1, %v16337_v57  ;;  %v17226_v46 = vld.sshfl [vmem:[#allocation5 + $0x44] sm:$0x33 pattern:$0x76325410] }
 0x25e   : > { %1528 = vmatprep.mubr.bf16.mxu0 %v20088_v3  ;;  %v5880_v18 = vsel %vm16109_vm4, %v5878_v63, %v5879_v4 }
 0x25f   : > { %v17200_v14 = vcombine.low %v5877_v31, %v5880_v18  ;;  %v300_v18 = vld [vmem:[%s16086_s5 + $0x198] sm:$0x1] }
 0x261   : > { %13266 = vmatmul.mubr.msk.bf16.gmra.mrb[120].mxu1 %vm703_vm1, %v13248_v2  ;;  %v296_v2 = vld [vmem:[%s16086_s5 + $0x178] sm:$0xf] }
 0x262   : > { %5781 = vmatprep.mubr.bf16.mxu1 %v20088_v3  ;;  %v5883_v8 = vrot.slane %v296_v2, 5  ;;  %v298_v2 = vld [vmem:[%s16086_s5 + $0x190] sm:$0xe] }
 0x263   : > { %v13270_v32 = vrot.slane %v298_v2, 9 }
 0x264   : > { %v5885_v1 = vrot.slane %v5883_v8, 4  ;;  %v5884_v63 = vsel %vm16109_vm4, %v13269_v37, %v5883_v8  ;;  %v5893_v37 = vrot.slane %v300_v18, 5  ;;  %v303_v18 = vld [vmem:[%s16086_s5 + $0x1b4] sm:$0x1] }
 0x265   : > { %12920 = vmatmul.mubr.msk.bf16.gmra.mrb[248].mxu0 %vm703_vm1, %v16353_v13  ;;  %v5900_v22 = vrot.slane %v303_v18, 5 }
 0x266   : > { %1538 = vmatprep.mubr.bf16.mxu0 %v20088_v3  ;;  %v5887_v4 = vsel %vm16109_vm4, %v5885_v1, %v5886_v21  ;;  %v302_v21 = vld [vmem:[%s16086_s5 + $0x1b0] sm:$0xf] }
 0x267   : > { %v17219_v48 = vcombine.low %v5884_v63, %v5887_v4  ;;  %v5897_v2 = vrot.slane %v302_v21, 5  ;;  %v304_v21 = vld [vmem:[%s16086_s5 + $0x1c8] sm:$0xe] }
 0x269   : > { %13267 = vmatmul.mubr.msk.bf16.gmra.mrb[124].mxu1 %vm703_vm1, %v13249_v26  ;;  %v299_v26 = vld [vmem:[%s16086_s5 + $0x194] sm:$0xf]  ;;  %v5899_v35 = vrot.slane %v5897_v2, 4 }
 0x26a   : > { %6001 = vmatprep.mubr.bf16.mxu1 %v20088_v3  ;;  %v5890_v31 = vrot.slane %v299_v26, 5  ;;  %v7424_v26 = vcombine.high %v17226_v46, %v17226_v46 }
 0x26c   : > { %v5892_v8 = vrot.slane %v5890_v31, 4  ;;  %v5891_v63 = vsel %vm16109_vm4, %v13270_v32, %v5890_v31  ;;  %v15661_v31 = vld [vmem:[%s16086_s5 + $0x38] sm:$0xff]  }
 0x26d   : > { %12921 = vmatmul.mubr.msk.bf16.gmra.mrb[252].mxu0 %vm703_vm1, %v16373_v38 }
 0x26e   : > { %1886 = vmatprep.mubr.bf16.mxu0 %v20088_v3  ;;  %v5894_v4 = vsel %vm16109_vm4, %v5892_v8, %v5893_v37  ;;  %v5901_v8 = vsel %vm16109_vm4, %v5899_v35, %v5900_v22  ;;  %v5904_v37 = vrot.slane %v305_v23, 5  ;;  %v15662_v22 = vld [vmem:[%s16086_s5 + $0x54] sm:$0xff]  }
 0x271   : > { %13282 = vmatmul.mubr.msk.bf16.vlgmr.msra.gmra.mrb[64].mxu1 %vm703_vm1, %v17200_v14 }
 0x272   : > { %6340 = vmatpush1.bf16.msra.mxu1 %v6334_v41  ;;  %6011 = vmatprep.mubr.bf16.mxu1 %v20088_v3  ;;  %v17221_v41 = vld.sshfl [vmem:[#allocation5 + $0x20] sm:$0x33 pattern:$0x76325410] }
 0x273   : > { %v3256_v1 = vcombine.high %v17221_v41, %v17221_v41  ;;  %13401 = vmatprep.subr.msk.bf16.mxu1 %vm752_vm0, %v7424_v26 }
 0x275   : > { %12940 = vmatmul.mubr.msk.bf16.vlgmr.msra.gmra.mrb[192].mxu0 %vm703_vm1, %v15659_v27  ;;  %v15660_v27 = vld [vmem:[%s16086_s5 + $0x1c] sm:$0xff]  }
 0x276   : > { %2257 = vmatpush1.bf16.msra.mxu0 %v2251_v54  ;;  %1896 = vmatprep.mubr.bf16.mxu0 %v20088_v3  ;;  %v301_v54 = vld [vmem:[%s16086_s5 + $0x1ac] sm:$0xe] }
 0x277   : > { %13057 = vmatprep.subr.msk.bf16.mxu0 %vm752_vm0, %v3256_v1  ;;  %v17244_v1 = vcombine.low %v5891_v63, %v5894_v4  ;;  %v13271_v26 = vrot.slane %v301_v54, 9  ;;  %v13272_v4 = vrot.slane %v304_v21, 9  ;;  %v5906_v54 = vrot.slane %v5904_v37, 4 }
 0x279   : > { %13283 = vmatmul.mubr.msk.bf16.gmra.mrb[68].mxu1 %vm703_vm1, %v17219_v48  ;;  %v5898_v32 = vsel %vm16109_vm4, %v13271_v26, %v5897_v2  ;;  %v5905_v23 = vsel %vm16109_vm4, %v13272_v4, %v5904_v37  ;;  %v5911_v2 = vrot.slane %v308_v15, 5  ;;  %v307_v26 = vld [vmem:[%s16086_s5 + $0x1e4] sm:$0xe]  ;;  %v15663_v37 = vld [vmem:[%s16086_s5 + $0x70] sm:$0xff]  }
 0x27a   : > { %6021 = vmatprep.mubr.bf16.mxu1 %v20088_v3  ;;  %v17259_v63 = vcombine.low %v5898_v32, %v5901_v8  ;;  %v13273_v8 = vrot.slane %v307_v26, 9  ;;  %v15669_v26 = vld [vmem:[%s16086_s5 + $0x118] sm:$0xff]  }
 0x27b   : > { %v5913_v21 = vrot.slane %v5911_v2, 4 }
 0x27c   : > { %v5912_v15 = vsel %vm16109_vm4, %v13273_v8, %v5911_v2  ;;  %v15668_v2 = vld [vmem:[%s16086_s5 + $0xfc] sm:$0xff]   ;;  %v15673_v8 = vld [vmem:[%s16086_s5 + $0x188] sm:$0xff]  }
 0x27d   : > { %12941 = vmatmul.mubr.msk.bf16.gmra.mrb[196].mxu0 %vm703_vm1, %v15660_v27  ;;  %v306_v27 = vld [vmem:[%s16086_s5 + $0x1d0] sm:$0x1] }
 0x27e   : > { %1906 = vmatprep.mubr.bf16.mxu0 %v20088_v3  ;;  %v5907_v18 = vrot.slane %v306_v27, 5 }
 0x280   : > { %v5908_v35 = vsel %vm16109_vm4, %v5906_v54, %v5907_v18  ;;  %v15664_v18 = vld [vmem:[%s16086_s5 + $0x8c] sm:$0xff]  }
 0x281   : > { %13284 = vmatmul.mubr.msk.bf16.gmra.mrb[72].mxu1 %vm703_vm1, %v17244_v1  ;;  %v17274_v32 = vcombine.low %v5905_v23, %v5908_v35  ;;  %v15666_v23 = vld [vmem:[%s16086_s5 + $0xc4] sm:$0xff]  }
 0x282   : > { %6031 = vmatprep.mubr.bf16.mxu1 %v20088_v3  ;;  %v15667_v35 = vld [vmem:[%s16086_s5 + $0xe0] sm:$0xff]  }
 0x285   : > { %12942 = vmatmul.mubr.msk.bf16.gmra.mrb[200].mxu0 %vm703_vm1, %v15661_v31  ;;  %v309_v31 = vld [vmem:[%s16086_s5 + $0x1ec] sm:$0x1] }
 0x286   : > { %1916 = vmatprep.mubr.bf16.mxu0 %v20088_v3  ;;  %v5914_v27 = vrot.slane %v309_v31, 5  ;;  %v15670_v31 = vld [vmem:[%s16086_s5 + $0x134] sm:$0xff]  }
 0x288   : > { %v5915_v4 = vsel %vm16109_vm4, %v5913_v21, %v5914_v27  ;;  %v15674_v21 = vld [vmem:[%s16086_s5 + $0x1a4] sm:$0xff]   ;;  %v7444_v27 = vsel %vm752_vm0, %v17226_v46, 0 }
 0x289   : > { %13285 = vmatmul.mubr.msk.bf16.gmra.mrb[76].mxu1 %vm703_vm1, %v17259_v63  ;;  %v17286_v54 = vcombine.low %v5912_v15, %v5915_v4  ;;  %v3306_v15 = vsel %vm752_vm0, %v17221_v41, 0  ;;  %v17364_v4 = vld.sshfl [vmem:[#allocation5 + $0x2c] sm:$0x33 pattern:$0x76325410]  ;;  %v15676_v41 = vld [vmem:[%s16086_s5 + $0x214] sm:$0xff]  }
 0x28a   : > { %6041 = vmatprep.mubr.bf16.mxu1 %v20088_v3  ;;  %v3734_v46 = vcombine.high %v17364_v4, %v17364_v4 }
 0x28d   : > { %12943 = vmatmul.mubr.msk.bf16.gmra.mrb[204].mxu0 %vm703_vm1, %v15662_v22  ;;  %v15665_v22 = vld [vmem:[%s16086_s5 + $0xa8] sm:$0xff]  }
 0x28e   : > { %1926 = vmatprep.mubr.bf16.mxu0 %v20088_v3 }
 0x291   : > { %13286 = vmatmul.mubr.msk.bf16.gmra.mrb[80].mxu1 %vm703_vm1, %v17274_v32 }
 0x292   : > { %6051 = vmatprep.mubr.bf16.mxu1 %v20088_v3 }
 0x295   : > { %12944 = vmatmul.mubr.msk.bf16.gmra.mrb[208].mxu0 %vm703_vm1, %v15663_v37  ;;  %v15675_v37 = vld [vmem:[%s16086_s5 + $0x1f8] sm:$0xff]  }
 0x296   : > { %1936 = vmatprep.mubr.bf16.mxu0 %v20088_v3 }
 0x299   : > { %13287 = vmatmul.mubr.msk.bf16.gmra.mrb[84].mxu1 %vm703_vm1, %v17286_v54 }
 0x29a   : > { %6061 = vmatprep.mubr.bf16.mxu1 %v20088_v3 }
 0x29d   : > { %12945 = vmatmul.mubr.msk.bf16.gmra.mrb[212].mxu0 %vm703_vm1, %v15664_v18 }
 0x29e   : > { %1946 = vmatprep.mubr.bf16.mxu0 %v20088_v3 }
 0x2a1   : > { %13288 = vmatmul.mubr.msk.bf16.gmra.mrb[88].mxu1 %vm703_vm1, %v16126_v51 }
 0x2a2   : > { %6071 = vmatprep.mubr.bf16.mxu1 %v20088_v3 }
 0x2a5   : > { %12946 = vmatmul.mubr.msk.bf16.gmra.mrb[216].mxu0 %vm703_vm1, %v15665_v22  ;;  %v15677_v22 = vld [vmem:[%s16086_s5 + $0x230] sm:$0xff]  }
 0x2a6   : > { %1956 = vmatprep.mubr.bf16.mxu0 %v20088_v3 }
 0x2a9   : > { %13289 = vmatmul.mubr.msk.bf16.gmra.mrb[92].mxu1 %vm703_vm1, %v16143_v60 }
 0x2aa   : > { %6081 = vmatprep.mubr.bf16.mxu1 %v20088_v3 }
 0x2ad   : > { %12947 = vmatmul.mubr.msk.bf16.gmra.mrb[220].mxu0 %vm703_vm1, %v15666_v23  ;;  %v359_v23 = vld [vmem:[%s16086_s5 + $0x3c4] sm:$0xf] }
 0x2ae   : > { %1966 = vmatprep.mubr.bf16.mxu0 %v20088_v3 }
 0x2b1   : > { %13290 = vmatmul.mubr.msk.bf16.gmra.mrb[96].mxu1 %vm703_vm1, %v16158_v9 }
 0x2b2   : > { %6091 = vmatprep.mubr.bf16.mxu1 %v20088_v3 }
 0x2b5   : > { %12948 = vmatmul.mubr.msk.bf16.gmra.mrb[224].mxu0 %vm703_vm1, %v15667_v35  ;;  %v15683_v35 = vld [vmem:[%s16086_s5 + $0x2d8] sm:$0xff]  }
 0x2b6   : > { %1976 = vmatprep.mubr.bf16.mxu0 %v20088_v3 }
 0x2b9   : > { %13291 = vmatmul.mubr.msk.bf16.gmra.mrb[100].mxu1 %vm703_vm1, %v16173_v25 }
 0x2ba   : > { %6101 = vmatprep.mubr.bf16.mxu1 %v20088_v3 }
 0x2bd   : > { %12949 = vmatmul.mubr.msk.bf16.gmra.mrb[228].mxu0 %vm703_vm1, %v15668_v2  ;;  %v6246_v2 = vrot.slane %v359_v23, 5 }
 0x2be   : > { %1986 = vmatprep.mubr.bf16.mxu0 %v20088_v3 }
 0x2c1   : > { %13292 = vmatmul.mubr.msk.bf16.gmra.mrb[104].mxu1 %vm703_vm1, %v16188_v39  ;;  %v15671_v39 = vld [vmem:[%s16086_s5 + $0x150] sm:$0xff]  }
 0x2c2   : > { %6111 = vmatprep.mubr.bf16.mxu1 %v20088_v3 }
 0x2c5   : > { %12950 = vmatmul.mubr.msk.bf16.gmra.mrb[232].mxu0 %vm703_vm1, %v15669_v26  ;;  %v358_v26 = vld [vmem:[%s16086_s5 + $0x3c0] sm:$0xe] }
 0x2c6   : > { %1996 = vmatprep.mubr.bf16.mxu0 %v20088_v3 }
 0x2c9   : > { %13293 = vmatmul.mubr.msk.bf16.gmra.mrb[108].mxu1 %vm703_vm1, %v16215_v56  ;;  %v15672_v56 = vld [vmem:[%s16086_s5 + $0x16c] sm:$0xff]  }
 0x2ca   : > { %6121 = vmatprep.mubr.bf16.mxu1 %v20088_v3 }
 0x2cd   : > { %12951 = vmatmul.mubr.msk.bf16.gmra.mrb[236].mxu0 %vm703_vm1, %v15670_v31  ;;  %v360_v31 = vld [vmem:[%s16086_s5 + $0x3c8] sm:$0x1] }
 0x2ce   : > { %2006 = vmatprep.mubr.bf16.mxu0 %v20088_v3 }
 0x2d1   : > { %13294 = vmatmul.mubr.msk.bf16.gmra.mrb[112].mxu1 %vm703_vm1, %v16233_v7 }
 0x2d2   : > { %6131 = vmatprep.mubr.bf16.mxu1 %v20088_v3 }
 0x2d5   : > { %12952 = vmatmul.mubr.msk.bf16.gmra.mrb[240].mxu0 %vm703_vm1, %v15671_v39  ;;  %v13298_v39 = vrot.slane %v358_v26, 9  ;;  %v364_v26 = vld [vmem:[%s16086_s5 + $0x3f8] sm:$0xe] }
 0x2d6   : > { %2016 = vmatprep.mubr.bf16.mxu0 %v20088_v3 }
 0x2d9   : > { %13295 = vmatmul.mubr.msk.bf16.gmra.mrb[116].mxu1 %vm703_vm1, %v16249_v33 }
 0x2da   : > { %6141 = vmatprep.mubr.bf16.mxu1 %v20088_v3 }
 0x2dd   : > { %12953 = vmatmul.mubr.msk.bf16.gmra.mrb[244].mxu0 %vm703_vm1, %v15672_v56  ;;  %v6248_v56 = vrot.slane %v6246_v2, 4 }
 0x2de   : > { %2026 = vmatprep.mubr.bf16.mxu0 %v20088_v3 }
 0x2e1   : > { %13296 = vmatmul.mubr.msk.bf16.gmra.mrb[120].mxu1 %vm703_vm1, %v16264_v47 }
 0x2e2   : > { %6151 = vmatprep.mubr.bf16.mxu1 %v20088_v3 }
 0x2e5   : > { %12954 = vmatmul.mubr.msk.bf16.gmra.mrb[248].mxu0 %vm703_vm1, %v15673_v8  ;;  %v6249_v8 = vrot.slane %v360_v31, 5  ;;  %v366_v31 = vld [vmem:[%s16086_s5 + $0x400] sm:$0x1] }
 0x2e6   : > { %2036 = vmatprep.mubr.bf16.mxu0 %v20088_v3 }
 0x2e9   : > { %13297 = vmatmul.mubr.msk.bf16.gmra.mrb[124].mxu1 %vm703_vm1, %v16279_v62 }
 0x2ea   : > { %6371 = vmatprep.mubr.bf16.mxu1 %v20088_v3 }
 0x2ed   : > { %12955 = vmatmul.mubr.msk.bf16.gmra.mrb[252].mxu0 %vm703_vm1, %v15674_v21  ;;  %v362_v21 = vld [vmem:[%s16086_s5 + $0x3e0] sm:$0xf] }
 0x2ee   : > { %2288 = vmatprep.mubr.bf16.mxu0 %v20088_v3 }
 0x2f1   : > { %13312 = vmatmul.mubr.msk.bf16.vlgmr.msra.gmra.mrb[64].mxu1 %vm703_vm1, %v16233_v7  ;;  %v17369_v7 = vld.sshfl [vmem:[#allocation5 + $0x58] sm:$0x33 pattern:$0x76325410] }
 0x2f2   : > { %7450 = vmatpush1.bf16.msra.mxu1 %v7444_v27  ;;  %6381 = vmatprep.mubr.bf16.mxu1 %v20088_v3  ;;  %v7794_v18 = vcombine.high %v17369_v7, %v17369_v7  ;;  %v15684_v27 = vld [vmem:[%s16086_s5 + $0x2f4] sm:$0xff]  }
 0x2f4   : > { %13431 = vmatprep.subr.msk.bf16.mxu1 %vm752_vm0, %v7794_v18  ;;  %v361_v18 = vld [vmem:[%s16086_s5 + $0x3dc] sm:$0xe] }
 0x2f5   : > { %12974 = vmatmul.mubr.msk.bf16.vlgmr.msra.gmra.mrb[192].mxu0 %vm703_vm1, %v15675_v37  ;;  %v6247_v37 = vsel %vm16109_vm4, %v13298_v39, %v6246_v2 }
 0x2f6   : > { %3312 = vmatpush1.bf16.msra.mxu0 %v3306_v15  ;;  %2298 = vmatprep.mubr.bf16.mxu0 %v20088_v3  ;;  %v6250_v15 = vsel %vm16109_vm4, %v6248_v56, %v6249_v8  ;;  %v13300_v56 = vrot.slane %v364_v26, 9 }
 0x2f7   : > { %13099 = vmatprep.subr.msk.bf16.mxu0 %vm752_vm0, %v3734_v46  ;;  %v6253_v46 = vrot.slane %v362_v21, 5  ;;  %v6263_v21 = vrot.slane %v366_v31, 5 }
 0x2f9   : > { %13313 = vmatmul.mubr.msk.bf16.gmra.mrb[68].mxu1 %vm703_vm1, %v16249_v33  ;;  %v15678_v33 = vld [vmem:[%s16086_s5 + $0x24c] sm:$0xff]  }
 0x2fa   : > { %6391 = vmatprep.mubr.bf16.mxu1 %v20088_v3 }
 0x2fd   : > { %12975 = vmatmul.mubr.msk.bf16.gmra.mrb[196].mxu0 %vm703_vm1, %v15676_v41  ;;  %v363_v41 = vld [vmem:[%s16086_s5 + $0x3e4] sm:$0x1] }
 0x2fe   : > { %2308 = vmatprep.mubr.bf16.mxu0 %v20088_v3 }
 0x301   : > { %13314 = vmatmul.mubr.msk.bf16.gmra.mrb[72].mxu1 %vm703_vm1, %v16264_v47  ;;  %v15679_v47 = vld [vmem:[%s16086_s5 + $0x268] sm:$0xff]  }
 0x302   : > { %6401 = vmatprep.mubr.bf16.mxu1 %v20088_v3 }
 0x305   : > { %12976 = vmatmul.mubr.msk.bf16.gmra.mrb[200].mxu0 %vm703_vm1, %v15677_v22  ;;  %v17438_v22 = vcombine.low %v6247_v37, %v6250_v15  ;;  %v15686_v37 = vld [vmem:[%s16086_s5 + $0x32c] sm:$0xff]  }
 0x306   : > { %2318 = vmatprep.mubr.bf16.mxu0 %v20088_v3 }
 0x309   : > { %13315 = vmatmul.mubr.msk.bf16.gmra.mrb[76].mxu1 %vm703_vm1, %v16279_v62  ;;  %v15680_v62 = vld [vmem:[%s16086_s5 + $0x284] sm:$0xff]  }
 0x30a   : > { %6411 = vmatprep.mubr.bf16.mxu1 %v20088_v3 }
 0x30d   : > { %12977 = vmatmul.mubr.msk.bf16.gmra.mrb[204].mxu0 %vm703_vm1, %v15678_v33  ;;  %v13299_v33 = vrot.slane %v361_v18, 9 }
 0x30e   : > { %2328 = vmatprep.mubr.bf16.mxu0 %v20088_v3 }
 0x30f   : > { %v6254_v23 = vsel %vm16109_vm4, %v13299_v33, %v6253_v46  ;;  %v369_v33 = vld [vmem:[%s16086_s5 + $0x41c] sm:$0x1] }
 0x311   : > { %13316 = vmatmul.mubr.msk.bf16.gmra.mrb[80].mxu1 %vm703_vm1, %v16293_v11  ;;  %v15681_v11 = vld [vmem:[%s16086_s5 + $0x2a0] sm:$0xff]  }
 0x312   : > { %6421 = vmatprep.mubr.bf16.mxu1 %v20088_v3 }
 0x315   : > { %12978 = vmatmul.mubr.msk.bf16.gmra.mrb[208].mxu0 %vm703_vm1, %v15679_v47  ;;  %v6255_v47 = vrot.slane %v6253_v46, 4 }
 0x316   : > { %2338 = vmatprep.mubr.bf16.mxu0 %v20088_v3 }
 0x319   : > { %13317 = vmatmul.mubr.msk.bf16.gmra.mrb[84].mxu1 %vm703_vm1, %v16309_v34  ;;  %v15682_v34 = vld [vmem:[%s16086_s5 + $0x2bc] sm:$0xff]  }
 0x31a   : > { %6431 = vmatprep.mubr.bf16.mxu1 %v20088_v3 }
 0x31d   : > { %12979 = vmatmul.mubr.msk.bf16.gmra.mrb[212].mxu0 %vm703_vm1, %v15680_v62  ;;  %v6256_v62 = vrot.slane %v363_v41, 5  ;;  %v367_v41 = vld [vmem:[%s16086_s5 + $0x414] sm:$0xe] }
 0x31e   : > { %2348 = vmatprep.mubr.bf16.mxu0 %v20088_v3 }
 0x321   : > { %13318 = vmatmul.mubr.msk.bf16.gmra.mrb[88].mxu1 %vm703_vm1, %v16322_v43 }
 0x322   : > { %6441 = vmatprep.mubr.bf16.mxu1 %v20088_v3 }
 0x325   : > { %12980 = vmatmul.mubr.msk.bf16.gmra.mrb[216].mxu0 %vm703_vm1, %v15681_v11  ;;  %v365_v11 = vld [vmem:[%s16086_s5 + $0x3fc] sm:$0xf] }
 0x326   : > { %2358 = vmatprep.mubr.bf16.mxu0 %v20088_v3  ;;  %v6260_v2 = vrot.slane %v365_v11, 5 }
 0x328   : > { %v6262_v8 = vrot.slane %v6260_v2, 4  ;;  %v6261_v15 = vsel %vm16109_vm4, %v13300_v56, %v6260_v2  ;;  %v370_v56 = vld [vmem:[%s16086_s5 + $0x430] sm:$0xe] }
 0x329   : > { %13319 = vmatmul.mubr.msk.bf16.gmra.mrb[92].mxu1 %vm703_vm1, %v16337_v57 }
 0x32a   : > { %6451 = vmatprep.mubr.bf16.mxu1 %v20088_v3  ;;  %v6264_v46 = vsel %vm16109_vm4, %v6262_v8, %v6263_v21  ;;  %v372_v8 = vld [vmem:[%s16086_s5 + $0x438] sm:$0x1] }
 0x32d   : > { %12981 = vmatmul.mubr.msk.bf16.gmra.mrb[220].mxu0 %vm703_vm1, %v15682_v34  ;;  %v15685_v34 = vld [vmem:[%s16086_s5 + $0x310] sm:$0xff]  }
 0x32e   : > { %2368 = vmatprep.mubr.bf16.mxu0 %v20088_v3 }
 0x331   : > { %13320 = vmatmul.mubr.msk.bf16.gmra.mrb[96].mxu1 %vm703_vm1, %v16353_v13 }
 0x332   : > { %6461 = vmatprep.mubr.bf16.mxu1 %v20088_v3 }
 0x335   : > { %12982 = vmatmul.mubr.msk.bf16.gmra.mrb[224].mxu0 %vm703_vm1, %v15683_v35  ;;  %v6257_v35 = vsel %vm16109_vm4, %v6255_v47, %v6256_v62  ;;  %v17468_v47 = vcombine.low %v6261_v15, %v6264_v46  ;;  %v13301_v62 = vrot.slane %v367_v41, 9  ;;  %v6277_v15 = vrot.slane %v372_v8, 5  ;;  %v374_v46 = vld [vmem:[%s16086_s5 + $0x450] sm:$0xf] }
 0x336   : > { %2378 = vmatprep.mubr.bf16.mxu0 %v20088_v3  ;;  %v17453_v39 = vcombine.low %v6254_v23, %v6257_v35  ;;  %v371_v23 = vld [vmem:[%s16086_s5 + $0x434] sm:$0xf]  ;;  %v15687_v35 = vld [vmem:[%s16086_s5 + $0x348] sm:$0xff]  }
 0x337   : > { %v6274_v31 = vrot.slane %v371_v23, 5 }
 0x339   : > { %13321 = vmatmul.mubr.msk.bf16.gmra.mrb[100].mxu1 %vm703_vm1, %v16373_v38 }
 0x33a   : > { %6471 = vmatprep.mubr.bf16.mxu1 %v20088_v3 }
 0x33d   : > { %12983 = vmatmul.mubr.msk.bf16.gmra.mrb[228].mxu0 %vm703_vm1, %v15684_v27  ;;  %v368_v27 = vld [vmem:[%s16086_s5 + $0x418] sm:$0xf] }
 0x33e   : > { %2388 = vmatprep.mubr.bf16.mxu0 %v20088_v3  ;;  %v6267_v18 = vrot.slane %v368_v27, 5  ;;  %v13302_v27 = vrot.slane %v370_v56, 9  ;;  %v257_v56 = vld [vmem:[%s16086_s5 + $0xc] sm:$0xf] }
 0x340   : > { %v6269_v11 = vrot.slane %v6267_v18, 4  ;;  %v6268_v2 = vsel %vm16109_vm4, %v13301_v62, %v6267_v18  ;;  %v15688_v18 = vld [vmem:[%s16086_s5 + $0x364] sm:$0xff]   ;;  %v6275_v41 = vsel %vm16109_vm4, %v13302_v27, %v6274_v31  ;;  %v6281_v62 = vrot.slane %v374_v46, 5  ;;  %v2916_v46 = vld [vmem:[%s16086_s5 + $0xac] sm:$0xf] }
 0x341   : > { %13322 = vmatmul.mubr.msk.bf16.gmra.mrb[104].mxu1 %vm703_vm1, %v17438_v22 }
 0x342   : > { %6481 = vmatprep.mubr.bf16.mxu1 %v20088_v3 }
 0x345   : > { %12984 = vmatmul.mubr.msk.bf16.gmra.mrb[232].mxu0 %vm703_vm1, %v15685_v34  ;;  %v6270_v34 = vrot.slane %v369_v33, 5 }
 0x346   : > { %2398 = vmatprep.mubr.bf16.mxu0 %v20088_v3 }
 0x347   : > { %v6271_v26 = vsel %vm16109_vm4, %v6269_v11, %v6270_v34  ;;  %v373_v11 = vld [vmem:[%s16086_s5 + $0x44c] sm:$0xe]  ;;  %v375_v34 = vld [vmem:[%s16086_s5 + $0x454] sm:$0x1] }
 0x348   : > { %v17483_v21 = vcombine.low %v6268_v2, %v6271_v26  ;;  %v6283_v2 = vrot.slane %v6281_v62, 4  ;;  %v6284_v26 = vrot.slane %v375_v34, 5 }
 0x349   : > { %13323 = vmatmul.mubr.msk.bf16.gmra.mrb[108].mxu1 %vm703_vm1, %v17453_v39 }
 0x34a   : > { %6491 = vmatprep.mubr.bf16.mxu1 %v20088_v3  ;;  %v6285_v27 = vsel %vm16109_vm4, %v6283_v2, %v6284_v26  ;;  %v260_v2 = vld [vmem:[%s16086_s5 + $0x28] sm:$0xf]  ;;  %v15690_v26 = vld [vmem:[%s16086_s5 + $0x39c] sm:$0xff]  }
 0x34d   : > { %12985 = vmatmul.mubr.msk.bf16.gmra.mrb[236].mxu0 %vm703_vm1, %v15686_v37  ;;  %v6276_v37 = vrot.slane %v6274_v31, 4  ;;  %v15689_v31 = vld [vmem:[%s16086_s5 + $0x380] sm:$0xff]  }
 0x34e   : > { %2408 = vmatprep.mubr.bf16.mxu0 %v20088_v3 }
 0x34f   : > { %v6278_v33 = vsel %vm16109_vm4, %v6276_v37, %v6277_v15  ;;  %v256_v37 = vld [vmem:[%s16086_s5 + $0x8] sm:$0xe]  ;;  %v7356_v15 = vrot.slane %v257_v56, 5 }
 0x350   : > { %v17498_v23 = vcombine.low %v6275_v41, %v6278_v33  ;;  %v13388_v33 = vrot.slane %v256_v37, 9 }
 0x351   : > { %13324 = vmatmul.mubr.msk.bf16.gmra.mrb[112].mxu1 %vm703_vm1, %v17468_v47  ;;  %v7358_v34 = vrot.slane %v7356_v15, 4 }
 0x352   : > { %6501 = vmatprep.mubr.bf16.mxu1 %v20088_v3 }
 0x355   : > { %12986 = vmatmul.mubr.msk.bf16.gmra.mrb[240].mxu0 %vm703_vm1, %v15687_v35  ;;  %v13303_v35 = vrot.slane %v373_v11, 9  ;;  %v3088_v11 = vrot.slane %v2916_v46, 7 }
 0x356   : > { %2418 = vmatprep.mubr.bf16.mxu0 %v20088_v3 }
 0x357   : > { %v6282_v8 = vsel %vm16109_vm4, %v13303_v35, %v6281_v62  ;;  %v2915_v62 = vld [vmem:[%s16086_s5 + $0xa8] sm:$0x8]  ;;  %v2917_v35 = vld [vmem:[%s16086_s5 + $0xb0] sm:$0x7] }
 0x358   : > { %v17514_v41 = vcombine.low %v6282_v8, %v6285_v27  ;;  %v13024_v56 = vrot.slane %v2915_v62, 11  ;;  %v3091_v8 = vrot.slane %v2917_v35, 7  ;;  %v7357_v27 = vsel %vm16109_vm4, %v13388_v33, %v7356_v15  ;;  %v2919_v62 = vld [vmem:[%s16086_s5 + $0xc8] sm:$0xf] }
 0x359   : > { %13325 = vmatmul.mubr.msk.bf16.gmra.mrb[116].mxu1 %vm703_vm1, %v17483_v21  ;;  %v3095_v42 = vrot.slane %v2919_v62, 7 }
 0x35a   : > { %6511 = vmatprep.mubr.bf16.mxu1 %v20088_v3  ;;  %v3089_v15 = vsel %vm17528_vm9, %v13024_v56, %v3088_v11  ;;  %v13025_v56 = vrot.slane %v2918_v5, 11 }
 0x35d   : > { %12987 = vmatmul.mubr.msk.bf16.gmra.mrb[244].mxu0 %vm703_vm1, %v15688_v18  ;;  %v258_v18 = vld [vmem:[%s16086_s5 + $0x10] sm:$0x1] }
 0x35e   : > { %2428 = vmatprep.mubr.bf16.mxu0 %v20088_v3  ;;  %v7359_v10 = vrot.slane %v258_v18, 5  ;;  %v7363_v18 = vrot.slane %v260_v2, 5  ;;  %v7366_v2 = vrot.slane %v261_v59, 5 }
 0x360   : > { %v7360_v37 = vsel %vm16109_vm4, %v7358_v34, %v7359_v10  ;;  %v263_v10 = vld [vmem:[%s16086_s5 + $0x44] sm:$0xf]  ;;  %v13389_v34 = vrot.slane %v259_v12, 9  ;;  %v7365_v58 = vrot.slane %v7363_v18, 4 }
 0x361   : > { %13326 = vmatmul.mubr.msk.bf16.gmra.mrb[120].mxu1 %vm703_vm1, %v17498_v23  ;;  %v13394_v35 = vcombine.low %v7357_v27, %v7360_v37  ;;  %v2920_v27 = vld [vmem:[%s16086_s5 + $0xcc] sm:$0x7]  ;;  %v7370_v37 = vrot.slane %v263_v10, 5  ;;  %v264_v10 = vld [vmem:[%s16086_s5 + $0x48] sm:$0x1] }
 0x362   : > { %6521 = vmatprep.mubr.bf16.mxu1 %v20088_v3  ;;  %v7364_v59 = vsel %vm16109_vm4, %v13389_v34, %v7363_v18  ;;  %v7367_v12 = vsel %vm16109_vm4, %v7365_v58, %v7366_v2  ;;  %v3098_v62 = vrot.slane %v2920_v27, 7  ;;  %v3096_v18 = vsel %vm17528_vm9, %v13025_v56, %v3095_v42  ;;  %v2921_v34 = vld [vmem:[%s16086_s5 + $0xe0] sm:$0x8] }
 0x365   : > { %12988 = vmatmul.mubr.msk.bf16.gmra.mrb[248].mxu0 %vm703_vm1, %v15689_v31  ;;  %v3090_v31 = vrot.slane %v3088_v11, 4 }
 0x366   : > { %2438 = vmatprep.mubr.bf16.mxu0 %v20088_v3 }
 0x367   : > { %v3092_v33 = vsel %vm17528_vm9, %v3090_v31, %v3091_v8  ;;  %v262_v31 = vld [vmem:[%s16086_s5 + $0x40] sm:$0xe]  ;;  %v3097_v8 = vrot.slane %v3095_v42, 4 }
 0x368   : > { %v13040_v11 = vcombine.low %v3089_v15, %v3092_v33  ;;  %v13390_v5 = vrot.slane %v262_v31, 9  ;;  %v7372_v15 = vrot.slane %v7370_v37, 4  ;;  %v13395_v33 = vcombine.low %v7364_v59, %v7367_v12  ;;  %v2923_v31 = vld [vmem:[%s16086_s5 + $0xe8] sm:$0x7]  ;;  %v266_v42 = vld [vmem:[%s16086_s5 + $0x60] sm:$0xf] }
 0x369   : > { %13327 = vmatmul.mubr.msk.bf16.gmra.mrb[124].mxu1 %vm703_vm1, %v17514_v41  ;;  %v3099_v58 = vsel %vm17528_vm9, %v3097_v8, %v3098_v62  ;;  %v13026_v8 = vrot.slane %v2921_v34, 11 }
 0x36a   : > { %7481 = vmatprep.mubr.bf16.mxu1 %v20088_v3  ;;  %v13041_v59 = vcombine.low %v3096_v18, %v3099_v58  ;;  %v7371_v12 = vsel %vm16109_vm4, %v13390_v5, %v7370_v37  ;;  %v2925_v18 = vld [vmem:[%s16086_s5 + $0x100] sm:$0xf] }
 0x36d   : > { %12989 = vmatmul.mubr.msk.bf16.gmra.mrb[252].mxu0 %vm703_vm1, %v15690_v26  ;;  %v7814_v26 = vsel %vm752_vm0, %v17369_v7, 0  ;;  %v3772_v7 = vsel %vm752_vm0, %v17364_v4, 0  ;;  %v7373_v4 = vrot.slane %v264_v10, 5  ;;  %v3105_v10 = vrot.slane %v2923_v31, 7  ;;  %v2924_v31 = vld [vmem:[%s16086_s5 + $0xfc] sm:$0x8] }
 0x36e   : > { %3343 = vmatprep.mubr.bf16.mxu0 %v20088_v3 }
 0x36f   : > { %v7374_v62 = vsel %vm16109_vm4, %v7372_v15, %v7373_v4 }
 0x370   : > { %v13396_v37 = vcombine.low %v7371_v12, %v7374_v62  ;;  %v13027_v12 = vrot.slane %v2924_v31, 11  ;;  %v2929_v31 = vld [vmem:[%s16086_s5 + $0x120] sm:$0x7] }
 0x371   : > { %13402 = vmatmul.mubr.msk.bf16.vlgmr.msra.gmra.mrb[0].mxu1 %vm703_vm1, %v13394_v35  ;;  %v2922_v35 = vld [vmem:[%s16086_s5 + $0xe4] sm:$0xf] }
 0x372   : > { %7820 = vmatpush1.bf16.msra.mxu1 %v7814_v26  ;;  %7491 = vmatprep.mubr.bf16.mxu1 %v20088_v3  ;;  %v17561_v26 = vld.sshfl [vmem:[#allocation5 + $0x34] sm:$0x33 pattern:$0x76325410]  ;;  %v3102_v2 = vrot.slane %v2922_v35, 7 }
 0x373   : > { %v4200_v27 = vcombine.high %v17561_v26, %v17561_v26  ;;  %v265_v35 = vld [vmem:[%s16086_s5 + $0x5c] sm:$0xe] }
 0x374   : > { %v3103_v5 = vsel %vm17528_vm9, %v13026_v8, %v3102_v2  ;;  %v13391_v34 = vrot.slane %v265_v35, 9  ;;  %v7384_v35 = vrot.slane %v269_v40, 5  ;;  %v2927_v40 = vld [vmem:[%s16086_s5 + $0x118] sm:$0x8] }
 0x375   : > { %13058 = vmatmul.mubr.msk.bf16.vlgmr.msra.gmra.mrb[128].mxu0 %vm703_vm1, %v13040_v11  ;;  %v17568_v11 = vld.sshfl [vmem:[#allocation5 + $0x8] sm:$0x33 pattern:$0x76325410] }
 0x376   : > { %3778 = vmatpush1.bf16.msra.mxu0 %v3772_v7  ;;  %3353 = vmatprep.mubr.bf16.mxu0 %v20088_v3  ;;  %v8222_v56 = vcombine.high %v17568_v11, %v17568_v11  ;;  %v3104_v7 = vrot.slane %v3102_v2, 4 }
 0x377   : > { %13141 = vmatprep.subr.msk.bf16.mxu0 %vm752_vm0, %v4200_v27  ;;  %v7377_v27 = vrot.slane %v266_v42, 5  ;;  %v3109_v42 = vrot.slane %v2925_v18, 7  ;;  %v2928_v18 = vld [vmem:[%s16086_s5 + $0x11c] sm:$0xf] }
 0x378   : > { %13465 = vmatprep.subr.msk.bf16.mxu1 %vm752_vm0, %v8222_v56  ;;  %v3106_v15 = vsel %vm17528_vm9, %v3104_v7, %v3105_v10  ;;  %v2926_v56 = vld [vmem:[%s16086_s5 + $0x104] sm:$0x7]  ;;  %v268_v10 = vld [vmem:[%s16086_s5 + $0x78] sm:$0xe] }
 0x379   : > { %13403 = vmatmul.mubr.msk.bf16.gmra.mrb[4].mxu1 %vm703_vm1, %v13395_v33  ;;  %v267_v33 = vld [vmem:[%s16086_s5 + $0x64] sm:$0x1]  ;;  %v7379_v58 = vrot.slane %v7377_v27, 4  ;;  %v7378_v2 = vsel %vm16109_vm4, %v13391_v34, %v7377_v27  ;;  %v3111_v62 = vrot.slane %v3109_v42, 4  ;;  %v3112_v7 = vrot.slane %v2926_v56, 7 }
 0x37a   : > { %7501 = vmatprep.mubr.bf16.mxu1 %v20088_v3  ;;  %v7380_v4 = vrot.slane %v267_v33, 5  ;;  %v270_v33 = vld [vmem:[%s16086_s5 + $0x80] sm:$0x1]  ;;  %v3110_v27 = vsel %vm17528_vm9, %v13027_v12, %v3109_v42  ;;  %v272_v56 = vld [vmem:[%s16086_s5 + $0x98] sm:$0xf] }
 0x37b   : > { %v3113_v34 = vsel %vm17528_vm9, %v3111_v62, %v3112_v7  ;;  %v3119_v62 = vrot.slane %v2929_v31, 7  ;;  %v271_v7 = vld [vmem:[%s16086_s5 + $0x94] sm:$0xe]  ;;  %v2932_v31 = vld [vmem:[%s16086_s5 + $0x13c] sm:$0x7] }
 0x37c   : > { %v7381_v8 = vsel %vm16109_vm4, %v7379_v58, %v7380_v4  ;;  %v7387_v58 = vrot.slane %v270_v33, 5  ;;  %v3116_v4 = vrot.slane %v2928_v18, 7  ;;  %v273_v33 = vld [vmem:[%s16086_s5 + $0x9c] sm:$0x1]  ;;  %v2931_v18 = vld [vmem:[%s16086_s5 + $0x138] sm:$0xf] }
 0x37d   : > { %13059 = vmatmul.mubr.msk.bf16.gmra.mrb[132].mxu0 %vm703_vm1, %v13041_v59  ;;  %v13042_v59 = vcombine.low %v3103_v5, %v3106_v15  ;;  %v13392_v5 = vrot.slane %v268_v10, 9  ;;  %v7386_v15 = vrot.slane %v7384_v35, 4  ;;  %v7391_v10 = vrot.slane %v272_v56, 5  ;;  %v275_v56 = vld [vmem:[%s16086_s5 + $0xb4] sm:$0xf] }
 0x37e   : > { %3363 = vmatprep.mubr.bf16.mxu0 %v20088_v3 }
 0x37f   : > { %v7385_v42 = vsel %vm16109_vm4, %v13392_v5, %v7384_v35  ;;  %v7388_v12 = vsel %vm16109_vm4, %v7386_v15, %v7387_v58  ;;  %v7394_v15 = vrot.slane %v273_v33, 5  ;;  %v2930_v58 = vld [vmem:[%s16086_s5 + $0x134] sm:$0x8]  ;;  %v276_v33 = vld [vmem:[%s16086_s5 + $0xb8] sm:$0x1] }
 0x381   : > { %13404 = vmatmul.mubr.msk.bf16.gmra.mrb[8].mxu1 %vm703_vm1, %v13396_v37  ;;  %v13397_v37 = vcombine.low %v7378_v2, %v7381_v8  ;;  %v13028_v2 = vrot.slane %v2927_v40, 11  ;;  %v3118_v8 = vrot.slane %v3116_v4, 4  ;;  %v3123_v40 = vrot.slane %v2931_v18, 7  ;;  %v2934_v18 = vld [vmem:[%s16086_s5 + $0x154] sm:$0xf] }
 0x382   : > { %7511 = vmatprep.mubr.bf16.mxu1 %v20088_v3 }
 0x383   : > { %v3117_v35 = vsel %vm17528_vm9, %v13028_v2, %v3116_v4  ;;  %v3120_v5 = vsel %vm17528_vm9, %v3118_v8, %v3119_v62  ;;  %v3126_v8 = vrot.slane %v2932_v31, 7  ;;  %v274_v62 = vld [vmem:[%s16086_s5 + $0xb0] sm:$0xe]  ;;  %v2935_v31 = vld [vmem:[%s16086_s5 + $0x158] sm:$0x7] }
 0x385   : > { %13060 = vmatmul.mubr.msk.bf16.gmra.mrb[136].mxu0 %vm703_vm1, %v13042_v59  ;;  %v13043_v59 = vcombine.low %v3110_v27, %v3113_v34  ;;  %v13393_v27 = vrot.slane %v271_v7, 9  ;;  %v7393_v34 = vrot.slane %v7391_v10, 4  ;;  %v6616_v7 = vrot.slane %v275_v56, 5  ;;  %v278_v56 = vld [vmem:[%s16086_s5 + $0xd0] sm:$0xf] }
 0x386   : > { %3373 = vmatprep.mubr.bf16.mxu0 %v20088_v3 }
 0x387   : > { %v7392_v4 = vsel %vm16109_vm4, %v13393_v27, %v7391_v10  ;;  %v7395_v2 = vsel %vm16109_vm4, %v7393_v34, %v7394_v15  ;;  %v6619_v34 = vrot.slane %v276_v33, 5  ;;  %v2933_v15 = vld [vmem:[%s16086_s5 + $0x150] sm:$0x8]  ;;  %v279_v33 = vld [vmem:[%s16086_s5 + $0xd4] sm:$0x1] }
 0x389   : > { %13405 = vmatmul.mubr.msk.bf16.gmra.mrb[12].mxu1 %vm703_vm1, %v13397_v37  ;;  %v13398_v37 = vcombine.low %v7385_v42, %v7388_v12  ;;  %v13029_v42 = vrot.slane %v2930_v58, 11  ;;  %v3125_v12 = vrot.slane %v3123_v40, 4  ;;  %v3130_v58 = vrot.slane %v2934_v18, 7  ;;  %v2937_v18 = vld [vmem:[%s16086_s5 + $0x170] sm:$0xf] }
 0x38a   : > { %7521 = vmatprep.mubr.bf16.mxu1 %v20088_v3 }
 0x38b   : > { %v3124_v10 = vsel %vm17528_vm9, %v13029_v42, %v3123_v40  ;;  %v3127_v27 = vsel %vm17528_vm9, %v3125_v12, %v3126_v8  ;;  %v3133_v12 = vrot.slane %v2935_v31, 7  ;;  %v277_v8 = vld [vmem:[%s16086_s5 + $0xcc] sm:$0xe]  ;;  %v2938_v31 = vld [vmem:[%s16086_s5 + $0x174] sm:$0x7] }
 0x38d   : > { %13061 = vmatmul.mubr.msk.bf16.gmra.mrb[140].mxu0 %vm703_vm1, %v13043_v59  ;;  %v13044_v59 = vcombine.low %v3117_v35, %v3120_v5  ;;  %v13328_v35 = vrot.slane %v274_v62, 9  ;;  %v6618_v5 = vrot.slane %v6616_v7, 4  ;;  %v6623_v62 = vrot.slane %v278_v56, 5  ;;  %v281_v56 = vld [vmem:[%s16086_s5 + $0xec] sm:$0xf] }
 0x38e   : > { %3383 = vmatprep.mubr.bf16.mxu0 %v20088_v3 }
 0x38f   : > { %v6617_v40 = vsel %vm16109_vm4, %v13328_v35, %v6616_v7  ;;  %v6620_v42 = vsel %vm16109_vm4, %v6618_v5, %v6619_v34  ;;  %v6626_v5 = vrot.slane %v279_v33, 5  ;;  %v2936_v34 = vld [vmem:[%s16086_s5 + $0x16c] sm:$0x8]  ;;  %v282_v33 = vld [vmem:[%s16086_s5 + $0xf0] sm:$0x1] }
 0x391   : > { %13406 = vmatmul.mubr.msk.bf16.gmra.mrb[16].mxu1 %vm703_vm1, %v13398_v37  ;;  %v13399_v37 = vcombine.low %v7392_v4, %v7395_v2  ;;  %v13030_v4 = vrot.slane %v2933_v15, 11  ;;  %v3132_v2 = vrot.slane %v3130_v58, 4  ;;  %v3137_v15 = vrot.slane %v2937_v18, 7  ;;  %v2940_v18 = vld [vmem:[%s16086_s5 + $0x18c] sm:$0xf] }
 0x392   : > { %7531 = vmatprep.mubr.bf16.mxu1 %v20088_v3 }
 0x393   : > { %v3131_v7 = vsel %vm17528_vm9, %v13030_v4, %v3130_v58  ;;  %v3134_v35 = vsel %vm17528_vm9, %v3132_v2, %v3133_v12  ;;  %v3140_v2 = vrot.slane %v2938_v31, 7  ;;  %v280_v12 = vld [vmem:[%s16086_s5 + $0xe8] sm:$0xe]  ;;  %v3144_v31 = vrot.slane %v2940_v18, 7  ;;  %v285_v18 = vld [vmem:[%s16086_s5 + $0x10c] sm:$0x1] }
 0x395   : > { %13062 = vmatmul.mubr.msk.bf16.gmra.mrb[144].mxu0 %vm703_vm1, %v13044_v59  ;;  %v13045_v59 = vcombine.low %v3124_v10, %v3127_v27  ;;  %v13329_v10 = vrot.slane %v277_v8, 9  ;;  %v6625_v27 = vrot.slane %v6623_v62, 4  ;;  %v6630_v8 = vrot.slane %v281_v56, 5  ;;  %v2941_v56 = vld [vmem:[%s16086_s5 + $0x190] sm:$0x7] }
 0x396   : > { %3393 = vmatprep.mubr.bf16.mxu0 %v20088_v3 }
 0x397   : > { %v6624_v58 = vsel %vm16109_vm4, %v13329_v10, %v6623_v62  ;;  %v6627_v4 = vsel %vm16109_vm4, %v6625_v27, %v6626_v5  ;;  %v13330_v10 = vrot.slane %v280_v12, 9  ;;  %v6632_v27 = vrot.slane %v6630_v8, 4  ;;  %v283_v12 = vld [vmem:[%s16086_s5 + $0x104] sm:$0xe] }
 0x398   : > { %v6633_v5 = vrot.slane %v282_v33, 5 }
 0x399   : > { %13407 = vmatmul.mubr.msk.bf16.gmra.mrb[20].mxu1 %vm703_vm1, %v13399_v37  ;;  %v17658_v37 = vcombine.low %v6617_v40, %v6620_v42  ;;  %v13031_v40 = vrot.slane %v2936_v34, 11  ;;  %v3139_v42 = vrot.slane %v3137_v15, 4  ;;  %v2939_v34 = vld [vmem:[%s16086_s5 + $0x188] sm:$0x8] }
 0x39a   : > { %7541 = vmatprep.mubr.bf16.mxu1 %v20088_v3 }
 0x39b   : > { %v3138_v62 = vsel %vm17528_vm9, %v13031_v40, %v3137_v15  ;;  %v6631_v15 = vsel %vm16109_vm4, %v13330_v10, %v6630_v8  ;;  %v13032_v40 = vrot.slane %v2939_v34, 11  ;;  %v13331_v10 = vrot.slane %v283_v12, 9  ;;  %v2942_v34 = vld [vmem:[%s16086_s5 + $0x1a4] sm:$0x8] }
 0x39d   : > { %13063 = vmatmul.mubr.msk.bf16.gmra.mrb[148].mxu0 %vm703_vm1, %v13045_v59  ;;  %v13046_v59 = vcombine.low %v3131_v7, %v3134_v35  ;;  %v17679_v7 = vcombine.low %v6624_v58, %v6627_v4  ;;  %v3141_v35 = vsel %vm17528_vm9, %v3139_v42, %v3140_v2  ;;  %v6634_v4 = vsel %vm16109_vm4, %v6632_v27, %v6633_v5 }
 0x39e   : > { %3403 = vmatprep.mubr.bf16.mxu0 %v20088_v3  ;;  %v13047_v58 = vcombine.low %v3138_v62, %v3141_v35  ;;  %v3146_v42 = vrot.slane %v3144_v31, 4  ;;  %v3147_v2 = vrot.slane %v2941_v56, 7  ;;  %v17700_v62 = vcombine.low %v6631_v15, %v6634_v4 }
 0x39f   : > { %v3145_v8 = vsel %vm17528_vm9, %v13032_v40, %v3144_v31  ;;  %v6640_v5 = vrot.slane %v285_v18, 5  ;;  %v3151_v56 = vrot.slane %v2943_v29, 7  ;;  %v13033_v40 = vrot.slane %v2942_v34, 11  ;;  %v286_v29 = vld [vmem:[%s16086_s5 + $0x120] sm:$0xe] }
 0x3a0   : > { %v3148_v35 = vsel %vm17528_vm9, %v3146_v42, %v3147_v2  ;;  %v288_v18 = vld [vmem:[%s16086_s5 + $0x128] sm:$0x1]  ;;  %v2945_v34 = vld [vmem:[%s16086_s5 + $0x1c0] sm:$0x8] }
 0x3a1   : > { %13408 = vmatmul.mubr.msk.bf16.gmra.mrb[24].mxu1 %vm703_vm1, %v17658_v37  ;;  %v13048_v15 = vcombine.low %v3145_v8, %v3148_v35  ;;  %v3153_v42 = vrot.slane %v3151_v56, 4 }
 0x3a2   : > { %7551 = vmatprep.mubr.bf16.mxu1 %v20088_v3 }
 0x3a5   : > { %13064 = vmatmul.mubr.msk.bf16.gmra.mrb[152].mxu0 %vm703_vm1, %v13046_v59  ;;  %v284_v59 = vld [vmem:[%s16086_s5 + $0x108] sm:$0xf] }
 0x3a6   : > { %3413 = vmatprep.mubr.bf16.mxu0 %v20088_v3  ;;  %v6637_v33 = vrot.slane %v284_v59, 5  ;;  %v2944_v59 = vld [vmem:[%s16086_s5 + $0x1ac] sm:$0x7] }
 0x3a7   : > { %v3154_v2 = vrot.slane %v2944_v59, 7  ;;  %v3158_v59 = vrot.slane %v2946_v24, 7  ;;  %v289_v24 = vld [vmem:[%s16086_s5 + $0x13c] sm:$0xe] }
 0x3a8   : > { %v6639_v27 = vrot.slane %v6637_v33, 4  ;;  %v6638_v31 = vsel %vm16109_vm4, %v13331_v10, %v6637_v33  ;;  %v3152_v33 = vsel %vm17528_vm9, %v13033_v40, %v3151_v56  ;;  %v13332_v10 = vrot.slane %v286_v29, 9 }
 0x3a9   : > { %13409 = vmatmul.mubr.msk.bf16.gmra.mrb[28].mxu1 %vm703_vm1, %v17679_v7  ;;  %v3155_v35 = vsel %vm17528_vm9, %v3153_v42, %v3154_v2  ;;  %v13034_v40 = vrot.slane %v2945_v34, 11  ;;  %v3160_v42 = vrot.slane %v3158_v59, 4  ;;  %v3165_v34 = vrot.slane %v2949_v45, 7  ;;  %v2952_v45 = vld [vmem:[%s16086_s5 + $0x1fc] sm:$0xf] }
 0x3aa   : > { %7561 = vmatprep.mubr.bf16.mxu1 %v20088_v3  ;;  %v6641_v4 = vsel %vm16109_vm4, %v6639_v27, %v6640_v5  ;;  %v6647_v5 = vrot.slane %v288_v18, 5  ;;  %v291_v18 = vld [vmem:[%s16086_s5 + $0x144] sm:$0x1] }
 0x3ab   : > { %v17721_v8 = vcombine.low %v6638_v31, %v6641_v4  ;;  %v13049_v31 = vcombine.low %v3152_v33, %v3155_v35 }
 0x3ad   : > { %13065 = vmatmul.mubr.msk.bf16.gmra.mrb[156].mxu0 %vm703_vm1, %v13047_v58  ;;  %v287_v58 = vld [vmem:[%s16086_s5 + $0x124] sm:$0xf] }
 0x3ae   : > { %3423 = vmatprep.mubr.bf16.mxu0 %v20088_v3  ;;  %v6644_v12 = vrot.slane %v287_v58, 5  ;;  %v2947_v58 = vld [vmem:[%s16086_s5 + $0x1c8] sm:$0x7] }
 0x3af   : > { %v3161_v2 = vrot.slane %v2947_v58, 7  ;;  %v2948_v58 = vld [vmem:[%s16086_s5 + $0x1dc] sm:$0x8] }
 0x3b0   : > { %v6646_v27 = vrot.slane %v6644_v12, 4  ;;  %v6645_v56 = vsel %vm16109_vm4, %v13332_v10, %v6644_v12  ;;  %v3159_v12 = vsel %vm17528_vm9, %v13034_v40, %v3158_v59  ;;  %v13333_v10 = vrot.slane %v289_v24, 9 }
 0x3b1   : > { %13410 = vmatmul.mubr.msk.bf16.gmra.mrb[32].mxu1 %vm703_vm1, %v17700_v62  ;;  %v3162_v35 = vsel %vm17528_vm9, %v3160_v42, %v3161_v2  ;;  %v13035_v40 = vrot.slane %v2948_v58, 11 }
 0x3b2   : > { %7571 = vmatprep.mubr.bf16.mxu1 %v20088_v3  ;;  %v6648_v4 = vsel %vm16109_vm4, %v6646_v27, %v6647_v5  ;;  %v6654_v5 = vrot.slane %v291_v18, 5  ;;  %v3172_v18 = vrot.slane %v2952_v45, 7  ;;  %v2954_v45 = vld [vmem:[%s16086_s5 + $0x214] sm:$0x8] }
 0x3b3   : > { %v17742_v33 = vcombine.low %v6645_v56, %v6648_v4  ;;  %v3167_v4 = vrot.slane %v3165_v34, 4  ;;  %v3166_v24 = vsel %vm17528_vm9, %v13035_v40, %v3165_v34 }
 0x3b5   : > { %13066 = vmatmul.mubr.msk.bf16.gmra.mrb[160].mxu0 %vm703_vm1, %v13048_v15  ;;  %v290_v15 = vld [vmem:[%s16086_s5 + $0x140] sm:$0xf] }
 0x3b6   : > { %3433 = vmatprep.mubr.bf16.mxu0 %v20088_v3  ;;  %v6651_v29 = vrot.slane %v290_v15, 5  ;;  %v2950_v15 = vld [vmem:[%s16086_s5 + $0x1e4] sm:$0x7] }
 0x3b7   : > { %v3168_v42 = vrot.slane %v2950_v15, 7  ;;  %v3174_v15 = vrot.slane %v3172_v18, 4 }
 0x3b8   : > { %v6653_v27 = vrot.slane %v6651_v29, 4  ;;  %v6652_v59 = vsel %vm16109_vm4, %v13333_v10, %v6651_v29  ;;  %v2953_v10 = vld [vmem:[%s16086_s5 + $0x200] sm:$0x7] }
 0x3b9   : > { %13411 = vmatmul.mubr.msk.bf16.gmra.mrb[36].mxu1 %vm703_vm1, %v17721_v8  ;;  %v3169_v29 = vsel %vm17528_vm9, %v3167_v4, %v3168_v42 }
 0x3ba   : > { %7581 = vmatprep.mubr.bf16.mxu1 %v20088_v3  ;;  %v6655_v56 = vsel %vm16109_vm4, %v6653_v27, %v6654_v5  ;;  %v13051_v5 = vcombine.low %v3166_v24, %v3169_v29  ;;  %v2956_v24 = vld [vmem:[%s16086_s5 + $0x21c] sm:$0x7] }
 0x3bb   : > { %v17760_v2 = vcombine.low %v6652_v59, %v6655_v56  ;;  %v2955_v56 = vld [vmem:[%s16086_s5 + $0x218] sm:$0xf] }
 0x3bc   : > { %v3179_v42 = vrot.slane %v2955_v56, 7  ;;  %v2958_v56 = vld [vmem:[%s16086_s5 + $0x234] sm:$0xf] }
 0x3bd   : > { %13067 = vmatmul.mubr.msk.bf16.gmra.mrb[164].mxu0 %vm703_vm1, %v13049_v31  ;;  %v13050_v31 = vcombine.low %v3159_v12, %v3162_v35  ;;  %v2951_v12 = vld [vmem:[%s16086_s5 + $0x1f8] sm:$0x8] }
 0x3be   : > { %3443 = vmatprep.mubr.bf16.mxu0 %v20088_v3  ;;  %v13036_v34 = vrot.slane %v2951_v12, 11 }
 0x3c0   : > { %v3173_v40 = vsel %vm17528_vm9, %v13036_v34, %v3172_v18  ;;  %v13037_v18 = vrot.slane %v2954_v45, 11  ;;  %v3181_v34 = vrot.slane %v3179_v42, 4  ;;  %v2959_v45 = vld [vmem:[%s16086_s5 + $0x238] sm:$0x7] }
 0x3c1   : > { %13412 = vmatmul.mubr.msk.bf16.gmra.mrb[40].mxu1 %vm703_vm1, %v17742_v33 }
 0x3c2   : > { %7591 = vmatprep.mubr.bf16.mxu1 %v20088_v3 }
 0x3c5   : > { %13068 = vmatmul.mubr.msk.bf16.gmra.mrb[168].mxu0 %vm703_vm1, %v13050_v31  ;;  %v3175_v31 = vrot.slane %v2953_v10, 7 }
 0x3c6   : > { %3453 = vmatprep.mubr.bf16.mxu0 %v20088_v3 }
 0x3c7   : > { %v3176_v4 = vsel %vm17528_vm9, %v3174_v15, %v3175_v31  ;;  %v3182_v15 = vrot.slane %v2956_v24, 7 }
 0x3c8   : > { %v17769_v35 = vpop.f32.mrb[192].mxu0  ;;  %v17795_v10 = vcombine.low %v3173_v40, %v3176_v4  ;;  %v3180_v40 = vsel %vm17528_vm9, %v13037_v18, %v3179_v42 }
 0x3c9   : > { %20172 = vst [vmem:[#allocation80_spill] sm:$0xff] %v17769_v35  ;;  %v17771_v27 = vpop.f32.mrb[193].mxu0  ;;  %13413 = vmatmul.mubr.msk.bf16.gmra.mrb[44].mxu1 %vm703_vm1, %v17760_v2  ;;  %v3183_v4 = vsel %vm17528_vm9, %v3181_v34, %v3182_v15  ;;  %v3189_v34 = vrot.slane %v2959_v45, 7 }
 0x3ca   : > { %20173 = vst [vmem:[#allocation81_spill] sm:$0xff] %v17771_v27  ;;  %v17775_v58 = vpop.f32.mrb[194].mxu0  ;;  %7601 = vmatprep.mubr.bf16.mxu1 %v20088_v3 }
 0x3cb   : > { %20174 = vst [vmem:[#allocation82_spill] sm:$0xff] %v17775_v58  ;;  %v17778_v59 = vpop.f32.mrb[195].mxu0 }
 0x3cc   : > { %20175 = vst [vmem:[#allocation83_spill] sm:$0xff] %v17778_v59  ;;  %v20183_v59 = vmov 0  }
 0x3cd   : > { %13069 = vmatmul.mubr.msk.bf16.gmra.mrb[172].mxu0 %vm703_vm1, %v13051_v5 }
 0x3ce   : > { %3463 = vmatprep.mubr.bf16.mxu0 %v20088_v3 }
 0x3d0   : > { %v17789_v29 = vpop.f32.mrb[196].mxu0 }
 0x3d1   : > { %20176 = vst [vmem:[#allocation84_spill] sm:$0xff] %v17789_v29  ;;  %v17791_v12 = vpop.f32.mrb[197].mxu0  ;;  %13414 = vmatmul.mubr.msk.bf16.gmra.mrb[48].mxu1 %vm703_vm1, %v17200_v14 }
 0x3d2   : > { %20177 = vst [vmem:[#allocation85_spill] sm:$0xff] %v17791_v12  ;;  %v17797_v5 = vpop.f32.mrb[198].mxu0  ;;  %7611 = vmatprep.mubr.bf16.mxu1 %v20088_v3  ;;  %v2957_v12 = vld [vmem:[%s16086_s5 + $0x230] sm:$0x8] }
 0x3d3   : > { %20178 = vst [vmem:[#allocation86_spill] sm:$0xff] %v17797_v5  ;;  %v17800_v31 = vpop.f32.mrb[199].mxu0  ;;  %v3186_v5 = vrot.slane %v2958_v56, 7  ;;  %v13038_v42 = vrot.slane %v2957_v12, 11  ;;  %v2961_v56 = vld [vmem:[%s16086_s5 + $0x250] sm:$0xf] }
 0x3d4   : > { %20179 = vst [vmem:[#allocation87_spill] sm:$0xff] %v17800_v31 }
 0x3d5   : > { %13070 = vmatmul.mubr.msk.bf16.gmra.mrb[176].mxu0 %vm703_vm1, %v17795_v10  ;;  %v3188_v18 = vrot.slane %v3186_v5, 4 }
 0x3d6   : > { %3473 = vmatprep.mubr.bf16.mxu0 %v20088_v3  ;;  %v13053_v3 = vcombine.low %v3180_v40, %v3183_v4  ;;  %v3193_v4 = vrot.slane %v2961_v56, 7 }
 0x3d7   : > { %v3190_v40 = vsel %vm17528_vm9, %v3188_v18, %v3189_v34 }
 0x3d8   : > { %v17812_v29 = vpop.f32.mrb[200].mxu0 }
 0x3d9   : > { %20180 = vst [vmem:[#allocation88_spill] sm:$0xff] %v17812_v29  ;;  %v17814_v24 = vpop.f32.mrb[201].mxu0  ;;  %13415 = vmatmul.mubr.msk.bf16.gmra.mrb[52].mxu1 %vm703_vm1, %v17219_v48  ;;  %v2962_v29 = vld [vmem:[%s16086_s5 + $0x254] sm:$0x7] }
 0x3da   : > { %20181 = vst [vmem:[#allocation89_spill] sm:$0xff] %v17814_v24  ;;  %v17818_v31 = vpop.f32.mrb[202].mxu0  ;;  %7621 = vmatprep.mubr.bf16.mxu1 %v20183_v59  ;;  %v3187_v24 = vsel %vm17528_vm9, %v13038_v42, %v3186_v5  ;;  %v3195_v5 = vrot.slane %v3193_v4, 4  ;;  %v3196_v42 = vrot.slane %v2962_v29, 7 }
 0x3db   : > { %20182 = vst [vmem:[#allocation90_spill] sm:$0xff] %v17818_v31  ;;  %v17821_v15 = vpop.f32.mrb[203].mxu0  ;;  %v2960_v31 = vld [vmem:[%s16086_s5 + $0x24c] sm:$0x8]  ;;  %v13054_v45 = vcombine.low %v3187_v24, %v3190_v40 }
 0x3dc   : > { %20184 = vst [vmem:[#allocation91_spill] sm:$0xff] %v17821_v15  ;;  %v13039_v27 = vrot.slane %v2960_v31, 11  ;;  %v3197_v34 = vsel %vm17528_vm9, %v3195_v5, %v3196_v42 }
 0x3dd   : > { %13071 = vmatmul.mubr.msk.bf16.gmra.mrb[180].mxu0 %vm703_vm1, %v13053_v3 }
 0x3de   : > { %3483 = vmatprep.mubr.bf16.mxu0 %v20183_v59  ;;  %v3194_v18 = vsel %vm17528_vm9, %v13039_v27, %v3193_v4  ;;  %v8272_v27 = vsel %vm752_vm0, %v17568_v11, 0  ;;  %v17882_v11 = vld.sshfl [vmem:[#allocation5 + $0x24] sm:$0x33 pattern:$0x76325410] }
 0x3df   : > { %v17855_v29 = vcombine.low %v3194_v18, %v3197_v34  ;;  %v4238_v34 = vsel %vm752_vm0, %v17561_v26, 0 }
 0x3e0   : > { %v17832_v58 = vpop.f32.mrb[204].mxu0 }
 0x3e1   : > { %20185 = vst [vmem:[#allocation92_spill] sm:$0xff] %v17832_v58  ;;  %v17834_v12 = vpop.f32.mrb[205].mxu0  ;;  %13416 = vmatmul.mubr.msk.bf16.gmra.mrb[56].mxu1 %vm703_vm1, %v17244_v1 }
 0x3e2   : > { %20186 = vst [vmem:[#allocation93_spill] sm:$0xff] %v17834_v12  ;;  %v17838_v15 = vpop.f32.mrb[206].mxu0  ;;  %7631 = vmatprep.mubr.bf16.mxu1 %v20183_v59 }
 0x3e3   : > { %20187 = vst [vmem:[#allocation94_spill] sm:$0xff] %v17838_v15  ;;  %v17841_v35 = vpop.f32.mrb[207].mxu0 }
 0x3e4   : > { %20188 = vst [vmem:[#allocation95_spill] sm:$0xff] %v17841_v35  ;;  %v380_v35 = vld [vmem:[%s16086_s5 + $0x488] sm:$0xf] }
 0x3e5   : > { %13072 = vmatmul.mubr.msk.bf16.gmra.mrb[184].mxu0 %vm703_vm1, %v13054_v45 }
 0x3e6   : > { %3493 = vmatprep.mubr.bf16.mxu0 %v20183_v59 }
 0x3e8   : > { %v17849_v24 = vpop.f32.mrb[208].mxu0 }
 0x3e9   : > { %20189 = vst [vmem:[#allocation96_spill] sm:$0xff] %v17849_v24  ;;  %v17851_v56 = vpop.f32.mrb[209].mxu0  ;;  %13417 = vmatmul.mubr.msk.bf16.gmra.mrb[60].mxu1 %vm703_vm1, %v17259_v63 }
 0x3ea   : > { %20190 = vst [vmem:[#allocation97_spill] sm:$0xff] %v17851_v56  ;;  %v17857_v31 = vpop.f32.mrb[210].mxu0  ;;  %7851 = vmatprep.mubr.bf16.mxu1 %v20183_v59  ;;  %v2963_v56 = vld [vmem:[%s16086_s5 + $0x268] sm:$0x8] }
 0x3eb   : > { %20191 = vst [vmem:[#allocation98_spill] sm:$0xff] %v17857_v31  ;;  %v17860_v40 = vpop.f32.mrb[211].mxu0 }
 0x3ec   : > { %20192 = vst [vmem:[#allocation99_spill] sm:$0xff] %v17860_v40  ;;  %v2964_v40 = vld [vmem:[%s16086_s5 + $0x26c] sm:$0xf] }
 0x3ed   : > { %13073 = vmatmul.mubr.msk.bf16.gmra.mrb[188].mxu0 %vm703_vm1, %v17855_v29  ;;  %v3606_v24 = vrot.slane %v2964_v40, 7 }
 0x3ee   : > { %3809 = vmatprep.mubr.bf16.mxu0 %v20183_v59 }
 0x3f0   : > { %v17867_v4 = vpop.f32.mrb[212].mxu0 }
 0x3f1   : > { %20193 = vst [vmem:[#allocation100_spill] sm:$0xff] %v17867_v4  ;;  %v17869_v5 = vpop.f32.mrb[213].mxu0  ;;  %13432 = vmatmul.mubr.msk.bf16.vlgmr.msra.gmra.mrb[0].mxu1 %vm703_vm1, %v17468_v47  ;;  %v378_v4 = vld [vmem:[%s16086_s5 + $0x470] sm:$0x1] }
 0x3f2   : > { %20194 = vst [vmem:[#allocation101_spill] sm:$0xff] %v17869_v5  ;;  %v17873_v42 = vpop.f32.mrb[214].mxu0  ;;  %8278 = vmatpush1.bf16.msra.mxu1 %v8272_v27  ;;  %7861 = vmatprep.mubr.bf16.mxu1 %v20183_v59  ;;  %v17887_v27 = vld.sshfl [vmem:[#allocation5 + $0x10] sm:$0x33 pattern:$0x76325410] }
 0x3f3   : > { %20195 = vst [vmem:[#allocation102_spill] sm:$0xff] %v17873_v42  ;;  %v17876_v18 = vpop.f32.mrb[215].mxu0  ;;  %v6684_v42 = vcombine.high %v17882_v11, %v17882_v11  ;;  %v6989_v31 = vrot.slane %v378_v4, 5  ;;  %v3608_v4 = vrot.slane %v3606_v24, 4 }
 0x3f4   : > { %20196 = vst [vmem:[#allocation103_spill] sm:$0xff] %v17876_v18  ;;  %v8574_v18 = vcombine.high %v17887_v27, %v17887_v27 }
 0x3f5   : > { %13100 = vmatmul.mubr.msk.bf16.vlgmr.msra.gmra.mrb[128].mxu0 %vm703_vm1, %v17795_v10 }
 0x3f6   : > { %4244 = vmatpush1.bf16.msra.mxu0 %v4238_v34  ;;  %3819 = vmatprep.mubr.bf16.mxu0 %v20183_v59 }
 0x3f7   : > { %13341 = vmatprep.subr.msk.bf16.mxu0 %vm752_vm0, %v6684_v42  ;;  %13489 = vmatprep.subr.msk.bf16.mxu1 %vm752_vm0, %v8574_v18  ;;  %v377_v42 = vld [vmem:[%s16086_s5 + $0x46c] sm:$0xf] }
 0x3f8   : > { %v17891_v5 = vpop.f32.mrb[216].mxu0 }
 0x3f9   : > { %20197 = vst [vmem:[#allocation104_spill] sm:$0xff] %v17891_v5  ;;  %v17894_v26 = vpop.f32.mrb[217].mxu0  ;;  %13433 = vmatmul.mubr.msk.bf16.gmra.mrb[4].mxu1 %vm703_vm1, %v17483_v21 }
 0x3fa   : > { %20198 = vst [vmem:[#allocation105_spill] sm:$0xff] %v17894_v26  ;;  %v17899_v10 = vpop.f32.mrb[218].mxu0  ;;  %7871 = vmatprep.mubr.bf16.mxu1 %v20183_v59 }
 0x3fb   : > { %20199 = vst [vmem:[#allocation106_spill] sm:$0xff] %v17899_v10  ;;  %v17902_v34 = vpop.f32.mrb[219].mxu0  ;;  %v6986_v10 = vrot.slane %v377_v42, 5 }
 0x3fc   : > { %20200 = vst [vmem:[#allocation107_spill] sm:$0xff] %v17902_v34  ;;  %v376_v34 = vld [vmem:[%s16086_s5 + $0x468] sm:$0xe] }
 0x3fd   : > { %13101 = vmatmul.mubr.msk.bf16.gmra.mrb[132].mxu0 %vm703_vm1, %v13053_v3 }
 0x3fe   : > { %3829 = vmatprep.mubr.bf16.mxu0 %v20183_v59 }
 0x400   : > { %v17907_v26 = vpop.f32.mrb[220].mxu0 }
 0x401   : > { %20201 = vst [vmem:[#allocation108_spill] sm:$0xff] %v17907_v26  ;;  %v17909_v5 = vpop.f32.mrb[221].mxu0  ;;  %13434 = vmatmul.mubr.msk.bf16.gmra.mrb[8].mxu1 %vm703_vm1, %v17498_v23  ;;  %v13358_v26 = vrot.slane %v376_v34, 9  ;;  %v13074_v34 = vrot.slane %v2963_v56, 11 }
 0x402   : > { %20202 = vst [vmem:[#allocation109_spill] sm:$0xff] %v17909_v5  ;;  %v17913_v18 = vpop.f32.mrb[222].mxu0  ;;  %7881 = vmatprep.mubr.bf16.mxu1 %v20183_v59  ;;  %v6988_v5 = vrot.slane %v6986_v10, 4 }
 0x403   : > { %20203 = vst [vmem:[#allocation110_spill] sm:$0xff] %v17913_v18  ;;  %v17917_v3 = vpop.f32.mrb[223].mxu0  ;;  %v2965_v18 = vld [vmem:[%s16086_s5 + $0x270] sm:$0x7] }
 0x404   : > { %20204 = vst [vmem:[#allocation111_spill] sm:$0xff] %v17917_v3  ;;  %v6990_v40 = vsel %vm16109_vm4, %v6988_v5, %v6989_v31  ;;  %v3609_v12 = vrot.slane %v2965_v18, 7  ;;  %v2966_v18 = vld [vmem:[%s16086_s5 + $0x284] sm:$0x8] }
 0x405   : > { %13102 = vmatmul.mubr.msk.bf16.gmra.mrb[136].mxu0 %vm703_vm1, %v13054_v45  ;;  %v6987_v45 = vsel %vm16109_vm4, %v13358_v26, %v6986_v10  ;;  %v3607_v26 = vsel %vm17528_vm9, %v13074_v34, %v3606_v24  ;;  %v13075_v24 = vrot.slane %v2966_v18, 11 }
 0x406   : > { %3839 = vmatprep.mubr.bf16.mxu0 %v20183_v59  ;;  %v17946_v56 = vcombine.low %v6987_v45, %v6990_v40  ;;  %v3610_v5 = vsel %vm17528_vm9, %v3608_v4, %v3609_v12  ;;  %v382_v4 = vld [vmem:[%s16086_s5 + $0x4a0] sm:$0xe] }
 0x407   : > { %v13360_v18 = vrot.slane %v382_v4, 9 }
 0x408   : > { %v17926_v15 = vpop.f32.mrb[224].mxu0 }
 0x409   : > { %20205 = vst [vmem:[#allocation112_spill] sm:$0xff] %v17926_v15  ;;  %v17928_v42 = vpop.f32.mrb[225].mxu0  ;;  %13435 = vmatmul.mubr.msk.bf16.gmra.mrb[12].mxu1 %vm703_vm1, %v17514_v41  ;;  %v379_v15 = vld [vmem:[%s16086_s5 + $0x484] sm:$0xe] }
 0x40a   : > { %20206 = vst [vmem:[#allocation113_spill] sm:$0xff] %v17928_v42  ;;  %v17934_v3 = vpop.f32.mrb[226].mxu0  ;;  %7891 = vmatprep.mubr.bf16.mxu1 %v20183_v59  ;;  %v6993_v42 = vrot.slane %v380_v35, 5  ;;  %v13359_v31 = vrot.slane %v379_v15, 9  ;;  %v6996_v35 = vrot.slane %v381_v0, 5  ;;  %v13086_v15 = vcombine.low %v3607_v26, %v3610_v5 }
 0x40b   : > { %20207 = vst [vmem:[#allocation114_spill] sm:$0xff] %v17934_v3  ;;  %v17940_v58 = vpop.f32.mrb[227].mxu0  ;;  %v2968_v3 = vld [vmem:[%s16086_s5 + $0x28c] sm:$0x7]  ;;  %v384_v26 = vld [vmem:[%s16086_s5 + $0x4a8] sm:$0x1] }
 0x40c   : > { %20208 = vst [vmem:[#allocation115_spill] sm:$0xff] %v17940_v58  ;;  %v6995_v10 = vrot.slane %v6993_v42, 4  ;;  %v3613_v58 = vrot.slane %v2967_v52, 7  ;;  %v6994_v12 = vsel %vm16109_vm4, %v13359_v31, %v6993_v42  ;;  %v3616_v40 = vrot.slane %v2968_v3, 7  ;;  %v2970_v5 = vld [vmem:[%s16086_s5 + $0x2a4] sm:$0xf] }
 0x40d   : > { %13103 = vmatmul.mubr.msk.bf16.gmra.mrb[140].mxu0 %vm703_vm1, %v17855_v29 }
 0x40e   : > { %3849 = vmatprep.mubr.bf16.mxu0 %v20183_v59  ;;  %v6997_v52 = vsel %vm16109_vm4, %v6995_v10, %v6996_v35  ;;  %v3615_v34 = vrot.slane %v3613_v58, 4  ;;  %v3614_v31 = vsel %vm17528_vm9, %v13075_v24, %v3613_v58  ;;  %v7003_v35 = vrot.slane %v384_v26, 5 }
 0x40f   : > { %v17975_v42 = vcombine.low %v6994_v12, %v6997_v52 }
 0x410   : > { %v17956_v29 = vpop.f32.mrb[228].mxu0  ;;  %v3617_v3 = vsel %vm17528_vm9, %v3615_v34, %v3616_v40 }
 0x411   : > { %20209 = vst [vmem:[#allocation116_spill] sm:$0xff] %v17956_v29  ;;  %v17958_v45 = vpop.f32.mrb[229].mxu0  ;;  %13436 = vmatmul.mubr.msk.bf16.gmra.mrb[16].mxu1 %vm703_vm1, %v17946_v56  ;;  %v13087_v58 = vcombine.low %v3614_v31, %v3617_v3  ;;  %v387_v31 = vld [vmem:[%s16086_s5 + $0x4c4] sm:$0x1]  ;;  %v2973_v3 = vld [vmem:[%s16086_s5 + $0x2c0] sm:$0xf] }
 0x412   : > { %20210 = vst [vmem:[#allocation117_spill] sm:$0xff] %v17958_v45  ;;  %v17964_v0 = vpop.f32.mrb[230].mxu0  ;;  %7901 = vmatprep.mubr.bf16.mxu1 %v20183_v59  ;;  %v7000_v45 = vrot.slane %v383_v50, 5  ;;  %v2969_v50 = vld [vmem:[%s16086_s5 + $0x2a0] sm:$0x8] }
 0x413   : > { %20211 = vst [vmem:[#allocation118_spill] sm:$0xff] %v17964_v0  ;;  %v17970_v29 = vpop.f32.mrb[231].mxu0  ;;  %v2971_v0 = vld [vmem:[%s16086_s5 + $0x2a8] sm:$0x7]  ;;  %v13076_v52 = vrot.slane %v2969_v50, 11 }
 0x414   : > { %20212 = vst [vmem:[#allocation119_spill] sm:$0xff] %v17970_v29  ;;  %v7002_v10 = vrot.slane %v7000_v45, 4  ;;  %v3620_v29 = vrot.slane %v2970_v5, 7  ;;  %v7001_v24 = vsel %vm16109_vm4, %v13360_v18, %v7000_v45  ;;  %v3623_v26 = vrot.slane %v2971_v0, 7  ;;  %v385_v5 = vld [vmem:[%s16086_s5 + $0x4bc] sm:$0xe] }
 0x415   : > { %13104 = vmatmul.mubr.msk.bf16.gmra.mrb[144].mxu0 %vm703_vm1, %v13086_v15  ;;  %v13361_v50 = vrot.slane %v385_v5, 9 }
 0x416   : > { %3859 = vmatprep.mubr.bf16.mxu0 %v20183_v59  ;;  %v7004_v40 = vsel %vm16109_vm4, %v7002_v10, %v7003_v35  ;;  %v3622_v4 = vrot.slane %v3620_v29, 4  ;;  %v3621_v18 = vsel %vm17528_vm9, %v13076_v52, %v3620_v29  ;;  %v7010_v35 = vrot.slane %v387_v31, 5 }
 0x417   : > { %v18004_v45 = vcombine.low %v7001_v24, %v7004_v40 }
 0x418   : > { %v17985_v15 = vpop.f32.mrb[232].mxu0  ;;  %v3624_v0 = vsel %vm17528_vm9, %v3622_v4, %v3623_v26 }
 0x419   : > { %20213 = vst [vmem:[#allocation120_spill] sm:$0xff] %v17985_v15  ;;  %v17987_v12 = vpop.f32.mrb[233].mxu0  ;;  %13437 = vmatmul.mubr.msk.bf16.gmra.mrb[20].mxu1 %vm703_vm1, %v17975_v42  ;;  %v13088_v29 = vcombine.low %v3621_v18, %v3624_v0  ;;  %v390_v18 = vld [vmem:[%s16086_s5 + $0x4e0] sm:$0x1]  ;;  %v2976_v0 = vld [vmem:[%s16086_s5 + $0x2dc] sm:$0xf] }
 0x41a   : > { %20214 = vst [vmem:[#allocation121_spill] sm:$0xff] %v17987_v12  ;;  %v17993_v34 = vpop.f32.mrb[234].mxu0  ;;  %7911 = vmatprep.mubr.bf16.mxu1 %v20183_v59  ;;  %v7007_v12 = vrot.slane %v386_v49, 5  ;;  %v2972_v49 = vld [vmem:[%s16086_s5 + $0x2bc] sm:$0x8] }
 0x41b   : > { %20215 = vst [vmem:[#allocation122_spill] sm:$0xff] %v17993_v34  ;;  %v17999_v15 = vpop.f32.mrb[235].mxu0  ;;  %v2974_v34 = vld [vmem:[%s16086_s5 + $0x2c4] sm:$0x7]  ;;  %v13077_v40 = vrot.slane %v2972_v49, 11 }
 0x41c   : > { %20216 = vst [vmem:[#allocation123_spill] sm:$0xff] %v17999_v15  ;;  %v7009_v10 = vrot.slane %v7007_v12, 4  ;;  %v3627_v15 = vrot.slane %v2973_v3, 7  ;;  %v7008_v52 = vsel %vm16109_vm4, %v13361_v50, %v7007_v12  ;;  %v3630_v31 = vrot.slane %v2974_v34, 7  ;;  %v388_v3 = vld [vmem:[%s16086_s5 + $0x4d8] sm:$0xe] }
 0x41d   : > { %13105 = vmatmul.mubr.msk.bf16.gmra.mrb[148].mxu0 %vm703_vm1, %v13087_v58  ;;  %v13362_v49 = vrot.slane %v388_v3, 9 }
 0x41e   : > { %3869 = vmatprep.mubr.bf16.mxu0 %v20183_v59  ;;  %v7011_v26 = vsel %vm16109_vm4, %v7009_v10, %v7010_v35  ;;  %v3629_v5 = vrot.slane %v3627_v15, 4  ;;  %v3628_v50 = vsel %vm17528_vm9, %v13077_v40, %v3627_v15  ;;  %v7017_v35 = vrot.slane %v390_v18, 5 }
 0x41f   : > { %v18033_v12 = vcombine.low %v7008_v52, %v7011_v26 }
 0x420   : > { %v18014_v58 = vpop.f32.mrb[236].mxu0  ;;  %v3631_v34 = vsel %vm17528_vm9, %v3629_v5, %v3630_v31 }
 0x421   : > { %20217 = vst [vmem:[#allocation124_spill] sm:$0xff] %v18014_v58  ;;  %v18016_v24 = vpop.f32.mrb[237].mxu0  ;;  %13438 = vmatmul.mubr.msk.bf16.gmra.mrb[24].mxu1 %vm703_vm1, %v18004_v45  ;;  %v13089_v15 = vcombine.low %v3628_v50, %v3631_v34  ;;  %v393_v50 = vld [vmem:[%s16086_s5 + $0x4fc] sm:$0x1]  ;;  %v2979_v34 = vld [vmem:[%s16086_s5 + $0x2f8] sm:$0xf] }
 0x422   : > { %20218 = vst [vmem:[#allocation125_spill] sm:$0xff] %v18016_v24  ;;  %v18022_v4 = vpop.f32.mrb[238].mxu0  ;;  %7921 = vmatprep.mubr.bf16.mxu1 %v20183_v59  ;;  %v7014_v24 = vrot.slane %v389_v28, 5  ;;  %v2975_v28 = vld [vmem:[%s16086_s5 + $0x2d8] sm:$0x8] }
 0x423   : > { %20219 = vst [vmem:[#allocation126_spill] sm:$0xff] %v18022_v4  ;;  %v18028_v58 = vpop.f32.mrb[239].mxu0  ;;  %v2977_v4 = vld [vmem:[%s16086_s5 + $0x2e0] sm:$0x7]  ;;  %v13078_v26 = vrot.slane %v2975_v28, 11 }
 0x424   : > { %20220 = vst [vmem:[#allocation127_spill] sm:$0xff] %v18028_v58  ;;  %v7016_v10 = vrot.slane %v7014_v24, 4  ;;  %v3634_v58 = vrot.slane %v2976_v0, 7  ;;  %v7015_v40 = vsel %vm16109_vm4, %v13362_v49, %v7014_v24  ;;  %v3637_v18 = vrot.slane %v2977_v4, 7  ;;  %v391_v0 = vld [vmem:[%s16086_s5 + $0x4f4] sm:$0xe] }
 0x425   : > { %13106 = vmatmul.mubr.msk.bf16.gmra.mrb[152].mxu0 %vm703_vm1, %v13088_v29  ;;  %v13363_v28 = vrot.slane %v391_v0, 9 }
 0x426   : > { %3879 = vmatprep.mubr.bf16.mxu0 %v20183_v59  ;;  %v7018_v31 = vsel %vm16109_vm4, %v7016_v10, %v7017_v35  ;;  %v3636_v3 = vrot.slane %v3634_v58, 4  ;;  %v3635_v49 = vsel %vm17528_vm9, %v13078_v26, %v3634_v58  ;;  %v7024_v35 = vrot.slane %v393_v50, 5 }
 0x427   : > { %v18062_v24 = vcombine.low %v7015_v40, %v7018_v31 }
 0x428   : > { %v18043_v29 = vpop.f32.mrb[240].mxu0  ;;  %v3638_v4 = vsel %vm17528_vm9, %v3636_v3, %v3637_v18 }
 0x429   : > { %20221 = vst [vmem:[#allocation128_spill] sm:$0xff] %v18043_v29  ;;  %v18045_v52 = vpop.f32.mrb[241].mxu0  ;;  %13439 = vmatmul.mubr.msk.bf16.gmra.mrb[28].mxu1 %vm703_vm1, %v18033_v12  ;;  %v13090_v58 = vcombine.low %v3635_v49, %v3638_v4  ;;  %v396_v49 = vld [vmem:[%s16086_s5 + $0x518] sm:$0x1]  ;;  %v2982_v4 = vld [vmem:[%s16086_s5 + $0x314] sm:$0xf] }
 0x42a   : > { %20222 = vst [vmem:[#allocation129_spill] sm:$0xff] %v18045_v52  ;;  %v18051_v5 = vpop.f32.mrb[242].mxu0  ;;  %7931 = vmatprep.mubr.bf16.mxu1 %v20183_v59  ;;  %v7021_v52 = vrot.slane %v392_v44, 5  ;;  %v2978_v44 = vld [vmem:[%s16086_s5 + $0x2f4] sm:$0x8] }
 0x42b   : > { %20223 = vst [vmem:[#allocation130_spill] sm:$0xff] %v18051_v5  ;;  %v18057_v29 = vpop.f32.mrb[243].mxu0  ;;  %v2980_v5 = vld [vmem:[%s16086_s5 + $0x2fc] sm:$0x7]  ;;  %v13079_v31 = vrot.slane %v2978_v44, 11 }
 0x42c   : > { %20224 = vst [vmem:[#allocation131_spill] sm:$0xff] %v18057_v29  ;;  %v7023_v10 = vrot.slane %v7021_v52, 4  ;;  %v3641_v29 = vrot.slane %v2979_v34, 7  ;;  %v7022_v26 = vsel %vm16109_vm4, %v13363_v28, %v7021_v52  ;;  %v3644_v50 = vrot.slane %v2980_v5, 7  ;;  %v394_v34 = vld [vmem:[%s16086_s5 + $0x510] sm:$0xe] }
 0x42d   : > { %13107 = vmatmul.mubr.msk.bf16.gmra.mrb[156].mxu0 %vm703_vm1, %v13089_v15  ;;  %v13418_v44 = vrot.slane %v394_v34, 9 }
 0x42e   : > { %3889 = vmatprep.mubr.bf16.mxu0 %v20183_v59  ;;  %v7025_v18 = vsel %vm16109_vm4, %v7023_v10, %v7024_v35  ;;  %v3643_v0 = vrot.slane %v3641_v29, 4  ;;  %v3642_v28 = vsel %vm17528_vm9, %v13079_v31, %v3641_v29  ;;  %v7729_v35 = vrot.slane %v396_v49, 5 }
 0x42f   : > { %v18091_v52 = vcombine.low %v7022_v26, %v7025_v18 }
 0x430   : > { %v18072_v15 = vpop.f32.mrb[244].mxu0  ;;  %v3645_v5 = vsel %vm17528_vm9, %v3643_v0, %v3644_v50 }
 0x431   : > { %20225 = vst [vmem:[#allocation132_spill] sm:$0xff] %v18072_v15  ;;  %v18074_v40 = vpop.f32.mrb[245].mxu0  ;;  %13440 = vmatmul.mubr.msk.bf16.gmra.mrb[32].mxu1 %vm703_vm1, %v18062_v24  ;;  %v13091_v29 = vcombine.low %v3642_v28, %v3645_v5  ;;  %v399_v28 = vld [vmem:[%s16086_s5 + $0x534] sm:$0x1]  ;;  %v2985_v5 = vld [vmem:[%s16086_s5 + $0x330] sm:$0xf] }
 0x432   : > { %20226 = vst [vmem:[#allocation133_spill] sm:$0xff] %v18074_v40  ;;  %v18080_v3 = vpop.f32.mrb[246].mxu0  ;;  %7941 = vmatprep.mubr.bf16.mxu1 %v20183_v59  ;;  %v7726_v40 = vrot.slane %v395_v17, 5  ;;  %v2981_v17 = vld [vmem:[%s16086_s5 + $0x310] sm:$0x8] }
 0x433   : > { %20227 = vst [vmem:[#allocation134_spill] sm:$0xff] %v18080_v3  ;;  %v18086_v15 = vpop.f32.mrb[247].mxu0  ;;  %v2983_v3 = vld [vmem:[%s16086_s5 + $0x318] sm:$0x7]  ;;  %v13080_v18 = vrot.slane %v2981_v17, 11 }
 0x434   : > { %20228 = vst [vmem:[#allocation135_spill] sm:$0xff] %v18086_v15  ;;  %v7728_v10 = vrot.slane %v7726_v40, 4  ;;  %v3648_v15 = vrot.slane %v2982_v4, 7  ;;  %v7727_v31 = vsel %vm16109_vm4, %v13418_v44, %v7726_v40  ;;  %v3651_v49 = vrot.slane %v2983_v3, 7  ;;  %v397_v4 = vld [vmem:[%s16086_s5 + $0x52c] sm:$0xe] }
 0x435   : > { %13108 = vmatmul.mubr.msk.bf16.gmra.mrb[160].mxu0 %vm703_vm1, %v13090_v58  ;;  %v13419_v17 = vrot.slane %v397_v4, 9 }
 0x436   : > { %3899 = vmatprep.mubr.bf16.mxu0 %v20183_v59  ;;  %v7730_v50 = vsel %vm16109_vm4, %v7728_v10, %v7729_v35  ;;  %v3650_v34 = vrot.slane %v3648_v15, 4  ;;  %v3649_v44 = vsel %vm17528_vm9, %v13080_v18, %v3648_v15  ;;  %v7736_v35 = vrot.slane %v399_v28, 5 }
 0x437   : > { %v13424_v40 = vcombine.low %v7727_v31, %v7730_v50 }
 0x438   : > { %v18101_v58 = vpop.f32.mrb[248].mxu0  ;;  %v3652_v3 = vsel %vm17528_vm9, %v3650_v34, %v3651_v49 }
 0x439   : > { %20229 = vst [vmem:[#allocation136_spill] sm:$0xff] %v18101_v58  ;;  %v18103_v26 = vpop.f32.mrb[249].mxu0  ;;  %13441 = vmatmul.mubr.msk.bf16.gmra.mrb[36].mxu1 %vm703_vm1, %v18091_v52  ;;  %v13092_v15 = vcombine.low %v3649_v44, %v3652_v3  ;;  %v402_v44 = vld [vmem:[%s16086_s5 + $0x550] sm:$0x1]  ;;  %v2988_v3 = vld [vmem:[%s16086_s5 + $0x34c] sm:$0xf] }
 0x43a   : > { %20230 = vst [vmem:[#allocation137_spill] sm:$0xff] %v18103_v26  ;;  %v18109_v0 = vpop.f32.mrb[250].mxu0  ;;  %7951 = vmatprep.mubr.bf16.mxu1 %v20183_v59  ;;  %v7733_v26 = vrot.slane %v398_v16, 5  ;;  %v2984_v16 = vld [vmem:[%s16086_s5 + $0x32c] sm:$0x8] }
 0x43b   : > { %20231 = vst [vmem:[#allocation138_spill] sm:$0xff] %v18109_v0  ;;  %v18115_v58 = vpop.f32.mrb[251].mxu0  ;;  %v3655_v0 = vrot.slane %v2985_v5, 7  ;;  %v13081_v50 = vrot.slane %v2984_v16, 11  ;;  %v400_v5 = vld [vmem:[%s16086_s5 + $0x548] sm:$0xe] }
 0x43c   : > { %20232 = vst [vmem:[#allocation139_spill] sm:$0xff] %v18115_v58  ;;  %v7735_v10 = vrot.slane %v7733_v26, 4  ;;  %v2986_v58 = vld [vmem:[%s16086_s5 + $0x334] sm:$0x7]  ;;  %v7734_v18 = vsel %vm16109_vm4, %v13419_v17, %v7733_v26  ;;  %v13420_v16 = vrot.slane %v400_v5, 9 }
 0x43d   : > { %13109 = vmatmul.mubr.msk.bf16.gmra.mrb[164].mxu0 %vm703_vm1, %v13091_v29  ;;  %v3657_v4 = vrot.slane %v3655_v0, 4  ;;  %v3658_v28 = vrot.slane %v2986_v58, 7  ;;  %v3656_v17 = vsel %vm17528_vm9, %v13081_v50, %v3655_v0 }
 0x43e   : > { %3909 = vmatprep.mubr.bf16.mxu0 %v20183_v59  ;;  %v7737_v49 = vsel %vm16109_vm4, %v7735_v10, %v7736_v35  ;;  %v2987_v35 = vld [vmem:[%s16086_s5 + $0x348] sm:$0x8] }
 0x43f   : > { %v13425_v26 = vcombine.low %v7734_v18, %v7737_v49  ;;  %v3659_v58 = vsel %vm17528_vm9, %v3657_v4, %v3658_v28  ;;  %v13082_v18 = vrot.slane %v2987_v35, 11  ;;  %v403_v28 = vld [vmem:[%s16086_s5 + $0x564] sm:$0xe] }
 0x440   : > { %v18128_v29 = vpop.f32.mrb[252].mxu0  ;;  %v407_v35 = vld [vmem:[%s16086_s5 + $0x584] sm:$0xf] }
 0x441   : > { %20233 = vst [vmem:[#allocation140_spill] sm:$0xff] %v18128_v29  ;;  %v18130_v31 = vpop.f32.mrb[253].mxu0  ;;  %13442 = vmatmul.mubr.msk.bf16.gmra.mrb[40].mxu1 %vm703_vm1, %v13424_v40  ;;  %v404_v29 = vld [vmem:[%s16086_s5 + $0x568] sm:$0xf] }
 0x442   : > { %20234 = vst [vmem:[#allocation141_spill] sm:$0xff] %v18130_v31  ;;  %v18135_v34 = vpop.f32.mrb[254].mxu0  ;;  %7961 = vmatprep.mubr.bf16.mxu1 %v20183_v59  ;;  %v7740_v31 = vrot.slane %v401_v61, 5  ;;  %v7743_v61 = vrot.slane %v402_v44, 5  ;;  %v7747_v5 = vrot.slane %v404_v29, 5 }
 0x443   : > { %20235 = vst [vmem:[#allocation142_spill] sm:$0xff] %v18135_v34  ;;  %v18141_v40 = vpop.f32.mrb[255].mxu0  ;;  %v2989_v34 = vld [vmem:[%s16086_s5 + $0x350] sm:$0x7]  ;;  %v405_v44 = vld [vmem:[%s16086_s5 + $0x56c] sm:$0x1] }
 0x444   : > { %20236 = vst [vmem:[#allocation143_spill] sm:$0xff] %v18141_v40  ;;  %v7742_v10 = vrot.slane %v7740_v31, 4  ;;  %v3662_v40 = vrot.slane %v2988_v3, 7  ;;  %v7741_v0 = vsel %vm16109_vm4, %v13420_v16, %v7740_v31  ;;  %v3665_v4 = vrot.slane %v2989_v34, 7  ;;  %v2991_v3 = vld [vmem:[%s16086_s5 + $0x368] sm:$0xf] }
 0x445   : > { %13110 = vmatmul.mubr.msk.bf16.gmra.mrb[168].mxu0 %vm703_vm1, %v13092_v15  ;;  %v13093_v15 = vcombine.low %v3656_v17, %v3659_v58  ;;  %v13421_v17 = vrot.slane %v403_v28, 9  ;;  %v7749_v58 = vrot.slane %v7747_v5, 4  ;;  %v7750_v34 = vrot.slane %v405_v44, 5  ;;  %v2990_v29 = vld [vmem:[%s16086_s5 + $0x364] sm:$0x8] }
 0x446   : > { %3919 = vmatprep.mubr.bf16.mxu0 %v20183_v59  ;;  %v7744_v50 = vsel %vm16109_vm4, %v7742_v10, %v7743_v61  ;;  %v3664_v49 = vrot.slane %v3662_v40, 4  ;;  %v3663_v31 = vsel %vm17528_vm9, %v13082_v18, %v3662_v40  ;;  %v3669_v10 = vrot.slane %v2991_v3, 7  ;;  %v2992_v61 = vld [vmem:[%s16086_s5 + $0x36c] sm:$0x7]  ;;  %v408_v44 = vld [vmem:[%s16086_s5 + $0x588] sm:$0x1] }
 0x447   : > { %v7748_v40 = vsel %vm16109_vm4, %v13421_v17, %v7747_v5  ;;  %v7751_v18 = vsel %vm16109_vm4, %v7749_v58, %v7750_v34  ;;  %v7754_v28 = vrot.slane %v407_v35, 5  ;;  %v2994_v3 = vld [vmem:[%s16086_s5 + $0x384] sm:$0xf]  ;;  %v7757_v58 = vrot.slane %v408_v44, 5  ;;  %v2993_v34 = vld [vmem:[%s16086_s5 + $0x380] sm:$0x8] }
 0x448   : > { %v3666_v16 = vsel %vm17528_vm9, %v3664_v49, %v3665_v4  ;;  %v3672_v49 = vrot.slane %v2992_v61, 7  ;;  %v406_v4 = vld [vmem:[%s16086_s5 + $0x580] sm:$0xe]  ;;  %v2995_v61 = vld [vmem:[%s16086_s5 + $0x388] sm:$0x7] }
 0x449   : > { %13443 = vmatmul.mubr.msk.bf16.gmra.mrb[44].mxu1 %vm703_vm1, %v13425_v26  ;;  %v13426_v26 = vcombine.low %v7741_v0, %v7744_v50  ;;  %v13083_v0 = vrot.slane %v2990_v29, 11  ;;  %v3671_v50 = vrot.slane %v3669_v10, 4  ;;  %v3676_v29 = vrot.slane %v2994_v3, 7  ;;  %v410_v35 = vld [vmem:[%s16086_s5 + $0x5a0] sm:$0xf] }
 0x44a   : > { %7971 = vmatprep.mubr.bf16.mxu1 %v20183_v59  ;;  %v7761_v44 = vrot.slane %v410_v35, 5  ;;  %v411_v3 = vld [vmem:[%s16086_s5 + $0x5a4] sm:$0x1] }
 0x44b   : > { %v3670_v5 = vsel %vm17528_vm9, %v13083_v0, %v3669_v10  ;;  %v3673_v17 = vsel %vm17528_vm9, %v3671_v50, %v3672_v49  ;;  %v13084_v0 = vrot.slane %v2993_v34, 11  ;;  %v3678_v50 = vrot.slane %v3676_v29, 4  ;;  %v2996_v34 = vld [vmem:[%s16086_s5 + $0x39c] sm:$0x8] }
 0x44c   : > { %v3679_v49 = vrot.slane %v2995_v61, 7  ;;  %v2998_v61 = vld [vmem:[%s16086_s5 + $0x3a4] sm:$0x7] }
 0x44d   : > { %13111 = vmatmul.mubr.msk.bf16.gmra.mrb[172].mxu0 %vm703_vm1, %v13093_v15  ;;  %v18173_v15 = vcombine.low %v3663_v31, %v3666_v16  ;;  %v13422_v31 = vrot.slane %v406_v4, 9  ;;  %v7756_v16 = vrot.slane %v7754_v28, 4  ;;  %v409_v4 = vld [vmem:[%s16086_s5 + $0x59c] sm:$0xe] }
 0x44e   : > { %3929 = vmatprep.mubr.bf16.mxu0 %v20183_v59 }
 0x44f   : > { %v7755_v10 = vsel %vm16109_vm4, %v13422_v31, %v7754_v28  ;;  %v3677_v28 = vsel %vm17528_vm9, %v13084_v0, %v3676_v29  ;;  %v3680_v31 = vsel %vm17528_vm9, %v3678_v50, %v3679_v49  ;;  %v13085_v0 = vrot.slane %v2996_v34, 11  ;;  %v2999_v34 = vld [vmem:[%s16086_s5 + $0x3b8] sm:$0x8] }
 0x450   : > { %v13096_v35 = vcombine.low %v3677_v28, %v3680_v31  ;;  %v3686_v50 = vrot.slane %v2998_v61, 7  ;;  %v15692_v28 = vld [vmem:[%s16086_s5 + $0x178] sm:$0xff]   ;;  %v18241_v31 = vld.sshfl [vmem:[#allocation5 + $0x1c] sm:$0x33 pattern:$0x76325410] }
 0x451   : > { %13444 = vmatmul.mubr.msk.bf16.gmra.mrb[48].mxu1 %vm703_vm1, %v13426_v26  ;;  %v13427_v26 = vcombine.low %v7748_v40, %v7751_v18  ;;  %v13095_v40 = vcombine.low %v3670_v5, %v3673_v17  ;;  %v7758_v18 = vsel %vm16109_vm4, %v7756_v16, %v7757_v58  ;;  %v13423_v5 = vrot.slane %v409_v4, 9 }
 0x452   : > { %7981 = vmatprep.mubr.bf16.mxu1 %v20183_v59  ;;  %v7763_v17 = vrot.slane %v7761_v44, 4  ;;  %v7764_v16 = vrot.slane %v411_v3, 5  ;;  %v3683_v58 = vrot.slane %v2997_v6, 7  ;;  %v8594_v3 = vsel %vm752_vm0, %v17887_v27, 0 }
 0x453   : > { %v13116_v61 = vrot.slane %v2999_v34, 11 }
 0x454   : > { %v7765_v29 = vsel %vm16109_vm4, %v7763_v17, %v7764_v16  ;;  %v3684_v49 = vsel %vm17528_vm9, %v13085_v0, %v3683_v58  ;;  %v3000_v17 = vld [vmem:[%s16086_s5 + $0x3bc] sm:$0xf]  ;;  %v15694_v16 = vld [vmem:[%s16086_s5 + $0x1b0] sm:$0xff]   ;;  %v3003_v0 = vld [vmem:[%s16086_s5 + $0x3d8] sm:$0xf] }
 0x455   : > { %13112 = vmatmul.mubr.msk.bf16.gmra.mrb[176].mxu0 %vm703_vm1, %v18173_v15 }
 0x456   : > { %3939 = vmatprep.mubr.bf16.mxu0 %v20183_v59 }
 0x459   : > { %13445 = vmatmul.mubr.msk.bf16.gmra.mrb[52].mxu1 %vm703_vm1, %v13427_v26  ;;  %v13428_v26 = vcombine.low %v7755_v10, %v7758_v18  ;;  %v7762_v10 = vsel %vm16109_vm4, %v13423_v5, %v7761_v44  ;;  %v3685_v18 = vrot.slane %v3683_v58, 4  ;;  %v18236_v5 = vld.sshfl [vmem:[#allocation5 + $0x38] sm:$0x33 pattern:$0x76325410]  ;;  %v4072_v58 = vrot.slane %v3000_v17, 7 }
 0x45a   : > { %7991 = vmatprep.mubr.bf16.mxu1 %v20183_v59  ;;  %v13429_v6 = vcombine.low %v7762_v10, %v7765_v29  ;;  %v7054_v27 = vcombine.high %v18236_v5, %v18236_v5 }
 0x45b   : > { %v3687_v4 = vsel %vm17528_vm9, %v3685_v18, %v3686_v50  ;;  %v4074_v10 = vrot.slane %v4072_v58, 4  ;;  %v4073_v18 = vsel %vm17528_vm9, %v13116_v61, %v4072_v58  ;;  %v3007_v58 = vld [vmem:[%s16086_s5 + $0x3f8] sm:$0x7] }
 0x45c   : > { %v13097_v44 = vcombine.low %v3684_v49, %v3687_v4  ;;  %v3002_v49 = vld [vmem:[%s16086_s5 + $0x3d4] sm:$0x8]  ;;  %v3004_v4 = vld [vmem:[%s16086_s5 + $0x3dc] sm:$0x7] }
 0x45d   : > { %13113 = vmatmul.mubr.msk.bf16.gmra.mrb[180].mxu0 %vm703_vm1, %v13095_v40 }
 0x45e   : > { %3949 = vmatprep.mubr.bf16.mxu0 %v20183_v59 }
 0x461   : > { %13446 = vmatmul.mubr.msk.bf16.gmra.mrb[56].mxu1 %vm703_vm1, %v13428_v26  ;;  %v6704_v26 = vsel %vm752_vm0, %v17882_v11, 0  ;;  %v8896_v11 = vcombine.high %v18241_v31, %v18241_v31 }
 0x462   : > { %8001 = vmatprep.mubr.bf16.mxu1 %v20183_v59 }
 0x465   : > { %13114 = vmatmul.mubr.msk.bf16.gmra.mrb[184].mxu0 %vm703_vm1, %v13096_v35 }
 0x466   : > { %3959 = vmatprep.mubr.bf16.mxu0 %v20183_v59 }
 0x469   : > { %13447 = vmatmul.mubr.msk.bf16.gmra.mrb[60].mxu1 %vm703_vm1, %v13429_v6  ;;  %v4079_v6 = vrot.slane %v3003_v0, 7  ;;  %v18289_v0 = vld [vmem:[%s16086_s5 + $0x204] sm:$0xff]  }
 0x46a   : > { %8309 = vmatprep.mubr.bf16.mxu1 %v20183_v59 }
 0x46d   : > { %13115 = vmatmul.mubr.msk.bf16.gmra.mrb[188].mxu0 %vm703_vm1, %v13097_v44 }
 0x46e   : > { %4275 = vmatprep.mubr.bf16.mxu0 %v20183_v59 }
 0x471   : > { %13466 = vmatmul.mubr.msk.bf16.vlgmr.msra.gmra.mrb[64].mxu1 %vm703_vm1, %v15691_v30 }
 0x472   : > { %8600 = vmatpush1.bf16.msra.mxu1 %v8594_v3  ;;  %8319 = vmatprep.mubr.bf16.mxu1 %v20183_v59  ;;  %v4081_v3 = vrot.slane %v4079_v6, 4 }
 0x473   : > { %13513 = vmatprep.subr.msk.bf16.mxu1 %vm752_vm0, %v8896_v11 }
 0x475   : > { %13142 = vmatmul.mubr.msk.bf16.vlgmr.msra.gmra.mrb[128].mxu0 %vm703_vm1, %v18173_v15  ;;  %v15693_v15 = vld [vmem:[%s16086_s5 + $0x194] sm:$0xff]  }
 0x476   : > { %6710 = vmatpush1.bf16.msra.mxu0 %v6704_v26  ;;  %4285 = vmatprep.mubr.bf16.mxu0 %v20183_v59  ;;  %v4082_v26 = vrot.slane %v3004_v4, 7 }
 0x477   : > { %13371 = vmatprep.subr.msk.bf16.mxu0 %vm752_vm0, %v7054_v27  ;;  %v15696_v27 = vld [vmem:[%s16086_s5 + $0x1e8] sm:$0xff]  }
 0x479   : > { %13467 = vmatmul.mubr.msk.bf16.gmra.mrb[68].mxu1 %vm703_vm1, %v15692_v28  ;;  %v3006_v28 = vld [vmem:[%s16086_s5 + $0x3f4] sm:$0xf] }
 0x47a   : > { %8329 = vmatprep.mubr.bf16.mxu1 %v20183_v59  ;;  %v4086_v17 = vrot.slane %v3006_v28, 7  ;;  %v18304_v28 = vld [vmem:[%s16086_s5 + $0x220] sm:$0xff]  }
 0x47c   : > { %v4088_v61 = vrot.slane %v4086_v17, 4 }
 0x47d   : > { %13143 = vmatmul.mubr.msk.bf16.gmra.mrb[132].mxu0 %vm703_vm1, %v13095_v40  ;;  %v3001_v40 = vld [vmem:[%s16086_s5 + $0x3c0] sm:$0x7] }
 0x47e   : > { %4295 = vmatprep.mubr.bf16.mxu0 %v20183_v59  ;;  %v4075_v29 = vrot.slane %v3001_v40, 7 }
 0x480   : > { %v4076_v50 = vsel %vm17528_vm9, %v4074_v10, %v4075_v29  ;;  %v4089_v10 = vrot.slane %v3007_v58, 7  ;;  %v3009_v29 = vld [vmem:[%s16086_s5 + $0x410] sm:$0xf] }
 0x481   : > { %13468 = vmatmul.mubr.msk.bf16.gmra.mrb[72].mxu1 %vm703_vm1, %v15693_v15  ;;  %v13128_v30 = vcombine.low %v4073_v18, %v4076_v50  ;;  %v4083_v15 = vsel %vm17528_vm9, %v4081_v3, %v4082_v26  ;;  %v4093_v50 = vrot.slane %v3009_v29, 7  ;;  %v3012_v26 = vld [vmem:[%s16086_s5 + $0x42c] sm:$0xf]  ;;  %v18319_v29 = vld [vmem:[%s16086_s5 + $0x23c] sm:$0xff]  }
 0x482   : > { %8339 = vmatprep.mubr.bf16.mxu1 %v20183_v59  ;;  %v4090_v18 = vsel %vm17528_vm9, %v4088_v61, %v4089_v10  ;;  %v3015_v10 = vld [vmem:[%s16086_s5 + $0x448] sm:$0xf] }
 0x485   : > { %13144 = vmatmul.mubr.msk.bf16.gmra.mrb[136].mxu0 %vm703_vm1, %v13096_v35  ;;  %v15695_v35 = vld [vmem:[%s16086_s5 + $0x1cc] sm:$0xff]  }
 0x486   : > { %4305 = vmatprep.mubr.bf16.mxu0 %v20183_v59 }
 0x489   : > { %13469 = vmatmul.mubr.msk.bf16.gmra.mrb[76].mxu1 %vm703_vm1, %v15694_v16  ;;  %v3005_v16 = vld [vmem:[%s16086_s5 + $0x3f0] sm:$0x8] }
 0x48a   : > { %8349 = vmatprep.mubr.bf16.mxu1 %v20183_v59  ;;  %v13118_v40 = vrot.slane %v3005_v16, 11  ;;  %v3013_v16 = vld [vmem:[%s16086_s5 + $0x430] sm:$0x7] }
 0x48b   : > { %v4103_v61 = vrot.slane %v3013_v16, 7  ;;  %v3017_v16 = vld [vmem:[%s16086_s5 + $0x460] sm:$0x8] }
 0x48d   : > { %13145 = vmatmul.mubr.msk.bf16.gmra.mrb[140].mxu0 %vm703_vm1, %v13097_v44  ;;  %v13117_v44 = vrot.slane %v3002_v49, 11  ;;  %v3010_v49 = vld [vmem:[%s16086_s5 + $0x414] sm:$0x7] }
 0x48e   : > { %4315 = vmatprep.mubr.bf16.mxu0 %v20183_v59  ;;  %v4096_v3 = vrot.slane %v3010_v49, 7  ;;  %v3016_v49 = vld [vmem:[%s16086_s5 + $0x44c] sm:$0x7] }
 0x48f   : > { %v4080_v11 = vsel %vm17528_vm9, %v13117_v44, %v4079_v6  ;;  %v3008_v6 = vld [vmem:[%s16086_s5 + $0x40c] sm:$0x8]  ;;  %v4095_v44 = vrot.slane %v4093_v50, 4 }
 0x490   : > { %v13129_v34 = vcombine.low %v4080_v11, %v4083_v15  ;;  %v4100_v15 = vrot.slane %v3012_v26, 7  ;;  %v3018_v26 = vld [vmem:[%s16086_s5 + $0x464] sm:$0xf] }
 0x491   : > { %13470 = vmatmul.mubr.msk.bf16.gmra.mrb[80].mxu1 %vm703_vm1, %v15695_v35  ;;  %v4087_v35 = vsel %vm17528_vm9, %v13118_v40, %v4086_v17  ;;  %v4097_v11 = vsel %vm17528_vm9, %v4095_v44, %v4096_v3  ;;  %v3011_v17 = vld [vmem:[%s16086_s5 + $0x428] sm:$0x8]  ;;  %v4110_v3 = vrot.slane %v3016_v49, 7 }
 0x492   : > { %8359 = vmatprep.mubr.bf16.mxu1 %v20183_v59  ;;  %v13130_v4 = vcombine.low %v4087_v35, %v4090_v18  ;;  %v4102_v40 = vrot.slane %v4100_v15, 4 }
 0x494   : > { %v4104_v18 = vsel %vm17528_vm9, %v4102_v40, %v4103_v61  ;;  %v13122_v40 = vrot.slane %v3017_v16, 11 }
 0x495   : > { %13146 = vmatmul.mubr.msk.bf16.gmra.mrb[144].mxu0 %vm703_vm1, %v13128_v30  ;;  %v13119_v30 = vrot.slane %v3008_v6, 11  ;;  %v3014_v6 = vld [vmem:[%s16086_s5 + $0x444] sm:$0x8] }
 0x496   : > { %4325 = vmatprep.mubr.bf16.mxu0 %v20183_v59 }
 0x499   : > { %13471 = vmatmul.mubr.msk.bf16.gmra.mrb[84].mxu1 %vm703_vm1, %v15696_v27  ;;  %v4094_v27 = vsel %vm17528_vm9, %v13119_v30, %v4093_v50  ;;  %v4107_v50 = vrot.slane %v3015_v10, 7  ;;  %v13121_v30 = vrot.slane %v3014_v6, 11 }
 0x49a   : > { %8369 = vmatprep.mubr.bf16.mxu1 %v20183_v59  ;;  %v13131_v58 = vcombine.low %v4094_v27, %v4097_v11  ;;  %v18334_v27 = vld [vmem:[%s16086_s5 + $0x258] sm:$0xff]  }
 0x49b   : > { %v4109_v44 = vrot.slane %v4107_v50, 4  ;;  %v4108_v11 = vsel %vm17528_vm9, %v13121_v30, %v4107_v50  ;;  %v3022_v30 = vld [vmem:[%s16086_s5 + $0x484] sm:$0x7] }
 0x49d   : > { %13147 = vmatmul.mubr.msk.bf16.gmra.mrb[148].mxu0 %vm703_vm1, %v13129_v34  ;;  %v13120_v34 = vrot.slane %v3011_v17, 11  ;;  %v4114_v17 = vrot.slane %v3018_v26, 7 }
 0x49e   : > { %4335 = vmatprep.mubr.bf16.mxu0 %v20183_v59 }
 0x49f   : > { %v4101_v35 = vsel %vm17528_vm9, %v13120_v34, %v4100_v15  ;;  %v4111_v15 = vsel %vm17528_vm9, %v4109_v44, %v4110_v3  ;;  %v4116_v61 = vrot.slane %v4114_v17, 4  ;;  %v4115_v50 = vsel %vm17528_vm9, %v13122_v40, %v4114_v17  ;;  %v18364_v17 = vld [vmem:[%s16086_s5 + $0x290] sm:$0xff]   ;;  %v3023_v40 = vld [vmem:[%s16086_s5 + $0x498] sm:$0x8] }
 0x4a0   : > { %v13133_v34 = vcombine.low %v4108_v11, %v4111_v15  ;;  %v4124_v11 = vrot.slane %v3022_v30, 7  ;;  %v3024_v15 = vld [vmem:[%s16086_s5 + $0x49c] sm:$0xf] }
 0x4a1   : > { %13472 = vmatmul.mubr.msk.bf16.gmra.mrb[88].mxu1 %vm703_vm1, %v18289_v0 }
 0x4a2   : > { %8379 = vmatprep.mubr.bf16.mxu1 %v20183_v59 }
 0x4a5   : > { %13148 = vmatmul.mubr.msk.bf16.gmra.mrb[152].mxu0 %vm703_vm1, %v13130_v4  ;;  %v13132_v4 = vcombine.low %v4101_v35, %v4104_v18  ;;  %v3021_v35 = vld [vmem:[%s16086_s5 + $0x480] sm:$0xf]  ;;  %v18349_v18 = vld [vmem:[%s16086_s5 + $0x274] sm:$0xff]  }
 0x4a6   : > { %4345 = vmatprep.mubr.bf16.mxu0 %v20183_v59  ;;  %v4121_v49 = vrot.slane %v3021_v35, 7  ;;  %v13124_v35 = vrot.slane %v3023_v40, 11 }
 0x4a8   : > { %v4123_v26 = vrot.slane %v4121_v49, 4 }
 0x4a9   : > { %13473 = vmatmul.mubr.msk.bf16.gmra.mrb[92].mxu1 %vm703_vm1, %v18304_v28 }
 0x4aa   : > { %8389 = vmatprep.mubr.bf16.mxu1 %v20183_v59 }
 0x4ad   : > { %13149 = vmatmul.mubr.msk.bf16.gmra.mrb[156].mxu0 %vm703_vm1, %v13131_v58  ;;  %v3019_v58 = vld [vmem:[%s16086_s5 + $0x468] sm:$0x7] }
 0x4ae   : > { %4355 = vmatprep.mubr.bf16.mxu0 %v20183_v59  ;;  %v4117_v10 = vrot.slane %v3019_v58, 7  ;;  %v4125_v58 = vsel %vm17528_vm9, %v4123_v26, %v4124_v11  ;;  %v3026_v26 = vld [vmem:[%s16086_s5 + $0x4b4] sm:$0x8]  ;;  %v3028_v11 = vld [vmem:[%s16086_s5 + $0x4bc] sm:$0x7] }
 0x4af   : > { %v4138_v40 = vrot.slane %v3028_v11, 7 }
 0x4b0   : > { %v4118_v6 = vsel %vm17528_vm9, %v4116_v61, %v4117_v10  ;;  %v3025_v61 = vld [vmem:[%s16086_s5 + $0x4a0] sm:$0x7] }
 0x4b1   : > { %13474 = vmatmul.mubr.msk.bf16.gmra.mrb[96].mxu1 %vm703_vm1, %v18319_v29  ;;  %v13134_v44 = vcombine.low %v4115_v50, %v4118_v6  ;;  %v4131_v6 = vrot.slane %v3025_v61, 7  ;;  %v3030_v61 = vld [vmem:[%s16086_s5 + $0x4d4] sm:$0xf] }
 0x4b2   : > { %8399 = vmatprep.mubr.bf16.mxu1 %v20183_v59 }
 0x4b5   : > { %13150 = vmatmul.mubr.msk.bf16.gmra.mrb[160].mxu0 %vm703_vm1, %v13132_v4  ;;  %v3020_v4 = vld [vmem:[%s16086_s5 + $0x47c] sm:$0x8] }
 0x4b6   : > { %4365 = vmatprep.mubr.bf16.mxu0 %v20183_v59  ;;  %v13123_v3 = vrot.slane %v3020_v4, 11  ;;  %v3027_v4 = vld [vmem:[%s16086_s5 + $0x4b8] sm:$0xf] }
 0x4b8   : > { %v4122_v16 = vsel %vm17528_vm9, %v13123_v3, %v4121_v49  ;;  %v18379_v49 = vld [vmem:[%s16086_s5 + $0x2ac] sm:$0xff]   ;;  %v4135_v3 = vrot.slane %v3027_v4, 7  ;;  %v3031_v4 = vld [vmem:[%s16086_s5 + $0x4d8] sm:$0x7] }
 0x4b9   : > { %13475 = vmatmul.mubr.msk.bf16.gmra.mrb[100].mxu1 %vm703_vm1, %v18334_v27  ;;  %v13135_v10 = vcombine.low %v4122_v16, %v4125_v58  ;;  %v13125_v16 = vrot.slane %v3026_v26, 11  ;;  %v4145_v11 = vrot.slane %v3031_v4, 7 }
 0x4ba   : > { %8409 = vmatprep.mubr.bf16.mxu1 %v20183_v59  ;;  %v4137_v58 = vrot.slane %v4135_v3, 4 }
 0x4bd   : > { %13151 = vmatmul.mubr.msk.bf16.gmra.mrb[164].mxu0 %vm703_vm1, %v13133_v34  ;;  %v4128_v34 = vrot.slane %v3024_v15, 7 }
 0x4be   : > { %4375 = vmatprep.mubr.bf16.mxu0 %v20183_v59 }
 0x4bf   : > { %v4130_v50 = vrot.slane %v4128_v34, 4  ;;  %v4129_v30 = vsel %vm17528_vm9, %v13124_v35, %v4128_v34  ;;  %v18394_v34 = vld [vmem:[%s16086_s5 + $0x2c8] sm:$0xff]   ;;  %v4139_v35 = vsel %vm17528_vm9, %v4137_v58, %v4138_v40 }
 0x4c1   : > { %13476 = vmatmul.mubr.msk.bf16.gmra.mrb[104].mxu1 %vm703_vm1, %v18349_v18 }
 0x4c2   : > { %8419 = vmatprep.mubr.bf16.mxu1 %v20183_v59 }
 0x4c5   : > { %13152 = vmatmul.mubr.msk.bf16.gmra.mrb[168].mxu0 %vm703_vm1, %v13134_v44  ;;  %v4132_v44 = vsel %vm17528_vm9, %v4130_v50, %v4131_v6  ;;  %v4142_v50 = vrot.slane %v3030_v61, 7  ;;  %v3029_v6 = vld [vmem:[%s16086_s5 + $0x4d0] sm:$0x8]  ;;  %v3032_v61 = vld [vmem:[%s16086_s5 + $0x4ec] sm:$0x8] }
 0x4c6   : > { %4385 = vmatprep.mubr.bf16.mxu0 %v20183_v59  ;;  %v13136_v15 = vcombine.low %v4129_v30, %v4132_v44  ;;  %v13126_v44 = vrot.slane %v3029_v6, 11  ;;  %v13127_v6 = vrot.slane %v3032_v61, 11  ;;  %v10767_v61 = vld [vmem:[%s16086_s5 + $0x4c] sm:$0xf] }
 0x4c7   : > { %v4144_v26 = vrot.slane %v4142_v50, 4 }
 0x4c9   : > { %13477 = vmatmul.mubr.msk.bf16.gmra.mrb[108].mxu1 %vm703_vm1, %v18364_v17  ;;  %v4146_v58 = vsel %vm17528_vm9, %v4144_v26, %v4145_v11  ;;  %v8916_v11 = vsel %vm752_vm0, %v18241_v31, 0 }
 0x4ca   : > { %8429 = vmatprep.mubr.bf16.mxu1 %v20183_v59 }
 0x4cd   : > { %13153 = vmatmul.mubr.msk.bf16.gmra.mrb[172].mxu0 %vm703_vm1, %v13135_v10  ;;  %v4136_v10 = vsel %vm17528_vm9, %v13125_v16, %v4135_v3  ;;  %v18409_v3 = vld [vmem:[%s16086_s5 + $0x2e4] sm:$0xff]   ;;  %v4143_v16 = vsel %vm17528_vm9, %v13126_v44, %v4142_v50 }
 0x4ce   : > { %4395 = vmatprep.mubr.bf16.mxu0 %v20183_v59  ;;  %v13137_v30 = vcombine.low %v4136_v10, %v4139_v35  ;;  %v3034_v10 = vld [vmem:[%s16086_s5 + $0x4f4] sm:$0x7]  ;;  %v13138_v35 = vcombine.low %v4143_v16, %v4146_v58  ;;  %v18444_v16 = vld.sshfl [vmem:[#allocation5 + $0x28] sm:$0x33 pattern:$0x76325410] }
 0x4cf   : > { %v9516_v31 = vcombine.high %v18444_v16, %v18444_v16  ;;  %v18449_v58 = vld.sshfl [vmem:[#allocation5 + $0x48] sm:$0x33 pattern:$0x76325410] }
 0x4d1   : > { %13478 = vmatmul.mubr.msk.bf16.gmra.mrb[112].mxu1 %vm703_vm1, %v18379_v49 }
 0x4d2   : > { %8439 = vmatprep.mubr.bf16.mxu1 %v20183_v59 }
 0x4d5   : > { %13154 = vmatmul.mubr.msk.bf16.gmra.mrb[176].mxu0 %vm703_vm1, %v13136_v15  ;;  %v3033_v15 = vld [vmem:[%s16086_s5 + $0x4f0] sm:$0xf] }
 0x4d6   : > { %4405 = vmatprep.mubr.bf16.mxu0 %v20183_v59  ;;  %v4149_v40 = vrot.slane %v3033_v15, 7  ;;  %v7074_v15 = vsel %vm752_vm0, %v18236_v5, 0 }
 0x4d8   : > { %v4151_v4 = vrot.slane %v4149_v40, 4  ;;  %v4150_v50 = vsel %vm17528_vm9, %v13127_v6, %v4149_v40 }
 0x4d9   : > { %13479 = vmatmul.mubr.msk.bf16.gmra.mrb[116].mxu1 %vm703_vm1, %v18394_v34 }
 0x4da   : > { %8449 = vmatprep.mubr.bf16.mxu1 %v20183_v59 }
 0x4dd   : > { %13155 = vmatmul.mubr.msk.bf16.gmra.mrb[180].mxu0 %vm703_vm1, %v13137_v30  ;;  %v4152_v30 = vrot.slane %v3034_v10, 7 }
 0x4de   : > { %4415 = vmatprep.mubr.bf16.mxu0 %v20183_v59 }
 0x4df   : > { %v4153_v44 = vsel %vm17528_vm9, %v4151_v4, %v4152_v30  ;;  %v9181_v4 = vld [vmem:[%s16086_s5 + $0xd0] sm:$0x8] }
 0x4e0   : > { %v13139_v26 = vcombine.low %v4150_v50, %v4153_v44  ;;  %v9183_v50 = vld [vmem:[%s16086_s5 + $0xd8] sm:$0x7]  ;;  %v10968_v44 = vrot.slane %v10767_v61, 6 }
 0x4e1   : > { %13480 = vmatmul.mubr.msk.bf16.gmra.mrb[120].mxu1 %vm703_vm1, %v18409_v3 }
 0x4e2   : > { %8459 = vmatprep.mubr.bf16.mxu1 %v20183_v59 }
 0x4e5   : > { %13156 = vmatmul.mubr.msk.bf16.gmra.mrb[184].mxu0 %vm703_vm1, %v13138_v35 }
 0x4e6   : > { %4425 = vmatprep.mubr.bf16.mxu0 %v20183_v59 }
 0x4e9   : > { %13481 = vmatmul.mubr.msk.bf16.gmra.mrb[124].mxu1 %vm703_vm1, %v18423_v55 }
 0x4ea   : > { %8631 = vmatprep.mubr.bf16.mxu1 %v20183_v59 }
 0x4ed   : > { %13157 = vmatmul.mubr.msk.bf16.gmra.mrb[188].mxu0 %vm703_vm1, %v13139_v26 }
 0x4ee   : > { %6741 = vmatprep.mubr.bf16.mxu0 %v20183_v59 }
 0x4f1   : > { %13490 = vmatmul.mubr.msk.bf16.vlgmr.msra.gmra.mrb[64].mxu1 %vm703_vm1, %v18289_v0  ;;  %v11122_v0 = vcombine.high %v18449_v58, %v18449_v58 }
 0x4f2   : > { %8922 = vmatpush1.bf16.msra.mxu1 %v8916_v11  ;;  %8641 = vmatprep.mubr.bf16.mxu1 %v20183_v59  ;;  %v13531_v11 = vrot.slane %v9181_v4, 11  ;;  %v9191_v4 = vld [vmem:[%s16086_s5 + $0x128] sm:$0xf] }
 0x4f3   : > { %13697 = vmatprep.subr.msk.bf16.mxu1 %vm752_vm0, %v11122_v0  ;;  %v9358_v0 = vrot.slane %v9183_v50, 7 }
 0x4f5   : > { %13342 = vmatmul.mubr.msk.bf16.vlgmr.msra.gmra.mrb[128].mxu0 %vm703_vm1, %v17658_v37  ;;  %v18559_v37 = vld.sshfl [vmem:[#allocation5 + $0x50] sm:$0x33 pattern:$0x76325410] }
 0x4f6   : > { %7080 = vmatpush1.bf16.msra.mxu0 %v7074_v15  ;;  %6751 = vmatprep.mubr.bf16.mxu0 %v20183_v59  ;;  %v10766_v15 = vld [vmem:[%s16086_s5 + $0x48] sm:$0xc] }
 0x4f7   : > { %13563 = vmatprep.subr.msk.bf16.mxu0 %vm752_vm0, %v9516_v31 }
 0x4f9   : > { %13491 = vmatmul.mubr.msk.bf16.gmra.mrb[68].mxu1 %vm703_vm1, %v18304_v28 }
 0x4fa   : > { %8651 = vmatprep.mubr.bf16.mxu1 %v20183_v59 }
 0x4fd   : > { %13343 = vmatmul.mubr.msk.bf16.gmra.mrb[132].mxu0 %vm703_vm1, %v17679_v7  ;;  %v11652_v7 = vcombine.high %v18559_v37, %v18559_v37 }
 0x4fe   : > { %6761 = vmatprep.mubr.bf16.mxu0 %v20183_v59 }
 0x501   : > { %13492 = vmatmul.mubr.msk.bf16.gmra.mrb[72].mxu1 %vm703_vm1, %v18319_v29 }
 0x502   : > { %8661 = vmatprep.mubr.bf16.mxu1 %v20183_v59 }
 0x505   : > { %13344 = vmatmul.mubr.msk.bf16.gmra.mrb[136].mxu0 %vm703_vm1, %v17700_v62 }
 0x506   : > { %6771 = vmatprep.mubr.bf16.mxu0 %v20183_v59 }
 0x509   : > { %13493 = vmatmul.mubr.msk.bf16.gmra.mrb[76].mxu1 %vm703_vm1, %v18334_v27 }
 0x50a   : > { %8671 = vmatprep.mubr.bf16.mxu1 %v20183_v59 }
 0x50d   : > { %13345 = vmatmul.mubr.msk.bf16.gmra.mrb[140].mxu0 %vm703_vm1, %v17721_v8 }
 0x50e   : > { %6781 = vmatprep.mubr.bf16.mxu0 %v20183_v59 }
 0x511   : > { %13494 = vmatmul.mubr.msk.bf16.gmra.mrb[80].mxu1 %vm703_vm1, %v18349_v18  ;;  %v10763_v18 = vld [vmem:[%s16086_s5 + $0x2c] sm:$0xc] }
 0x512   : > { %8681 = vmatprep.mubr.bf16.mxu1 %v20183_v59  ;;  %v13665_v10 = vrot.slane %v10763_v18, 10  ;;  %v10773_v18 = vld [vmem:[%s16086_s5 + $0x84] sm:$0xf] }
 0x515   : > { %13346 = vmatmul.mubr.msk.bf16.gmra.mrb[144].mxu0 %vm703_vm1, %v17742_v33 }
 0x516   : > { %6791 = vmatprep.mubr.bf16.mxu0 %v20183_v59 }
 0x519   : > { %13495 = vmatmul.mubr.msk.bf16.gmra.mrb[84].mxu1 %vm703_vm1, %v18364_v17  ;;  %v10765_v17 = vld [vmem:[%s16086_s5 + $0x34] sm:$0x3] }
 0x51a   : > { %8691 = vmatprep.mubr.bf16.mxu1 %v20183_v59  ;;  %v10964_v6 = vrot.slane %v10765_v17, 6 }
 0x51d   : > { %13347 = vmatmul.mubr.msk.bf16.gmra.mrb[148].mxu0 %vm703_vm1, %v17760_v2 }
 0x51e   : > { %6801 = vmatprep.mubr.bf16.mxu0 %v20183_v59 }
 0x521   : > { %13496 = vmatmul.mubr.msk.bf16.gmra.mrb[88].mxu1 %vm703_vm1, %v18379_v49 }
 0x522   : > { %8701 = vmatprep.mubr.bf16.mxu1 %v20183_v59 }
 0x525   : > { %13348 = vmatmul.mubr.msk.bf16.gmra.mrb[152].mxu0 %vm703_vm1, %v17200_v14  ;;  %v15707_v14 = vld [vmem:[%s16086_s5 + $0x31c] sm:$0xff]  }
 0x526   : > { %6811 = vmatprep.mubr.bf16.mxu0 %v20183_v59 }
 0x529   : > { %13497 = vmatmul.mubr.msk.bf16.gmra.mrb[92].mxu1 %vm703_vm1, %v18394_v34 }
 0x52a   : > { %8711 = vmatprep.mubr.bf16.mxu1 %v20183_v59 }
 0x52d   : > { %13349 = vmatmul.mubr.msk.bf16.gmra.mrb[156].mxu0 %vm703_vm1, %v17219_v48  ;;  %v15708_v48 = vld [vmem:[%s16086_s5 + $0x338] sm:$0xff]  }
 0x52e   : > { %6821 = vmatprep.mubr.bf16.mxu0 %v20183_v59 }
 0x531   : > { %13498 = vmatmul.mubr.msk.bf16.gmra.mrb[96].mxu1 %vm703_vm1, %v18409_v3 }
 0x532   : > { %8721 = vmatprep.mubr.bf16.mxu1 %v20183_v59 }
 0x535   : > { %13350 = vmatmul.mubr.msk.bf16.gmra.mrb[160].mxu0 %vm703_vm1, %v17244_v1  ;;  %v15709_v1 = vld [vmem:[%s16086_s5 + $0x354] sm:$0xff]  }
 0x536   : > { %6831 = vmatprep.mubr.bf16.mxu0 %v20183_v59 }
 0x539   : > { %13499 = vmatmul.mubr.msk.bf16.gmra.mrb[100].mxu1 %vm703_vm1, %v18423_v55 }
 0x53a   : > { %8731 = vmatprep.mubr.bf16.mxu1 %v20183_v59 }
 0x53d   : > { %13351 = vmatmul.mubr.msk.bf16.gmra.mrb[164].mxu0 %vm703_vm1, %v17259_v63  ;;  %v15710_v63 = vld [vmem:[%s16086_s5 + $0x370] sm:$0xff]  }
 0x53e   : > { %6841 = vmatprep.mubr.bf16.mxu0 %v20183_v59 }
 0x541   : > { %13500 = vmatmul.mubr.msk.bf16.gmra.mrb[104].mxu1 %vm703_vm1, %v15707_v14 }
 0x542   : > { %8741 = vmatprep.mubr.bf16.mxu1 %v20183_v59 }
 0x545   : > { %13352 = vmatmul.mubr.msk.bf16.gmra.mrb[168].mxu0 %vm703_vm1, %v17274_v32  ;;  %v15711_v32 = vld [vmem:[%s16086_s5 + $0x38c] sm:$0xff]  }
 0x546   : > { %6851 = vmatprep.mubr.bf16.mxu0 %v20183_v59 }
 0x549   : > { %13501 = vmatmul.mubr.msk.bf16.gmra.mrb[108].mxu1 %vm703_vm1, %v15708_v48 }
 0x54a   : > { %8751 = vmatprep.mubr.bf16.mxu1 %v20183_v59 }
 0x54d   : > { %13353 = vmatmul.mubr.msk.bf16.gmra.mrb[172].mxu0 %vm703_vm1, %v17286_v54  ;;  %v18554_v54 = vld.sshfl [vmem:[#allocation5 + $0x30] sm:$0x33 pattern:$0x76325410] }
 0x54e   : > { %6861 = vmatprep.mubr.bf16.mxu0 %v20183_v59 }
 0x551   : > { %13502 = vmatmul.mubr.msk.bf16.gmra.mrb[112].mxu1 %vm703_vm1, %v15709_v1 }
 0x552   : > { %8761 = vmatprep.mubr.bf16.mxu1 %v20183_v59 }
 0x555   : > { %13354 = vmatmul.mubr.msk.bf16.gmra.mrb[176].mxu0 %vm703_vm1, %v16126_v51  ;;  %v15712_v51 = vld [vmem:[%s16086_s5 + $0x3a8] sm:$0xff]  }
 0x556   : > { %6871 = vmatprep.mubr.bf16.mxu0 %v20183_v59 }
 0x559   : > { %13503 = vmatmul.mubr.msk.bf16.gmra.mrb[116].mxu1 %vm703_vm1, %v15710_v63 }
 0x55a   : > { %8771 = vmatprep.mubr.bf16.mxu1 %v20183_v59 }
 0x55d   : > { %13355 = vmatmul.mubr.msk.bf16.gmra.mrb[180].mxu0 %vm703_vm1, %v16143_v60  ;;  %v11172_v60 = vsel %vm752_vm0, %v18449_v58, 0 }
 0x55e   : > { %6881 = vmatprep.mubr.bf16.mxu0 %v20183_v59 }
 0x561   : > { %13504 = vmatmul.mubr.msk.bf16.gmra.mrb[120].mxu1 %vm703_vm1, %v15711_v32 }
 0x562   : > { %8781 = vmatprep.mubr.bf16.mxu1 %v20183_v59 }
 0x565   : > { %13356 = vmatmul.mubr.msk.bf16.gmra.mrb[184].mxu0 %vm703_vm1, %v16158_v9  ;;  %v9566_v9 = vsel %vm752_vm0, %v18444_v16, 0 }
 0x566   : > { %6891 = vmatprep.mubr.bf16.mxu0 %v20183_v59 }
 0x569   : > { %13505 = vmatmul.mubr.msk.bf16.gmra.mrb[124].mxu1 %vm703_vm1, %v15712_v51 }
 0x56a   : > { %8953 = vmatprep.mubr.bf16.mxu1 %v20183_v59 }
 0x56d   : > { %13357 = vmatmul.mubr.msk.bf16.gmra.mrb[188].mxu0 %vm703_vm1, %v16173_v25  ;;  %v9994_v25 = vcombine.high %v18554_v54, %v18554_v54 }
 0x56e   : > { %7111 = vmatprep.mubr.bf16.mxu0 %v20183_v59 }
 0x571   : > { %13514 = vmatmul.mubr.msk.bf16.vlgmr.msra.gmra.mrb[64].mxu1 %vm703_vm1, %v18379_v49  ;;  %v9182_v49 = vld [vmem:[%s16086_s5 + $0xd4] sm:$0xf] }
 0x572   : > { %11178 = vmatpush1.bf16.msra.mxu1 %v11172_v60  ;;  %8963 = vmatprep.mubr.bf16.mxu1 %v20183_v59  ;;  %v9355_v30 = vrot.slane %v9182_v49, 7 }
 0x573   : > { %13747 = vmatprep.subr.msk.bf16.mxu1 %vm752_vm0, %v11652_v7 }
 0x574   : > { %v9357_v58 = vrot.slane %v9355_v30, 4  ;;  %v9356_v60 = vsel %vm17528_vm9, %v13531_v11, %v9355_v30 }
 0x575   : > { %13372 = vmatmul.mubr.msk.bf16.vlgmr.msra.gmra.mrb[128].mxu0 %vm703_vm1, %v16322_v43  ;;  %v15713_v43 = vld [vmem:[%s16086_s5 + $0x3c4] sm:$0xff]  }
 0x576   : > { %9572 = vmatpush1.bf16.msra.mxu0 %v9566_v9  ;;  %7121 = vmatprep.mubr.bf16.mxu0 %v20183_v59  ;;  %v9184_v9 = vld [vmem:[%s16086_s5 + $0xec] sm:$0x8] }
 0x577   : > { %13605 = vmatprep.subr.msk.bf16.mxu0 %vm752_vm0, %v9994_v25  ;;  %v18687_v25 = vld.sshfl [vmem:[#allocation5 + $0x3c] sm:$0x33 pattern:$0x76325410] }
 0x579   : > { %13515 = vmatmul.mubr.msk.bf16.gmra.mrb[68].mxu1 %vm703_vm1, %v18394_v34 }
 0x57a   : > { %8973 = vmatprep.mubr.bf16.mxu1 %v20183_v59 }
 0x57d   : > { %13373 = vmatmul.mubr.msk.bf16.gmra.mrb[132].mxu0 %vm703_vm1, %v16337_v57  ;;  %v15714_v57 = vld [vmem:[%s16086_s5 + $0x3e0] sm:$0xff]  }
 0x57e   : > { %7131 = vmatprep.mubr.bf16.mxu0 %v20183_v59 }
 0x581   : > { %13516 = vmatmul.mubr.msk.bf16.gmra.mrb[72].mxu1 %vm703_vm1, %v18409_v3 }
 0x582   : > { %8983 = vmatprep.mubr.bf16.mxu1 %v20183_v59 }
 0x585   : > { %13374 = vmatmul.mubr.msk.bf16.gmra.mrb[136].mxu0 %vm703_vm1, %v16353_v13  ;;  %v15715_v13 = vld [vmem:[%s16086_s5 + $0x3fc] sm:$0xff]  }
 0x586   : > { %7141 = vmatprep.mubr.bf16.mxu0 %v20183_v59 }
 0x589   : > { %13517 = vmatmul.mubr.msk.bf16.gmra.mrb[76].mxu1 %vm703_vm1, %v18423_v55  ;;  %v15717_v55 = vld [vmem:[%s16086_s5 + $0x434] sm:$0xff]  }
 0x58a   : > { %8993 = vmatprep.mubr.bf16.mxu1 %v20183_v59 }
 0x58d   : > { %13375 = vmatmul.mubr.msk.bf16.gmra.mrb[140].mxu0 %vm703_vm1, %v16373_v38  ;;  %v15716_v38 = vld [vmem:[%s16086_s5 + $0x418] sm:$0xff]  }
 0x58e   : > { %7151 = vmatprep.mubr.bf16.mxu0 %v20183_v59 }
 0x591   : > { %13518 = vmatmul.mubr.msk.bf16.gmra.mrb[80].mxu1 %vm703_vm1, %v15707_v14  ;;  %v10032_v14 = vsel %vm752_vm0, %v18554_v54, 0  ;;  %v9359_v54 = vsel %vm17528_vm9, %v9357_v58, %v9358_v0  ;;  %v10776_v58 = vld [vmem:[%s16086_s5 + $0xa0] sm:$0xf] }
 0x592   : > { %9003 = vmatprep.mubr.bf16.mxu1 %v20183_v59 }
 0x595   : > { %13376 = vmatmul.mubr.msk.bf16.gmra.mrb[144].mxu0 %vm703_vm1, %v17438_v22  ;;  %v10761_v22 = vld [vmem:[%s16086_s5 + $0x14] sm:$0xf] }
 0x596   : > { %7161 = vmatprep.mubr.bf16.mxu0 %v20183_v59 }
 0x599   : > { %13519 = vmatmul.mubr.msk.bf16.gmra.mrb[84].mxu1 %vm703_vm1, %v15708_v48  ;;  %v10768_v48 = vld [vmem:[%s16086_s5 + $0x50] sm:$0x3] }
 0x59a   : > { %9013 = vmatprep.mubr.bf16.mxu1 %v20183_v59 }
 0x59d   : > { %13377 = vmatmul.mubr.msk.bf16.gmra.mrb[148].mxu0 %vm703_vm1, %v17453_v39  ;;  %v10760_v39 = vld [vmem:[%s16086_s5 + $0x10] sm:$0xc] }
 0x59e   : > { %7171 = vmatprep.mubr.bf16.mxu0 %v20183_v59  ;;  %v13664_v62 = vrot.slane %v10760_v39, 10 }
 0x5a1   : > { %13520 = vmatmul.mubr.msk.bf16.gmra.mrb[88].mxu1 %vm703_vm1, %v15709_v1  ;;  %v9185_v1 = vld [vmem:[%s16086_s5 + $0xf0] sm:$0xf] }
 0x5a2   : > { %9023 = vmatprep.mubr.bf16.mxu1 %v20183_v59  ;;  %v9362_v7 = vrot.slane %v9185_v1, 7 }
 0x5a5   : > { %13378 = vmatmul.mubr.msk.bf16.gmra.mrb[152].mxu0 %vm703_vm1, %v17468_v47  ;;  %v10954_v47 = vrot.slane %v10761_v22, 6  ;;  %v13547_v22 = vcombine.low %v9356_v60, %v9359_v54  ;;  %v10989_v60 = vrot.slane %v10776_v58, 6  ;;  %v9194_v54 = vld [vmem:[%s16086_s5 + $0x144] sm:$0xf] }
 0x5a6   : > { %7181 = vmatprep.mubr.bf16.mxu0 %v20183_v59 }
 0x5a7   : > { %v10956_v33 = vrot.slane %v10954_v47, 4 }
 0x5a9   : > { %13521 = vmatmul.mubr.msk.bf16.gmra.mrb[92].mxu1 %vm703_vm1, %v15710_v63  ;;  %v13666_v63 = vrot.slane %v10766_v15, 10  ;;  %v9190_v15 = vld [vmem:[%s16086_s5 + $0x124] sm:$0x8] }
 0x5aa   : > { %9033 = vmatprep.mubr.bf16.mxu1 %v20183_v59 }
 0x5ab   : > { %v10969_v39 = vsel %vm16367_vm6, %v13666_v63, %v10968_v44 }
 0x5ad   : > { %13379 = vmatmul.mubr.msk.bf16.gmra.mrb[156].mxu0 %vm703_vm1, %v17483_v21  ;;  %v9179_v21 = vld [vmem:[%s16086_s5 + $0xb8] sm:$0xf] }
 0x5ae   : > { %7191 = vmatprep.mubr.bf16.mxu0 %v20183_v59  ;;  %v9348_v8 = vrot.slane %v9179_v21, 7 }
 0x5b0   : > { %v9350_v5 = vrot.slane %v9348_v8, 4 }
 0x5b1   : > { %13522 = vmatmul.mubr.msk.bf16.gmra.mrb[96].mxu1 %vm703_vm1, %v15711_v32  ;;  %v10970_v32 = vrot.slane %v10968_v44, 4 }
 0x5b2   : > { %9043 = vmatprep.mubr.bf16.mxu1 %v20183_v59 }
 0x5b5   : > { %13380 = vmatmul.mubr.msk.bf16.gmra.mrb[160].mxu0 %vm703_vm1, %v17498_v23  ;;  %v10762_v23 = vld [vmem:[%s16086_s5 + $0x18] sm:$0x3] }
 0x5b6   : > { %7201 = vmatprep.mubr.bf16.mxu0 %v20183_v59  ;;  %v10957_v2 = vrot.slane %v10762_v23, 6  ;;  %v9364_v23 = vrot.slane %v9362_v7, 4 }
 0x5b8   : > { %v10958_v29 = vsel %vm16367_vm6, %v10956_v33, %v10957_v2  ;;  %v10771_v33 = vld [vmem:[%s16086_s5 + $0x6c] sm:$0x3] }
 0x5b9   : > { %13523 = vmatmul.mubr.msk.bf16.gmra.mrb[100].mxu1 %vm703_vm1, %v15712_v51  ;;  %v9188_v2 = vld [vmem:[%s16086_s5 + $0x10c] sm:$0xf] }
 0x5ba   : > { %9053 = vmatprep.mubr.bf16.mxu1 %v20183_v59 }
 0x5bd   : > { %13381 = vmatmul.mubr.msk.bf16.gmra.mrb[164].mxu0 %vm703_vm1, %v17514_v41  ;;  %v15718_v41 = vld [vmem:[%s16086_s5 + $0x450] sm:$0xff]  }
 0x5be   : > { %7211 = vmatprep.mubr.bf16.mxu0 %v20183_v59 }
 0x5c1   : > { %13524 = vmatmul.mubr.msk.bf16.gmra.mrb[104].mxu1 %vm703_vm1, %v15713_v43  ;;  %v10460_v43 = vcombine.high %v18687_v25, %v18687_v25 }
 0x5c2   : > { %9063 = vmatprep.mubr.bf16.mxu1 %v20183_v59 }
 0x5c5   : > { %13382 = vmatmul.mubr.msk.bf16.gmra.mrb[168].mxu0 %vm703_vm1, %v17946_v56  ;;  %v9178_v56 = vld [vmem:[%s16086_s5 + $0xb4] sm:$0x8] }
 0x5c6   : > { %7221 = vmatprep.mubr.bf16.mxu0 %v20183_v59 }
 0x5c9   : > { %13525 = vmatmul.mubr.msk.bf16.gmra.mrb[108].mxu1 %vm703_vm1, %v15714_v57  ;;  %v18694_v57 = vld.sshfl [vmem:[#allocation5 + $0x5c] sm:$0x33 pattern:$0x76325410] }
 0x5ca   : > { %9073 = vmatprep.mubr.bf16.mxu1 %v20183_v59 }
 0x5cd   : > { %13383 = vmatmul.mubr.msk.bf16.gmra.mrb[172].mxu0 %vm703_vm1, %v17975_v42  ;;  %v9180_v42 = vld [vmem:[%s16086_s5 + $0xbc] sm:$0x7] }
 0x5ce   : > { %7231 = vmatprep.mubr.bf16.mxu0 %v20183_v59  ;;  %v9351_v28 = vrot.slane %v9180_v42, 7 }
 0x5d0   : > { %v9352_v40 = vsel %vm17528_vm9, %v9350_v5, %v9351_v28  ;;  %v10978_v28 = vrot.slane %v10771_v33, 6 }
 0x5d1   : > { %13526 = vmatmul.mubr.msk.bf16.gmra.mrb[112].mxu1 %vm703_vm1, %v15715_v13  ;;  %v9186_v13 = vld [vmem:[%s16086_s5 + $0xf4] sm:$0x7] }
 0x5d2   : > { %9083 = vmatprep.mubr.bf16.mxu1 %v20183_v59 }
 0x5d5   : > { %13384 = vmatmul.mubr.msk.bf16.gmra.mrb[176].mxu0 %vm703_vm1, %v18004_v45  ;;  %v10764_v45 = vld [vmem:[%s16086_s5 + $0x30] sm:$0xf] }
 0x5d6   : > { %7241 = vmatprep.mubr.bf16.mxu0 %v20183_v59  ;;  %v10961_v27 = vrot.slane %v10764_v45, 6 }
 0x5d8   : > { %v10963_v35 = vrot.slane %v10961_v27, 4  ;;  %v10962_v16 = vsel %vm16367_vm6, %v13665_v10, %v10961_v27  ;;  %v9189_v27 = vld [vmem:[%s16086_s5 + $0x110] sm:$0x7]  ;;  %v10772_v10 = vld [vmem:[%s16086_s5 + $0x80] sm:$0xc] }
 0x5d9   : > { %13527 = vmatmul.mubr.msk.bf16.gmra.mrb[116].mxu1 %vm703_vm1, %v15716_v38  ;;  %v10770_v38 = vld [vmem:[%s16086_s5 + $0x68] sm:$0xf]  ;;  %v9372_v61 = vrot.slane %v9189_v27, 7  ;;  %v13668_v50 = vrot.slane %v10772_v10, 10 }
 0x5da   : > { %9093 = vmatprep.mubr.bf16.mxu1 %v20183_v59  ;;  %v10965_v31 = vsel %vm16367_vm6, %v10963_v35, %v10964_v6  ;;  %v10982_v35 = vrot.slane %v10773_v18, 6  ;;  %v10774_v6 = vld [vmem:[%s16086_s5 + $0x88] sm:$0x3] }
 0x5db   : > { %v13681_v51 = vcombine.low %v10962_v16, %v10965_v31  ;;  %v10985_v11 = vrot.slane %v10774_v6, 6  ;;  %v9376_v16 = vrot.slane %v9191_v4, 7  ;;  %v9192_v31 = vld [vmem:[%s16086_s5 + $0x12c] sm:$0x7] }
 0x5dd   : > { %13385 = vmatmul.mubr.msk.bf16.gmra.mrb[180].mxu0 %vm703_vm1, %v18033_v12  ;;  %v13530_v12 = vrot.slane %v9178_v56, 11  ;;  %v9378_v63 = vrot.slane %v9376_v16, 4 }
 0x5de   : > { %7251 = vmatprep.mubr.bf16.mxu0 %v20183_v59 }
 0x5df   : > { %v9349_v3 = vsel %vm17528_vm9, %v13530_v12, %v9348_v8  ;;  %v10975_v8 = vrot.slane %v10770_v38, 6  ;;  %v10991_v38 = vrot.slane %v10989_v60, 4 }
 0x5e0   : > { %v13546_v26 = vcombine.low %v9349_v3, %v9352_v40 }
 0x5e1   : > { %13528 = vmatmul.mubr.msk.bf16.gmra.mrb[120].mxu1 %vm703_vm1, %v15717_v55  ;;  %v12182_v55 = vcombine.high %v18694_v57, %v18694_v57  ;;  %v10977_v5 = vrot.slane %v10975_v8, 4 }
 0x5e2   : > { %9103 = vmatprep.mubr.bf16.mxu1 %v20183_v59 }
 0x5e3   : > { %v10979_v3 = vsel %vm16367_vm6, %v10977_v5, %v10978_v28 }
 0x5e5   : > { %13386 = vmatmul.mubr.msk.bf16.gmra.mrb[184].mxu0 %vm703_vm1, %v18062_v24  ;;  %v10955_v24 = vsel %vm16367_vm6, %v13664_v62, %v10954_v47  ;;  %v13532_v47 = vrot.slane %v9184_v9, 11  ;;  %v10769_v62 = vld [vmem:[%s16086_s5 + $0x64] sm:$0xc]  ;;  %v10777_v9 = vld [vmem:[%s16086_s5 + $0xa4] sm:$0x3] }
 0x5e6   : > { %7261 = vmatprep.mubr.bf16.mxu0 %v20183_v59  ;;  %v13680_v34 = vcombine.low %v10955_v24, %v10958_v29  ;;  %v13667_v45 = vrot.slane %v10769_v62, 10  ;;  %v9187_v24 = vld [vmem:[%s16086_s5 + $0x108] sm:$0x8]  ;;  %v9369_v29 = vrot.slane %v9188_v2, 7 }
 0x5e7   : > { %v9363_v42 = vsel %vm17528_vm9, %v13532_v47, %v9362_v7  ;;  %v9195_v47 = vld [vmem:[%s16086_s5 + $0x148] sm:$0x7] }
 0x5e8   : > { %v10976_v49 = vsel %vm16367_vm6, %v13667_v45, %v10975_v8  ;;  %v9371_v40 = vrot.slane %v9369_v29, 4  ;;  %v9386_v2 = vrot.slane %v9195_v47, 7  ;;  %v10780_v45 = vld [vmem:[%s16086_s5 + $0xc0] sm:$0x3] }
 0x5e9   : > { %13529 = vmatmul.mubr.msk.bf16.gmra.mrb[124].mxu1 %vm703_vm1, %v15718_v41  ;;  %v9365_v41 = vrot.slane %v9186_v13, 7  ;;  %v13683_v30 = vcombine.low %v10976_v49, %v10979_v3  ;;  %v10999_v18 = vrot.slane %v10780_v45, 6  ;;  %v10782_v3 = vld [vmem:[%s16086_s5 + $0xd8] sm:$0xf] }
 0x5ea   : > { %11209 = vmatprep.mubr.bf16.mxu1 %v20183_v59  ;;  %v9373_v44 = vsel %vm17528_vm9, %v9371_v40, %v9372_v61 }
 0x5eb   : > { %v9366_v12 = vsel %vm17528_vm9, %v9364_v23, %v9365_v41 }
 0x5ec   : > { %v13548_v17 = vcombine.low %v9363_v42, %v9366_v12  ;;  %v9197_v12 = vld [vmem:[%s16086_s5 + $0x160] sm:$0xf] }
 0x5ed   : > { %13387 = vmatmul.mubr.msk.bf16.gmra.mrb[188].mxu0 %vm703_vm1, %v18091_v52  ;;  %v11702_v52 = vsel %vm752_vm0, %v18559_v37, 0  ;;  %v10971_v37 = vrot.slane %v10768_v48, 6  ;;  %v13534_v48 = vrot.slane %v9190_v15, 11  ;;  %v9390_v49 = vrot.slane %v9197_v12, 7 }
 0x5ee   : > { %9603 = vmatprep.mubr.bf16.mxu0 %v20183_v59 }
 0x5ef   : > { %v10972_v21 = vsel %vm16367_vm6, %v10970_v32, %v10971_v37  ;;  %v9379_v32 = vrot.slane %v9192_v31, 7  ;;  %v9377_v7 = vsel %vm17528_vm9, %v13534_v48, %v9376_v16  ;;  %v9392_v6 = vrot.slane %v9390_v49, 4  ;;  %v9201_v48 = vld [vmem:[%s16086_s5 + $0x180] sm:$0x7] }
 0x5f0   : > { %v13682_v56 = vcombine.low %v10969_v39, %v10972_v21  ;;  %v9383_v39 = vrot.slane %v9194_v54, 7  ;;  %v10779_v21 = vld [vmem:[%s16086_s5 + $0xbc] sm:$0xf]  ;;  %v9400_v54 = vrot.slane %v9201_v48, 7 }
 0x5f1   : > { %13698 = vmatmul.mubr.msk.bf16.vlgmr.msra.gmra.mrb[0].mxu1 %vm703_vm1, %v13680_v34  ;;  %v13533_v34 = vrot.slane %v9187_v24, 11  ;;  %v9380_v13 = vsel %vm17528_vm9, %v9378_v63, %v9379_v32  ;;  %v10996_v42 = vrot.slane %v10779_v21, 6 }
 0x5f2   : > { %11708 = vmatpush1.bf16.msra.mxu1 %v11702_v52  ;;  %11219 = vmatprep.mubr.bf16.mxu1 %v20183_v59  ;;  %v13550_v23 = vcombine.low %v9377_v7, %v9380_v13  ;;  %v9385_v33 = vrot.slane %v9383_v39, 4  ;;  %v9203_v13 = vld [vmem:[%s16086_s5 + $0x198] sm:$0xf] }
 0x5f3   : > { %13797 = vmatprep.subr.msk.bf16.mxu1 %vm752_vm0, %v12182_v55  ;;  %v9370_v52 = vsel %vm17528_vm9, %v13533_v34, %v9369_v29  ;;  %v10992_v55 = vrot.slane %v10777_v9, 6  ;;  %v10998_v27 = vrot.slane %v10996_v42, 4  ;;  %v9198_v34 = vld [vmem:[%s16086_s5 + $0x164] sm:$0x7] }
 0x5f4   : > { %v13549_v0 = vcombine.low %v9370_v52, %v9373_v44  ;;  %v9387_v29 = vsel %vm17528_vm9, %v9385_v33, %v9386_v2  ;;  %v9393_v4 = vrot.slane %v9198_v34, 7  ;;  %v11003_v52 = vrot.slane %v10782_v3, 6  ;;  %v9200_v44 = vld [vmem:[%s16086_s5 + $0x17c] sm:$0xf] }
 0x5f5   : > { %13564 = vmatmul.mubr.msk.bf16.vlgmr.msra.gmra.mrb[128].mxu0 %vm703_vm1, %v13546_v26  ;;  %v10984_v26 = vrot.slane %v10982_v35, 4  ;;  %v10993_v8 = vsel %vm16367_vm6, %v10991_v38, %v10992_v55 }
 0x5f6   : > { %10038 = vmatpush1.bf16.msra.mxu0 %v10032_v14  ;;  %9613 = vmatprep.mubr.bf16.mxu0 %v20183_v59  ;;  %v10983_v14 = vsel %vm16367_vm6, %v13668_v50, %v10982_v35  ;;  %v11000_v35 = vsel %vm16367_vm6, %v10998_v27, %v10999_v18  ;;  %v10783_v50 = vld [vmem:[%s16086_s5 + $0xdc] sm:$0x3]  ;;  %v9394_v16 = vsel %vm17528_vm9, %v9392_v6, %v9393_v4  ;;  %v11005_v31 = vrot.slane %v11003_v52, 4 }
 0x5f7   : > { %13647 = vmatprep.subr.msk.bf16.mxu0 %vm752_vm0, %v10460_v43  ;;  %v10986_v1 = vsel %vm16367_vm6, %v10984_v26, %v10985_v11  ;;  %v11006_v58 = vrot.slane %v10783_v50, 6 }
 0x5f8   : > { %v13684_v37 = vcombine.low %v10983_v14, %v10986_v1  ;;  %v9397_v14 = vrot.slane %v9200_v44, 7  ;;  %v10785_v1 = vld [vmem:[%s16086_s5 + $0xf4] sm:$0xf] }
 0x5f9   : > { %13699 = vmatmul.mubr.msk.bf16.gmra.mrb[4].mxu1 %vm703_vm1, %v13681_v51  ;;  %v10775_v51 = vld [vmem:[%s16086_s5 + $0x9c] sm:$0xc]  ;;  %v11010_v7 = vrot.slane %v10785_v1, 6 }
 0x5fa   : > { %11229 = vmatprep.mubr.bf16.mxu1 %v20183_v59  ;;  %v13669_v43 = vrot.slane %v10775_v51, 10  ;;  %v9399_v9 = vrot.slane %v9397_v14, 4 }
 0x5fb   : > { %v11012_v47 = vrot.slane %v11010_v7, 4 }
 0x5fc   : > { %v10990_v41 = vsel %vm16367_vm6, %v13669_v43, %v10989_v60  ;;  %v11007_v60 = vsel %vm16367_vm6, %v11005_v31, %v11006_v58  ;;  %v10786_v43 = vld [vmem:[%s16086_s5 + $0xf8] sm:$0x3] }
 0x5fd   : > { %13565 = vmatmul.mubr.msk.bf16.gmra.mrb[132].mxu0 %vm703_vm1, %v13547_v22  ;;  %v9193_v22 = vld [vmem:[%s16086_s5 + $0x140] sm:$0x8]  ;;  %v13685_v5 = vcombine.low %v10990_v41, %v10993_v8  ;;  %v11013_v21 = vrot.slane %v10786_v43, 6  ;;  %v9404_v41 = vrot.slane %v9203_v13, 7  ;;  %v10788_v8 = vld [vmem:[%s16086_s5 + $0x110] sm:$0xf] }
 0x5fe   : > { %9623 = vmatprep.mubr.bf16.mxu0 %v20183_v59  ;;  %v13535_v62 = vrot.slane %v9193_v22, 11  ;;  %v9212_v43 = vld [vmem:[%s16086_s5 + $0x1ec] sm:$0xf] }
 0x5ff   : > { %v9406_v45 = vrot.slane %v9404_v41, 4 }
 0x600   : > { %v9384_v28 = vsel %vm17528_vm9, %v13535_v62, %v9383_v39  ;;  %v9401_v39 = vsel %vm17528_vm9, %v9399_v9, %v9400_v54  ;;  %v9204_v62 = vld [vmem:[%s16086_s5 + $0x19c] sm:$0x7] }
 0x601   : > { %13700 = vmatmul.mubr.msk.bf16.gmra.mrb[8].mxu1 %vm703_vm1, %v13682_v56  ;;  %v10778_v56 = vld [vmem:[%s16086_s5 + $0xb8] sm:$0xc]  ;;  %v13551_v40 = vcombine.low %v9384_v28, %v9387_v29  ;;  %v9407_v12 = vrot.slane %v9204_v62, 7  ;;  %v11017_v28 = vrot.slane %v10788_v8, 6  ;;  %v9206_v29 = vld [vmem:[%s16086_s5 + $0x1b4] sm:$0xf] }
 0x602   : > { %11239 = vmatprep.mubr.bf16.mxu1 %v20183_v59  ;;  %v13670_v24 = vrot.slane %v10778_v56, 10  ;;  %v9211_v8 = vld [vmem:[%s16086_s5 + $0x1e8] sm:$0x8] }
 0x603   : > { %v11019_v34 = vrot.slane %v11017_v28, 4 }
 0x604   : > { %v10997_v61 = vsel %vm16367_vm6, %v13670_v24, %v10996_v42  ;;  %v11014_v42 = vsel %vm16367_vm6, %v11012_v47, %v11013_v21  ;;  %v10789_v24 = vld [vmem:[%s16086_s5 + $0x114] sm:$0x3]  ;;  %v9425_v21 = vrot.slane %v9212_v43, 7  ;;  %v10799_v43 = vld [vmem:[%s16086_s5 + $0x17c] sm:$0xc] }
 0x605   : > { %13566 = vmatmul.mubr.msk.bf16.gmra.mrb[136].mxu0 %vm703_vm1, %v13548_v17  ;;  %v9196_v17 = vld [vmem:[%s16086_s5 + $0x15c] sm:$0x8]  ;;  %v13686_v26 = vcombine.low %v10997_v61, %v11000_v35  ;;  %v11020_v3 = vrot.slane %v10789_v24, 6  ;;  %v9411_v61 = vrot.slane %v9206_v29, 7  ;;  %v10791_v35 = vld [vmem:[%s16086_s5 + $0x12c] sm:$0xf] }
 0x606   : > { %9633 = vmatprep.mubr.bf16.mxu0 %v20183_v59  ;;  %v13536_v10 = vrot.slane %v9196_v17, 11 }
 0x607   : > { %v9413_v50 = vrot.slane %v9411_v61, 4 }
 0x608   : > { %v9391_v11 = vsel %vm17528_vm9, %v13536_v10, %v9390_v49  ;;  %v9408_v49 = vsel %vm17528_vm9, %v9406_v45, %v9407_v12  ;;  %v9207_v10 = vld [vmem:[%s16086_s5 + $0x1b8] sm:$0x7]  ;;  %v13541_v45 = vrot.slane %v9211_v8, 11  ;;  %v9427_v12 = vrot.slane %v9425_v21, 4 }
 0x609   : > { %13701 = vmatmul.mubr.msk.bf16.gmra.mrb[12].mxu1 %vm703_vm1, %v13683_v30  ;;  %v10781_v30 = vld [vmem:[%s16086_s5 + $0xd4] sm:$0xc]  ;;  %v13552_v63 = vcombine.low %v9391_v11, %v9394_v16  ;;  %v9414_v44 = vrot.slane %v9207_v10, 7  ;;  %v11024_v11 = vrot.slane %v10791_v35, 6  ;;  %v9209_v16 = vld [vmem:[%s16086_s5 + $0x1d0] sm:$0xf] }
 0x60a   : > { %11249 = vmatprep.mubr.bf16.mxu1 %v20183_v59  ;;  %v13671_v15 = vrot.slane %v10781_v30, 10 }
 0x60b   : > { %v11026_v48 = vrot.slane %v11024_v11, 4 }
 0x60c   : > { %v11004_v32 = vsel %vm16367_vm6, %v13671_v15, %v11003_v52  ;;  %v11021_v52 = vsel %vm16367_vm6, %v11019_v34, %v11020_v3  ;;  %v10792_v15 = vld [vmem:[%s16086_s5 + $0x130] sm:$0x3]  ;;  %v1005_v34 = vadd.f32 %v16855_v53, %v16090_v19  ;;  %v20237_v3 = vld [vmem:[#allocation17_spill] sm:$0xff] }
 0x60d   : > { %13567 = vmatmul.mubr.msk.bf16.gmra.mrb[140].mxu0 %vm703_vm1, %v13549_v0  ;;  %v9199_v0 = vld [vmem:[%s16086_s5 + $0x178] sm:$0x8]  ;;  %v13687_v38 = vcombine.low %v11004_v32, %v11007_v60  ;;  %v11027_v1 = vrot.slane %v10792_v15, 6  ;;  %v10794_v32 = vld [vmem:[%s16086_s5 + $0x148] sm:$0xf] }
 0x60e   : > { %9643 = vmatprep.mubr.bf16.mxu0 %v20183_v59  ;;  %v13537_v51 = vrot.slane %v9199_v0, 11  ;;  %v9210_v60 = vld [vmem:[%s16086_s5 + $0x1d4] sm:$0x7]  ;;  %v20239_v15 = vld [vmem:[#allocation19_spill] sm:$0xff] }
 0x60f   : > { %v11028_v13 = vsel %vm16367_vm6, %v11026_v48, %v11027_v1 }
 0x610   : > { %v9398_v55 = vsel %vm17528_vm9, %v13537_v51, %v9397_v14  ;;  %v9415_v14 = vsel %vm17528_vm9, %v9413_v50, %v9414_v44  ;;  %v9208_v51 = vld [vmem:[%s16086_s5 + $0x1cc] sm:$0x8] }
 0x611   : > { %13702 = vmatmul.mubr.msk.bf16.gmra.mrb[16].mxu1 %vm703_vm1, %v13684_v37  ;;  %v10784_v37 = vld [vmem:[%s16086_s5 + $0xf0] sm:$0xc]  ;;  %v13553_v33 = vcombine.low %v9398_v55, %v9401_v39  ;;  %v10795_v39 = vld [vmem:[%s16086_s5 + $0x14c] sm:$0x3] }
 0x612   : > { %11259 = vmatprep.mubr.bf16.mxu1 %v20183_v59  ;;  %v13672_v22 = vrot.slane %v10784_v37, 10  ;;  %v10793_v37 = vld [vmem:[%s16086_s5 + $0x144] sm:$0xc]  ;;  %v11034_v62 = vrot.slane %v10795_v39, 6 }
 0x613   : > { %v13675_v47 = vrot.slane %v10793_v37, 10  ;;  %v9218_v39 = vld [vmem:[%s16086_s5 + $0x224] sm:$0xf] }
 0x614   : > { %v11011_v2 = vsel %vm16367_vm6, %v13672_v22, %v11010_v7  ;;  %v11031_v7 = vrot.slane %v10794_v32, 6  ;;  %v9421_v22 = vrot.slane %v9210_v60, 7 }
 0x615   : > { %13568 = vmatmul.mubr.msk.bf16.gmra.mrb[144].mxu0 %vm703_vm1, %v13550_v23  ;;  %v9202_v23 = vld [vmem:[%s16086_s5 + $0x194] sm:$0x8]  ;;  %v13688_v27 = vcombine.low %v11011_v2, %v11014_v42  ;;  %v10797_v42 = vld [vmem:[%s16086_s5 + $0x164] sm:$0xf] }
 0x616   : > { %9653 = vmatprep.mubr.bf16.mxu0 %v20183_v59  ;;  %v13538_v56 = vrot.slane %v9202_v23, 11  ;;  %v11032_v24 = vsel %vm16367_vm6, %v13675_v47, %v11031_v7  ;;  %v20241_v47 = vld [vmem:[#allocation21_spill] sm:$0xff] }
 0x618   : > { %v9405_v18 = vsel %vm17528_vm9, %v13538_v56, %v9404_v41  ;;  %v11033_v41 = vrot.slane %v11031_v7, 4 }
 0x619   : > { %13703 = vmatmul.mubr.msk.bf16.gmra.mrb[20].mxu1 %vm703_vm1, %v13685_v5  ;;  %v10787_v5 = vld [vmem:[%s16086_s5 + $0x10c] sm:$0xc]  ;;  %v13554_v6 = vcombine.low %v9405_v18, %v9408_v49  ;;  %v11038_v18 = vrot.slane %v10797_v42, 6  ;;  %v9215_v49 = vld [vmem:[%s16086_s5 + $0x208] sm:$0xf] }
 0x61a   : > { %11269 = vmatprep.mubr.bf16.mxu1 %v20183_v59  ;;  %v13673_v17 = vrot.slane %v10787_v5, 10  ;;  %v11035_v29 = vsel %vm16367_vm6, %v11033_v41, %v11034_v62  ;;  %v20243_v62 = vld [vmem:[#allocation23_spill] sm:$0xff] }
 0x61b   : > { %v11040_v44 = vrot.slane %v11038_v18, 4  ;;  %v1021_v8 = vadd.f32 %v20243_v62, %v16092_v20 }
 0x61c   : > { %v11018_v4 = vsel %vm16367_vm6, %v13673_v17, %v11017_v28  ;;  %v10798_v17 = vld [vmem:[%s16086_s5 + $0x168] sm:$0x3] }
 0x61d   : > { %13569 = vmatmul.mubr.msk.bf16.gmra.mrb[148].mxu0 %vm703_vm1, %v13551_v40  ;;  %v9205_v40 = vld [vmem:[%s16086_s5 + $0x1b0] sm:$0x8]  ;;  %v13689_v31 = vcombine.low %v11018_v4, %v11021_v52  ;;  %v9426_v4 = vsel %vm17528_vm9, %v13541_v45, %v9425_v21  ;;  %v1017_v21 = vadd.f32 %v20241_v47, %v16092_v20 }
 0x61e   : > { %9663 = vmatprep.mubr.bf16.mxu0 %v20183_v59  ;;  %v13539_v30 = vrot.slane %v9205_v40, 11  ;;  %v1007_v40 = vadd.f32 %v20237_v3, %v16092_v20  ;;  %v9217_v3 = vld [vmem:[%s16086_s5 + $0x220] sm:$0x8] }
 0x620   : > { %v9412_v58 = vsel %vm17528_vm9, %v13539_v30, %v9411_v61  ;;  %v20238_v61 = vld [vmem:[#allocation18_spill] sm:$0xff] }
 0x621   : > { %13704 = vmatmul.mubr.msk.bf16.gmra.mrb[24].mxu1 %vm703_vm1, %v13686_v26  ;;  %v10790_v26 = vld [vmem:[%s16086_s5 + $0x128] sm:$0xc]  ;;  %v13555_v9 = vcombine.low %v9412_v58, %v9415_v14  ;;  %v1009_v10 = vadd.f32 %v20238_v61, %v16090_v19  ;;  %v9216_v14 = vld [vmem:[%s16086_s5 + $0x20c] sm:$0x7] }
 0x622   : > { %11279 = vmatprep.mubr.bf16.mxu1 %v20183_v59  ;;  %v13674_v0 = vrot.slane %v10790_v26, 10  ;;  %v11041_v26 = vrot.slane %v10798_v17, 6  ;;  %v9435_v7 = vrot.slane %v9216_v14, 7  ;;  %v9439_v17 = vrot.slane %v9218_v39, 7  ;;  %v10806_v39 = vld [vmem:[%s16086_s5 + $0x1b8] sm:$0xf] }
 0x624   : > { %v11025_v54 = vsel %vm16367_vm6, %v13674_v0, %v11024_v11  ;;  %v9432_v11 = vrot.slane %v9215_v49, 7  ;;  %v9214_v0 = vld [vmem:[%s16086_s5 + $0x204] sm:$0x8] }
 0x625   : > { %13570 = vmatmul.mubr.msk.bf16.gmra.mrb[152].mxu0 %vm703_vm1, %v13552_v63  ;;  %v9418_v63 = vrot.slane %v9209_v16, 7  ;;  %v13690_v23 = vcombine.low %v11025_v54, %v11028_v13  ;;  %v1011_v16 = vadd.f32 %v20239_v15, %v16092_v20  ;;  %v13542_v54 = vrot.slane %v9214_v0, 11 }
 0x626   : > { %9673 = vmatprep.mubr.bf16.mxu0 %v20183_v59  ;;  %v9434_v37 = vrot.slane %v9432_v11, 4 }
 0x627   : > { %v9420_v55 = vrot.slane %v9418_v63, 4  ;;  %v9433_v45 = vsel %vm17528_vm9, %v13542_v54, %v9432_v11  ;;  %v20244_v11 = vld [vmem:[#allocation24_spill] sm:$0xff]  ;;  %v9220_v54 = vld [vmem:[%s16086_s5 + $0x23c] sm:$0x8] }
 0x628   : > { %v1025_v15 = vadd.f32 %v20244_v11, %v16090_v19 }
 0x629   : > { %13705 = vmatmul.mubr.msk.bf16.gmra.mrb[28].mxu1 %vm703_vm1, %v13687_v38  ;;  %v13540_v38 = vrot.slane %v9208_v51, 11  ;;  %v9422_v56 = vsel %vm17528_vm9, %v9420_v55, %v9421_v22  ;;  %v10801_v22 = vld [vmem:[%s16086_s5 + $0x184] sm:$0x3] }
 0x62a   : > { %11289 = vmatprep.mubr.bf16.mxu1 %v20183_v59 }
 0x62b   : > { %v9419_v2 = vsel %vm17528_vm9, %v13540_v38, %v9418_v63  ;;  %v10800_v63 = vld [vmem:[%s16086_s5 + $0x180] sm:$0xf]  ;;  %v20240_v38 = vld [vmem:[#allocation20_spill] sm:$0xff] }
 0x62c   : > { %v13556_v28 = vcombine.low %v9419_v2, %v9422_v56  ;;  %v11045_v13 = vrot.slane %v10800_v63, 6  ;;  %v1015_v55 = vadd.f32 %v20240_v38, %v16090_v19 }
 0x62d   : > { %13571 = vmatmul.mubr.msk.bf16.gmra.mrb[156].mxu0 %vm703_vm1, %v13553_v33  ;;  %v9213_v33 = vld [vmem:[%s16086_s5 + $0x1f0] sm:$0x7] }
 0x62e   : > { %9683 = vmatprep.mubr.bf16.mxu0 %v20183_v59  ;;  %v9428_v5 = vrot.slane %v9213_v33, 7 }
 0x630   : > { %v9429_v30 = vsel %vm17528_vm9, %v9427_v12, %v9428_v5  ;;  %v9436_v12 = vsel %vm17528_vm9, %v9434_v37, %v9435_v7  ;;  %v13677_v5 = vrot.slane %v10799_v43, 10  ;;  %v9222_v37 = vld [vmem:[%s16086_s5 + $0x244] sm:$0x7]  ;;  %v20247_v7 = vld [vmem:[#allocation27_spill] sm:$0xff] }
 0x631   : > { %13706 = vmatmul.mubr.msk.bf16.gmra.mrb[32].mxu1 %vm703_vm1, %v13688_v27  ;;  %v10796_v27 = vld [vmem:[%s16086_s5 + $0x160] sm:$0xc]  ;;  %v13557_v51 = vcombine.low %v9426_v4, %v9429_v30  ;;  %v10802_v4 = vld [vmem:[%s16086_s5 + $0x198] sm:$0xc]  ;;  %v1031_v43 = vadd.f32 %v20247_v7, %v16092_v20 }
 0x632   : > { %11299 = vmatprep.mubr.bf16.mxu1 %v20183_v59  ;;  %v13676_v52 = vrot.slane %v10796_v27, 10  ;;  %v11047_v27 = vrot.slane %v11045_v13, 4  ;;  %v9221_v30 = vld [vmem:[%s16086_s5 + $0x240] sm:$0xf]  ;;  %v13678_v0 = vrot.slane %v10802_v4, 10 }
 0x634   : > { %v11039_v60 = vsel %vm16367_vm6, %v13676_v52, %v11038_v18  ;;  %v11048_v18 = vrot.slane %v10801_v22, 6 }
 0x635   : > { %13572 = vmatmul.mubr.msk.bf16.gmra.mrb[160].mxu0 %vm703_vm1, %v13554_v6  ;;  %v13691_v6 = vcombine.low %v11032_v24, %v11035_v29 }
 0x636   : > { %9693 = vmatprep.mubr.bf16.mxu0 %v20183_v59  ;;  %v11049_v52 = vsel %vm16367_vm6, %v11047_v27, %v11048_v18  ;;  %v9224_v27 = vld [vmem:[%s16086_s5 + $0x25c] sm:$0xf]  ;;  %v20250_v18 = vld [vmem:[#allocation30_spill] sm:$0xff] }
 0x637   : > { %v9453_v11 = vrot.slane %v9224_v27, 7 }
 0x639   : > { %13707 = vmatmul.mubr.msk.bf16.gmra.mrb[36].mxu1 %vm703_vm1, %v13689_v31 }
 0x63a   : > { %11309 = vmatprep.mubr.bf16.mxu1 %v20183_v59 }
 0x63d   : > { %13573 = vmatmul.mubr.msk.bf16.gmra.mrb[164].mxu0 %vm703_vm1, %v13555_v9  ;;  %v11042_v9 = vsel %vm16367_vm6, %v11040_v44, %v11041_v26  ;;  %v10804_v26 = vld [vmem:[%s16086_s5 + $0x1a0] sm:$0x3] }
 0x63e   : > { %9703 = vmatprep.mubr.bf16.mxu0 %v20183_v59  ;;  %v13692_v2 = vcombine.low %v11039_v60, %v11042_v9  ;;  %v11055_v9 = vrot.slane %v10804_v26, 6  ;;  %v9223_v26 = vld [vmem:[%s16086_s5 + $0x258] sm:$0x8] }
 0x641   : > { %13708 = vmatmul.mubr.msk.bf16.gmra.mrb[40].mxu1 %vm703_vm1, %v13690_v23  ;;  %v20242_v23 = vld [vmem:[#allocation22_spill] sm:$0xff] }
 0x642   : > { %11319 = vmatprep.mubr.bf16.mxu1 %v20183_v59  ;;  %v1019_v41 = vadd.f32 %v20242_v23, %v16090_v19 }
 0x644   : > { %v8955_v35 = vpop.f32.mrb[64].mxu1 }
 0x645   : > { %13574 = vmatmul.mubr.msk.bf16.gmra.mrb[168].mxu0 %vm703_vm1, %v13556_v28  ;;  %v13821_v53 = vadd.f32 %v8955_v35, %v1005_v34  ;;  %v8957_v50 = vpop.f32.mrb[65].mxu1  ;;  %v10803_v28 = vld [vmem:[%s16086_s5 + $0x19c] sm:$0xf]  ;;  %v18924_v35 = vcombine.low %v9433_v45, %v9436_v12  ;;  %v10805_v45 = vld [vmem:[%s16086_s5 + $0x1b4] sm:$0xc] }
 0x646   : > { %v13823_v31 = vadd.f32 %v8957_v50, %v1007_v40  ;;  %v8959_v58 = vpop.f32.mrb[66].mxu1  ;;  %9713 = vmatprep.mubr.bf16.mxu0 %v20183_v59  ;;  %v9219_v40 = vld [vmem:[%s16086_s5 + $0x228] sm:$0x7]  ;;  %v9441_v50 = vrot.slane %v9439_v17, 4  ;;  %v10807_v12 = vld [vmem:[%s16086_s5 + $0x1bc] sm:$0x3] }
 0x647   : > { %12494 = vst [vmem:[%s16570_s11 + $0x10] sm:$0xff] %v13821_v53  ;;  %v13825_v48 = vadd.f32 %v8959_v58, %v1009_v10  ;;  %v8961_v1 = vpop.f32.mrb[67].mxu1  ;;  %v11052_v10 = vrot.slane %v10803_v28, 6  ;;  %v13543_v53 = vrot.slane %v9217_v3, 11  ;;  %v9442_v44 = vrot.slane %v9219_v40, 7 }
 0x648   : > { %12495 = vst [vmem:[%s16570_s11 + $0x18] sm:$0xff] %v13823_v31  ;;  %v13827_v32 = vadd.f32 %v8961_v1, %v1011_v16  ;;  %v20245_v16 = vld [vmem:[#allocation25_spill] sm:$0xff]  ;;  %v20246_v1 = vld [vmem:[#allocation26_spill] sm:$0xff] }
 0x649   : > { %12496 = vst [vmem:[%s16570_s11 + $0x50] sm:$0xff] %v13825_v48  ;;  %13709 = vmatmul.mubr.msk.bf16.gmra.mrb[44].mxu1 %vm703_vm1, %v13691_v6  ;;  %v11046_v6 = vsel %vm16367_vm6, %v13677_v5, %v11045_v13  ;;  %v1027_v31 = vadd.f32 %v20245_v16, %v16092_v20  ;;  %v11054_v14 = vrot.slane %v11052_v10, 4  ;;  %v9446_v48 = vrot.slane %v9221_v30, 7  ;;  %v20248_v5 = vld [vmem:[#allocation28_spill] sm:$0xff] }
 0x64a   : > { %12497 = vst [vmem:[%s16570_s11 + $0x58] sm:$0xff] %v13827_v32  ;;  %11329 = vmatprep.mubr.bf16.mxu1 %v20183_v59  ;;  %v1029_v63 = vadd.f32 %v20246_v1, %v16090_v19  ;;  %v13693_v60 = vcombine.low %v11046_v6, %v11049_v52  ;;  %v9443_v22 = vsel %vm17528_vm9, %v9441_v50, %v9442_v44  ;;  %v13679_v6 = vrot.slane %v10805_v45, 10  ;;  %v20251_v52 = vld [vmem:[#allocation31_spill] sm:$0xff] }
 0x64b   : > { %v9448_v62 = vrot.slane %v9446_v48, 4  ;;  %v1035_v28 = vadd.f32 %v20248_v5, %v16090_v19  ;;  %v11062_v30 = vrot.slane %v10807_v12, 6  ;;  %v10812_v5 = vld [vmem:[%s16086_s5 + $0x228] sm:$0xf] }
 0x64c   : > { %v8965_v33 = vpop.f32.mrb[68].mxu1 }
 0x64d   : > { %13575 = vmatmul.mubr.msk.bf16.gmra.mrb[172].mxu0 %vm703_vm1, %v13557_v51  ;;  %v13829_v56 = vadd.f32 %v8965_v33, %v1015_v55  ;;  %v8967_v42 = vpop.f32.mrb[69].mxu1  ;;  %v9440_v55 = vsel %vm17528_vm9, %v13543_v53, %v9439_v17  ;;  %v1039_v17 = vadd.f32 %v20250_v18, %v16090_v19  ;;  %v1041_v53 = vadd.f32 %v20251_v52, %v16092_v20 }
 0x64e   : > { %v13831_v24 = vadd.f32 %v8967_v42, %v1017_v21  ;;  %v8969_v29 = vpop.f32.mrb[70].mxu1  ;;  %9723 = vmatprep.mubr.bf16.mxu0 %v20183_v59  ;;  %v18957_v33 = vcombine.low %v9440_v55, %v9443_v22  ;;  %v11059_v42 = vrot.slane %v10806_v39, 6 }
 0x64f   : > { %12498 = vst [vmem:[%s16570_s11 + $0x90] sm:$0xff] %v13829_v56  ;;  %v13833_v49 = vadd.f32 %v8969_v29, %v1019_v41  ;;  %v8971_v34 = vpop.f32.mrb[71].mxu1  ;;  %v13544_v41 = vrot.slane %v9220_v54, 11  ;;  %v11056_v56 = vsel %vm16367_vm6, %v11054_v14, %v11055_v9  ;;  %v10808_v9 = vld [vmem:[%s16086_s5 + $0x208] sm:$0xc] }
 0x650   : > { %12499 = vst [vmem:[%s16570_s11 + $0x98] sm:$0xff] %v13831_v24  ;;  %v13835_v61 = vadd.f32 %v8971_v34, %v1021_v8  ;;  %v9449_v8 = vrot.slane %v9222_v37, 7  ;;  %v20249_v24 = vld [vmem:[#allocation29_spill] sm:$0xff]  ;;  %v11061_v4 = vrot.slane %v11059_v42, 4  ;;  %v10810_v54 = vld [vmem:[%s16086_s5 + $0x210] sm:$0x3] }
 0x651   : > { %12500 = vst [vmem:[%s16570_s11 + $0xd0] sm:$0xff] %v13833_v49  ;;  %13710 = vmatmul.mubr.msk.bf16.gmra.mrb[48].mxu1 %vm703_vm1, %v13692_v2  ;;  %v11053_v2 = vsel %vm16367_vm6, %v13678_v0, %v11052_v10  ;;  %v1037_v29 = vadd.f32 %v20249_v24, %v16092_v20  ;;  %v9447_v3 = vsel %vm17528_vm9, %v13544_v41, %v9446_v48  ;;  %v20252_v37 = vld [vmem:[#allocation32_spill] sm:$0xff] }
 0x652   : > { %12501 = vst [vmem:[%s16570_s11 + $0xd8] sm:$0xff] %v13835_v61  ;;  %11339 = vmatprep.mubr.bf16.mxu1 %v20183_v59  ;;  %v13694_v34 = vcombine.low %v11053_v2, %v11056_v56  ;;  %v9450_v40 = vsel %vm17528_vm9, %v9448_v62, %v9449_v8  ;;  %v11060_v48 = vsel %vm16367_vm6, %v13679_v6, %v11059_v42  ;;  %v11487_v62 = vrot.slane %v10810_v54, 6  ;;  %v20255_v8 = vld [vmem:[#allocation35_spill] sm:$0xff] }
 0x653   : > { %v18988_v14 = vcombine.low %v9447_v3, %v9450_v40  ;;  %v11063_v1 = vsel %vm16367_vm6, %v11061_v4, %v11062_v30  ;;  %v1045_v7 = vadd.f32 %v20252_v37, %v16090_v19  ;;  %v1051_v2 = vadd.f32 %v20255_v8, %v16092_v20  ;;  %v10813_v3 = vld [vmem:[%s16086_s5 + $0x22c] sm:$0x3]  ;;  %v20256_v40 = vld [vmem:[#allocation36_spill] sm:$0xff]  ;;  %v20258_v4 = vld [vmem:[#allocation38_spill] sm:$0xff] }
 0x654   : > { %v8975_v58 = vpop.f32.mrb[72].mxu1  ;;  %v13695_v39 = vcombine.low %v11060_v48, %v11063_v1  ;;  %v1059_v30 = vadd.f32 %v20258_v4, %v16090_v19  ;;  %v10815_v48 = vld [vmem:[%s16086_s5 + $0x244] sm:$0xf]  ;;  %v10814_v37 = vld [vmem:[%s16086_s5 + $0x240] sm:$0xc] }
 0x655   : > { %13576 = vmatmul.mubr.msk.bf16.gmra.mrb[176].mxu0 %vm703_vm1, %v18924_v35  ;;  %v13837_v32 = vadd.f32 %v8975_v58, %v1025_v15  ;;  %v8977_v51 = vpop.f32.mrb[73].mxu1  ;;  %v10809_v15 = vld [vmem:[%s16086_s5 + $0x20c] sm:$0xf]  ;;  %v9225_v58 = vld [vmem:[%s16086_s5 + $0x260] sm:$0x7]  ;;  %v11498_v54 = vrot.slane %v10815_v48, 6 }
 0x656   : > { %v13839_v13 = vadd.f32 %v8977_v51, %v1027_v31  ;;  %v8979_v38 = vpop.f32.mrb[74].mxu1  ;;  %9733 = vmatprep.mubr.bf16.mxu0 %v20183_v59  ;;  %v9455_v51 = vrot.slane %v9453_v11, 4 }
 0x657   : > { %12502 = vst [vmem:[%s16570_s11 + $0x110] sm:$0xff] %v13837_v32  ;;  %v13841_v47 = vadd.f32 %v8979_v38, %v1029_v63  ;;  %v8981_v21 = vpop.f32.mrb[75].mxu1  ;;  %v13545_v63 = vrot.slane %v9223_v26, 11  ;;  %v11484_v32 = vrot.slane %v10809_v15, 6  ;;  %v20254_v38 = vld [vmem:[#allocation34_spill] sm:$0xff]  ;;  %v11494_v15 = vrot.slane %v10813_v3, 6 }
 0x658   : > { %12503 = vst [vmem:[%s16570_s11 + $0x118] sm:$0xff] %v13839_v13  ;;  %v13843_v23 = vadd.f32 %v8981_v21, %v1031_v43  ;;  %v20253_v43 = vld [vmem:[#allocation33_spill] sm:$0xff]  ;;  %v1049_v55 = vadd.f32 %v20254_v38, %v16090_v19  ;;  %v11500_v8 = vrot.slane %v11498_v54, 4 }
 0x659   : > { %12504 = vst [vmem:[%s16570_s11 + $0x150] sm:$0xff] %v13841_v47  ;;  %13711 = vmatmul.mubr.msk.bf16.gmra.mrb[52].mxu1 %vm703_vm1, %v13693_v60  ;;  %v9456_v60 = vrot.slane %v9225_v58, 7  ;;  %v1047_v13 = vadd.f32 %v20253_v43, %v16092_v20  ;;  %v11486_v41 = vrot.slane %v11484_v32, 4  ;;  %v9454_v45 = vsel %vm17528_vm9, %v13545_v63, %v9453_v11  ;;  %v20261_v38 = vld [vmem:[#allocation41_spill] sm:$0xff] }
 0x65a   : > { %12505 = vst [vmem:[%s16570_s11 + $0x158] sm:$0xff] %v13843_v23  ;;  %11349 = vmatprep.mubr.bf16.mxu1 %v20183_v59  ;;  %v13714_v23 = vrot.slane %v10808_v9, 10 }
 0x65b   : > { %v9457_v12 = vsel %vm17528_vm9, %v9455_v51, %v9456_v60 }
 0x65c   : > { %v8985_v49 = vpop.f32.mrb[76].mxu1  ;;  %v19020_v27 = vcombine.low %v9454_v45, %v9457_v12  ;;  %v11485_v18 = vsel %vm16367_vm6, %v13714_v23, %v11484_v32  ;;  %v12232_v32 = vsel %vm752_vm0, %v18694_v57, 0  ;;  %v20260_v57 = vld [vmem:[#allocation40_spill] sm:$0xff]  ;;  %v10818_v12 = vld [vmem:[%s16086_s5 + $0x260] sm:$0xf] }
 0x65d   : > { %13577 = vmatmul.mubr.msk.bf16.gmra.mrb[180].mxu0 %vm703_vm1, %v18957_v33  ;;  %v13845_v61 = vadd.f32 %v8985_v49, %v1035_v28  ;;  %v8987_v10 = vpop.f32.mrb[77].mxu1  ;;  %v11491_v49 = vrot.slane %v10812_v5, 6  ;;  %v1065_v43 = vadd.f32 %v20260_v57, %v16090_v19 }
 0x65e   : > { %v13847_v50 = vadd.f32 %v8987_v10, %v1037_v29  ;;  %v8989_v44 = vpop.f32.mrb[78].mxu1  ;;  %9743 = vmatprep.mubr.bf16.mxu0 %v20183_v59  ;;  %v20257_v10 = vld [vmem:[#allocation37_spill] sm:$0xff] }
 0x65f   : > { %12506 = vst [vmem:[%s16570_s11 + $0x190] sm:$0xff] %v13845_v61  ;;  %v13849_v16 = vadd.f32 %v8989_v44, %v1039_v17  ;;  %v8991_v31 = vpop.f32.mrb[79].mxu1  ;;  %v11488_v17 = vsel %vm16367_vm6, %v11486_v41, %v11487_v62  ;;  %v1055_v61 = vadd.f32 %v20256_v40, %v16090_v19  ;;  %v1057_v6 = vadd.f32 %v20257_v10, %v16092_v20  ;;  %v20265_v40 = vld [vmem:[#allocation45_spill] sm:$0xff]  ;;  %v20266_v10 = vld [vmem:[#allocation46_spill] sm:$0xff] }
 0x660   : > { %12507 = vst [vmem:[%s16570_s11 + $0x198] sm:$0xff] %v13847_v50  ;;  %v13851_v0 = vadd.f32 %v8991_v31, %v1041_v53  ;;  %v13730_v53 = vcombine.low %v11485_v18, %v11488_v17  ;;  %v11493_v11 = vrot.slane %v11491_v49, 4  ;;  %v13716_v62 = vrot.slane %v10814_v37, 10  ;;  %v10817_v17 = vld [vmem:[%s16086_s5 + $0x25c] sm:$0xc] }
 0x661   : > { %12508 = vst [vmem:[%s16570_s11 + $0x1d0] sm:$0xff] %v13849_v16  ;;  %13712 = vmatmul.mubr.msk.bf16.gmra.mrb[56].mxu1 %vm703_vm1, %v13694_v34  ;;  %v10811_v34 = vld [vmem:[%s16086_s5 + $0x224] sm:$0xc]  ;;  %v20259_v16 = vld [vmem:[#allocation39_spill] sm:$0xff]  ;;  %v11505_v18 = vrot.slane %v10818_v12, 6 }
 0x662   : > { %12509 = vst [vmem:[%s16570_s11 + $0x1d8] sm:$0xff] %v13851_v0  ;;  %11359 = vmatprep.mubr.bf16.mxu1 %v20183_v59  ;;  %v13715_v26 = vrot.slane %v10811_v34, 10  ;;  %v1061_v31 = vadd.f32 %v20259_v16, %v16092_v20  ;;  %v11495_v9 = vsel %vm16367_vm6, %v11493_v11, %v11494_v15  ;;  %v20264_v34 = vld [vmem:[#allocation44_spill] sm:$0xff]  ;;  %v20267_v11 = vld [vmem:[#allocation47_spill] sm:$0xff]  ;;  %v10824_v12 = vld [vmem:[%s16086_s5 + $0x298] sm:$0xf] }
 0x663   : > { %v1075_v3 = vadd.f32 %v20264_v34, %v16090_v19  ;;  %v1081_v15 = vadd.f32 %v20267_v11, %v16092_v20  ;;  %v20272_v34 = vld [vmem:[#allocation52_spill] sm:$0xff] }
 0x664   : > { %v8995_v22 = vpop.f32.mrb[80].mxu1  ;;  %v11492_v60 = vsel %vm16367_vm6, %v13715_v26, %v11491_v49  ;;  %v10819_v49 = vld [vmem:[%s16086_s5 + $0x264] sm:$0x3] }
 0x665   : > { %13578 = vmatmul.mubr.msk.bf16.gmra.mrb[184].mxu0 %vm703_vm1, %v18988_v14  ;;  %v13853_v47 = vadd.f32 %v8995_v22, %v1045_v7  ;;  %v8997_v21 = vpop.f32.mrb[81].mxu1  ;;  %v10816_v7 = vld [vmem:[%s16086_s5 + $0x248] sm:$0x3]  ;;  %v20262_v22 = vld [vmem:[#allocation42_spill] sm:$0xff]  ;;  %v11508_v26 = vrot.slane %v10819_v49, 6  ;;  %v11519_v49 = vrot.slane %v10824_v12, 6 }
 0x666   : > { %v13855_v56 = vadd.f32 %v8997_v21, %v1047_v13  ;;  %v8999_v42 = vpop.f32.mrb[82].mxu1  ;;  %9753 = vmatprep.mubr.bf16.mxu0 %v20183_v59  ;;  %v10498_v13 = vsel %vm752_vm0, %v18687_v25, 0  ;;  %v13731_v21 = vcombine.low %v11492_v60, %v11495_v9  ;;  %v11501_v25 = vrot.slane %v10816_v7, 6  ;;  %v10822_v60 = vld [vmem:[%s16086_s5 + $0x280] sm:$0x3]  ;;  %v20269_v7 = vld [vmem:[#allocation49_spill] sm:$0xff] }
 0x667   : > { %12510 = vst [vmem:[%s16570_s11 + $0x210] sm:$0xff] %v13853_v47  ;;  %v13857_v28 = vadd.f32 %v8999_v42, %v1049_v55  ;;  %v9001_v24 = vpop.f32.mrb[83].mxu1  ;;  %v1067_v55 = vadd.f32 %v20261_v38, %v16092_v20  ;;  %v9227_v9 = vld [vmem:[%s16086_s5 + $0x278] sm:$0xf]  ;;  %v1087_v57 = vadd.f32 %v20269_v7, %v16092_v20 }
 0x668   : > { %12511 = vst [vmem:[%s16570_s11 + $0x218] sm:$0xff] %v13855_v56  ;;  %v13859_v29 = vadd.f32 %v9001_v24, %v1051_v2  ;;  %v20263_v2 = vld [vmem:[#allocation43_spill] sm:$0xff]  ;;  %v11499_v24 = vsel %vm16367_vm6, %v13716_v62, %v11498_v54  ;;  %v20268_v54 = vld [vmem:[#allocation48_spill] sm:$0xff] }
 0x669   : > { %12512 = vst [vmem:[%s16570_s11 + $0x250] sm:$0xff] %v13857_v28  ;;  %13713 = vmatmul.mubr.msk.bf16.gmra.mrb[60].mxu1 %vm703_vm1, %v13695_v39  ;;  %v1069_v39 = vadd.f32 %v20262_v22, %v16090_v19  ;;  %v1071_v56 = vadd.f32 %v20263_v2, %v16092_v20  ;;  %v1085_v37 = vadd.f32 %v20268_v54, %v16090_v19  ;;  %v20271_v62 = vld [vmem:[#allocation51_spill] sm:$0xff] }
 0x66a   : > { %12513 = vst [vmem:[%s16570_s11 + $0x258] sm:$0xff] %v13859_v29  ;;  %11739 = vmatprep.mubr.bf16.mxu1 %v20183_v59  ;;  %v11502_v29 = vsel %vm16367_vm6, %v11500_v8, %v11501_v25  ;;  %v1091_v8 = vadd.f32 %v20271_v62, %v16092_v20 }
 0x66c   : > { %v9005_v52 = vpop.f32.mrb[84].mxu1 }
 0x66d   : > { %13579 = vmatmul.mubr.msk.bf16.gmra.mrb[188].mxu0 %vm703_vm1, %v19020_v27  ;;  %v13861_v50 = vadd.f32 %v9005_v52, %v1055_v61  ;;  %v9007_v44 = vpop.f32.mrb[85].mxu1  ;;  %v1077_v61 = vadd.f32 %v20265_v40, %v16092_v20  ;;  %v10825_v40 = vld [vmem:[%s16086_s5 + $0x29c] sm:$0x3] }
 0x66e   : > { %v13863_v58 = vadd.f32 %v9007_v44, %v1057_v6  ;;  %v9009_v0 = vpop.f32.mrb[86].mxu1  ;;  %10069 = vmatprep.mubr.bf16.mxu0 %v20183_v59  ;;  %v1079_v6 = vadd.f32 %v20266_v10, %v16090_v19  ;;  %v11507_v44 = vrot.slane %v11505_v18, 4  ;;  %v20273_v10 = vld [vmem:[#allocation53_spill] sm:$0xff] }
 0x66f   : > { %12514 = vst [vmem:[%s16570_s11 + $0x290] sm:$0xff] %v13861_v50  ;;  %v13865_v1 = vadd.f32 %v9009_v0, %v1059_v30  ;;  %v9011_v63 = vpop.f32.mrb[87].mxu1  ;;  %v13732_v30 = vcombine.low %v11499_v24, %v11502_v29  ;;  %v13717_v50 = vrot.slane %v10817_v17, 10  ;;  %v10823_v17 = vld [vmem:[%s16086_s5 + $0x294] sm:$0xc] }
 0x670   : > { %12515 = vst [vmem:[%s16570_s11 + $0x298] sm:$0xff] %v13863_v58  ;;  %v13867_v51 = vadd.f32 %v9011_v63, %v1061_v31  ;;  %v10821_v58 = vld [vmem:[%s16086_s5 + $0x27c] sm:$0xf]  ;;  %v11509_v63 = vsel %vm16367_vm6, %v11507_v44, %v11508_v26 }
 0x671   : > { %12516 = vst [vmem:[%s16570_s11 + $0x2d0] sm:$0xff] %v13865_v1  ;;  %13748 = vmatmul.mubr.msk.bf16.vlgmr.msra.gmra.mrb[0].mxu1 %vm703_vm1, %v13730_v53  ;;  %v11506_v1 = vsel %vm16367_vm6, %v13717_v50, %v11505_v18 }
 0x672   : > { %12517 = vst [vmem:[%s16570_s11 + $0x2d8] sm:$0xff] %v13867_v51  ;;  %12238 = vmatpush1.bf16.msra.mxu1 %v12232_v32  ;;  %11749 = vmatprep.mubr.bf16.mxu1 %v20183_v59  ;;  %v10820_v32 = vld [vmem:[%s16086_s5 + $0x278] sm:$0xc]  ;;  %v11512_v51 = vrot.slane %v10821_v58, 6  ;;  %v10827_v58 = vld [vmem:[%s16086_s5 + $0x2b4] sm:$0xf] }
 0x673   : > { %v13718_v22 = vrot.slane %v10820_v32, 10  ;;  %v11526_v54 = vrot.slane %v10827_v58, 6  ;;  %v20281_v58 = vld [vmem:[#allocation61_spill] sm:$0xff] }
 0x674   : > { %v9015_v47 = vpop.f32.mrb[88].mxu1 }
 0x675   : > { %13606 = vmatmul.mubr.msk.bf16.vlgmr.msra.gmra.mrb[128].mxu0 %vm703_vm1, %v18924_v35  ;;  %v13869_v23 = vadd.f32 %v9015_v47, %v1065_v43  ;;  %v9017_v41 = vpop.f32.mrb[89].mxu1  ;;  %v20270_v43 = vld [vmem:[#allocation50_spill] sm:$0xff] }
 0x676   : > { %10504 = vmatpush1.bf16.msra.mxu0 %v10498_v13  ;;  %v13871_v42 = vadd.f32 %v9017_v41, %v1067_v55  ;;  %v9019_v45 = vpop.f32.mrb[90].mxu1  ;;  %10079 = vmatprep.mubr.bf16.mxu0 %v20183_v59  ;;  %v1089_v13 = vadd.f32 %v20270_v43, %v16090_v19  ;;  %v13733_v55 = vcombine.low %v11506_v1, %v11509_v63  ;;  %v9866_v41 = vrot.slane %v9227_v9, 7  ;;  %v9233_v43 = vld [vmem:[%s16086_s5 + $0x2b0] sm:$0xf] }
 0x677   : > { %12518 = vst [vmem:[%s16570_s11 + $0x310] sm:$0xff] %v13869_v23  ;;  %v13873_v35 = vadd.f32 %v9019_v45, %v1069_v39  ;;  %v9021_v5 = vpop.f32.mrb[91].mxu1  ;;  %v11515_v23 = vrot.slane %v10822_v60, 6  ;;  %v9231_v60 = vld [vmem:[%s16086_s5 + $0x298] sm:$0x7] }
 0x678   : > { %12519 = vst [vmem:[%s16570_s11 + $0x318] sm:$0xff] %v13871_v42  ;;  %v13875_v28 = vadd.f32 %v9021_v5, %v1071_v56  ;;  %v9226_v56 = vld [vmem:[%s16086_s5 + $0x274] sm:$0x8]  ;;  %v9228_v42 = vld [vmem:[%s16086_s5 + $0x27c] sm:$0x7]  ;;  %v11513_v5 = vsel %vm16367_vm6, %v13718_v22, %v11512_v51  ;;  %v9868_v29 = vrot.slane %v9866_v41, 4 }
 0x679   : > { %12520 = vst [vmem:[%s16570_s11 + $0x350] sm:$0xff] %v13873_v35  ;;  %13749 = vmatmul.mubr.msk.bf16.gmra.mrb[4].mxu1 %vm703_vm1, %v13731_v21  ;;  %v11514_v21 = vrot.slane %v11512_v51, 4  ;;  %v13580_v24 = vrot.slane %v9226_v56, 11  ;;  %v9869_v18 = vrot.slane %v9228_v42, 7  ;;  %v9229_v51 = vld [vmem:[%s16086_s5 + $0x290] sm:$0x8] }
 0x67a   : > { %12521 = vst [vmem:[%s16570_s11 + $0x358] sm:$0xff] %v13875_v28  ;;  %11759 = vmatprep.mubr.bf16.mxu1 %v20183_v59  ;;  %v9876_v22 = vrot.slane %v9231_v60, 7  ;;  %v20278_v56 = vld [vmem:[#allocation58_spill] sm:$0xff] }
 0x67b   : > { %v11516_v28 = vsel %vm16367_vm6, %v11514_v21, %v11515_v23  ;;  %v20277_v23 = vld [vmem:[#allocation57_spill] sm:$0xff]  ;;  %v1109_v42 = vadd.f32 %v20278_v56, %v16090_v19 }
 0x67c   : > { %v9025_v4 = vpop.f32.mrb[92].mxu1  ;;  %v13734_v44 = vcombine.low %v11513_v5, %v11516_v28  ;;  %v9232_v5 = vld [vmem:[%s16086_s5 + $0x2ac] sm:$0x8]  ;;  %v9234_v28 = vld [vmem:[%s16086_s5 + $0x2b4] sm:$0x7] }
 0x67d   : > { %13607 = vmatmul.mubr.msk.bf16.gmra.mrb[132].mxu0 %vm703_vm1, %v18957_v33  ;;  %v13877_v52 = vadd.f32 %v9025_v4, %v1075_v3  ;;  %v9027_v53 = vpop.f32.mrb[93].mxu1  ;;  %v1095_v3 = vadd.f32 %v20272_v34, %v16090_v19  ;;  %v20274_v4 = vld [vmem:[#allocation54_spill] sm:$0xff] }
 0x67e   : > { %v13879_v16 = vadd.f32 %v9027_v53, %v1077_v61  ;;  %v9029_v31 = vpop.f32.mrb[94].mxu1  ;;  %10089 = vmatprep.mubr.bf16.mxu0 %v20183_v59  ;;  %v9230_v61 = vld [vmem:[%s16086_s5 + $0x294] sm:$0xf] }
 0x67f   : > { %12522 = vst [vmem:[%s16570_s11 + $0x390] sm:$0xff] %v13877_v52  ;;  %v13881_v33 = vadd.f32 %v9029_v31, %v1079_v6  ;;  %v9031_v0 = vpop.f32.mrb[95].mxu1  ;;  %v1097_v6 = vadd.f32 %v20273_v10, %v16092_v20  ;;  %v20275_v52 = vld [vmem:[#allocation55_spill] sm:$0xff]  ;;  %v13719_v31 = vrot.slane %v10823_v17, 10  ;;  %v9873_v1 = vrot.slane %v9230_v61, 7 }
 0x680   : > { %12523 = vst [vmem:[%s16570_s11 + $0x398] sm:$0xff] %v13879_v16  ;;  %v13883_v48 = vadd.f32 %v9031_v0, %v1081_v15  ;;  %v1101_v53 = vadd.f32 %v20275_v52, %v16092_v20  ;;  %v9867_v15 = vsel %vm17528_vm9, %v13580_v24, %v9866_v41  ;;  %v9870_v16 = vsel %vm17528_vm9, %v9868_v29, %v9869_v18  ;;  %v20279_v24 = vld [vmem:[#allocation59_spill] sm:$0xff] }
 0x681   : > { %12524 = vst [vmem:[%s16570_s11 + $0x3d0] sm:$0xff] %v13881_v33  ;;  %13750 = vmatmul.mubr.msk.bf16.gmra.mrb[8].mxu1 %vm703_vm1, %v13732_v30  ;;  %v1099_v30 = vadd.f32 %v20274_v4, %v16090_v19  ;;  %v11520_v7 = vsel %vm16367_vm6, %v13719_v31, %v11519_v49  ;;  %v1107_v41 = vadd.f32 %v20277_v23, %v16092_v20 }
 0x682   : > { %12525 = vst [vmem:[%s16570_s11 + $0x3d8] sm:$0xff] %v13883_v48  ;;  %11769 = vmatprep.mubr.bf16.mxu1 %v20183_v59  ;;  %v11522_v48 = vrot.slane %v10825_v40, 6  ;;  %v1111_v29 = vadd.f32 %v20279_v24, %v16092_v20 }
 0x684   : > { %v9035_v38 = vpop.f32.mrb[96].mxu1 }
 0x685   : > { %13608 = vmatmul.mubr.msk.bf16.gmra.mrb[136].mxu0 %vm703_vm1, %v18988_v14  ;;  %v13885_v39 = vadd.f32 %v9035_v38, %v1085_v37  ;;  %v9037_v47 = vpop.f32.mrb[97].mxu1  ;;  %v13592_v37 = vcombine.low %v9867_v15, %v9870_v16  ;;  %v13581_v38 = vrot.slane %v9229_v51, 11  ;;  %v9236_v15 = vld [vmem:[%s16086_s5 + $0x2cc] sm:$0xf]  ;;  %v20280_v16 = vld [vmem:[#allocation60_spill] sm:$0xff] }
 0x686   : > { %v13887_v25 = vadd.f32 %v9037_v47, %v1087_v57  ;;  %v9039_v2 = vpop.f32.mrb[98].mxu1  ;;  %10099 = vmatprep.mubr.bf16.mxu0 %v20183_v59  ;;  %v10826_v57 = vld [vmem:[%s16086_s5 + $0x2b0] sm:$0xc]  ;;  %v1115_v31 = vadd.f32 %v20280_v16, %v16090_v19  ;;  %v9238_v16 = vld [vmem:[%s16086_s5 + $0x2e4] sm:$0x8] }
 0x687   : > { %12526 = vst [vmem:[%s16570_s11 + $0x410] sm:$0xff] %v13885_v39  ;;  %v13889_v14 = vadd.f32 %v9039_v2, %v1089_v13  ;;  %v9041_v45 = vpop.f32.mrb[99].mxu1  ;;  %v10828_v39 = vld [vmem:[%s16086_s5 + $0x2b8] sm:$0x3]  ;;  %v20276_v47 = vld [vmem:[#allocation56_spill] sm:$0xff]  ;;  %v9880_v2 = vrot.slane %v9233_v43, 7 }
 0x688   : > { %12527 = vst [vmem:[%s16570_s11 + $0x418] sm:$0xff] %v13887_v25  ;;  %v13891_v35 = vadd.f32 %v9041_v45, %v1091_v8  ;;  %v1105_v21 = vadd.f32 %v20276_v47, %v16090_v19  ;;  %v13720_v8 = vrot.slane %v10826_v57, 10  ;;  %v11528_v25 = vrot.slane %v11526_v54, 4  ;;  %v20283_v57 = vld [vmem:[#allocation63_spill] sm:$0xff] }
 0x689   : > { %12528 = vst [vmem:[%s16570_s11 + $0x450] sm:$0xff] %v13889_v14  ;;  %13751 = vmatmul.mubr.msk.bf16.gmra.mrb[12].mxu1 %vm703_vm1, %v13733_v55  ;;  %v9875_v55 = vrot.slane %v9873_v1, 4  ;;  %v9882_v4 = vrot.slane %v9880_v2, 4  ;;  %v1121_v43 = vadd.f32 %v20283_v57, %v16092_v20 }
 0x68a   : > { %12529 = vst [vmem:[%s16570_s11 + $0x458] sm:$0xff] %v13891_v35  ;;  %11779 = vmatprep.mubr.bf16.mxu1 %v20183_v59  ;;  %v11529_v35 = vrot.slane %v10828_v39, 6 }
 0x68b   : > { %v9877_v34 = vsel %vm17528_vm9, %v9875_v55, %v9876_v22  ;;  %v9235_v55 = vld [vmem:[%s16086_s5 + $0x2c8] sm:$0x8]  ;;  %v9237_v22 = vld [vmem:[%s16086_s5 + $0x2d0] sm:$0x7] }
 0x68c   : > { %v9045_v50 = vpop.f32.mrb[100].mxu1  ;;  %v9890_v56 = vrot.slane %v9237_v22, 7  ;;  %v20290_v22 = vld [vmem:[#allocation70_spill] sm:$0xff] }
 0x68d   : > { %13609 = vmatmul.mubr.msk.bf16.gmra.mrb[140].mxu0 %vm703_vm1, %v19020_v27  ;;  %v13893_v26 = vadd.f32 %v9045_v50, %v1095_v3  ;;  %v9047_v11 = vpop.f32.mrb[101].mxu1  ;;  %v11521_v27 = vrot.slane %v11519_v49, 4  ;;  %v9874_v49 = vsel %vm17528_vm9, %v13581_v38, %v9873_v1  ;;  %v10830_v3 = vld [vmem:[%s16086_s5 + $0x2d0] sm:$0xf]  ;;  %v11530_v50 = vsel %vm16367_vm6, %v11528_v25, %v11529_v35 }
 0x68e   : > { %v13895_v33 = vadd.f32 %v9047_v11, %v1097_v6  ;;  %v9049_v0 = vpop.f32.mrb[102].mxu1  ;;  %10109 = vmatprep.mubr.bf16.mxu0 %v20183_v59  ;;  %v13582_v6 = vrot.slane %v9232_v5, 11  ;;  %v13593_v52 = vcombine.low %v9874_v49, %v9877_v34  ;;  %v10831_v11 = vld [vmem:[%s16086_s5 + $0x2d4] sm:$0x3]  ;;  %v13583_v25 = vrot.slane %v9235_v55, 11 }
 0x68f   : > { %12530 = vst [vmem:[%s16570_s11 + $0x490] sm:$0xff] %v13893_v26  ;;  %v13897_v63 = vadd.f32 %v9049_v0, %v1099_v30  ;;  %v9051_v32 = vpop.f32.mrb[103].mxu1  ;;  %v11523_v13 = vsel %vm16367_vm6, %v11521_v27, %v11522_v48  ;;  %v9883_v30 = vrot.slane %v9234_v28, 7  ;;  %v11533_v26 = vrot.slane %v10830_v3, 6  ;;  %v20282_v0 = vld [vmem:[#allocation62_spill] sm:$0xff]  ;;  %v20285_v28 = vld [vmem:[#allocation65_spill] sm:$0xff] }
 0x690   : > { %12531 = vst [vmem:[%s16570_s11 + $0x498] sm:$0xff] %v13895_v33  ;;  %v13899_v9 = vadd.f32 %v9051_v32, %v1101_v53  ;;  %v13735_v12 = vcombine.low %v11520_v7, %v11523_v13  ;;  %v11527_v53 = vsel %vm16367_vm6, %v13720_v8, %v11526_v54  ;;  %v1117_v33 = vadd.f32 %v20281_v58, %v16092_v20  ;;  %v10834_v35 = vld [vmem:[%s16086_s5 + $0x2f0] sm:$0x3]  ;;  %v9239_v5 = vld [vmem:[%s16086_s5 + $0x2e8] sm:$0xf] }
 0x691   : > { %12532 = vst [vmem:[%s16570_s11 + $0x4d0] sm:$0xff] %v13897_v63  ;;  %13752 = vmatmul.mubr.msk.bf16.gmra.mrb[16].mxu1 %vm703_vm1, %v13734_v44  ;;  %v10829_v44 = vld [vmem:[%s16086_s5 + $0x2cc] sm:$0xc]  ;;  %v1119_v27 = vadd.f32 %v20282_v0, %v16090_v19  ;;  %v13736_v1 = vcombine.low %v11527_v53, %v11530_v50  ;;  %v9881_v63 = vsel %vm17528_vm9, %v13582_v6, %v9880_v2  ;;  %v11535_v54 = vrot.slane %v11533_v26, 4 }
 0x692   : > { %12533 = vst [vmem:[%s16570_s11 + $0x4d8] sm:$0xff] %v13899_v9  ;;  %11789 = vmatprep.mubr.bf16.mxu1 %v20183_v59  ;;  %v9884_v32 = vsel %vm17528_vm9, %v9882_v4, %v9883_v30  ;;  %v13721_v51 = vrot.slane %v10829_v44, 10  ;;  %v9887_v7 = vrot.slane %v9236_v15, 7  ;;  %v1127_v24 = vadd.f32 %v20285_v28, %v16092_v20  ;;  %v10836_v30 = vld [vmem:[%s16086_s5 + $0x308] sm:$0xf] }
 0x693   : > { %v11543_v44 = vrot.slane %v10834_v35, 6 }
 0x694   : > { %v9055_v62 = vpop.f32.mrb[104].mxu1  ;;  %v9889_v2 = vrot.slane %v9887_v7, 4 }
 0x695   : > { %13610 = vmatmul.mubr.msk.bf16.gmra.mrb[144].mxu0 %vm703_vm1, %v13592_v37  ;;  %v13901_v14 = vadd.f32 %v9055_v62, %v1105_v21  ;;  %v9057_v45 = vpop.f32.mrb[105].mxu1  ;;  %v11536_v37 = vrot.slane %v10831_v11, 6  ;;  %v10833_v21 = vld [vmem:[%s16086_s5 + $0x2ec] sm:$0xf]  ;;  %v11534_v62 = vsel %vm16367_vm6, %v13721_v51, %v11533_v26  ;;  %v9894_v26 = vrot.slane %v9239_v5, 7 }
 0x696   : > { %v13903_v18 = vadd.f32 %v9057_v45, %v1107_v41  ;;  %v9059_v17 = vpop.f32.mrb[106].mxu1  ;;  %10119 = vmatprep.mubr.bf16.mxu0 %v20183_v59  ;;  %v13594_v41 = vcombine.low %v9881_v63, %v9884_v32  ;;  %v20284_v45 = vld [vmem:[#allocation64_spill] sm:$0xff]  ;;  %v9891_v6 = vsel %vm17528_vm9, %v9889_v2, %v9890_v56  ;;  %v13584_v32 = vrot.slane %v9238_v16, 11 }
 0x697   : > { %12534 = vst [vmem:[%s16570_s11 + $0x510] sm:$0xff] %v13901_v14  ;;  %v13905_v40 = vadd.f32 %v9059_v17, %v1109_v42  ;;  %v9061_v61 = vpop.f32.mrb[107].mxu1  ;;  %v11537_v8 = vsel %vm16367_vm6, %v11535_v54, %v11536_v37  ;;  %v10832_v42 = vld [vmem:[%s16086_s5 + $0x2e8] sm:$0xc]  ;;  %v11540_v14 = vrot.slane %v10833_v21, 6  ;;  %v9896_v51 = vrot.slane %v9894_v26, 4 }
 0x698   : > { %12535 = vst [vmem:[%s16570_s11 + $0x518] sm:$0xff] %v13903_v18  ;;  %v13907_v10 = vadd.f32 %v9061_v61, %v1111_v29  ;;  %v20286_v29 = vld [vmem:[#allocation66_spill] sm:$0xff]  ;;  %v20287_v17 = vld [vmem:[#allocation67_spill] sm:$0xff]  ;;  %v13737_v3 = vcombine.low %v11534_v62, %v11537_v8  ;;  %v13722_v4 = vrot.slane %v10832_v42, 10  ;;  %v20288_v54 = vld [vmem:[#allocation68_spill] sm:$0xff] }
 0x699   : > { %12536 = vst [vmem:[%s16570_s11 + $0x550] sm:$0xff] %v13905_v40  ;;  %13753 = vmatmul.mubr.msk.bf16.gmra.mrb[20].mxu1 %vm703_vm1, %v13735_v12  ;;  %v1125_v12 = vadd.f32 %v20284_v45, %v16090_v19  ;;  %v1129_v18 = vadd.f32 %v20286_v29, %v16090_v19  ;;  %v1131_v49 = vadd.f32 %v20287_v17, %v16092_v20  ;;  %v11542_v50 = vrot.slane %v11540_v14, 4  ;;  %v9241_v62 = vld [vmem:[%s16086_s5 + $0x300] sm:$0x8]  ;;  %v9243_v8 = vld [vmem:[%s16086_s5 + $0x308] sm:$0x7] }
 0x69a   : > { %12537 = vst [vmem:[%s16570_s11 + $0x558] sm:$0xff] %v13907_v10  ;;  %11799 = vmatprep.mubr.bf16.mxu1 %v20183_v59  ;;  %v9888_v10 = vsel %vm17528_vm9, %v13583_v25, %v9887_v7  ;;  %v1135_v37 = vadd.f32 %v20288_v54, %v16090_v19  ;;  %v20289_v7 = vld [vmem:[#allocation69_spill] sm:$0xff]  ;;  %v20291_v25 = vld [vmem:[#allocation71_spill] sm:$0xff] }
 0x69b   : > { %v13595_v0 = vcombine.low %v9888_v10, %v9891_v6  ;;  %v11544_v63 = vsel %vm16367_vm6, %v11542_v50, %v11543_v44  ;;  %v1137_v57 = vadd.f32 %v20289_v7, %v16092_v20  ;;  %v1141_v2 = vadd.f32 %v20291_v25, %v16092_v20  ;;  %v9245_v10 = vld [vmem:[%s16086_s5 + $0x320] sm:$0xf]  ;;  %v20292_v6 = vld [vmem:[#allocation72_spill] sm:$0xff] }
 0x69c   : > { %v9065_v48 = vpop.f32.mrb[108].mxu1 }
 0x69d   : > { %13611 = vmatmul.mubr.msk.bf16.gmra.mrb[148].mxu0 %vm703_vm1, %v13593_v52  ;;  %v13909_v60 = vadd.f32 %v9065_v48, %v1115_v31  ;;  %v9067_v9 = vpop.f32.mrb[109].mxu1  ;;  %v9240_v31 = vld [vmem:[%s16086_s5 + $0x2ec] sm:$0x7]  ;;  %v10835_v48 = vld [vmem:[%s16086_s5 + $0x304] sm:$0xc] }
 0x69e   : > { %v13911_v13 = vadd.f32 %v9067_v9, %v1117_v33  ;;  %v9069_v38 = vpop.f32.mrb[110].mxu1  ;;  %10129 = vmatprep.mubr.bf16.mxu0 %v20183_v59  ;;  %v11547_v33 = vrot.slane %v10836_v30, 6  ;;  %v10837_v9 = vld [vmem:[%s16086_s5 + $0x30c] sm:$0x3]  ;;  %v20293_v30 = vld [vmem:[#allocation73_spill] sm:$0xff] }
 0x69f   : > { %12538 = vst [vmem:[%s16570_s11 + $0x590] sm:$0xff] %v13909_v60  ;;  %v13913_v39 = vadd.f32 %v9069_v38, %v1119_v27  ;;  %v9071_v47 = vpop.f32.mrb[111].mxu1  ;;  %v11541_v27 = vsel %vm16367_vm6, %v13722_v4, %v11540_v14  ;;  %v9897_v60 = vrot.slane %v9240_v31, 7  ;;  %v9895_v14 = vsel %vm17528_vm9, %v13584_v32, %v9894_v26 }
 0x6a0   : > { %12539 = vst [vmem:[%s16570_s11 + $0x598] sm:$0xff] %v13911_v13  ;;  %v13915_v23 = vadd.f32 %v9071_v47, %v1121_v43  ;;  %v13723_v13 = vrot.slane %v10835_v48, 10  ;;  %v11549_v38 = vrot.slane %v11547_v33, 4  ;;  %v1145_v4 = vadd.f32 %v20292_v6, %v16090_v19  ;;  %v20295_v48 = vld [vmem:[#allocation75_spill] sm:$0xff] }
 0x6a1   : > { %12540 = vst [vmem:[%s16570_s11 + $0x5d0] sm:$0xff] %v13913_v39  ;;  %13754 = vmatmul.mubr.msk.bf16.gmra.mrb[24].mxu1 %vm703_vm1, %v13736_v1  ;;  %v9242_v1 = vld [vmem:[%s16086_s5 + $0x304] sm:$0xf]  ;;  %v1139_v39 = vadd.f32 %v20290_v22, %v16090_v19  ;;  %v9898_v45 = vsel %vm17528_vm9, %v9896_v51, %v9897_v60  ;;  %v9244_v51 = vld [vmem:[%s16086_s5 + $0x31c] sm:$0x8] }
 0x6a2   : > { %12541 = vst [vmem:[%s16570_s11 + $0x5d8] sm:$0xff] %v13915_v23  ;;  %11809 = vmatprep.mubr.bf16.mxu1 %v20183_v59  ;;  %v9901_v55 = vrot.slane %v9242_v1, 7  ;;  %v13738_v23 = vcombine.low %v11541_v27, %v11544_v63  ;;  %v13596_v17 = vcombine.low %v9895_v14, %v9898_v45  ;;  %v9908_v27 = vrot.slane %v9245_v10, 7  ;;  %v9246_v60 = vld [vmem:[%s16086_s5 + $0x324] sm:$0x7] }
 0x6a3   : > { %v1151_v1 = vadd.f32 %v20295_v48, %v16092_v20  ;;  %v9911_v22 = vrot.slane %v9246_v60, 7  ;;  %v10845_v10 = vld [vmem:[%s16086_s5 + $0x35c] sm:$0xf] }
 0x6a4   : > { %v9075_v34 = vpop.f32.mrb[112].mxu1  ;;  %v9903_v29 = vrot.slane %v9901_v55, 4 }
 0x6a5   : > { %13612 = vmatmul.mubr.msk.bf16.gmra.mrb[152].mxu0 %vm703_vm1, %v13594_v41  ;;  %v13917_v40 = vadd.f32 %v9075_v34, %v1125_v12  ;;  %v9077_v61 = vpop.f32.mrb[113].mxu1  ;;  %v11550_v41 = vrot.slane %v10837_v9, 6  ;;  %v10839_v12 = vld [vmem:[%s16086_s5 + $0x324] sm:$0xf] }
 0x6a6   : > { %v13919_v52 = vadd.f32 %v9077_v61, %v1127_v24  ;;  %v9079_v53 = vpop.f32.mrb[114].mxu1  ;;  %10139 = vmatprep.mubr.bf16.mxu0 %v20183_v59  ;;  %v13585_v24 = vrot.slane %v9241_v62, 11  ;;  %v10840_v61 = vld [vmem:[%s16086_s5 + $0x328] sm:$0x3]  ;;  %v9248_v62 = vld [vmem:[%s16086_s5 + $0x33c] sm:$0xf] }
 0x6a7   : > { %12542 = vst [vmem:[%s16570_s11 + $0x610] sm:$0xff] %v13917_v40  ;;  %v13921_v11 = vadd.f32 %v9079_v53, %v1129_v18  ;;  %v9081_v15 = vpop.f32.mrb[115].mxu1  ;;  %v9904_v18 = vrot.slane %v9243_v8, 7  ;;  %v11551_v34 = vsel %vm16367_vm6, %v11549_v38, %v11550_v41  ;;  %v11554_v40 = vrot.slane %v10839_v12, 6  ;;  %v20294_v53 = vld [vmem:[#allocation74_spill] sm:$0xff]  ;;  %v20297_v8 = vld [vmem:[#allocation77_spill] sm:$0xff] }
 0x6a8   : > { %12543 = vst [vmem:[%s16570_s11 + $0x618] sm:$0xff] %v13919_v52  ;;  %v13923_v58 = vadd.f32 %v9081_v15, %v1131_v49  ;;  %v11548_v49 = vsel %vm16367_vm6, %v13723_v13, %v11547_v33  ;;  %v1147_v52 = vadd.f32 %v20293_v30, %v16092_v20  ;;  %v1149_v50 = vadd.f32 %v20294_v53, %v16090_v19  ;;  %v10843_v41 = vld [vmem:[%s16086_s5 + $0x344] sm:$0x3] }
 0x6a9   : > { %12544 = vst [vmem:[%s16570_s11 + $0x650] sm:$0xff] %v13921_v11  ;;  %13755 = vmatmul.mubr.msk.bf16.gmra.mrb[28].mxu1 %vm703_vm1, %v13737_v3  ;;  %v10838_v3 = vld [vmem:[%s16086_s5 + $0x320] sm:$0xc]  ;;  %v13739_v26 = vcombine.low %v11548_v49, %v11551_v34  ;;  %v9902_v11 = vsel %vm17528_vm9, %v13585_v24, %v9901_v55  ;;  %v9905_v15 = vsel %vm17528_vm9, %v9903_v29, %v9904_v18  ;;  %v11556_v33 = vrot.slane %v11554_v40, 4  ;;  %v9247_v49 = vld [vmem:[%s16086_s5 + $0x338] sm:$0x8] }
 0x6aa   : > { %12545 = vst [vmem:[%s16570_s11 + $0x658] sm:$0xff] %v13923_v58  ;;  %11819 = vmatprep.mubr.bf16.mxu1 %v20183_v59  ;;  %v13724_v16 = vrot.slane %v10838_v3, 10  ;;  %v13586_v38 = vrot.slane %v9244_v51, 11  ;;  %v9910_v55 = vrot.slane %v9908_v27, 4  ;;  %v1157_v25 = vadd.f32 %v20297_v8, %v16092_v20  ;;  %v10848_v51 = vld [vmem:[%s16086_s5 + $0x378] sm:$0xf] }
 0x6ab   : > { %v9915_v34 = vrot.slane %v9248_v62, 7  ;;  %v9253_v62 = vld [vmem:[%s16086_s5 + $0x370] sm:$0x8] }
 0x6ac   : > { %v9085_v43 = vpop.f32.mrb[116].mxu1  ;;  %v9912_v24 = vsel %vm17528_vm9, %v9910_v55, %v9911_v22  ;;  %v9254_v55 = vld [vmem:[%s16086_s5 + $0x374] sm:$0xf] }
 0x6ad   : > { %13613 = vmatmul.mubr.msk.bf16.gmra.mrb[156].mxu0 %vm703_vm1, %v13595_v0  ;;  %v13925_v47 = vadd.f32 %v9085_v43, %v1135_v37  ;;  %v9087_v21 = vpop.f32.mrb[117].mxu1  ;;  %v11557_v0 = vrot.slane %v10840_v61, 6  ;;  %v10842_v37 = vld [vmem:[%s16086_s5 + $0x340] sm:$0xf]  ;;  %v11555_v43 = vsel %vm16367_vm6, %v13724_v16, %v11554_v40  ;;  %v9251_v16 = vld [vmem:[%s16086_s5 + $0x358] sm:$0xf] }
 0x6ae   : > { %v13927_v56 = vadd.f32 %v9087_v21, %v1137_v57  ;;  %v9089_v42 = vpop.f32.mrb[118].mxu1  ;;  %10149 = vmatprep.mubr.bf16.mxu0 %v20183_v59  ;;  %v13597_v57 = vcombine.low %v9902_v11, %v9905_v15  ;;  %v20296_v21 = vld [vmem:[#allocation76_spill] sm:$0xff]  ;;  %v9249_v61 = vld [vmem:[%s16086_s5 + $0x340] sm:$0x7]  ;;  %v11568_v11 = vrot.slane %v10845_v10, 6  ;;  %v9929_v8 = vrot.slane %v9254_v55, 7 }
 0x6af   : > { %12546 = vst [vmem:[%s16570_s11 + $0x690] sm:$0xff] %v13925_v47  ;;  %v13929_v35 = vadd.f32 %v9089_v42, %v1139_v39  ;;  %v9091_v5 = vpop.f32.mrb[119].mxu1  ;;  %v11558_v13 = vsel %vm16367_vm6, %v11556_v33, %v11557_v0  ;;  %v10841_v39 = vld [vmem:[%s16086_s5 + $0x33c] sm:$0xc]  ;;  %v11561_v47 = vrot.slane %v10842_v37, 6  ;;  %v20299_v42 = vld [vmem:[#allocation79_spill] sm:$0xff] }
 0x6b0   : > { %12547 = vst [vmem:[%s16570_s11 + $0x698] sm:$0xff] %v13927_v56  ;;  %v13931_v28 = vadd.f32 %v9091_v5, %v1141_v2  ;;  %v20298_v2 = vld [vmem:[#allocation78_spill] sm:$0xff]  ;;  %v1161_v14 = vadd.f32 %v20299_v42, %v16092_v20  ;;  %v13740_v12 = vcombine.low %v11555_v43, %v11558_v13  ;;  %v10847_v43 = vld [vmem:[%s16086_s5 + $0x374] sm:$0xc]  ;;  %v11575_v13 = vrot.slane %v10848_v51, 6 }
 0x6b1   : > { %12548 = vst [vmem:[%s16570_s11 + $0x6d0] sm:$0xff] %v13929_v35  ;;  %13756 = vmatmul.mubr.msk.bf16.gmra.mrb[32].mxu1 %vm703_vm1, %v13738_v23  ;;  %v1155_v23 = vadd.f32 %v20296_v21, %v16090_v19  ;;  %v1159_v56 = vadd.f32 %v20298_v2, %v16090_v19  ;;  %v13725_v19 = vrot.slane %v10841_v39, 10  ;;  %v11563_v18 = vrot.slane %v11561_v47, 4  ;;  %v10846_v15 = vld [vmem:[%s16086_s5 + $0x360] sm:$0x3] }
 0x6b2   : > { %12549 = vst [vmem:[%s16570_s11 + $0x6d8] sm:$0xff] %v13931_v28  ;;  %11829 = vmatprep.mubr.bf16.mxu1 %v20183_v59  ;;  %v9909_v28 = vsel %vm17528_vm9, %v13586_v38, %v9908_v27  ;;  %v11570_v27 = vrot.slane %v11568_v11, 4  ;;  %v11571_v48 = vrot.slane %v10846_v15, 6  ;;  %v10849_v38 = vld [vmem:[%s16086_s5 + $0x37c] sm:$0x3] }
 0x6b3   : > { %v11562_v30 = vsel %vm16367_vm6, %v13725_v19, %v11561_v47  ;;  %v13727_v47 = vrot.slane %v10847_v43, 10  ;;  %v10851_v2 = vld [vmem:[%s16086_s5 + $0x394] sm:$0xf]  ;;  %v9257_v19 = vld [vmem:[%s16086_s5 + $0x390] sm:$0xf] }
 0x6b4   : > { %v9095_v44 = vpop.f32.mrb[120].mxu1  ;;  %v11572_v37 = vsel %vm16367_vm6, %v11570_v27, %v11571_v48  ;;  %v10854_v10 = vld [vmem:[%s16086_s5 + $0x3b0] sm:$0xf]  ;;  %v9260_v15 = vld [vmem:[%s16086_s5 + $0x3ac] sm:$0xf] }
 0x6b5   : > { %13614 = vmatmul.mubr.msk.bf16.gmra.mrb[160].mxu0 %vm703_vm1, %v13596_v17  ;;  %v13933_v31 = vadd.f32 %v9095_v44, %v1145_v4  ;;  %v9097_v58 = vpop.f32.mrb[121].mxu1  ;;  %v11564_v17 = vrot.slane %v10843_v41, 6  ;;  %v13598_v4 = vcombine.low %v9909_v28, %v9912_v24  ;;  %v9918_v44 = vrot.slane %v9249_v61, 7  ;;  %v10852_v24 = vld [vmem:[%s16086_s5 + $0x398] sm:$0x3] }
 0x6b6   : > { %v13935_v63 = vadd.f32 %v9097_v58, %v1147_v52  ;;  %v9099_v32 = vpop.f32.mrb[122].mxu1  ;;  %10159 = vmatprep.mubr.bf16.mxu0 %v20183_v59  ;;  %v13587_v52 = vrot.slane %v9247_v49, 11  ;;  %v11578_v41 = vrot.slane %v10849_v38, 6  ;;  %v11576_v42 = vsel %vm16367_vm6, %v13727_v47, %v11575_v13  ;;  %v9258_v61 = vld [vmem:[%s16086_s5 + $0x394] sm:$0x7] }
 0x6b7   : > { %12550 = vst [vmem:[%s16570_s11 + $0x710] sm:$0xff] %v13933_v31  ;;  %v13937_v9 = vadd.f32 %v9099_v32, %v1149_v50  ;;  %v9101_v54 = vpop.f32.mrb[123].mxu1  ;;  %v11565_v53 = vsel %vm16367_vm6, %v11563_v18, %v11564_v17  ;;  %v9917_v50 = vrot.slane %v9915_v34, 4  ;;  %v9252_v32 = vld [vmem:[%s16086_s5 + $0x35c] sm:$0x7]  ;;  %v11582_v28 = vrot.slane %v10851_v2, 6 }
 0x6b8   : > { %12551 = vst [vmem:[%s16570_s11 + $0x718] sm:$0xff] %v13935_v63  ;;  %v13939_v7 = vadd.f32 %v9101_v54, %v1151_v1  ;;  %v13741_v31 = vcombine.low %v11562_v30, %v11565_v53  ;;  %v9916_v58 = vsel %vm17528_vm9, %v13587_v52, %v9915_v34  ;;  %v9250_v1 = vld [vmem:[%s16086_s5 + $0x354] sm:$0x8]  ;;  %v9922_v63 = vrot.slane %v9251_v16, 7  ;;  %v9259_v48 = vld [vmem:[%s16086_s5 + $0x3a8] sm:$0x8] }
 0x6b9   : > { %12552 = vst [vmem:[%s16570_s11 + $0x750] sm:$0xff] %v13937_v9  ;;  %13757 = vmatmul.mubr.msk.bf16.gmra.mrb[36].mxu1 %vm703_vm1, %v13739_v26  ;;  %v10844_v26 = vld [vmem:[%s16086_s5 + $0x358] sm:$0xc]  ;;  %v9919_v0 = vsel %vm17528_vm9, %v9917_v50, %v9918_v44  ;;  %v13588_v54 = vrot.slane %v9250_v1, 11  ;;  %v11584_v49 = vrot.slane %v11582_v28, 4  ;;  %v11585_v34 = vrot.slane %v10852_v24, 6 }
 0x6ba   : > { %12553 = vst [vmem:[%s16570_s11 + $0x758] sm:$0xff] %v13939_v7  ;;  %11839 = vmatprep.mubr.bf16.mxu1 %v20183_v59  ;;  %v13726_v33 = vrot.slane %v10844_v26, 10  ;;  %v13599_v60 = vcombine.low %v9916_v58, %v9919_v0  ;;  %v9924_v7 = vrot.slane %v9922_v63, 4  ;;  %v9939_v50 = vrot.slane %v9258_v61, 7  ;;  %v10853_v44 = vld [vmem:[%s16086_s5 + $0x3ac] sm:$0xc] }
 0x6bb   : > { %v9923_v39 = vsel %vm17528_vm9, %v13588_v54, %v9922_v63  ;;  %v11586_v52 = vsel %vm16367_vm6, %v11584_v49, %v11585_v34  ;;  %v11589_v26 = vrot.slane %v10854_v10, 6  ;;  %v13729_v58 = vrot.slane %v10853_v44, 10  ;;  %v9261_v63 = vld [vmem:[%s16086_s5 + $0x3b0] sm:$0x7]  ;;  %v10856_v43 = vld [vmem:[%s16086_s5 + $0x400] sm:$0xc] }
 0x6bc   : > { %v9105_v45 = vpop.f32.mrb[124].mxu1  ;;  %v11569_v9 = vsel %vm16367_vm6, %v13726_v33, %v11568_v11  ;;  %v10855_v11 = vld [vmem:[%s16086_s5 + $0x3b4] sm:$0x3]  ;;  %v9943_v1 = vrot.slane %v9260_v15, 7  ;;  %v10859_v2 = vld [vmem:[%s16086_s5 + $0x41c] sm:$0xc] }
 0x6bd   : > { %13615 = vmatmul.mubr.msk.bf16.gmra.mrb[164].mxu0 %vm703_vm1, %v13597_v57  ;;  %v13941_v35 = vadd.f32 %v9105_v45, %v1155_v23  ;;  %v9107_v5 = vpop.f32.mrb[125].mxu1  ;;  %v9925_v57 = vrot.slane %v9252_v32, 7  ;;  %v13742_v22 = vcombine.low %v11569_v9, %v11572_v37  ;;  %v11577_v23 = vrot.slane %v11575_v13, 4  ;;  %v10857_v32 = vld [vmem:[%s16086_s5 + $0x404] sm:$0xf] }
 0x6be   : > { %v13943_v29 = vadd.f32 %v9107_v5, %v1157_v25  ;;  %v9109_v20 = vpop.f32.mrb[126].mxu1  ;;  %10169 = vmatprep.mubr.bf16.mxu0 %v20183_v59  ;;  %v9255_v25 = vld [vmem:[%s16086_s5 + $0x378] sm:$0x7]  ;;  %v10850_v5 = vld [vmem:[%s16086_s5 + $0x390] sm:$0xc]  ;;  %v11591_v0 = vrot.slane %v11589_v26, 4 }
 0x6bf   : > { %12554 = vst [vmem:[%s16570_s11 + $0x790] sm:$0xff] %v13941_v35  ;;  %v13945_v3 = vadd.f32 %v9109_v20, %v1159_v56  ;;  %v9111_v40 = vpop.f32.mrb[127].mxu1  ;;  %v9926_v21 = vsel %vm17528_vm9, %v9924_v7, %v9925_v57  ;;  %v11579_v45 = vsel %vm16367_vm6, %v11577_v23, %v11578_v41  ;;  %v9932_v35 = vrot.slane %v9255_v25, 7  ;;  %v10858_v13 = vld [vmem:[%s16086_s5 + $0x408] sm:$0x3] }
 0x6c0   : > { %12555 = vst [vmem:[%s16570_s11 + $0x798] sm:$0xff] %v13943_v29  ;;  %v13947_v6 = vadd.f32 %v9111_v40, %v1161_v14  ;;  %v19373_v56 = vcombine.low %v9923_v39, %v9926_v21  ;;  %v13589_v14 = vrot.slane %v9253_v62, 11  ;;  %v13743_v29 = vcombine.low %v11576_v42, %v11579_v45  ;;  %v10860_v23 = vld [vmem:[%s16086_s5 + $0x420] sm:$0xf]  ;;  %v10861_v42 = vld [vmem:[%s16086_s5 + $0x424] sm:$0x3] }
 0x6c1   : > { %12556 = vst [vmem:[%s16570_s11 + $0x7d0] sm:$0xff] %v13945_v3  ;;  %13758 = vmatmul.mubr.msk.bf16.gmra.mrb[40].mxu1 %vm703_vm1, %v13740_v12  ;;  %v9931_v12 = vrot.slane %v9929_v8, 4  ;;  %v13728_v18 = vrot.slane %v10850_v5, 10  ;;  %v9256_v3 = vld [vmem:[%s16086_s5 + $0x38c] sm:$0x8]  ;;  %v9936_v40 = vrot.slane %v9257_v19, 7 }
 0x6c2   : > { %12557 = vst [vmem:[%s16570_s11 + $0x7d8] sm:$0xff] %v13947_v6  ;;  %11849 = vmatprep.mubr.bf16.mxu1 %v20183_v59  ;;  %v9930_v20 = vsel %vm17528_vm9, %v13589_v14, %v9929_v8  ;;  %v13590_v30 = vrot.slane %v9256_v3, 11  ;;  %v11592_v27 = vrot.slane %v10855_v11, 6  ;;  %v13591_v9 = vrot.slane %v9259_v48, 11  ;;  %v10863_v5 = vld [vmem:[%s16086_s5 + $0x43c] sm:$0xf] }
 0x6c3   : > { %v9933_v17 = vsel %vm17528_vm9, %v9931_v12, %v9932_v35  ;;  %v9938_v53 = vrot.slane %v9936_v40, 4  ;;  %v9945_v37 = vrot.slane %v9943_v1, 4  ;;  %v9946_v7 = vrot.slane %v9261_v63, 7  ;;  %v10866_v3 = vld [vmem:[%s16086_s5 + $0x458] sm:$0xf] }
 0x6c4   : > { %v19394_v6 = vcombine.low %v9930_v20, %v9933_v17  ;;  %v11593_v54 = vsel %vm16367_vm6, %v11591_v0, %v11592_v27  ;;  %v12014_v57 = vrot.slane %v10857_v32, 6  ;;  %v9944_v55 = vsel %vm17528_vm9, %v13591_v9, %v9943_v1  ;;  %v10864_v20 = vld [vmem:[%s16086_s5 + $0x440] sm:$0x3]  ;;  %v10865_v10 = vld [vmem:[%s16086_s5 + $0x454] sm:$0xc] }
 0x6c5   : > { %13616 = vmatmul.mubr.msk.bf16.gmra.mrb[168].mxu0 %vm703_vm1, %v13598_v4  ;;  %v11583_v4 = vsel %vm16367_vm6, %v13728_v18, %v11582_v28  ;;  %v9940_v33 = vsel %vm17528_vm9, %v9938_v53, %v9939_v50  ;;  %v13764_v39 = vrot.slane %v10856_v43, 10  ;;  %v12017_v21 = vrot.slane %v10858_v13, 6  ;;  %v10869_v44 = vld [vmem:[%s16086_s5 + $0x474] sm:$0xf]  ;;  %v10868_v11 = vld [vmem:[%s16086_s5 + $0x470] sm:$0xc] }
 0x6c6   : > { %10179 = vmatprep.mubr.bf16.mxu0 %v20183_v59  ;;  %v13744_v16 = vcombine.low %v11583_v4, %v11586_v52  ;;  %v12016_v47 = vrot.slane %v12014_v57, 4  ;;  %v12021_v25 = vrot.slane %v10860_v23, 6  ;;  %v13765_v45 = vrot.slane %v10859_v2, 10  ;;  %v10867_v4 = vld [vmem:[%s16086_s5 + $0x45c] sm:$0x3] }
 0x6c7   : > { %v12015_v62 = vsel %vm16367_vm6, %v13764_v39, %v12014_v57  ;;  %v12024_v35 = vrot.slane %v10861_v42, 6  ;;  %v12028_v19 = vrot.slane %v10863_v5, 6  ;;  %v12031_v34 = vrot.slane %v10864_v20, 6  ;;  %v9262_v48 = vld [vmem:[%s16086_s5 + $0x3c4] sm:$0x8] }
 0x6c8   : > { %v12018_v8 = vsel %vm16367_vm6, %v12016_v47, %v12017_v21  ;;  %v12023_v12 = vrot.slane %v12021_v25, 4  ;;  %v12022_v28 = vsel %vm16367_vm6, %v13765_v45, %v12021_v25  ;;  %v13767_v52 = vrot.slane %v10865_v10, 10  ;;  %v9264_v63 = vld [vmem:[%s16086_s5 + $0x3cc] sm:$0x7]  ;;  %v10872_v32 = vld [vmem:[%s16086_s5 + $0x490] sm:$0xf] }
 0x6c9   : > { %13759 = vmatmul.mubr.msk.bf16.gmra.mrb[44].mxu1 %vm703_vm1, %v13741_v31  ;;  %v9937_v31 = vsel %vm17528_vm9, %v13590_v30, %v9936_v40  ;;  %v13780_v14 = vcombine.low %v12015_v62, %v12018_v8  ;;  %v12030_v49 = vrot.slane %v12028_v19, 4  ;;  %v12038_v50 = vrot.slane %v10867_v4, 6  ;;  %v10873_v43 = vld [vmem:[%s16086_s5 + $0x494] sm:$0x3]  ;;  %v9266_v13 = vld [vmem:[%s16086_s5 + $0x3e4] sm:$0xf] }
 0x6ca   : > { %11859 = vmatprep.mubr.bf16.mxu1 %v20183_v59  ;;  %v19415_v51 = vcombine.low %v9937_v31, %v9940_v33  ;;  %v12025_v24 = vsel %vm16367_vm6, %v12023_v12, %v12024_v35  ;;  %v12042_v15 = vrot.slane %v10869_v44, 6  ;;  %v9263_v31 = vld [vmem:[%s16086_s5 + $0x3c8] sm:$0xf]  ;;  %v13768_v33 = vrot.slane %v10868_v11, 10  ;;  %v9265_v23 = vld [vmem:[%s16086_s5 + $0x3e0] sm:$0x8] }
 0x6cb   : > { %v13781_v18 = vcombine.low %v12022_v28, %v12025_v24  ;;  %v12032_v61 = vsel %vm16367_vm6, %v12030_v49, %v12031_v34  ;;  %v10332_v1 = vrot.slane %v9263_v31, 7  ;;  %v13622_v9 = vrot.slane %v9262_v48, 11  ;;  %v9267_v8 = vld [vmem:[%s16086_s5 + $0x3e8] sm:$0x7]  ;;  %v10875_v25 = vld [vmem:[%s16086_s5 + $0x4ac] sm:$0xf] }
 0x6cc   : > { %v12044_v0 = vrot.slane %v12042_v15, 4  ;;  %v12049_v57 = vrot.slane %v10872_v32, 6  ;;  %v12052_v21 = vrot.slane %v10873_v43, 6  ;;  %v10339_v62 = vrot.slane %v9266_v13, 7  ;;  %v10874_v35 = vld [vmem:[%s16086_s5 + $0x4a8] sm:$0xc] }
 0x6cd   : > { %13617 = vmatmul.mubr.msk.bf16.gmra.mrb[172].mxu0 %vm703_vm1, %v13599_v60  ;;  %v11590_v60 = vsel %vm16367_vm6, %v13729_v58, %v11589_v26  ;;  %v13623_v42 = vrot.slane %v9265_v23, 11  ;;  %v10342_v12 = vrot.slane %v9267_v8, 7  ;;  %v12056_v5 = vrot.slane %v10875_v25, 6  ;;  %v10876_v28 = vld [vmem:[%s16086_s5 + $0x4b0] sm:$0x3] }
 0x6ce   : > { %10189 = vmatprep.mubr.bf16.mxu0 %v20183_v59  ;;  %v13745_v38 = vcombine.low %v11590_v60, %v11593_v54  ;;  %v12043_v60 = vsel %vm16367_vm6, %v13768_v33, %v12042_v15  ;;  %v10334_v54 = vrot.slane %v10332_v1, 4  ;;  %v12051_v47 = vrot.slane %v12049_v57, 4  ;;  %v9269_v24 = vld [vmem:[%s16086_s5 + $0x400] sm:$0xf]  ;;  %v9268_v34 = vld [vmem:[%s16086_s5 + $0x3fc] sm:$0x8] }
 0x6cf   : > { %v10341_v45 = vrot.slane %v10339_v62, 4  ;;  %v13770_v20 = vrot.slane %v10874_v35, 10  ;;  %v12059_v49 = vrot.slane %v10876_v28, 6  ;;  %v13624_v4 = vrot.slane %v9268_v34, 11  ;;  %v9273_v48 = vld [vmem:[%s16086_s5 + $0x420] sm:$0x7] }
 0x6d0   : > { %v9275_v43 = vld [vmem:[%s16086_s5 + $0x438] sm:$0xf]  ;;  %v10884_v8 = vld [vmem:[%s16086_s5 + $0x500] sm:$0xf]  ;;  %v9278_v28 = vld [vmem:[%s16086_s5 + $0x454] sm:$0xf] }
 0x6d1   : > { %13760 = vmatmul.mubr.msk.bf16.gmra.mrb[48].mxu1 %vm703_vm1, %v13742_v22  ;;  %v9947_v22 = vsel %vm17528_vm9, %v9945_v37, %v9946_v7  ;;  %v10335_v37 = vrot.slane %v9264_v63, 7  ;;  %v10871_v7 = vld [vmem:[%s16086_s5 + $0x48c] sm:$0xc]  ;;  %v12057_v10 = vsel %vm16367_vm6, %v13770_v20, %v12056_v5  ;;  %v10360_v23 = vrot.slane %v9275_v43, 7 }
 0x6d2   : > { %11869 = vmatprep.mubr.bf16.mxu1 %v20183_v59  ;;  %v19433_v41 = vcombine.low %v9944_v55, %v9947_v22  ;;  %v10333_v55 = vsel %vm17528_vm9, %v13622_v9, %v10332_v1  ;;  %v13769_v22 = vrot.slane %v10871_v7, 10  ;;  %v10881_v1 = vld [vmem:[%s16086_s5 + $0x4e4] sm:$0xf]  ;;  %v12077_v35 = vrot.slane %v10884_v8, 6 }
 0x6d3   : > { %v10336_v39 = vsel %vm17528_vm9, %v10334_v54, %v10335_v37  ;;  %v10356_v54 = vrot.slane %v9273_v48, 7  ;;  %v10880_v37 = vld [vmem:[%s16086_s5 + $0x4e0] sm:$0xc]  ;;  %v12070_v7 = vrot.slane %v10881_v1, 6  ;;  %v10367_v34 = vrot.slane %v9278_v28, 7 }
 0x6d4   : > { %v12050_v2 = vsel %vm16367_vm6, %v13769_v22, %v12049_v57  ;;  %v10882_v57 = vld [vmem:[%s16086_s5 + $0x4e8] sm:$0x3]  ;;  %v10890_v48 = vld [vmem:[%s16086_s5 + $0x538] sm:$0xf] }
 0x6d5   : > { %13618 = vmatmul.mubr.msk.bf16.gmra.mrb[176].mxu0 %vm703_vm1, %v19373_v56 }
 0x6d6   : > { %10199 = vmatprep.mubr.bf16.mxu0 %v20183_v59 }
 0x6d9   : > { %13761 = vmatmul.mubr.msk.bf16.gmra.mrb[52].mxu1 %vm703_vm1, %v13743_v29  ;;  %v10862_v29 = vld [vmem:[%s16086_s5 + $0x438] sm:$0xc] }
 0x6da   : > { %11879 = vmatprep.mubr.bf16.mxu1 %v20183_v59  ;;  %v13766_v17 = vrot.slane %v10862_v29, 10  ;;  %v10340_v29 = vsel %vm17528_vm9, %v13623_v42, %v10339_v62  ;;  %v9276_v62 = vld [vmem:[%s16086_s5 + $0x43c] sm:$0x7] }
 0x6dc   : > { %v12029_v40 = vsel %vm16367_vm6, %v13766_v17, %v12028_v19  ;;  %v12058_v17 = vrot.slane %v12056_v5, 4  ;;  %v10885_v5 = vld [vmem:[%s16086_s5 + $0x504] sm:$0x3] }
 0x6dd   : > { %13619 = vmatmul.mubr.msk.bf16.gmra.mrb[180].mxu0 %vm703_vm1, %v19394_v6  ;;  %v13782_v30 = vcombine.low %v12029_v40, %v12032_v61  ;;  %v9270_v40 = vld [vmem:[%s16086_s5 + $0x404] sm:$0x7]  ;;  %v10878_v61 = vld [vmem:[%s16086_s5 + $0x4c8] sm:$0xf] }
 0x6de   : > { %10209 = vmatprep.mubr.bf16.mxu0 %v20183_v59  ;;  %v12063_v44 = vrot.slane %v10878_v61, 6 }
 0x6e1   : > { %13762 = vmatmul.mubr.msk.bf16.gmra.mrb[56].mxu1 %vm703_vm1, %v13744_v16  ;;  %v10870_v16 = vld [vmem:[%s16086_s5 + $0x478] sm:$0x3] }
 0x6e2   : > { %11889 = vmatprep.mubr.bf16.mxu1 %v20183_v59  ;;  %v12045_v27 = vrot.slane %v10870_v16, 6 }
 0x6e5   : > { %13620 = vmatmul.mubr.msk.bf16.gmra.mrb[184].mxu0 %vm703_vm1, %v19415_v51 }
 0x6e6   : > { %10219 = vmatprep.mubr.bf16.mxu0 %v20183_v59 }
 0x6e9   : > { %13763 = vmatmul.mubr.msk.bf16.gmra.mrb[60].mxu1 %vm703_vm1, %v13745_v38 }
 0x6ea   : > { %12269 = vmatprep.mubr.bf16.mxu1 %v20183_v59 }
 0x6ed   : > { %13621 = vmatmul.mubr.msk.bf16.gmra.mrb[188].mxu0 %vm703_vm1, %v19433_v41 }
 0x6ee   : > { %10535 = vmatprep.mubr.bf16.mxu0 %v20183_v59 }
 0x6f1   : > { %13798 = vmatmul.mubr.msk.bf16.vlgmr.msra.gmra.mrb[0].mxu1 %vm703_vm1, %v13780_v14  ;;  %v12053_v14 = vsel %vm16367_vm6, %v12051_v47, %v12052_v21  ;;  %v12073_v47 = vrot.slane %v10882_v57, 6  ;;  %v9274_v21 = vld [vmem:[%s16086_s5 + $0x434] sm:$0x8]  ;;  %v9284_v57 = vld [vmem:[%s16086_s5 + $0x48c] sm:$0xf] }
 0x6f2   : > { %12279 = vmatprep.mubr.bf16.mxu1 %v20183_v59  ;;  %v13785_v19 = vcombine.low %v12050_v2, %v12053_v14  ;;  %v13626_v2 = vrot.slane %v9274_v21, 11  ;;  %v10362_v14 = vrot.slane %v10360_v23, 4  ;;  %v10381_v21 = vrot.slane %v9284_v57, 7 }
 0x6f5   : > { %13648 = vmatmul.mubr.msk.bf16.vlgmr.msra.gmra.mrb[128].mxu0 %vm703_vm1, %v19373_v56  ;;  %v12035_v56 = vrot.slane %v10866_v3, 6  ;;  %v10346_v3 = vrot.slane %v9269_v24, 7 }
 0x6f6   : > { %10545 = vmatprep.mubr.bf16.mxu0 %v20183_v59 }
 0x6f7   : > { %v12037_v53 = vrot.slane %v12035_v56, 4  ;;  %v12036_v26 = vsel %vm16367_vm6, %v13767_v52, %v12035_v56  ;;  %v10348_v52 = vrot.slane %v10346_v3, 4  ;;  %v10347_v15 = vsel %vm17528_vm9, %v13624_v4, %v10346_v3  ;;  %v9279_v3 = vld [vmem:[%s16086_s5 + $0x458] sm:$0x7] }
 0x6f9   : > { %13799 = vmatmul.mubr.msk.bf16.gmra.mrb[4].mxu1 %vm703_vm1, %v13781_v18  ;;  %v10343_v18 = vsel %vm17528_vm9, %v10341_v45, %v10342_v12  ;;  %v10363_v45 = vrot.slane %v9276_v62, 7  ;;  %v10883_v12 = vld [vmem:[%s16086_s5 + $0x4fc] sm:$0xc]  ;;  %v10893_v62 = vld [vmem:[%s16086_s5 + $0x554] sm:$0xf] }
 0x6fa   : > { %12289 = vmatprep.mubr.bf16.mxu1 %v20183_v59  ;;  %v13635_v56 = vcombine.low %v10340_v29, %v10343_v18  ;;  %v13773_v29 = vrot.slane %v10883_v12, 10  ;;  %v12079_v18 = vrot.slane %v12077_v35, 4  ;;  %v12098_v12 = vrot.slane %v10893_v62, 6 }
 0x6fb   : > { %v10364_v20 = vsel %vm17528_vm9, %v10362_v14, %v10363_v45  ;;  %v10892_v45 = vld [vmem:[%s16086_s5 + $0x550] sm:$0xc] }
 0x6fd   : > { %13649 = vmatmul.mubr.msk.bf16.gmra.mrb[132].mxu0 %vm703_vm1, %v19394_v6  ;;  %v12039_v6 = vsel %vm16367_vm6, %v12037_v53, %v12038_v50  ;;  %v10349_v53 = vrot.slane %v9270_v40, 7  ;;  %v10877_v50 = vld [vmem:[%s16086_s5 + $0x4c4] sm:$0xc]  ;;  %v10887_v40 = vld [vmem:[%s16086_s5 + $0x51c] sm:$0xf] }
 0x6fe   : > { %10555 = vmatprep.mubr.bf16.mxu0 %v20183_v59  ;;  %v13783_v58 = vcombine.low %v12036_v26, %v12039_v6  ;;  %v10879_v26 = vld [vmem:[%s16086_s5 + $0x4cc] sm:$0x3]  ;;  %v9272_v6 = vld [vmem:[%s16086_s5 + $0x41c] sm:$0xf]  ;;  %v13771_v16 = vrot.slane %v10877_v50, 10  ;;  %v12084_v50 = vrot.slane %v10887_v40, 6 }
 0x6ff   : > { %v10350_v31 = vsel %vm17528_vm9, %v10348_v52, %v10349_v53  ;;  %v12066_v33 = vrot.slane %v10879_v26, 6  ;;  %v10370_v52 = vrot.slane %v9279_v3, 7  ;;  %v10886_v53 = vld [vmem:[%s16086_s5 + $0x518] sm:$0xc]  ;;  %v9281_v26 = vld [vmem:[%s16086_s5 + $0x470] sm:$0xf] }
 0x700   : > { %v13636_v63 = vcombine.low %v10347_v15, %v10350_v31  ;;  %v12064_v32 = vsel %vm16367_vm6, %v13771_v16, %v12063_v44  ;;  %v13774_v15 = vrot.slane %v10886_v53, 10  ;;  %v12086_v31 = vrot.slane %v12084_v50, 4  ;;  %v10896_v3 = vld [vmem:[%s16086_s5 + $0x570] sm:$0xf] }
 0x701   : > { %13800 = vmatmul.mubr.msk.bf16.gmra.mrb[8].mxu1 %vm703_vm1, %v13782_v30  ;;  %v12060_v30 = vsel %vm16367_vm6, %v12058_v17, %v12059_v49  ;;  %v12080_v17 = vrot.slane %v10885_v5, 6  ;;  %v9277_v49 = vld [vmem:[%s16086_s5 + $0x450] sm:$0x8]  ;;  %v9287_v5 = vld [vmem:[%s16086_s5 + $0x4a8] sm:$0xf]  ;;  %v12105_v53 = vrot.slane %v10896_v3, 6 }
 0x702   : > { %12299 = vmatprep.mubr.bf16.mxu1 %v20183_v59  ;;  %v13786_v11 = vcombine.low %v12057_v10, %v12060_v30  ;;  %v13627_v10 = vrot.slane %v9277_v49, 11  ;;  %v10369_v30 = vrot.slane %v10367_v34, 4  ;;  %v10388_v49 = vrot.slane %v9287_v5, 7 }
 0x703   : > { %v12081_v4 = vsel %vm16367_vm6, %v12079_v18, %v12080_v17  ;;  %v9286_v17 = vld [vmem:[%s16086_s5 + $0x4a4] sm:$0x8] }
 0x704   : > { %v10371_v16 = vsel %vm17528_vm9, %v10369_v30, %v10370_v52  ;;  %v10895_v52 = vld [vmem:[%s16086_s5 + $0x56c] sm:$0xc] }
 0x705   : > { %13650 = vmatmul.mubr.msk.bf16.gmra.mrb[136].mxu0 %vm703_vm1, %v19415_v51  ;;  %v12046_v51 = vsel %vm16367_vm6, %v12044_v0, %v12045_v27  ;;  %v9271_v0 = vld [vmem:[%s16086_s5 + $0x418] sm:$0x8]  ;;  %v10353_v27 = vrot.slane %v9272_v6, 7 }
 0x706   : > { %10565 = vmatprep.mubr.bf16.mxu0 %v20183_v59  ;;  %v13784_v38 = vcombine.low %v12043_v60, %v12046_v51  ;;  %v13625_v60 = vrot.slane %v9271_v0, 11  ;;  %v10374_v0 = vrot.slane %v9281_v26, 7 }
 0x707   : > { %v10355_v51 = vrot.slane %v10353_v27, 4 }
 0x709   : > { %13801 = vmatmul.mubr.msk.bf16.gmra.mrb[12].mxu1 %vm703_vm1, %v13783_v58  ;;  %v12065_v58 = vrot.slane %v12063_v44, 4  ;;  %v10357_v22 = vsel %vm17528_vm9, %v10355_v51, %v10356_v54  ;;  %v10888_v44 = vld [vmem:[%s16086_s5 + $0x520] sm:$0x3]  ;;  %v10889_v54 = vld [vmem:[%s16086_s5 + $0x534] sm:$0xc] }
 0x70a   : > { %12309 = vmatprep.mubr.bf16.mxu1 %v20183_v59 }
 0x70b   : > { %v12067_v9 = vsel %vm16367_vm6, %v12065_v58, %v12066_v33  ;;  %v12087_v58 = vrot.slane %v10888_v44, 6  ;;  %v9280_v33 = vld [vmem:[%s16086_s5 + $0x46c] sm:$0x8]  ;;  %v9290_v44 = vld [vmem:[%s16086_s5 + $0x4c4] sm:$0xf] }
 0x70c   : > { %v13787_v13 = vcombine.low %v12064_v32, %v12067_v9  ;;  %v13628_v32 = vrot.slane %v9280_v33, 11  ;;  %v10376_v9 = vrot.slane %v10374_v0, 4  ;;  %v10395_v33 = vrot.slane %v9290_v44, 7 }
 0x70d   : > { %13651 = vmatmul.mubr.msk.bf16.gmra.mrb[140].mxu0 %vm703_vm1, %v19433_v41  ;;  %v13634_v41 = vcombine.low %v10333_v55, %v10336_v39  ;;  %v13772_v55 = vrot.slane %v10880_v37, 10  ;;  %v12072_v39 = vrot.slane %v12070_v7, 4  ;;  %v12091_v37 = vrot.slane %v10890_v48, 6 }
 0x70e   : > { %10575 = vmatprep.mubr.bf16.mxu0 %v20183_v59 }
 0x70f   : > { %v12074_v42 = vsel %vm16367_vm6, %v12072_v39, %v12073_v47  ;;  %v9283_v47 = vld [vmem:[%s16086_s5 + $0x488] sm:$0x8] }
 0x711   : > { %13802 = vmatmul.mubr.msk.bf16.gmra.mrb[16].mxu1 %vm703_vm1, %v13784_v38  ;;  %v10354_v38 = vsel %vm17528_vm9, %v13625_v60, %v10353_v27  ;;  %v9282_v27 = vld [vmem:[%s16086_s5 + $0x474] sm:$0x7]  ;;  %v12088_v60 = vsel %vm16367_vm6, %v12086_v31, %v12087_v58  ;;  %v9289_v58 = vld [vmem:[%s16086_s5 + $0x4c0] sm:$0x8] }
 0x712   : > { %12319 = vmatprep.mubr.bf16.mxu1 %v20183_v59  ;;  %v13637_v25 = vcombine.low %v10354_v38, %v10357_v22  ;;  %v10377_v51 = vrot.slane %v9282_v27, 7  ;;  %v13775_v38 = vrot.slane %v10889_v54, 10  ;;  %v12093_v22 = vrot.slane %v12091_v37, 4  ;;  %v10899_v27 = vld [vmem:[%s16086_s5 + $0x58c] sm:$0xf] }
 0x713   : > { %v12112_v54 = vrot.slane %v10899_v27, 6 }
 0x715   : > { %13652 = vmatmul.mubr.msk.bf16.gmra.mrb[144].mxu0 %vm703_vm1, %v13634_v41  ;;  %v12071_v41 = vsel %vm16367_vm6, %v13772_v55, %v12070_v7  ;;  %v10891_v7 = vld [vmem:[%s16086_s5 + $0x53c] sm:$0x3]  ;;  %v10378_v55 = vsel %vm17528_vm9, %v10376_v9, %v10377_v51  ;;  %v10898_v51 = vld [vmem:[%s16086_s5 + $0x588] sm:$0xc] }
 0x716   : > { %10585 = vmatprep.mubr.bf16.mxu0 %v20183_v59  ;;  %v13788_v24 = vcombine.low %v12071_v41, %v12074_v42  ;;  %v12094_v39 = vrot.slane %v10891_v7, 6  ;;  %v13629_v41 = vrot.slane %v9283_v47, 11  ;;  %v10383_v42 = vrot.slane %v10381_v21, 4  ;;  %v9293_v7 = vld [vmem:[%s16086_s5 + $0x4e0] sm:$0xf] }
 0x717   : > { %v10402_v47 = vrot.slane %v9293_v7, 7 }
 0x719   : > { %13803 = vmatmul.mubr.msk.bf16.gmra.mrb[20].mxu1 %vm703_vm1, %v13785_v19  ;;  %v10361_v19 = vsel %vm17528_vm9, %v13626_v2, %v10360_v23  ;;  %v9285_v23 = vld [vmem:[%s16086_s5 + $0x490] sm:$0x7]  ;;  %v12095_v2 = vsel %vm16367_vm6, %v12093_v22, %v12094_v39  ;;  %v9292_v39 = vld [vmem:[%s16086_s5 + $0x4dc] sm:$0x8] }
 0x71a   : > { %12329 = vmatprep.mubr.bf16.mxu1 %v20183_v59  ;;  %v13638_v61 = vcombine.low %v10361_v19, %v10364_v20  ;;  %v10384_v14 = vrot.slane %v9285_v23, 7  ;;  %v13776_v19 = vrot.slane %v10892_v45, 10  ;;  %v12100_v20 = vrot.slane %v12098_v12, 4  ;;  %v10902_v23 = vld [vmem:[%s16086_s5 + $0x5a8] sm:$0xf] }
 0x71b   : > { %v12119_v45 = vrot.slane %v10902_v23, 6 }
 0x71d   : > { %13653 = vmatmul.mubr.msk.bf16.gmra.mrb[148].mxu0 %vm703_vm1, %v13635_v56  ;;  %v12078_v56 = vsel %vm16367_vm6, %v13773_v29, %v12077_v35  ;;  %v10894_v35 = vld [vmem:[%s16086_s5 + $0x558] sm:$0x3]  ;;  %v10385_v29 = vsel %vm17528_vm9, %v10383_v42, %v10384_v14  ;;  %v10901_v14 = vld [vmem:[%s16086_s5 + $0x5a4] sm:$0xc] }
 0x71e   : > { %10595 = vmatprep.mubr.bf16.mxu0 %v20183_v59  ;;  %v13789_v6 = vcombine.low %v12078_v56, %v12081_v4  ;;  %v12101_v18 = vrot.slane %v10894_v35, 6  ;;  %v13630_v56 = vrot.slane %v9286_v17, 11  ;;  %v10390_v4 = vrot.slane %v10388_v49, 4  ;;  %v9296_v35 = vld [vmem:[%s16086_s5 + $0x4fc] sm:$0xf] }
 0x71f   : > { %v9295_v17 = vld [vmem:[%s16086_s5 + $0x4f8] sm:$0x8] }
 0x721   : > { %13804 = vmatmul.mubr.msk.bf16.gmra.mrb[24].mxu1 %vm703_vm1, %v13786_v11  ;;  %v10368_v11 = vsel %vm17528_vm9, %v13627_v10, %v10367_v34  ;;  %v9288_v34 = vld [vmem:[%s16086_s5 + $0x4ac] sm:$0x7]  ;;  %v12102_v10 = vsel %vm16367_vm6, %v12100_v20, %v12101_v18  ;;  %v10409_v18 = vrot.slane %v9296_v35, 7 }
 0x722   : > { %12339 = vmatprep.mubr.bf16.mxu1 %v20183_v59  ;;  %v13639_v1 = vcombine.low %v10368_v11, %v10371_v16  ;;  %v10391_v30 = vrot.slane %v9288_v34, 7  ;;  %v13777_v11 = vrot.slane %v10895_v52, 10  ;;  %v12107_v16 = vrot.slane %v12105_v53, 4 }
 0x725   : > { %13654 = vmatmul.mubr.msk.bf16.gmra.mrb[152].mxu0 %vm703_vm1, %v13636_v63  ;;  %v12085_v63 = vsel %vm16367_vm6, %v13774_v15, %v12084_v50  ;;  %v10897_v50 = vld [vmem:[%s16086_s5 + $0x574] sm:$0x3]  ;;  %v10392_v15 = vsel %vm17528_vm9, %v10390_v4, %v10391_v30 }
 0x726   : > { %10605 = vmatprep.mubr.bf16.mxu0 %v20183_v59  ;;  %v13790_v43 = vcombine.low %v12085_v63, %v12088_v60  ;;  %v12108_v31 = vrot.slane %v10897_v50, 6  ;;  %v13631_v63 = vrot.slane %v9289_v58, 11  ;;  %v10397_v60 = vrot.slane %v10395_v33, 4  ;;  %v20301_v50 = vld [vmem:[#allocation80_spill] sm:$0xff]  ;;  %v20305_v58 = vld [vmem:[#allocation83_spill] sm:$0xff] }
 0x729   : > { %13805 = vmatmul.mubr.msk.bf16.gmra.mrb[28].mxu1 %vm703_vm1, %v13787_v13  ;;  %v10375_v13 = vsel %vm17528_vm9, %v13628_v32, %v10374_v0  ;;  %v9291_v0 = vld [vmem:[%s16086_s5 + $0x4c8] sm:$0x7]  ;;  %v12109_v32 = vsel %vm16367_vm6, %v12107_v16, %v12108_v31 }
 0x72a   : > { %12349 = vmatprep.mubr.bf16.mxu1 %v20183_v59  ;;  %v13640_v8 = vcombine.low %v10375_v13, %v10378_v55  ;;  %v10398_v9 = vrot.slane %v9291_v0, 7  ;;  %v13778_v13 = vrot.slane %v10898_v51, 10  ;;  %v12114_v55 = vrot.slane %v12112_v54, 4 }
 0x72d   : > { %13655 = vmatmul.mubr.msk.bf16.gmra.mrb[156].mxu0 %vm703_vm1, %v13637_v25  ;;  %v12092_v25 = vsel %vm16367_vm6, %v13775_v38, %v12091_v37  ;;  %v10900_v37 = vld [vmem:[%s16086_s5 + $0x590] sm:$0x3]  ;;  %v10399_v38 = vsel %vm17528_vm9, %v10397_v60, %v10398_v9  ;;  %v20306_v60 = vld [vmem:[#allocation13_spill] sm:$0xff] }
 0x72e   : > { %10615 = vmatprep.mubr.bf16.mxu0 %v20183_v59  ;;  %v13791_v28 = vcombine.low %v12092_v25, %v12095_v2  ;;  %v12115_v22 = vrot.slane %v10900_v37, 6  ;;  %v13632_v25 = vrot.slane %v9292_v39, 11  ;;  %v10404_v2 = vrot.slane %v10402_v47, 4 }
 0x731   : > { %13806 = vmatmul.mubr.msk.bf16.gmra.mrb[32].mxu1 %vm703_vm1, %v13788_v24  ;;  %v10382_v24 = vsel %vm17528_vm9, %v13629_v41, %v10381_v21  ;;  %v9294_v21 = vld [vmem:[%s16086_s5 + $0x4e4] sm:$0x7]  ;;  %v12116_v41 = vsel %vm16367_vm6, %v12114_v55, %v12115_v22  ;;  %v20309_v55 = vld [vmem:[#allocation85_spill] sm:$0xff] }
 0x732   : > { %12359 = vmatprep.mubr.bf16.mxu1 %v20183_v59  ;;  %v13641_v40 = vcombine.low %v10382_v24, %v10385_v29  ;;  %v10405_v42 = vrot.slane %v9294_v21, 7  ;;  %v13779_v24 = vrot.slane %v10901_v14, 10  ;;  %v12121_v29 = vrot.slane %v12119_v45, 4  ;;  %v20310_v21 = vld [vmem:[#allocation86_spill] sm:$0xff] }
 0x734   : > { %v12120_v3 = vsel %vm16367_vm6, %v13779_v24, %v12119_v45 }
 0x735   : > { %13656 = vmatmul.mubr.msk.bf16.gmra.mrb[160].mxu0 %vm703_vm1, %v13638_v61  ;;  %v12099_v61 = vsel %vm16367_vm6, %v13776_v19, %v12098_v12  ;;  %v10903_v12 = vld [vmem:[%s16086_s5 + $0x5ac] sm:$0x3]  ;;  %v10406_v19 = vsel %vm17528_vm9, %v10404_v2, %v10405_v42 }
 0x736   : > { %10625 = vmatprep.mubr.bf16.mxu0 %v20183_v59  ;;  %v13792_v26 = vcombine.low %v12099_v61, %v12102_v10  ;;  %v12122_v20 = vrot.slane %v10903_v12, 6  ;;  %v13633_v61 = vrot.slane %v9295_v17, 11 }
 0x738   : > { %v10410_v30 = vsel %vm17528_vm9, %v13633_v61, %v10409_v18  ;;  %v20314_v61 = vld [vmem:[#allocation90_spill] sm:$0xff] }
 0x739   : > { %13807 = vmatmul.mubr.msk.bf16.gmra.mrb[36].mxu1 %vm703_vm1, %v13789_v6  ;;  %v10389_v6 = vsel %vm17528_vm9, %v13630_v56, %v10388_v49  ;;  %v9297_v49 = vld [vmem:[%s16086_s5 + $0x500] sm:$0x7]  ;;  %v10411_v56 = vrot.slane %v10409_v18, 4 }
 0x73a   : > { %12369 = vmatprep.mubr.bf16.mxu1 %v20183_v59  ;;  %v13642_v48 = vcombine.low %v10389_v6, %v10392_v15  ;;  %v10412_v10 = vrot.slane %v9297_v49, 7  ;;  %v20303_v6 = vld [vmem:[#allocation81_spill] sm:$0xff]  ;;  %v20304_v15 = vld [vmem:[#allocation82_spill] sm:$0xff] }
 0x73b   : > { %v20313_v49 = vld [vmem:[#allocation89_spill] sm:$0xff] }
 0x73c   : > { %v10413_v52 = vsel %vm17528_vm9, %v10411_v56, %v10412_v10 }
 0x73d   : > { %13657 = vmatmul.mubr.msk.bf16.gmra.mrb[164].mxu0 %vm703_vm1, %v13639_v1  ;;  %v12106_v1 = vsel %vm16367_vm6, %v13777_v11, %v12105_v53  ;;  %v13645_v36 = vcombine.low %v10410_v30, %v10413_v52  ;;  %v20300_v53 = vld [vmem:[#allocation15_spill] sm:$0xff] }
 0x73e   : > { %10635 = vmatprep.mubr.bf16.mxu0 %v20183_v59  ;;  %v13793_v57 = vcombine.low %v12106_v1, %v12109_v32  ;;  %v14012_v44 = vadd.f32 %v20301_v50, %v20300_v53  ;;  %v14016_v16 = vadd.f32 %v20304_v15, %v20300_v53  ;;  %v14024_v23 = vadd.f32 %v20310_v21, %v20300_v53  ;;  %v20315_v30 = vld [vmem:[#allocation91_spill] sm:$0xff] }
 0x73f   : > { %v14032_v56 = vadd.f32 %v20314_v61, %v20300_v53 }
 0x741   : > { %13808 = vmatmul.mubr.msk.bf16.gmra.mrb[40].mxu1 %vm703_vm1, %v13790_v43  ;;  %v10396_v43 = vsel %vm17528_vm9, %v13631_v63, %v10395_v33 }
 0x742   : > { %12379 = vmatprep.mubr.bf16.mxu1 %v20183_v59  ;;  %v13643_v62 = vcombine.low %v10396_v43, %v10399_v38 }
 0x745   : > { %13658 = vmatmul.mubr.msk.bf16.gmra.mrb[168].mxu0 %vm703_vm1, %v13640_v8  ;;  %v12113_v8 = vsel %vm16367_vm6, %v13778_v13, %v12112_v54  ;;  %v20307_v54 = vld [vmem:[#allocation14_spill] sm:$0xff] }
 0x746   : > { %10645 = vmatprep.mubr.bf16.mxu0 %v20183_v59  ;;  %v13794_v5 = vcombine.low %v12113_v8, %v12116_v41 }
 0x749   : > { %13809 = vmatmul.mubr.msk.bf16.gmra.mrb[44].mxu1 %vm703_vm1, %v13791_v28  ;;  %v10403_v28 = vsel %vm17528_vm9, %v13632_v25, %v10402_v47  ;;  %v20311_v25 = vld [vmem:[#allocation87_spill] sm:$0xff] }
 0x74a   : > { %12389 = vmatprep.mubr.bf16.mxu1 %v20183_v59  ;;  %v13644_v34 = vcombine.low %v10403_v28, %v10406_v19 }
 0x74d   : > { %13659 = vmatmul.mubr.msk.bf16.gmra.mrb[172].mxu0 %vm703_vm1, %v13641_v40  ;;  %v12123_v40 = vsel %vm16367_vm6, %v12121_v29, %v12122_v20  ;;  %v20312_v29 = vld [vmem:[#allocation88_spill] sm:$0xff] }
 0x74e   : > { %10655 = vmatprep.mubr.bf16.mxu0 %v20183_v59  ;;  %v13795_v4 = vcombine.low %v12120_v3, %v12123_v40  ;;  %v14028_v20 = vadd.f32 %v20312_v29, %v20300_v53  ;;  %v20323_v29 = vld [vmem:[#allocation99_spill] sm:$0xff] }
 0x751   : > { %13810 = vmatmul.mubr.msk.bf16.gmra.mrb[48].mxu1 %vm703_vm1, %v13792_v26  ;;  %v20302_v26 = vld [vmem:[#allocation16_spill] sm:$0xff] }
 0x752   : > { %12399 = vmatprep.mubr.bf16.mxu1 %v20183_v59  ;;  %v14014_v11 = vadd.f32 %v20303_v6, %v20302_v26  ;;  %v14018_v33 = vadd.f32 %v20305_v58, %v20302_v26  ;;  %v14022_v22 = vadd.f32 %v20309_v55, %v20302_v26  ;;  %v14026_v41 = vadd.f32 %v20311_v25, %v20302_v26  ;;  %v20316_v58 = vld [vmem:[#allocation92_spill] sm:$0xff] }
 0x753   : > { %v14034_v52 = vadd.f32 %v20315_v30, %v20302_v26  ;;  %v20320_v25 = vld [vmem:[#allocation96_spill] sm:$0xff] }
 0x754   : > { %v20324_v30 = vld [vmem:[#allocation100_spill] sm:$0xff] }
 0x755   : > { %13660 = vmatmul.mubr.msk.bf16.gmra.mrb[176].mxu0 %vm703_vm1, %v13642_v48 }
 0x756   : > { %10665 = vmatprep.mubr.bf16.mxu0 %v20183_v59 }
 0x759   : > { %13811 = vmatmul.mubr.msk.bf16.gmra.mrb[52].mxu1 %vm703_vm1, %v13793_v57  ;;  %v20308_v57 = vld [vmem:[#allocation84_spill] sm:$0xff] }
 0x75a   : > { %12409 = vmatprep.mubr.bf16.mxu1 %v20183_v59  ;;  %v14020_v43 = vadd.f32 %v20308_v57, %v20300_v53  ;;  %v20319_v57 = vld [vmem:[#allocation95_spill] sm:$0xff] }
 0x75d   : > { %13661 = vmatmul.mubr.msk.bf16.gmra.mrb[180].mxu0 %vm703_vm1, %v13643_v62 }
 0x75e   : > { %10675 = vmatprep.mubr.bf16.mxu0 %v20183_v59 }
 0x761   : > { %13812 = vmatmul.mubr.msk.bf16.gmra.mrb[56].mxu1 %vm703_vm1, %v13794_v5 }
 0x762   : > { %12419 = vmatprep.mubr.bf16.mxu1 %v20183_v59 }
 0x765   : > { %13662 = vmatmul.mubr.msk.bf16.gmra.mrb[184].mxu0 %vm703_vm1, %v13644_v34  ;;  %v14030_v34 = vadd.f32 %v20313_v49, %v20302_v26 }
 0x766   : > { %10685 = vmatprep.mubr.bf16.mxu0 %v20183_v59 }
 0x769   : > { %13813 = vmatmul.mubr.msk.bf16.gmra.mrb[60].mxu1 %vm703_vm1, %v13795_v4 }
 0x76d   : > { %13663 = vmatmul.mubr.msk.bf16.gmra.mrb[188].mxu0 %vm703_vm1, %v13645_v36 }
 0x7c4   : > { %v12271_v59 = vpop.f32.mrb[0].mxu1 }
 0x7c5   : > { %v14013_v46 = vadd.f32 %v14012_v44, %v12271_v59  ;;  %v12273_v31 = vpop.f32.mrb[1].mxu1 }
 0x7c6   : > { %v14015_v0 = vadd.f32 %v14014_v11, %v12273_v31  ;;  %v12275_v27 = vpop.f32.mrb[2].mxu1 }
 0x7c7   : > { %12622 = vst [vmem:[%s16570_s11 + $0x30] sm:$0xff] %v14013_v46  ;;  %v14017_v48 = vadd.f32 %v14016_v16, %v12275_v27  ;;  %v12277_v1 = vpop.f32.mrb[3].mxu1 }
 0x7c8   : > { %12623 = vst [vmem:[%s16570_s11 + $0x38] sm:$0xff] %v14015_v0  ;;  %v10537_v63 = vpop.f32.mrb[128].mxu0  ;;  %v14019_v32 = vadd.f32 %v14018_v33, %v12277_v1  ;;  %v14036_v33 = vadd.f32 %v20316_v58, %v20300_v53  ;;  %v20327_v58 = vld [vmem:[#allocation103_spill] sm:$0xff] }
 0x7c9   : > { %v13948_v9 = vadd.f32 %v10537_v63, %v20306_v60  ;;  %12624 = vst [vmem:[%s16570_s11 + $0x70] sm:$0xff] %v14017_v48  ;;  %v10539_v51 = vpop.f32.mrb[129].mxu0  ;;  %v20317_v48 = vld [vmem:[#allocation93_spill] sm:$0xff] }
 0x7ca   : > { %v13949_v37 = vadd.f32 %v10539_v51, %v20307_v54  ;;  %12625 = vst [vmem:[%s16570_s11 + $0x78] sm:$0xff] %v14019_v32  ;;  %v10541_v7 = vpop.f32.mrb[130].mxu0  ;;  %v14038_v1 = vadd.f32 %v20317_v48, %v20302_v26 }
 0x7cb   : > { %12558 = vst [vmem:[%s16570_s11 + $0x20] sm:$0xff] %v13948_v9  ;;  %v13950_v13 = vadd.f32 %v10541_v7, %v20306_v60  ;;  %v10543_v38 = vpop.f32.mrb[131].mxu0  ;;  %v20318_v9 = vld [vmem:[#allocation94_spill] sm:$0xff] }
 0x7cc   : > { %12559 = vst [vmem:[%s16570_s11 + $0x28] sm:$0xff] %v13949_v37  ;;  %v13951_v39 = vadd.f32 %v10543_v38, %v20307_v54  ;;  %v12281_v47 = vpop.f32.mrb[4].mxu1  ;;  %v14040_v51 = vadd.f32 %v20318_v9, %v20300_v53 }
 0x7cd   : > { %12560 = vst [vmem:[%s16570_s11 + $0x60] sm:$0xff] %v13950_v13  ;;  %v14021_v62 = vadd.f32 %v14020_v43, %v12281_v47  ;;  %v12283_v8 = vpop.f32.mrb[5].mxu1  ;;  %v14042_v43 = vadd.f32 %v20319_v57, %v20302_v26  ;;  %v20328_v57 = vld [vmem:[#allocation104_spill] sm:$0xff] }
 0x7ce   : > { %12561 = vst [vmem:[%s16570_s11 + $0x68] sm:$0xff] %v13951_v39  ;;  %v14023_v2 = vadd.f32 %v14022_v22, %v12283_v8  ;;  %v12285_v42 = vpop.f32.mrb[6].mxu1 }
 0x7cf   : > { %12626 = vst [vmem:[%s16570_s11 + $0xb0] sm:$0xff] %v14021_v62  ;;  %v14025_v14 = vadd.f32 %v14024_v23, %v12285_v42  ;;  %v12287_v45 = vpop.f32.mrb[7].mxu1 }
 0x7d0   : > { %12627 = vst [vmem:[%s16570_s11 + $0xb8] sm:$0xff] %v14023_v2  ;;  %v10547_v12 = vpop.f32.mrb[132].mxu0  ;;  %v14027_v35 = vadd.f32 %v14026_v41, %v12287_v45  ;;  %v14044_v41 = vadd.f32 %v20320_v25, %v20300_v53  ;;  %v20331_v25 = vld [vmem:[#allocation107_spill] sm:$0xff] }
 0x7d1   : > { %v13952_v5 = vadd.f32 %v10547_v12, %v20306_v60  ;;  %12628 = vst [vmem:[%s16570_s11 + $0xf0] sm:$0xff] %v14025_v14  ;;  %v10549_v28 = vpop.f32.mrb[133].mxu0  ;;  %v20321_v14 = vld [vmem:[#allocation97_spill] sm:$0xff] }
 0x7d2   : > { %v13953_v24 = vadd.f32 %v10549_v28, %v20307_v54  ;;  %12629 = vst [vmem:[%s16570_s11 + $0xf8] sm:$0xff] %v14027_v35  ;;  %v10551_v19 = vpop.f32.mrb[134].mxu0  ;;  %v14046_v45 = vadd.f32 %v20321_v14, %v20302_v26 }
 0x7d3   : > { %12562 = vst [vmem:[%s16570_s11 + $0xa0] sm:$0xff] %v13952_v5  ;;  %v13954_v18 = vadd.f32 %v10551_v19, %v20306_v60  ;;  %v10553_v17 = vpop.f32.mrb[135].mxu0  ;;  %v20322_v5 = vld [vmem:[#allocation98_spill] sm:$0xff] }
 0x7d4   : > { %12563 = vst [vmem:[%s16570_s11 + $0xa8] sm:$0xff] %v13953_v24  ;;  %v13955_v3 = vadd.f32 %v10553_v17, %v20307_v54  ;;  %v12291_v40 = vpop.f32.mrb[8].mxu1  ;;  %v14048_v28 = vadd.f32 %v20322_v5, %v20300_v53 }
 0x7d5   : > { %12564 = vst [vmem:[%s16570_s11 + $0xe0] sm:$0xff] %v13954_v18  ;;  %v14029_v10 = vadd.f32 %v14028_v20, %v12291_v40  ;;  %v12293_v4 = vpop.f32.mrb[9].mxu1  ;;  %v14050_v20 = vadd.f32 %v20323_v29, %v20302_v26  ;;  %v20332_v29 = vld [vmem:[#allocation108_spill] sm:$0xff] }
 0x7d6   : > { %12565 = vst [vmem:[%s16570_s11 + $0xe8] sm:$0xff] %v13955_v3  ;;  %v14031_v36 = vadd.f32 %v14030_v34, %v12293_v4  ;;  %v12295_v50 = vpop.f32.mrb[10].mxu1 }
 0x7d7   : > { %12630 = vst [vmem:[%s16570_s11 + $0x130] sm:$0xff] %v14029_v10  ;;  %v14033_v44 = vadd.f32 %v14032_v56, %v12295_v50  ;;  %v12297_v6 = vpop.f32.mrb[11].mxu1 }
 0x7d8   : > { %12631 = vst [vmem:[%s16570_s11 + $0x138] sm:$0xff] %v14031_v36  ;;  %v10557_v11 = vpop.f32.mrb[136].mxu0  ;;  %v14035_v59 = vadd.f32 %v14034_v52, %v12297_v6  ;;  %v14052_v52 = vadd.f32 %v20324_v30, %v20300_v53  ;;  %v20335_v30 = vld [vmem:[#allocation111_spill] sm:$0xff] }
 0x7d9   : > { %v13956_v15 = vadd.f32 %v10557_v11, %v20306_v60  ;;  %12632 = vst [vmem:[%s16570_s11 + $0x170] sm:$0xff] %v14033_v44  ;;  %v10559_v16 = vpop.f32.mrb[137].mxu0  ;;  %v20325_v44 = vld [vmem:[#allocation101_spill] sm:$0xff] }
 0x7da   : > { %v13957_v46 = vadd.f32 %v10559_v16, %v20307_v54  ;;  %12633 = vst [vmem:[%s16570_s11 + $0x178] sm:$0xff] %v14035_v59  ;;  %v10561_v31 = vpop.f32.mrb[138].mxu0  ;;  %v14054_v6 = vadd.f32 %v20325_v44, %v20302_v26 }
 0x7db   : > { %12566 = vst [vmem:[%s16570_s11 + $0x120] sm:$0xff] %v13956_v15  ;;  %v13958_v0 = vadd.f32 %v10561_v31, %v20306_v60  ;;  %v10563_v27 = vpop.f32.mrb[139].mxu0  ;;  %v20326_v15 = vld [vmem:[#allocation102_spill] sm:$0xff] }
 0x7dc   : > { %12567 = vst [vmem:[%s16570_s11 + $0x128] sm:$0xff] %v13957_v46  ;;  %v13959_v63 = vadd.f32 %v10563_v27, %v20307_v54  ;;  %v12301_v32 = vpop.f32.mrb[12].mxu1  ;;  %v14056_v16 = vadd.f32 %v20326_v15, %v20300_v53 }
 0x7dd   : > { %12568 = vst [vmem:[%s16570_s11 + $0x160] sm:$0xff] %v13958_v0  ;;  %v14037_v37 = vadd.f32 %v14036_v33, %v12301_v32  ;;  %v12303_v7 = vpop.f32.mrb[13].mxu1  ;;  %v14058_v33 = vadd.f32 %v20327_v58, %v20302_v26  ;;  %v20336_v58 = vld [vmem:[#allocation112_spill] sm:$0xff] }
 0x7de   : > { %12569 = vst [vmem:[%s16570_s11 + $0x168] sm:$0xff] %v13959_v63  ;;  %v14039_v13 = vadd.f32 %v14038_v1, %v12303_v7  ;;  %v12305_v38 = vpop.f32.mrb[14].mxu1 }
 0x7df   : > { %12634 = vst [vmem:[%s16570_s11 + $0x1b0] sm:$0xff] %v14037_v37  ;;  %v14041_v55 = vadd.f32 %v14040_v51, %v12305_v38  ;;  %v12307_v22 = vpop.f32.mrb[15].mxu1 }
 0x7e0   : > { %12635 = vst [vmem:[%s16570_s11 + $0x1b8] sm:$0xff] %v14039_v13  ;;  %v10567_v39 = vpop.f32.mrb[140].mxu0  ;;  %v14043_v47 = vadd.f32 %v14042_v43, %v12307_v22  ;;  %v14060_v43 = vadd.f32 %v20328_v57, %v20300_v53  ;;  %v20339_v57 = vld [vmem:[#allocation115_spill] sm:$0xff] }
 0x7e1   : > { %v13960_v21 = vadd.f32 %v10567_v39, %v20306_v60  ;;  %12636 = vst [vmem:[%s16570_s11 + $0x1f0] sm:$0xff] %v14041_v55  ;;  %v10569_v23 = vpop.f32.mrb[141].mxu0  ;;  %v20329_v55 = vld [vmem:[#allocation105_spill] sm:$0xff] }
 0x7e2   : > { %v13961_v62 = vadd.f32 %v10569_v23, %v20307_v54  ;;  %12637 = vst [vmem:[%s16570_s11 + $0x1f8] sm:$0xff] %v14043_v47  ;;  %v10571_v8 = vpop.f32.mrb[142].mxu0  ;;  %v14062_v22 = vadd.f32 %v20329_v55, %v20302_v26 }
 0x7e3   : > { %12570 = vst [vmem:[%s16570_s11 + $0x1a0] sm:$0xff] %v13960_v21  ;;  %v13962_v2 = vadd.f32 %v10571_v8, %v20306_v60  ;;  %v10573_v42 = vpop.f32.mrb[143].mxu0  ;;  %v20330_v21 = vld [vmem:[#allocation106_spill] sm:$0xff] }
 0x7e4   : > { %12571 = vst [vmem:[%s16570_s11 + $0x1a8] sm:$0xff] %v13961_v62  ;;  %v13963_v12 = vadd.f32 %v10573_v42, %v20307_v54  ;;  %v12311_v35 = vpop.f32.mrb[16].mxu1  ;;  %v14064_v23 = vadd.f32 %v20330_v21, %v20300_v53 }
 0x7e5   : > { %12572 = vst [vmem:[%s16570_s11 + $0x1e0] sm:$0xff] %v13962_v2  ;;  %v14045_v24 = vadd.f32 %v14044_v41, %v12311_v35  ;;  %v12313_v19 = vpop.f32.mrb[17].mxu1  ;;  %v14066_v41 = vadd.f32 %v20331_v25, %v20302_v26  ;;  %v20340_v25 = vld [vmem:[#allocation116_spill] sm:$0xff] }
 0x7e6   : > { %12573 = vst [vmem:[%s16570_s11 + $0x1e8] sm:$0xff] %v13963_v12  ;;  %v14047_v18 = vadd.f32 %v14046_v45, %v12313_v19  ;;  %v12315_v17 = vpop.f32.mrb[18].mxu1 }
 0x7e7   : > { %12638 = vst [vmem:[%s16570_s11 + $0x230] sm:$0xff] %v14045_v24  ;;  %v14049_v49 = vadd.f32 %v14048_v28, %v12315_v17  ;;  %v12317_v34 = vpop.f32.mrb[19].mxu1 }
 0x7e8   : > { %12639 = vst [vmem:[%s16570_s11 + $0x238] sm:$0xff] %v14047_v18  ;;  %v10577_v3 = vpop.f32.mrb[144].mxu0  ;;  %v14051_v40 = vadd.f32 %v14050_v20, %v12317_v34  ;;  %v14068_v20 = vadd.f32 %v20332_v29, %v20300_v53  ;;  %v20343_v29 = vld [vmem:[#allocation119_spill] sm:$0xff] }
 0x7e9   : > { %v13964_v61 = vadd.f32 %v10577_v3, %v20306_v60  ;;  %12640 = vst [vmem:[%s16570_s11 + $0x270] sm:$0xff] %v14049_v49  ;;  %v10579_v56 = vpop.f32.mrb[145].mxu0  ;;  %v20333_v49 = vld [vmem:[#allocation109_spill] sm:$0xff] }
 0x7ea   : > { %v13965_v10 = vadd.f32 %v10579_v56, %v20307_v54  ;;  %12641 = vst [vmem:[%s16570_s11 + $0x278] sm:$0xff] %v14051_v40  ;;  %v10581_v4 = vpop.f32.mrb[146].mxu0  ;;  %v14070_v34 = vadd.f32 %v20333_v49, %v20302_v26 }
 0x7eb   : > { %12574 = vst [vmem:[%s16570_s11 + $0x220] sm:$0xff] %v13964_v61  ;;  %v13966_v36 = vadd.f32 %v10581_v4, %v20306_v60  ;;  %v10583_v50 = vpop.f32.mrb[147].mxu0  ;;  %v20334_v61 = vld [vmem:[#allocation110_spill] sm:$0xff] }
 0x7ec   : > { %12575 = vst [vmem:[%s16570_s11 + $0x228] sm:$0xff] %v13965_v10  ;;  %v13967_v11 = vadd.f32 %v10583_v50, %v20307_v54  ;;  %v12321_v59 = vpop.f32.mrb[20].mxu1  ;;  %v14072_v56 = vadd.f32 %v20334_v61, %v20300_v53 }
 0x7ed   : > { %12576 = vst [vmem:[%s16570_s11 + $0x260] sm:$0xff] %v13966_v36  ;;  %v14053_v46 = vadd.f32 %v14052_v52, %v12321_v59  ;;  %v12323_v31 = vpop.f32.mrb[21].mxu1  ;;  %v14074_v52 = vadd.f32 %v20335_v30, %v20302_v26  ;;  %v20344_v30 = vld [vmem:[#allocation120_spill] sm:$0xff] }
 0x7ee   : > { %12577 = vst [vmem:[%s16570_s11 + $0x268] sm:$0xff] %v13967_v11  ;;  %v14055_v0 = vadd.f32 %v14054_v6, %v12323_v31  ;;  %v12325_v27 = vpop.f32.mrb[22].mxu1 }
 0x7ef   : > { %12642 = vst [vmem:[%s16570_s11 + $0x2b0] sm:$0xff] %v14053_v46  ;;  %v14057_v48 = vadd.f32 %v14056_v16, %v12325_v27  ;;  %v12327_v1 = vpop.f32.mrb[23].mxu1 }
 0x7f0   : > { %12643 = vst [vmem:[%s16570_s11 + $0x2b8] sm:$0xff] %v14055_v0  ;;  %v10587_v63 = vpop.f32.mrb[148].mxu0  ;;  %v14059_v32 = vadd.f32 %v14058_v33, %v12327_v1  ;;  %v14076_v33 = vadd.f32 %v20336_v58, %v20300_v53  ;;  %v20347_v58 = vld [vmem:[#allocation123_spill] sm:$0xff] }
 0x7f1   : > { %v13968_v9 = vadd.f32 %v10587_v63, %v20306_v60  ;;  %12644 = vst [vmem:[%s16570_s11 + $0x2f0] sm:$0xff] %v14057_v48  ;;  %v10589_v51 = vpop.f32.mrb[149].mxu0  ;;  %v20337_v48 = vld [vmem:[#allocation113_spill] sm:$0xff] }
 0x7f2   : > { %v13969_v37 = vadd.f32 %v10589_v51, %v20307_v54  ;;  %12645 = vst [vmem:[%s16570_s11 + $0x2f8] sm:$0xff] %v14059_v32  ;;  %v10591_v7 = vpop.f32.mrb[150].mxu0  ;;  %v14078_v1 = vadd.f32 %v20337_v48, %v20302_v26 }
 0x7f3   : > { %12578 = vst [vmem:[%s16570_s11 + $0x2a0] sm:$0xff] %v13968_v9  ;;  %v13970_v13 = vadd.f32 %v10591_v7, %v20306_v60  ;;  %v10593_v38 = vpop.f32.mrb[151].mxu0  ;;  %v20338_v9 = vld [vmem:[#allocation114_spill] sm:$0xff] }
 0x7f4   : > { %12579 = vst [vmem:[%s16570_s11 + $0x2a8] sm:$0xff] %v13969_v37  ;;  %v13971_v39 = vadd.f32 %v10593_v38, %v20307_v54  ;;  %v12331_v47 = vpop.f32.mrb[24].mxu1  ;;  %v14080_v51 = vadd.f32 %v20338_v9, %v20300_v53 }
 0x7f5   : > { %12580 = vst [vmem:[%s16570_s11 + $0x2e0] sm:$0xff] %v13970_v13  ;;  %v14061_v62 = vadd.f32 %v14060_v43, %v12331_v47  ;;  %v12333_v8 = vpop.f32.mrb[25].mxu1  ;;  %v14082_v43 = vadd.f32 %v20339_v57, %v20302_v26  ;;  %v20348_v57 = vld [vmem:[#allocation124_spill] sm:$0xff] }
 0x7f6   : > { %12581 = vst [vmem:[%s16570_s11 + $0x2e8] sm:$0xff] %v13971_v39  ;;  %v14063_v2 = vadd.f32 %v14062_v22, %v12333_v8  ;;  %v12335_v42 = vpop.f32.mrb[26].mxu1 }
 0x7f7   : > { %12646 = vst [vmem:[%s16570_s11 + $0x330] sm:$0xff] %v14061_v62  ;;  %v14065_v14 = vadd.f32 %v14064_v23, %v12335_v42  ;;  %v12337_v45 = vpop.f32.mrb[27].mxu1 }
 0x7f8   : > { %12647 = vst [vmem:[%s16570_s11 + $0x338] sm:$0xff] %v14063_v2  ;;  %v10597_v12 = vpop.f32.mrb[152].mxu0  ;;  %v14067_v35 = vadd.f32 %v14066_v41, %v12337_v45  ;;  %v14084_v41 = vadd.f32 %v20340_v25, %v20300_v53  ;;  %v20351_v25 = vld [vmem:[#allocation127_spill] sm:$0xff] }
 0x7f9   : > { %v13972_v5 = vadd.f32 %v10597_v12, %v20306_v60  ;;  %12648 = vst [vmem:[%s16570_s11 + $0x370] sm:$0xff] %v14065_v14  ;;  %v10599_v28 = vpop.f32.mrb[153].mxu0  ;;  %v20341_v14 = vld [vmem:[#allocation117_spill] sm:$0xff] }
 0x7fa   : > { %v13973_v24 = vadd.f32 %v10599_v28, %v20307_v54  ;;  %12649 = vst [vmem:[%s16570_s11 + $0x378] sm:$0xff] %v14067_v35  ;;  %v10601_v19 = vpop.f32.mrb[154].mxu0  ;;  %v14086_v45 = vadd.f32 %v20341_v14, %v20302_v26 }
 0x7fb   : > { %12582 = vst [vmem:[%s16570_s11 + $0x320] sm:$0xff] %v13972_v5  ;;  %v13974_v18 = vadd.f32 %v10601_v19, %v20306_v60  ;;  %v10603_v17 = vpop.f32.mrb[155].mxu0  ;;  %v20342_v5 = vld [vmem:[#allocation118_spill] sm:$0xff] }
 0x7fc   : > { %12583 = vst [vmem:[%s16570_s11 + $0x328] sm:$0xff] %v13973_v24  ;;  %v13975_v3 = vadd.f32 %v10603_v17, %v20307_v54  ;;  %v12341_v40 = vpop.f32.mrb[28].mxu1  ;;  %v14088_v28 = vadd.f32 %v20342_v5, %v20300_v53 }
 0x7fd   : > { %12584 = vst [vmem:[%s16570_s11 + $0x360] sm:$0xff] %v13974_v18  ;;  %v14069_v10 = vadd.f32 %v14068_v20, %v12341_v40  ;;  %v12343_v4 = vpop.f32.mrb[29].mxu1  ;;  %v14090_v20 = vadd.f32 %v20343_v29, %v20302_v26  ;;  %v20352_v29 = vld [vmem:[#allocation128_spill] sm:$0xff] }
 0x7fe   : > { %12585 = vst [vmem:[%s16570_s11 + $0x368] sm:$0xff] %v13975_v3  ;;  %v14071_v36 = vadd.f32 %v14070_v34, %v12343_v4  ;;  %v12345_v50 = vpop.f32.mrb[30].mxu1 }
 0x7ff   : > { %12650 = vst [vmem:[%s16570_s11 + $0x3b0] sm:$0xff] %v14069_v10  ;;  %v14073_v44 = vadd.f32 %v14072_v56, %v12345_v50  ;;  %v12347_v6 = vpop.f32.mrb[31].mxu1 }
 0x800   : > { %12651 = vst [vmem:[%s16570_s11 + $0x3b8] sm:$0xff] %v14071_v36  ;;  %v10607_v11 = vpop.f32.mrb[156].mxu0  ;;  %v14075_v59 = vadd.f32 %v14074_v52, %v12347_v6  ;;  %v14092_v52 = vadd.f32 %v20344_v30, %v20300_v53  ;;  %v20355_v30 = vld [vmem:[#allocation131_spill] sm:$0xff] }
 0x801   : > { %v13976_v15 = vadd.f32 %v10607_v11, %v20306_v60  ;;  %12652 = vst [vmem:[%s16570_s11 + $0x3f0] sm:$0xff] %v14073_v44  ;;  %v10609_v16 = vpop.f32.mrb[157].mxu0  ;;  %v20345_v44 = vld [vmem:[#allocation121_spill] sm:$0xff] }
 0x802   : > { %v13977_v46 = vadd.f32 %v10609_v16, %v20307_v54  ;;  %12653 = vst [vmem:[%s16570_s11 + $0x3f8] sm:$0xff] %v14075_v59  ;;  %v10611_v31 = vpop.f32.mrb[158].mxu0  ;;  %v14094_v6 = vadd.f32 %v20345_v44, %v20302_v26 }
 0x803   : > { %12586 = vst [vmem:[%s16570_s11 + $0x3a0] sm:$0xff] %v13976_v15  ;;  %v13978_v0 = vadd.f32 %v10611_v31, %v20306_v60  ;;  %v10613_v27 = vpop.f32.mrb[159].mxu0  ;;  %v20346_v15 = vld [vmem:[#allocation122_spill] sm:$0xff] }
 0x804   : > { %12587 = vst [vmem:[%s16570_s11 + $0x3a8] sm:$0xff] %v13977_v46  ;;  %v13979_v63 = vadd.f32 %v10613_v27, %v20307_v54  ;;  %v12351_v32 = vpop.f32.mrb[32].mxu1  ;;  %v14096_v16 = vadd.f32 %v20346_v15, %v20300_v53 }
 0x805   : > { %12588 = vst [vmem:[%s16570_s11 + $0x3e0] sm:$0xff] %v13978_v0  ;;  %v14077_v37 = vadd.f32 %v14076_v33, %v12351_v32  ;;  %v12353_v7 = vpop.f32.mrb[33].mxu1  ;;  %v14098_v33 = vadd.f32 %v20347_v58, %v20302_v26  ;;  %v20356_v58 = vld [vmem:[#allocation132_spill] sm:$0xff] }
 0x806   : > { %12589 = vst [vmem:[%s16570_s11 + $0x3e8] sm:$0xff] %v13979_v63  ;;  %v14079_v13 = vadd.f32 %v14078_v1, %v12353_v7  ;;  %v12355_v38 = vpop.f32.mrb[34].mxu1 }
 0x807   : > { %12654 = vst [vmem:[%s16570_s11 + $0x430] sm:$0xff] %v14077_v37  ;;  %v14081_v55 = vadd.f32 %v14080_v51, %v12355_v38  ;;  %v12357_v22 = vpop.f32.mrb[35].mxu1 }
 0x808   : > { %12655 = vst [vmem:[%s16570_s11 + $0x438] sm:$0xff] %v14079_v13  ;;  %v10617_v39 = vpop.f32.mrb[160].mxu0  ;;  %v14083_v47 = vadd.f32 %v14082_v43, %v12357_v22  ;;  %v14100_v43 = vadd.f32 %v20348_v57, %v20300_v53  ;;  %v20359_v57 = vld [vmem:[#allocation135_spill] sm:$0xff] }
 0x809   : > { %v13980_v21 = vadd.f32 %v10617_v39, %v20306_v60  ;;  %12656 = vst [vmem:[%s16570_s11 + $0x470] sm:$0xff] %v14081_v55  ;;  %v10619_v23 = vpop.f32.mrb[161].mxu0  ;;  %v20349_v55 = vld [vmem:[#allocation125_spill] sm:$0xff] }
 0x80a   : > { %v13981_v62 = vadd.f32 %v10619_v23, %v20307_v54  ;;  %12657 = vst [vmem:[%s16570_s11 + $0x478] sm:$0xff] %v14083_v47  ;;  %v10621_v8 = vpop.f32.mrb[162].mxu0  ;;  %v14102_v22 = vadd.f32 %v20349_v55, %v20302_v26 }
 0x80b   : > { %12590 = vst [vmem:[%s16570_s11 + $0x420] sm:$0xff] %v13980_v21  ;;  %v13982_v2 = vadd.f32 %v10621_v8, %v20306_v60  ;;  %v10623_v42 = vpop.f32.mrb[163].mxu0  ;;  %v20350_v21 = vld [vmem:[#allocation126_spill] sm:$0xff] }
 0x80c   : > { %12591 = vst [vmem:[%s16570_s11 + $0x428] sm:$0xff] %v13981_v62  ;;  %v13983_v12 = vadd.f32 %v10623_v42, %v20307_v54  ;;  %v12361_v35 = vpop.f32.mrb[36].mxu1  ;;  %v14104_v23 = vadd.f32 %v20350_v21, %v20300_v53 }
 0x80d   : > { %12592 = vst [vmem:[%s16570_s11 + $0x460] sm:$0xff] %v13982_v2  ;;  %v14085_v24 = vadd.f32 %v14084_v41, %v12361_v35  ;;  %v12363_v19 = vpop.f32.mrb[37].mxu1  ;;  %v14106_v41 = vadd.f32 %v20351_v25, %v20302_v26  ;;  %v20360_v25 = vld [vmem:[#allocation136_spill] sm:$0xff] }
 0x80e   : > { %12593 = vst [vmem:[%s16570_s11 + $0x468] sm:$0xff] %v13983_v12  ;;  %v14087_v18 = vadd.f32 %v14086_v45, %v12363_v19  ;;  %v12365_v17 = vpop.f32.mrb[38].mxu1 }
 0x80f   : > { %12658 = vst [vmem:[%s16570_s11 + $0x4b0] sm:$0xff] %v14085_v24  ;;  %v14089_v49 = vadd.f32 %v14088_v28, %v12365_v17  ;;  %v12367_v34 = vpop.f32.mrb[39].mxu1 }
 0x810   : > { %12659 = vst [vmem:[%s16570_s11 + $0x4b8] sm:$0xff] %v14087_v18  ;;  %v10627_v3 = vpop.f32.mrb[164].mxu0  ;;  %v14091_v40 = vadd.f32 %v14090_v20, %v12367_v34  ;;  %v14108_v20 = vadd.f32 %v20352_v29, %v20300_v53  ;;  %v20363_v29 = vld [vmem:[#allocation139_spill] sm:$0xff] }
 0x811   : > { %v13984_v61 = vadd.f32 %v10627_v3, %v20306_v60  ;;  %12660 = vst [vmem:[%s16570_s11 + $0x4f0] sm:$0xff] %v14089_v49  ;;  %v10629_v56 = vpop.f32.mrb[165].mxu0  ;;  %v20353_v49 = vld [vmem:[#allocation129_spill] sm:$0xff] }
 0x812   : > { %v13985_v10 = vadd.f32 %v10629_v56, %v20307_v54  ;;  %12661 = vst [vmem:[%s16570_s11 + $0x4f8] sm:$0xff] %v14091_v40  ;;  %v10631_v4 = vpop.f32.mrb[166].mxu0  ;;  %v14110_v34 = vadd.f32 %v20353_v49, %v20302_v26 }
 0x813   : > { %12594 = vst [vmem:[%s16570_s11 + $0x4a0] sm:$0xff] %v13984_v61  ;;  %v13986_v36 = vadd.f32 %v10631_v4, %v20306_v60  ;;  %v10633_v50 = vpop.f32.mrb[167].mxu0  ;;  %v20354_v61 = vld [vmem:[#allocation130_spill] sm:$0xff] }
 0x814   : > { %12595 = vst [vmem:[%s16570_s11 + $0x4a8] sm:$0xff] %v13985_v10  ;;  %v13987_v11 = vadd.f32 %v10633_v50, %v20307_v54  ;;  %v12371_v59 = vpop.f32.mrb[40].mxu1  ;;  %v14112_v56 = vadd.f32 %v20354_v61, %v20300_v53 }
 0x815   : > { %12596 = vst [vmem:[%s16570_s11 + $0x4e0] sm:$0xff] %v13986_v36  ;;  %v14093_v46 = vadd.f32 %v14092_v52, %v12371_v59  ;;  %v12373_v31 = vpop.f32.mrb[41].mxu1  ;;  %v14114_v52 = vadd.f32 %v20355_v30, %v20302_v26  ;;  %v20364_v30 = vld [vmem:[#allocation140_spill] sm:$0xff] }
 0x816   : > { %12597 = vst [vmem:[%s16570_s11 + $0x4e8] sm:$0xff] %v13987_v11  ;;  %v14095_v0 = vadd.f32 %v14094_v6, %v12373_v31  ;;  %v12375_v27 = vpop.f32.mrb[42].mxu1 }
 0x817   : > { %12662 = vst [vmem:[%s16570_s11 + $0x530] sm:$0xff] %v14093_v46  ;;  %v14097_v48 = vadd.f32 %v14096_v16, %v12375_v27  ;;  %v12377_v1 = vpop.f32.mrb[43].mxu1 }
 0x818   : > { %12663 = vst [vmem:[%s16570_s11 + $0x538] sm:$0xff] %v14095_v0  ;;  %v10637_v63 = vpop.f32.mrb[168].mxu0  ;;  %v14099_v32 = vadd.f32 %v14098_v33, %v12377_v1  ;;  %v14116_v33 = vadd.f32 %v20356_v58, %v20300_v53  ;;  %v20367_v58 = vld [vmem:[#allocation143_spill] sm:$0xff] }
 0x819   : > { %v13988_v9 = vadd.f32 %v10637_v63, %v20306_v60  ;;  %12664 = vst [vmem:[%s16570_s11 + $0x570] sm:$0xff] %v14097_v48  ;;  %v10639_v51 = vpop.f32.mrb[169].mxu0  ;;  %v20357_v48 = vld [vmem:[#allocation133_spill] sm:$0xff] }
 0x81a   : > { %v13989_v37 = vadd.f32 %v10639_v51, %v20307_v54  ;;  %12665 = vst [vmem:[%s16570_s11 + $0x578] sm:$0xff] %v14099_v32  ;;  %v10641_v7 = vpop.f32.mrb[170].mxu0  ;;  %v14118_v1 = vadd.f32 %v20357_v48, %v20302_v26 }
 0x81b   : > { %12598 = vst [vmem:[%s16570_s11 + $0x520] sm:$0xff] %v13988_v9  ;;  %v13990_v13 = vadd.f32 %v10641_v7, %v20306_v60  ;;  %v10643_v38 = vpop.f32.mrb[171].mxu0  ;;  %v20358_v9 = vld [vmem:[#allocation134_spill] sm:$0xff] }
 0x81c   : > { %12599 = vst [vmem:[%s16570_s11 + $0x528] sm:$0xff] %v13989_v37  ;;  %v13991_v39 = vadd.f32 %v10643_v38, %v20307_v54  ;;  %v12381_v47 = vpop.f32.mrb[44].mxu1  ;;  %v14120_v51 = vadd.f32 %v20358_v9, %v20300_v53 }
 0x81d   : > { %12600 = vst [vmem:[%s16570_s11 + $0x560] sm:$0xff] %v13990_v13  ;;  %v14101_v62 = vadd.f32 %v14100_v43, %v12381_v47  ;;  %v12383_v8 = vpop.f32.mrb[45].mxu1  ;;  %v14122_v43 = vadd.f32 %v20359_v57, %v20302_v26 }
 0x81e   : > { %12601 = vst [vmem:[%s16570_s11 + $0x568] sm:$0xff] %v13991_v39  ;;  %v14103_v2 = vadd.f32 %v14102_v22, %v12383_v8  ;;  %v12385_v42 = vpop.f32.mrb[46].mxu1 }
 0x81f   : > { %12666 = vst [vmem:[%s16570_s11 + $0x5b0] sm:$0xff] %v14101_v62  ;;  %v14105_v14 = vadd.f32 %v14104_v23, %v12385_v42  ;;  %v12387_v45 = vpop.f32.mrb[47].mxu1 }
 0x820   : > { %12667 = vst [vmem:[%s16570_s11 + $0x5b8] sm:$0xff] %v14103_v2  ;;  %v10647_v12 = vpop.f32.mrb[172].mxu0  ;;  %v14107_v35 = vadd.f32 %v14106_v41, %v12387_v45  ;;  %v14124_v41 = vadd.f32 %v20360_v25, %v20300_v53 }
 0x821   : > { %v13992_v5 = vadd.f32 %v10647_v12, %v20306_v60  ;;  %12668 = vst [vmem:[%s16570_s11 + $0x5f0] sm:$0xff] %v14105_v14  ;;  %v10649_v28 = vpop.f32.mrb[173].mxu0  ;;  %v20361_v14 = vld [vmem:[#allocation137_spill] sm:$0xff] }
 0x822   : > { %v13993_v24 = vadd.f32 %v10649_v28, %v20307_v54  ;;  %12669 = vst [vmem:[%s16570_s11 + $0x5f8] sm:$0xff] %v14107_v35  ;;  %v10651_v19 = vpop.f32.mrb[174].mxu0  ;;  %v14126_v45 = vadd.f32 %v20361_v14, %v20302_v26 }
 0x823   : > { %12602 = vst [vmem:[%s16570_s11 + $0x5a0] sm:$0xff] %v13992_v5  ;;  %v13994_v18 = vadd.f32 %v10651_v19, %v20306_v60  ;;  %v10653_v17 = vpop.f32.mrb[175].mxu0  ;;  %v20362_v5 = vld [vmem:[#allocation138_spill] sm:$0xff] }
 0x824   : > { %12603 = vst [vmem:[%s16570_s11 + $0x5a8] sm:$0xff] %v13993_v24  ;;  %v13995_v3 = vadd.f32 %v10653_v17, %v20307_v54  ;;  %v12391_v40 = vpop.f32.mrb[48].mxu1  ;;  %v14128_v28 = vadd.f32 %v20362_v5, %v20300_v53 }
 0x825   : > { %12604 = vst [vmem:[%s16570_s11 + $0x5e0] sm:$0xff] %v13994_v18  ;;  %v14109_v10 = vadd.f32 %v14108_v20, %v12391_v40  ;;  %v12393_v4 = vpop.f32.mrb[49].mxu1  ;;  %v14130_v20 = vadd.f32 %v20363_v29, %v20302_v26 }
 0x826   : > { %12605 = vst [vmem:[%s16570_s11 + $0x5e8] sm:$0xff] %v13995_v3  ;;  %v14111_v36 = vadd.f32 %v14110_v34, %v12393_v4  ;;  %v12395_v50 = vpop.f32.mrb[50].mxu1 }
 0x827   : > { %12670 = vst [vmem:[%s16570_s11 + $0x630] sm:$0xff] %v14109_v10  ;;  %v14113_v44 = vadd.f32 %v14112_v56, %v12395_v50  ;;  %v12397_v6 = vpop.f32.mrb[51].mxu1 }
 0x828   : > { %12671 = vst [vmem:[%s16570_s11 + $0x638] sm:$0xff] %v14111_v36  ;;  %v10657_v11 = vpop.f32.mrb[176].mxu0  ;;  %v14115_v59 = vadd.f32 %v14114_v52, %v12397_v6  ;;  %v14132_v52 = vadd.f32 %v20364_v30, %v20300_v53 }
 0x829   : > { %v13996_v15 = vadd.f32 %v10657_v11, %v20306_v60  ;;  %12672 = vst [vmem:[%s16570_s11 + $0x670] sm:$0xff] %v14113_v44  ;;  %v10659_v16 = vpop.f32.mrb[177].mxu0  ;;  %v20365_v44 = vld [vmem:[#allocation141_spill] sm:$0xff] }
 0x82a   : > { %v13997_v46 = vadd.f32 %v10659_v16, %v20307_v54  ;;  %12673 = vst [vmem:[%s16570_s11 + $0x678] sm:$0xff] %v14115_v59  ;;  %v10661_v31 = vpop.f32.mrb[178].mxu0  ;;  %v14134_v6 = vadd.f32 %v20365_v44, %v20302_v26 }
 0x82b   : > { %12606 = vst [vmem:[%s16570_s11 + $0x620] sm:$0xff] %v13996_v15  ;;  %v13998_v0 = vadd.f32 %v10661_v31, %v20306_v60  ;;  %v10663_v27 = vpop.f32.mrb[179].mxu0  ;;  %v20366_v15 = vld [vmem:[#allocation142_spill] sm:$0xff] }
 0x82c   : > { %12607 = vst [vmem:[%s16570_s11 + $0x628] sm:$0xff] %v13997_v46  ;;  %v13999_v63 = vadd.f32 %v10663_v27, %v20307_v54  ;;  %v12401_v32 = vpop.f32.mrb[52].mxu1  ;;  %v14136_v16 = vadd.f32 %v20366_v15, %v20300_v53 }
 0x82d   : > { %12608 = vst [vmem:[%s16570_s11 + $0x660] sm:$0xff] %v13998_v0  ;;  %v14117_v37 = vadd.f32 %v14116_v33, %v12401_v32  ;;  %v12403_v7 = vpop.f32.mrb[53].mxu1  ;;  %v14138_v33 = vadd.f32 %v20367_v58, %v20302_v26 }
 0x82e   : > { %12609 = vst [vmem:[%s16570_s11 + $0x668] sm:$0xff] %v13999_v63  ;;  %v14119_v13 = vadd.f32 %v14118_v1, %v12403_v7  ;;  %v12405_v38 = vpop.f32.mrb[54].mxu1 }
 0x82f   : > { %12674 = vst [vmem:[%s16570_s11 + $0x6b0] sm:$0xff] %v14117_v37  ;;  %v14121_v55 = vadd.f32 %v14120_v51, %v12405_v38  ;;  %v12407_v22 = vpop.f32.mrb[55].mxu1 }
 0x830   : > { %12675 = vst [vmem:[%s16570_s11 + $0x6b8] sm:$0xff] %v14119_v13  ;;  %v10667_v39 = vpop.f32.mrb[180].mxu0  ;;  %v14123_v47 = vadd.f32 %v14122_v43, %v12407_v22 }
 0x831   : > { %v14000_v21 = vadd.f32 %v10667_v39, %v20306_v60  ;;  %12676 = vst [vmem:[%s16570_s11 + $0x6f0] sm:$0xff] %v14121_v55  ;;  %v10669_v23 = vpop.f32.mrb[181].mxu0 }
 0x832   : > { %v14001_v62 = vadd.f32 %v10669_v23, %v20307_v54  ;;  %12677 = vst [vmem:[%s16570_s11 + $0x6f8] sm:$0xff] %v14123_v47  ;;  %v10671_v8 = vpop.f32.mrb[182].mxu0 }
 0x833   : > { %12610 = vst [vmem:[%s16570_s11 + $0x6a0] sm:$0xff] %v14000_v21  ;;  %v14002_v2 = vadd.f32 %v10671_v8, %v20306_v60  ;;  %v10673_v42 = vpop.f32.mrb[183].mxu0 }
 0x834   : > { %12611 = vst [vmem:[%s16570_s11 + $0x6a8] sm:$0xff] %v14001_v62  ;;  %v14003_v12 = vadd.f32 %v10673_v42, %v20307_v54  ;;  %v12411_v35 = vpop.f32.mrb[56].mxu1 }
 0x835   : > { %12612 = vst [vmem:[%s16570_s11 + $0x6e0] sm:$0xff] %v14002_v2  ;;  %v14125_v24 = vadd.f32 %v14124_v41, %v12411_v35  ;;  %v12413_v19 = vpop.f32.mrb[57].mxu1 }
 0x836   : > { %12613 = vst [vmem:[%s16570_s11 + $0x6e8] sm:$0xff] %v14003_v12  ;;  %v14127_v18 = vadd.f32 %v14126_v45, %v12413_v19  ;;  %v12415_v17 = vpop.f32.mrb[58].mxu1 }
 0x837   : > { %12678 = vst [vmem:[%s16570_s11 + $0x730] sm:$0xff] %v14125_v24  ;;  %v14129_v49 = vadd.f32 %v14128_v28, %v12415_v17  ;;  %v12417_v34 = vpop.f32.mrb[59].mxu1 }
 0x838   : > { %12679 = vst [vmem:[%s16570_s11 + $0x738] sm:$0xff] %v14127_v18  ;;  %v10677_v3 = vpop.f32.mrb[184].mxu0  ;;  %v14131_v40 = vadd.f32 %v14130_v20, %v12417_v34 }
 0x839   : > { %v14004_v61 = vadd.f32 %v10677_v3, %v20306_v60  ;;  %12680 = vst [vmem:[%s16570_s11 + $0x770] sm:$0xff] %v14129_v49  ;;  %v10679_v56 = vpop.f32.mrb[185].mxu0 }
 0x83a   : > { %v14005_v10 = vadd.f32 %v10679_v56, %v20307_v54  ;;  %12681 = vst [vmem:[%s16570_s11 + $0x778] sm:$0xff] %v14131_v40  ;;  %v10681_v4 = vpop.f32.mrb[186].mxu0 }
 0x83b   : > { %12614 = vst [vmem:[%s16570_s11 + $0x720] sm:$0xff] %v14004_v61  ;;  %v14006_v36 = vadd.f32 %v10681_v4, %v20306_v60  ;;  %v10683_v50 = vpop.f32.mrb[187].mxu0 }
 0x83c   : > { %12615 = vst [vmem:[%s16570_s11 + $0x728] sm:$0xff] %v14005_v10  ;;  %v14007_v11 = vadd.f32 %v10683_v50, %v20307_v54  ;;  %v12421_v59 = vpop.f32.mrb[60].mxu1 }
 0x83d   : > { %12616 = vst [vmem:[%s16570_s11 + $0x760] sm:$0xff] %v14006_v36  ;;  %v14133_v46 = vadd.f32 %v14132_v52, %v12421_v59  ;;  %v12423_v31 = vpop.f32.mrb[61].mxu1 }
 0x83e   : > { %12617 = vst [vmem:[%s16570_s11 + $0x768] sm:$0xff] %v14007_v11  ;;  %v14135_v0 = vadd.f32 %v14134_v6, %v12423_v31  ;;  %v12425_v27 = vpop.f32.mrb[62].mxu1 }
 0x83f   : > { %12682 = vst [vmem:[%s16570_s11 + $0x7b0] sm:$0xff] %v14133_v46  ;;  %v14137_v48 = vadd.f32 %v14136_v16, %v12425_v27  ;;  %v12427_v1 = vpop.f32.mrb[63].mxu1 }
 0x840   : > { %12683 = vst [vmem:[%s16570_s11 + $0x7b8] sm:$0xff] %v14135_v0  ;;  %v10687_v63 = vpop.f32.mrb[188].mxu0  ;;  %v14139_v32 = vadd.f32 %v14138_v33, %v12427_v1 }
 0x841   : > { %v14008_v53 = vadd.f32 %v10687_v63, %v20306_v60  ;;  %12684 = vst [vmem:[%s16570_s11 + $0x7f0] sm:$0xff] %v14137_v48  ;;  %v10689_v26 = vpop.f32.mrb[189].mxu0 }
 0x842   : > { %v14009_v9 = vadd.f32 %v10689_v26, %v20307_v54  ;;  %12685 = vst [vmem:[%s16570_s11 + $0x7f8] sm:$0xff] %v14139_v32  ;;  %v10691_v51 = vpop.f32.mrb[190].mxu0 }
 0x843   : > { %12618 = vst [vmem:[%s16570_s11 + $0x7a0] sm:$0xff] %v14008_v53  ;;  %v14010_v37 = vadd.f32 %v10691_v51, %v20306_v60  ;;  %v10693_v7 = vpop.f32.mrb[191].mxu0 }
 0x844   : > { %12619 = vst [vmem:[%s16570_s11 + $0x7a8] sm:$0xff] %v14009_v9  ;;  %v14011_v57 = vadd.f32 %v10693_v7, %v20307_v54 }
 0x845   : > { %12620 = vst [vmem:[%s16570_s11 + $0x7e0] sm:$0xff] %v14010_v37 }
 0x846   : > { %12621 = vst [vmem:[%s16570_s11 + $0x7e8] sm:$0xff] %v14011_v57 }
 0x847   : > { %15817 = shalt.err (!%p15814_p6)
}
 0x848   : > { %s15818_s29 = scalar_lea.hbm %s20018_s18, 32768  ;;  %s15822_s21 = scalar_lea.hbm %s20078_s4, 65536 }
 0x849   : > { %p15819_p7 = scmp.ne.s32.totalorder %s20018_s18, %s15818_s29  ;;  %p15823_p4 = scmp.lt.u32.totalorder %s20018_s18, %s20078_s4 }
 0x84a   : > { %p15824_p8 = scmp.lt.u32.totalorder %s15822_s21, %s15818_s29  ;;  %p15826_p1 = scmp.lt.u32.totalorder %s15818_s29, %s20018_s18 }
 0x84b   : > { %p15820_p9 = pnand %p15819_p7, %p20368_p10 }
 0x84c   : > { %p15825_p13 = por %p15824_p8, %p15823_p4 }
 0x84d   : > { %p15821_p12 = pneg %p15820_p9 }
 0x84e   : > { %p15827_p11 = por %p15826_p1, %p15825_p13 }
 0x850   : > { %p15828_p0 = pnand %p15827_p11, %p15821_p12 }
 0x852   : > { %15831 = shalt.err (!%p15828_p0)
}
 0x853   : > { %s15900_s8 = smov 1024   ;;  %s15901_s11 = smov 64  }
 0x854   : > { %15561 = dma.vmem_to_hbm [thread:$0]  (%p20368_p10), %s20020_s13, 32768, %s20018_s18, %s20028_s24, %s15900_s8, %s15900_s8, %s15901_s11  }
 0x855 PF: > { %p15583_p2 = scmp.ge.s32.totalorder %s15890_s20, 2  ;;  %s12718_s12 = sand.u32 1, %s15870_s15  }
 0x856   : > { %p20369_p3 = scmp.ne.s32.totalorder %s20092_s27, 0  ;;  %s12719_s14 = scalar_lea.sflag [#allocation4], %s12718_s12 }
 0x858   : > { %p15574_p5 = pnand %p15583_p2, %p20369_p3 }
 0x85a   : > { %15865 = dma.done.wait (!%p15574_p5), %s12719_s14, 32768  }
 0x85b   : > { %15867 = vsyncadd (!%p15574_p5), %s12719_s14, 4294934528  ;;  %s19_s20 = sadd.s32 1, %s15890_s20   ;;  %s20370_s25 = sld [smem:[#allocation12_spill]] }
 0x85c   : > { %p16_p6 = scmp.ge.s32.totalorder %s19_s20, 4   ;;  %s20371_s15 = smov %s15874_s16 }
 0x85d   : > { %s20372_s16 = smov %s15878_s17  ;;  %s20373_s17 = smov %s15980_s28 }
 0x85e   : > { %s20374_s18 = smov %s15886_s19  ;;  %18 = sbr.rel (!%p16_p6) target bundleno = 6 (0x6), region = 108 }
 0x861   : > { %s20375_s19 = smov %s20370_s25 }
 0x865   :  { %12724 = vsyncpa [#allocation3], 1 }
 0x866   :  { %12726 = vsyncpa [#allocation3 + $0x1], 1 }
 0x867   :  { %12727 = vsyncpa [#allocation6], 1 }
 0x868   :  { %12728 = vsyncpa [#allocation4], 1 }
 0x869   :  { %12730 = vsyncpa [#allocation4 + $0x1], 1 }

</bundles_post_ra>
